<compile_context>
chip_gen: v6e
topology: v6e:2x2x1
jax: 0.10.0
libtpu: 0.0.40
codegen_flags: <defaults>
</compile_context>

<pallas_src>
import functools

import jax
import jax.numpy as jnp
from jax.experimental import pallas as pl
from jax.experimental.pallas import tpu as pltpu

LANE = 128
VMEM_LIMIT = 32 * 1024 * 1024  # explicit scoped-VMEM cap (<= physical on all generations)


def _round_up(x, m):
    return (x + m - 1) // m * m


# ----------------------------- kernels --------------------------------------

def _conv3x3_and_stats(a, w_ref, y_ref, stats_ref, xpad_ref, acc_ref, *, H, W):
    """Shared body: 3x3 'same' conv of `a` (H*W, Cin) + per-image BN partial stats.

    w_ref   : (9, Cin, Cout) packed weights
    y_ref   : (1, H*W, Cout) pre-BN conv output block
    stats_ref: (1, 2, Cout)  [sum, sum_of_squares] over this image
    xpad_ref: (H+2, W+2, Cin) VMEM scratch (spatial halo padding, no HBM copy)
    acc_ref : (H*W, Cout)    VMEM f32 scratch accumulator
    """
    Cin = a.shape[-1]
    Cout = acc_ref.shape[-1]

    # Spatial zero-padding in VMEM scratch.
    xpad_ref[...] = jnp.zeros_like(xpad_ref)
    xpad_ref[1:H + 1, 1:W + 1, :] = a.reshape(H, W, Cin)

    # 9 shifted matmuls accumulated into the scratch accumulator (K = Cin_pad = 128).
    acc_ref[...] = jnp.zeros_like(acc_ref)
    for kh in range(3):
        for kw in range(3):
            patch = xpad_ref[kh:kh + H, kw:kw + W, :].reshape(H * W, Cin)
            acc_ref[...] += jnp.dot(patch, w_ref[kh * 3 + kw],
                                    preferred_element_type=jnp.float32)

    y = acc_ref[...]
    y_ref[...] = y.reshape(1, H * W, Cout).astype(y_ref.dtype)

    # One-pass BN partial stats (no 'centered' temporaries); reduced over the
    # batch in the wrapper (var = E[x^2] - mean^2).
    s = jnp.sum(y, axis=0, keepdims=True)
    ss = jnp.sum(y * y, axis=0, keepdims=True)
    stats_ref[...] = jnp.concatenate([s, ss], axis=0).reshape(1, 2, Cout)


def conv_stats_kernel(x_ref, w_ref, y_ref, stats_ref, xpad_ref, acc_ref, *, H, W):
    _conv3x3_and_stats(x_ref[0].astype(jnp.float32), w_ref, y_ref, stats_ref,
                       xpad_ref, acc_ref, H=H, W=W)


def bnrelu_conv_stats_kernel(x_ref, scale_ref, shift_ref, w_ref,
                             y_ref, stats_ref, xpad_ref, acc_ref, *, H, W):
    # Fused: BN-normalize(prev conv) + ReLU, then conv + stats of this conv.
    a = jnp.maximum(x_ref[0].astype(jnp.float32) * scale_ref[...] + shift_ref[...], 0.0)
    _conv3x3_and_stats(a, w_ref, y_ref, stats_ref, xpad_ref, acc_ref, H=H, W=W)


def bnrelu_kernel(x_ref, scale_ref, shift_ref, o_ref):
    x = x_ref[0].astype(jnp.float32)                       # (H*W, C)
    y = jnp.maximum(x * scale_ref[...] + shift_ref[...], 0.0)
    o_ref[...] = y.reshape(o_ref.shape).astype(o_ref.dtype)


# ----------------------------- pallas_call wrappers ---------------------------

def _compiler_params():
    return pltpu.CompilerParams(
        dimension_semantics=("parallel",),     # batch axis -> both TCs on v7x
        vmem_limit_bytes=VMEM_LIMIT,
    )


def conv_stats_call(x, w9, H, W):
    N, HW, Cpin = x.shape
    Cpout = w9.shape[2]
    kernel = functools.partial(conv_stats_kernel, H=H, W=W)
    return pl.pallas_call(
        kernel,
        out_shape=(jax.ShapeDtypeStruct((N, HW, Cpout), jnp.float32),
                   jax.ShapeDtypeStruct((N, 2, Cpout), jnp.float32)),
        grid_spec=pltpu.PrefetchScalarGridSpec(
            num_scalar_prefetch=0,
            grid=(N,),
            in_specs=[
                pl.BlockSpec((1, HW, Cpin), lambda n: (n, 0, 0)),
                pl.BlockSpec((9, Cpin, Cpout), lambda n: (0, 0, 0)),
            ],
            out_specs=(
                pl.BlockSpec((1, HW, Cpout), lambda n: (n, 0, 0)),
                pl.BlockSpec((1, 2, Cpout), lambda n: (n, 0, 0)),
            ),
            scratch_shapes=[
                pltpu.VMEM((H + 2, W + 2, Cpin), jnp.float32),
                pltpu.VMEM((HW, Cpout), jnp.float32),
            ],
        ),
        compiler_params=_compiler_params(),
    )(x, w9)


def bnrelu_conv_stats_call(x, scale, shift, w9, H, W):
    N, HW, Cpin = x.shape
    Cpout = w9.shape[2]
    kernel = functools.partial(bnrelu_conv_stats_kernel, H=H, W=W)
    return pl.pallas_call(
        kernel,
        out_shape=(jax.ShapeDtypeStruct((N, HW, Cpout), jnp.float32),
                   jax.ShapeDtypeStruct((N, 2, Cpout), jnp.float32)),
        grid_spec=pltpu.PrefetchScalarGridSpec(
            num_scalar_prefetch=0,
            grid=(N,),
            in_specs=[
                pl.BlockSpec((1, HW, Cpin), lambda n: (n, 0, 0)),
                pl.BlockSpec((1, Cpin), lambda n: (0, 0)),
                pl.BlockSpec((1, Cpin), lambda n: (0, 0)),
                pl.BlockSpec((9, Cpin, Cpout), lambda n: (0, 0, 0)),
            ],
            out_specs=(
                pl.BlockSpec((1, HW, Cpout), lambda n: (n, 0, 0)),
                pl.BlockSpec((1, 2, Cpout), lambda n: (n, 0, 0)),
            ),
            scratch_shapes=[
                pltpu.VMEM((H + 2, W + 2, Cpin), jnp.float32),
                pltpu.VMEM((HW, Cpout), jnp.float32),
            ],
        ),
        compiler_params=_compiler_params(),
    )(x, scale, shift, w9)


def bnrelu_call(x, scale, shift):
    N, HW, Cp = x.shape
    return pl.pallas_call(
        bnrelu_kernel,
        out_shape=jax.ShapeDtypeStruct((N, HW, Cp), jnp.float32),
        grid_spec=pltpu.PrefetchScalarGridSpec(
            num_scalar_prefetch=0,
            grid=(N,),
            in_specs=[
                pl.BlockSpec((1, HW, Cp), lambda n: (n, 0, 0)),
                pl.BlockSpec((1, Cp), lambda n: (0, 0)),
                pl.BlockSpec((1, Cp), lambda n: (0, 0)),
            ],
            out_specs=pl.BlockSpec((1, HW, Cp), lambda n: (n, 0, 0)),
        ),
        compiler_params=_compiler_params(),
    )(x, scale, shift)


# ----------------------------- host-side helpers ------------------------------

def _pad_axis(a, axis, new_size):
    pad = new_size - a.shape[axis]
    if pad <= 0:
        return a
    widths = [(0, 0)] * a.ndim
    widths[axis] = (0, pad)
    return jnp.pad(a, widths)


def _pack_weight(w, cin_p, cout_p):
    # (3, 3, Cin, Cout) -> zero-padded (9, Cin_p, Cout_p)
    w = _pad_axis(_pad_axis(w, 2, cin_p), 3, cout_p)
    return w.reshape(9, cin_p, cout_p)


def _bn_scale_shift(stats, gamma_p, beta_p, count):
    """Fold batch stats + affine into per-channel scale/shift (tiny O(C) work)."""
    total = jnp.sum(stats, axis=0)                               # (2, Cp)
    mean = total[0] / count
    var = jnp.maximum(total[1] / count - mean * mean, 0.0)       # biased var, as PyTorch BN fwd
    scale = gamma_p * jax.lax.rsqrt(var + 1e-5)
    shift = beta_p - mean * scale
    return scale.reshape(1, -1), shift.reshape(1, -1)


@jax.jit
def conv_block_forward(x_nchw, params):
    N, Cin, H, W = x_nchw.shape
    Cmid = params["w1"].shape[-1]
    Cout = params["w2"].shape[-1]
    Cpin, Cpmid, Cpout = (_round_up(c, LANE) for c in (Cin, Cmid, Cout))

    # NCHW -> lane-dense (N, H*W, Cpad)
    x = jnp.transpose(x_nchw, (0, 2, 3, 1)).reshape(N, H * W, Cin)
    x = _pad_axis(x, 2, Cpin)

    w1 = _pack_weight(params["w1"], Cpin, Cpmid)
    w2 = _pack_weight(params["w2"], Cpmid, Cpout)
    g1 = _pad_axis(params["gamma1"], 0, Cpmid)
    b1 = _pad_axis(params["beta1"], 0, Cpmid)
    g2 = _pad_axis(params["gamma2"], 0, Cpout)
    b2 = _pad_axis(params["beta2"], 0, Cpout)
    # NOTE: conv biases b1/b2 are intentionally not applied — a per-channel bias
    # immediately before train-mode BatchNorm is exactly cancelled by the mean
    # subtraction, so the forward output is unchanged.

    count = jnp.float32(N * H * W)

    y1, st1 = conv_stats_call(x, w1, H, W)                    # conv1 + stats1
    s1, t1 = _bn_scale_shift(st1, g1, b1, count)
    y2, st2 = bnrelu_conv_stats_call(y1, s1, t1, w2, H, W)    # bn1 + relu + conv2 + stats2
    s2, t2 = _bn_scale_shift(st2, g2, b2, count)
    out = bnrelu_call(y2, s2, t2)                             # bn2 + relu

    out = out[:, :, :Cout].reshape(N, H, W, Cout)
    return jnp.transpose(out, (0, 3, 1, 2))                   # NHWC -> NCHW


# ------------------------- pure-JAX reference ---------------------------------

def conv_block_reference(x_nchw, params):
    def conv(x, w, b):  # w: (3,3,Cin,Cout)
        w_oihw = jnp.transpose(w, (3, 2, 0, 1))
        y = jax.lax.conv_general_dilated(
            x, w_oihw, window_strides=(1, 1), padding=((1, 1), (1, 1)),
            dimension_numbers=("NCHW", "OIHW", "NCHW"))
        return y + b.reshape(1, -1, 1, 1)

    def bn_relu_ref(x, g, bta):
        mean = jnp.mean(x, axis=(0, 2, 3), keepdims=True)
        var = jnp.mean((x - mean) ** 2, axis=(0, 2, 3), keepdims=True)
        y = (x - mean) * jax.lax.rsqrt(var + 1e-5)
        y = y * g.reshape(1, -1, 1, 1) + bta.reshape(1, -1, 1, 1)
        return jnp.maximum(y, 0.0)

    x = conv(x_nchw, params["w1"], params["b1"])
    x = bn_relu_ref(x, params["gamma1"], params["beta1"])
    x = conv(x, params["w2"], params["b2"])
    x = bn_relu_ref(x, params["gamma2"], params["beta2"])
    return x


# ----------------------------- main ------------------------------------------

def init_params(key, in_ch, mid_ch, out_ch):
    k1, k2, k3, k4 = jax.random.split(key, 4)
    scale1 = 1.0 / jnp.sqrt(in_ch * 9.0)
    scale2 = 1.0 / jnp.sqrt(mid_ch * 9.0)
    return {
        "w1": jax.random.uniform(k1, (3, 3, in_ch, mid_ch), jnp.float32, -scale1, scale1),
        "b1": jax.random.uniform(k2, (mid_ch,), jnp.float32, -scale1, scale1),
        "gamma1": jnp.ones((mid_ch,), jnp.float32),   # BatchNorm2d default init
        "beta1": jnp.zeros((mid_ch,), jnp.float32),
        "w2": jax.random.uniform(k3, (3, 3, mid_ch, out_ch), jnp.float32, -scale2, scale2),
        "b2": jax.random.uniform(k4, (out_ch,), jnp.float32, -scale2, scale2),
        "gamma2": jnp.ones((out_ch,), jnp.float32),
        "beta2": jnp.zeros((out_ch,), jnp.float32),
    }


if __name__ == "__main__":
    in_ch, mid_ch, out_ch = 4, 8, 4
    N, H, W = 2, 16, 16

    key = jax.random.PRNGKey(0)
    kx, kp = jax.random.split(key)
    x = jax.random.normal(kx, (N, in_ch, H, W), dtype=jnp.float32)
    params = init_params(kp, in_ch, mid_ch, out_ch)

    out = conv_block_forward(x, params)
    out = jax.block_until_ready(out)

    ref = conv_block_reference(x, params)
    assert out.shape == (N, out_ch, H, W)
    assert jnp.max(jnp.abs(out - ref)) < 2e-4, "mismatch vs pure-JAX reference"

    print("KERNEL_OK")
</pallas_src>

<mosaic_0001>
module attributes {stable_mosaic.version = 11 : i64} {
  func.func @conv_stats_kernel(%arg0: i32, %arg1: memref<1x256x128xf32, #tpu.memory_space<vmem>>, %arg2: memref<9x128x128xf32, #tpu.memory_space<vmem>>, %arg3: memref<1x256x128xf32, #tpu.memory_space<vmem>>, %arg4: memref<1x2x128xf32, #tpu.memory_space<vmem>>, %arg5: memref<18x18x128xf32, #tpu.memory_space<vmem>>, %arg6: memref<256x128xf32, #tpu.memory_space<vmem>>) attributes {dimension_semantics = [#tpu.dimension_semantics<parallel>], iteration_bounds = array<i64: 2>, scalar_prefetch = 0 : i64, scratch_operands = 2 : i64, tpu.core_type = #tpu.core_type<tc>, window_params = [{transform_indices = @transform_0, window_bounds = array<i64: 1, 256, 128>}, {pipeline_mode = #tpu.pipeline_mode<synchronous>, transform_indices = @transform_1, window_bounds = array<i64: 9, 128, 128>}, {transform_indices = @transform_2, window_bounds = array<i64: 1, 256, 128>}, {transform_indices = @transform_3, window_bounds = array<i64: 1, 2, 128>}]} {
    %c0 = arith.constant 0 : index
    %c0_0 = arith.constant 0 : index
    %c0_1 = arith.constant 0 : index
    %0 = vector.load %arg1[%c0, %c0_0, %c0_1] : memref<1x256x128xf32, #tpu.memory_space<vmem>>, vector<1x256x128xf32>
    %1 = vector.shape_cast %0 : vector<1x256x128xf32> to vector<256x128xf32>
    %cst = arith.constant 0.000000e+00 : f32
    %2 = vector.broadcast %cst : f32 to vector<18x18x128xf32>
    %c0_2 = arith.constant 0 : index
    %c0_3 = arith.constant 0 : index
    %c0_4 = arith.constant 0 : index
    %3 = vector.load %arg5[%c0_2, %c0_3, %c0_4] : memref<18x18x128xf32, #tpu.memory_space<vmem>>, vector<18x18x128xf32>
    tpu.vector_store %arg5[%c0_2, %c0_3, %c0_4], %2 {strides = array<i32>} : memref<18x18x128xf32, #tpu.memory_space<vmem>>, vector<18x18x128xf32>,
    %4 = vector.shape_cast %1 : vector<256x128xf32> to vector<16x16x128xf32>
    %c1 = arith.constant 1 : index
    %c1_5 = arith.constant 1 : index
    %c0_6 = arith.constant 0 : index
    %5 = vector.load %arg5[%c1, %c1_5, %c0_6] : memref<18x18x128xf32, #tpu.memory_space<vmem>>, vector<16x16x128xf32>
    tpu.vector_store %arg5[%c1, %c1_5, %c0_6], %4 {strides = array<i32>} : memref<18x18x128xf32, #tpu.memory_space<vmem>>, vector<16x16x128xf32>,
    %cst_7 = arith.constant 0.000000e+00 : f32
    %6 = vector.broadcast %cst_7 : f32 to vector<256x128xf32>
    %c0_8 = arith.constant 0 : index
    %c0_9 = arith.constant 0 : index
    %7 = vector.load %arg6[%c0_8, %c0_9] : memref<256x128xf32, #tpu.memory_space<vmem>>, vector<256x128xf32>
    tpu.vector_store %arg6[%c0_8, %c0_9], %6 {strides = array<i32>} : memref<256x128xf32, #tpu.memory_space<vmem>>, vector<256x128xf32>,
    %c0_10 = arith.constant 0 : index
    %c0_11 = arith.constant 0 : index
    %c0_12 = arith.constant 0 : index
    %8 = vector.load %arg5[%c0_10, %c0_11, %c0_12] : memref<18x18x128xf32, #tpu.memory_space<vmem>>, vector<16x16x128xf32>
    %9 = vector.shape_cast %8 : vector<16x16x128xf32> to vector<256x128xf32>
    %c0_13 = arith.constant 0 : index
    %c0_14 = arith.constant 0 : index
    %10 = vector.load %arg6[%c0_13, %c0_14] : memref<256x128xf32, #tpu.memory_space<vmem>>, vector<256x128xf32>
    %c0_15 = arith.constant 0 : index
    %c0_16 = arith.constant 0 : index
    %c0_17 = arith.constant 0 : index
    %11 = vector.load %arg2[%c0_15, %c0_16, %c0_17] : memref<9x128x128xf32, #tpu.memory_space<vmem>>, vector<1x128x128xf32>
    %12 = vector.shape_cast %11 : vector<1x128x128xf32> to vector<128x128xf32>
    %cst_18 = arith.constant dense<0.000000e+00> : vector<256x128xf32>
    %13 = tpu.matmul %9, %12, %cst_18 {dimension_numbers = #tpu.dot_dimension_numbers<[1], [0], [0], [1], [0, 0, 1, 1], [], []>} : vector<256x128xf32>, vector<128x128xf32>, vector<256x128xf32> -> vector<256x128xf32>
    %14 = arith.addf %10, %13 : vector<256x128xf32>
    %c0_19 = arith.constant 0 : index
    %c0_20 = arith.constant 0 : index
    %15 = vector.load %arg6[%c0_19, %c0_20] : memref<256x128xf32, #tpu.memory_space<vmem>>, vector<256x128xf32>
    tpu.vector_store %arg6[%c0_19, %c0_20], %14 {strides = array<i32>} : memref<256x128xf32, #tpu.memory_space<vmem>>, vector<256x128xf32>,
    %c0_21 = arith.constant 0 : index
    %c1_22 = arith.constant 1 : index
    %c0_23 = arith.constant 0 : index
    %16 = vector.load %arg5[%c0_21, %c1_22, %c0_23] : memref<18x18x128xf32, #tpu.memory_space<vmem>>, vector<16x16x128xf32>
    %17 = vector.shape_cast %16 : vector<16x16x128xf32> to vector<256x128xf32>
    %c0_24 = arith.constant 0 : index
    %c0_25 = arith.constant 0 : index
    %18 = vector.load %arg6[%c0_24, %c0_25] : memref<256x128xf32, #tpu.memory_space<vmem>>, vector<256x128xf32>
    %c1_26 = arith.constant 1 : index
    %c0_27 = arith.constant 0 : index
    %c0_28 = arith.constant 0 : index
    %19 = vector.load %arg2[%c1_26, %c0_27, %c0_28] : memref<9x128x128xf32, #tpu.memory_space<vmem>>, vector<1x128x128xf32>
    %20 = vector.shape_cast %19 : vector<1x128x128xf32> to vector<128x128xf32>
    %cst_29 = arith.constant dense<0.000000e+00> : vector<256x128xf32>
    %21 = tpu.matmul %17, %20, %cst_29 {dimension_numbers = #tpu.dot_dimension_numbers<[1], [0], [0], [1], [0, 0, 1, 1], [], []>} : vector<256x128xf32>, vector<128x128xf32>, vector<256x128xf32> -> vector<256x128xf32>
    %22 = arith.addf %18, %21 : vector<256x128xf32>
    %c0_30 = arith.constant 0 : index
    %c0_31 = arith.constant 0 : index
    %23 = vector.load %arg6[%c0_30, %c0_31] : memref<256x128xf32, #tpu.memory_space<vmem>>, vector<256x128xf32>
    tpu.vector_store %arg6[%c0_30, %c0_31], %22 {strides = array<i32>} : memref<256x128xf32, #tpu.memory_space<vmem>>, vector<256x128xf32>,
    %c0_32 = arith.constant 0 : index
    %c2 = arith.constant 2 : index
    %c0_33 = arith.constant 0 : index
    %24 = vector.load %arg5[%c0_32, %c2, %c0_33] : memref<18x18x128xf32, #tpu.memory_space<vmem>>, vector<16x16x128xf32>
    %25 = vector.shape_cast %24 : vector<16x16x128xf32> to vector<256x128xf32>
    %c0_34 = arith.constant 0 : index
    %c0_35 = arith.constant 0 : index
    %26 = vector.load %arg6[%c0_34, %c0_35] : memref<256x128xf32, #tpu.memory_space<vmem>>, vector<256x128xf32>
    %c2_36 = arith.constant 2 : index
    %c0_37 = arith.constant 0 : index
    %c0_38 = arith.constant 0 : index
    %27 = vector.load %arg2[%c2_36, %c0_37, %c0_38] : memref<9x128x128xf32, #tpu.memory_space<vmem>>, vector<1x128x128xf32>
    %28 = vector.shape_cast %27 : vector<1x128x128xf32> to vector<128x128xf32>
    %cst_39 = arith.constant dense<0.000000e+00> : vector<256x128xf32>
    %29 = tpu.matmul %25, %28, %cst_39 {dimension_numbers = #tpu.dot_dimension_numbers<[1], [0], [0], [1], [0, 0, 1, 1], [], []>} : vector<256x128xf32>, vector<128x128xf32>, vector<256x128xf32> -> vector<256x128xf32>
    %30 = arith.addf %26, %29 : vector<256x128xf32>
    %c0_40 = arith.constant 0 : index
    %c0_41 = arith.constant 0 : index
    %31 = vector.load %arg6[%c0_40, %c0_41] : memref<256x128xf32, #tpu.memory_space<vmem>>, vector<256x128xf32>
    tpu.vector_store %arg6[%c0_40, %c0_41], %30 {strides = array<i32>} : memref<256x128xf32, #tpu.memory_space<vmem>>, vector<256x128xf32>,
    %c1_42 = arith.constant 1 : index
    %c0_43 = arith.constant 0 : index
    %c0_44 = arith.constant 0 : index
    %32 = vector.load %arg5[%c1_42, %c0_43, %c0_44] : memref<18x18x128xf32, #tpu.memory_space<vmem>>, vector<16x16x128xf32>
    %33 = vector.shape_cast %32 : vector<16x16x128xf32> to vector<256x128xf32>
    %c0_45 = arith.constant 0 : index
    %c0_46 = arith.constant 0 : index
    %34 = vector.load %arg6[%c0_45, %c0_46] : memref<256x128xf32, #tpu.memory_space<vmem>>, vector<256x128xf32>
    %c3 = arith.constant 3 : index
    %c0_47 = arith.constant 0 : index
    %c0_48 = arith.constant 0 : index
    %35 = vector.load %arg2[%c3, %c0_47, %c0_48] : memref<9x128x128xf32, #tpu.memory_space<vmem>>, vector<1x128x128xf32>
    %36 = vector.shape_cast %35 : vector<1x128x128xf32> to vector<128x128xf32>
    %cst_49 = arith.constant dense<0.000000e+00> : vector<256x128xf32>
    %37 = tpu.matmul %33, %36, %cst_49 {dimension_numbers = #tpu.dot_dimension_numbers<[1], [0], [0], [1], [0, 0, 1, 1], [], []>} : vector<256x128xf32>, vector<128x128xf32>, vector<256x128xf32> -> vector<256x128xf32>
    %38 = arith.addf %34, %37 : vector<256x128xf32>
    %c0_50 = arith.constant 0 : index
    %c0_51 = arith.constant 0 : index
    %39 = vector.load %arg6[%c0_50, %c0_51] : memref<256x128xf32, #tpu.memory_space<vmem>>, vector<256x128xf32>
    tpu.vector_store %arg6[%c0_50, %c0_51], %38 {strides = array<i32>} : memref<256x128xf32, #tpu.memory_space<vmem>>, vector<256x128xf32>,
    %c1_52 = arith.constant 1 : index
    %c1_53 = arith.constant 1 : index
    %c0_54 = arith.constant 0 : index
    %40 = vector.load %arg5[%c1_52, %c1_53, %c0_54] : memref<18x18x128xf32, #tpu.memory_space<vmem>>, vector<16x16x128xf32>
    %41 = vector.shape_cast %40 : vector<16x16x128xf32> to vector<256x128xf32>
    %c0_55 = arith.constant 0 : index
    %c0_56 = arith.constant 0 : index
    %42 = vector.load %arg6[%c0_55, %c0_56] : memref<256x128xf32, #tpu.memory_space<vmem>>, vector<256x128xf32>
    %c4 = arith.constant 4 : index
    %c0_57 = arith.constant 0 : index
    %c0_58 = arith.constant 0 : index
    %43 = vector.load %arg2[%c4, %c0_57, %c0_58] : memref<9x128x128xf32, #tpu.memory_space<vmem>>, vector<1x128x128xf32>
    %44 = vector.shape_cast %43 : vector<1x128x128xf32> to vector<128x128xf32>
    %cst_59 = arith.constant dense<0.000000e+00> : vector<256x128xf32>
    %45 = tpu.matmul %41, %44, %cst_59 {dimension_numbers = #tpu.dot_dimension_numbers<[1], [0], [0], [1], [0, 0, 1, 1], [], []>} : vector<256x128xf32>, vector<128x128xf32>, vector<256x128xf32> -> vector<256x128xf32>
    %46 = arith.addf %42, %45 : vector<256x128xf32>
    %c0_60 = arith.constant 0 : index
    %c0_61 = arith.constant 0 : index
    %47 = vector.load %arg6[%c0_60, %c0_61] : memref<256x128xf32, #tpu.memory_space<vmem>>, vector<256x128xf32>
    tpu.vector_store %arg6[%c0_60, %c0_61], %46 {strides = array<i32>} : memref<256x128xf32, #tpu.memory_space<vmem>>, vector<256x128xf32>,
    %c1_62 = arith.constant 1 : index
    %c2_63 = arith.constant 2 : index
    %c0_64 = arith.constant 0 : index
    %48 = vector.load %arg5[%c1_62, %c2_63, %c0_64] : memref<18x18x128xf32, #tpu.memory_space<vmem>>, vector<16x16x128xf32>
    %49 = vector.shape_cast %48 : vector<16x16x128xf32> to vector<256x128xf32>
    %c0_65 = arith.constant 0 : index
    %c0_66 = arith.constant 0 : index
    %50 = vector.load %arg6[%c0_65, %c0_66] : memref<256x128xf32, #tpu.memory_space<vmem>>, vector<256x128xf32>
    %c5 = arith.constant 5 : index
    %c0_67 = arith.constant 0 : index
    %c0_68 = arith.constant 0 : index
    %51 = vector.load %arg2[%c5, %c0_67, %c0_68] : memref<9x128x128xf32, #tpu.memory_space<vmem>>, vector<1x128x128xf32>
    %52 = vector.shape_cast %51 : vector<1x128x128xf32> to vector<128x128xf32>
    %cst_69 = arith.constant dense<0.000000e+00> : vector<256x128xf32>
    %53 = tpu.matmul %49, %52, %cst_69 {dimension_numbers = #tpu.dot_dimension_numbers<[1], [0], [0], [1], [0, 0, 1, 1], [], []>} : vector<256x128xf32>, vector<128x128xf32>, vector<256x128xf32> -> vector<256x128xf32>
    %54 = arith.addf %50, %53 : vector<256x128xf32>
    %c0_70 = arith.constant 0 : index
    %c0_71 = arith.constant 0 : index
    %55 = vector.load %arg6[%c0_70, %c0_71] : memref<256x128xf32, #tpu.memory_space<vmem>>, vector<256x128xf32>
    tpu.vector_store %arg6[%c0_70, %c0_71], %54 {strides = array<i32>} : memref<256x128xf32, #tpu.memory_space<vmem>>, vector<256x128xf32>,
    %c2_72 = arith.constant 2 : index
    %c0_73 = arith.constant 0 : index
    %c0_74 = arith.constant 0 : index
    %56 = vector.load %arg5[%c2_72, %c0_73, %c0_74] : memref<18x18x128xf32, #tpu.memory_space<vmem>>, vector<16x16x128xf32>
    %57 = vector.shape_cast %56 : vector<16x16x128xf32> to vector<256x128xf32>
    %c0_75 = arith.constant 0 : index
    %c0_76 = arith.constant 0 : index
    %58 = vector.load %arg6[%c0_75, %c0_76] : memref<256x128xf32, #tpu.memory_space<vmem>>, vector<256x128xf32>
    %c6 = arith.constant 6 : index
    %c0_77 = arith.constant 0 : index
    %c0_78 = arith.constant 0 : index
    %59 = vector.load %arg2[%c6, %c0_77, %c0_78] : memref<9x128x128xf32, #tpu.memory_space<vmem>>, vector<1x128x128xf32>
    %60 = vector.shape_cast %59 : vector<1x128x128xf32> to vector<128x128xf32>
    %cst_79 = arith.constant dense<0.000000e+00> : vector<256x128xf32>
    %61 = tpu.matmul %57, %60, %cst_79 {dimension_numbers = #tpu.dot_dimension_numbers<[1], [0], [0], [1], [0, 0, 1, 1], [], []>} : vector<256x128xf32>, vector<128x128xf32>, vector<256x128xf32> -> vector<256x128xf32>
    %62 = arith.addf %58, %61 : vector<256x128xf32>
    %c0_80 = arith.constant 0 : index
    %c0_81 = arith.constant 0 : index
    %63 = vector.load %arg6[%c0_80, %c0_81] : memref<256x128xf32, #tpu.memory_space<vmem>>, vector<256x128xf32>
    tpu.vector_store %arg6[%c0_80, %c0_81], %62 {strides = array<i32>} : memref<256x128xf32, #tpu.memory_space<vmem>>, vector<256x128xf32>,
    %c2_82 = arith.constant 2 : index
    %c1_83 = arith.constant 1 : index
    %c0_84 = arith.constant 0 : index
    %64 = vector.load %arg5[%c2_82, %c1_83, %c0_84] : memref<18x18x128xf32, #tpu.memory_space<vmem>>, vector<16x16x128xf32>
    %65 = vector.shape_cast %64 : vector<16x16x128xf32> to vector<256x128xf32>
    %c0_85 = arith.constant 0 : index
    %c0_86 = arith.constant 0 : index
    %66 = vector.load %arg6[%c0_85, %c0_86] : memref<256x128xf32, #tpu.memory_space<vmem>>, vector<256x128xf32>
    %c7 = arith.constant 7 : index
    %c0_87 = arith.constant 0 : index
    %c0_88 = arith.constant 0 : index
    %67 = vector.load %arg2[%c7, %c0_87, %c0_88] : memref<9x128x128xf32, #tpu.memory_space<vmem>>, vector<1x128x128xf32>
    %68 = vector.shape_cast %67 : vector<1x128x128xf32> to vector<128x128xf32>
    %cst_89 = arith.constant dense<0.000000e+00> : vector<256x128xf32>
    %69 = tpu.matmul %65, %68, %cst_89 {dimension_numbers = #tpu.dot_dimension_numbers<[1], [0], [0], [1], [0, 0, 1, 1], [], []>} : vector<256x128xf32>, vector<128x128xf32>, vector<256x128xf32> -> vector<256x128xf32>
    %70 = arith.addf %66, %69 : vector<256x128xf32>
    %c0_90 = arith.constant 0 : index
    %c0_91 = arith.constant 0 : index
    %71 = vector.load %arg6[%c0_90, %c0_91] : memref<256x128xf32, #tpu.memory_space<vmem>>, vector<256x128xf32>
    tpu.vector_store %arg6[%c0_90, %c0_91], %70 {strides = array<i32>} : memref<256x128xf32, #tpu.memory_space<vmem>>, vector<256x128xf32>,
    %c2_92 = arith.constant 2 : index
    %c2_93 = arith.constant 2 : index
    %c0_94 = arith.constant 0 : index
    %72 = vector.load %arg5[%c2_92, %c2_93, %c0_94] : memref<18x18x128xf32, #tpu.memory_space<vmem>>, vector<16x16x128xf32>
    %73 = vector.shape_cast %72 : vector<16x16x128xf32> to vector<256x128xf32>
    %c0_95 = arith.constant 0 : index
    %c0_96 = arith.constant 0 : index
    %74 = vector.load %arg6[%c0_95, %c0_96] : memref<256x128xf32, #tpu.memory_space<vmem>>, vector<256x128xf32>
    %c8 = arith.constant 8 : index
    %c0_97 = arith.constant 0 : index
    %c0_98 = arith.constant 0 : index
    %75 = vector.load %arg2[%c8, %c0_97, %c0_98] : memref<9x128x128xf32, #tpu.memory_space<vmem>>, vector<1x128x128xf32>
    %76 = vector.shape_cast %75 : vector<1x128x128xf32> to vector<128x128xf32>
    %cst_99 = arith.constant dense<0.000000e+00> : vector<256x128xf32>
    %77 = tpu.matmul %73, %76, %cst_99 {dimension_numbers = #tpu.dot_dimension_numbers<[1], [0], [0], [1], [0, 0, 1, 1], [], []>} : vector<256x128xf32>, vector<128x128xf32>, vector<256x128xf32> -> vector<256x128xf32>
    %78 = arith.addf %74, %77 : vector<256x128xf32>
    %c0_100 = arith.constant 0 : index
    %c0_101 = arith.constant 0 : index
    %79 = vector.load %arg6[%c0_100, %c0_101] : memref<256x128xf32, #tpu.memory_space<vmem>>, vector<256x128xf32>
    tpu.vector_store %arg6[%c0_100, %c0_101], %78 {strides = array<i32>} : memref<256x128xf32, #tpu.memory_space<vmem>>, vector<256x128xf32>,
    %c0_102 = arith.constant 0 : index
    %c0_103 = arith.constant 0 : index
    %80 = vector.load %arg6[%c0_102, %c0_103] : memref<256x128xf32, #tpu.memory_space<vmem>>, vector<256x128xf32>
    %81 = vector.shape_cast %80 : vector<256x128xf32> to vector<1x256x128xf32>
    %c0_104 = arith.constant 0 : index
    %c0_105 = arith.constant 0 : index
    %c0_106 = arith.constant 0 : index
    %82 = vector.load %arg3[%c0_104, %c0_105, %c0_106] : memref<1x256x128xf32, #tpu.memory_space<vmem>>, vector<1x256x128xf32>
    tpu.vector_store %arg3[%c0_104, %c0_105, %c0_106], %81 {strides = array<i32>} : memref<1x256x128xf32, #tpu.memory_space<vmem>>, vector<1x256x128xf32>,
    %cst_107 = arith.constant dense<0.000000e+00> : vector<128xf32>
    %83 = vector.multi_reduction <add>, %80, %cst_107 [0] : vector<256x128xf32> to vector<128xf32>
    %84 = vector.shape_cast %83 : vector<128xf32> to vector<1x128xf32>
    %85 = arith.mulf %80, %80 : vector<256x128xf32>
    %cst_108 = arith.constant dense<0.000000e+00> : vector<128xf32>
    %86 = vector.multi_reduction <add>, %85, %cst_108 [0] : vector<256x128xf32> to vector<128xf32>
    %87 = vector.shape_cast %86 : vector<128xf32> to vector<1x128xf32>
    %88 = tpu.concatenate %84, %87 in 0 : vector<1x128xf32>, vector<1x128xf32> -> vector<2x128xf32>
    %89 = vector.shape_cast %88 : vector<2x128xf32> to vector<1x2x128xf32>
    %c0_109 = arith.constant 0 : index
    %c0_110 = arith.constant 0 : index
    %c0_111 = arith.constant 0 : index
    %90 = vector.load %arg4[%c0_109, %c0_110, %c0_111] : memref<1x2x128xf32, #tpu.memory_space<vmem>>, vector<1x2x128xf32>
    tpu.vector_store %arg4[%c0_109, %c0_110, %c0_111], %89 {strides = array<i32>} : memref<1x2x128xf32, #tpu.memory_space<vmem>>, vector<1x2x128xf32>,
    return
  }
  func.func @transform_0(%arg0: i32) -> (i32, i32, i32) {
    %c0_i32 = arith.constant 0 : i32
    %c0_i32_0 = arith.constant 0 : i32
    %c0_i32_1 = arith.constant 0 : i32
    return %arg0, %c0_i32, %c0_i32_0 : i32, i32, i32
  }
  func.func @transform_1(%arg0: i32) -> (i32, i32, i32) {
    %c0_i32 = arith.constant 0 : i32
    %c0_i32_0 = arith.constant 0 : i32
    %c0_i32_1 = arith.constant 0 : i32
    %c0_i32_2 = arith.constant 0 : i32
    return %c0_i32, %c0_i32_0, %c0_i32_1 : i32, i32, i32
  }
  func.func @transform_2(%arg0: i32) -> (i32, i32, i32) {
    %c0_i32 = arith.constant 0 : i32
    %c0_i32_0 = arith.constant 0 : i32
    %c0_i32_1 = arith.constant 0 : i32
    return %arg0, %c0_i32, %c0_i32_0 : i32, i32, i32
  }
  func.func @transform_3(%arg0: i32) -> (i32, i32, i32) {
    %c0_i32 = arith.constant 0 : i32
    %c0_i32_0 = arith.constant 0 : i32
    %c0_i32_1 = arith.constant 0 : i32
    return %arg0, %c0_i32, %c0_i32_0 : i32, i32, i32
  }
}

module attributes {stable_mosaic.version = 11 : i64} {
  func.func @bnrelu_kernel(%arg0: i32, %arg1: memref<1x256x128xf32, #tpu.memory_space<vmem>>, %arg2: memref<1x128xf32, #tpu.memory_space<vmem>>, %arg3: memref<1x128xf32, #tpu.memory_space<vmem>>, %arg4: memref<1x256x128xf32, #tpu.memory_space<vmem>>) attributes {dimension_semantics = [#tpu.dimension_semantics<parallel>], iteration_bounds = array<i64: 2>, scalar_prefetch = 0 : i64, scratch_operands = 0 : i64, tpu.core_type = #tpu.core_type<tc>, window_params = [{transform_indices = @transform_0, window_bounds = array<i64: 1, 256, 128>}, {pipeline_mode = #tpu.pipeline_mode<synchronous>, transform_indices = @transform_1, window_bounds = array<i64: 1, 128>}, {pipeline_mode = #tpu.pipeline_mode<synchronous>, transform_indices = @transform_2, window_bounds = array<i64: 1, 128>}, {transform_indices = @transform_3, window_bounds = array<i64: 1, 256, 128>}]} {
    %c0 = arith.constant 0 : index
    %c0_0 = arith.constant 0 : index
    %c0_1 = arith.constant 0 : index
    %0 = vector.load %arg1[%c0, %c0_0, %c0_1] : memref<1x256x128xf32, #tpu.memory_space<vmem>>, vector<1x256x128xf32>
    %1 = vector.shape_cast %0 : vector<1x256x128xf32> to vector<256x128xf32>
    %c0_2 = arith.constant 0 : index
    %c0_3 = arith.constant 0 : index
    %2 = vector.load %arg2[%c0_2, %c0_3] : memref<1x128xf32, #tpu.memory_space<vmem>>, vector<1x128xf32>
    %3 = vector.broadcast %2 : vector<1x128xf32> to vector<256x128xf32>
    %4 = arith.mulf %1, %3 : vector<256x128xf32>
    %c0_4 = arith.constant 0 : index
    %c0_5 = arith.constant 0 : index
    %5 = vector.load %arg3[%c0_4, %c0_5] : memref<1x128xf32, #tpu.memory_space<vmem>>, vector<1x128xf32>
    %6 = vector.broadcast %5 : vector<1x128xf32> to vector<256x128xf32>
    %7 = arith.addf %4, %6 : vector<256x128xf32>
    %cst = arith.constant 0.000000e+00 : f32
    %8 = vector.broadcast %cst : f32 to vector<256x128xf32>
    %9 = arith.maximumf %7, %8 : vector<256x128xf32>
    %10 = vector.shape_cast %9 : vector<256x128xf32> to vector<1x256x128xf32>
    %c0_6 = arith.constant 0 : index
    %c0_7 = arith.constant 0 : index
    %c0_8 = arith.constant 0 : index
    %11 = vector.load %arg4[%c0_6, %c0_7, %c0_8] : memref<1x256x128xf32, #tpu.memory_space<vmem>>, vector<1x256x128xf32>
    tpu.vector_store %arg4[%c0_6, %c0_7, %c0_8], %10 {strides = array<i32>} : memref<1x256x128xf32, #tpu.memory_space<vmem>>, vector<1x256x128xf32>,
    return
  }
  func.func @transform_0(%arg0: i32) -> (i32, i32, i32) {
    %c0_i32 = arith.constant 0 : i32
    %c0_i32_0 = arith.constant 0 : i32
    %c0_i32_1 = arith.constant 0 : i32
    return %arg0, %c0_i32, %c0_i32_0 : i32, i32, i32
  }
  func.func @transform_1(%arg0: i32) -> (i32, i32) {
    %c0_i32 = arith.constant 0 : i32
    %c0_i32_0 = arith.constant 0 : i32
    %c0_i32_1 = arith.constant 0 : i32
    return %c0_i32, %c0_i32_0 : i32, i32
  }
  func.func @transform_2(%arg0: i32) -> (i32, i32) {
    %c0_i32 = arith.constant 0 : i32
    %c0_i32_0 = arith.constant 0 : i32
    %c0_i32_1 = arith.constant 0 : i32
    return %c0_i32, %c0_i32_0 : i32, i32
  }
  func.func @transform_3(%arg0: i32) -> (i32, i32, i32) {
    %c0_i32 = arith.constant 0 : i32
    %c0_i32_0 = arith.constant 0 : i32
    %c0_i32_1 = arith.constant 0 : i32
    return %arg0, %c0_i32, %c0_i32_0 : i32, i32, i32
  }
}

module attributes {stable_mosaic.version = 11 : i64} {
  func.func @bnrelu_conv_stats_kernel(%arg0: i32, %arg1: memref<1x256x128xf32, #tpu.memory_space<vmem>>, %arg2: memref<1x128xf32, #tpu.memory_space<vmem>>, %arg3: memref<1x128xf32, #tpu.memory_space<vmem>>, %arg4: memref<9x128x128xf32, #tpu.memory_space<vmem>>, %arg5: memref<1x256x128xf32, #tpu.memory_space<vmem>>, %arg6: memref<1x2x128xf32, #tpu.memory_space<vmem>>, %arg7: memref<18x18x128xf32, #tpu.memory_space<vmem>>, %arg8: memref<256x128xf32, #tpu.memory_space<vmem>>) attributes {dimension_semantics = [#tpu.dimension_semantics<parallel>], iteration_bounds = array<i64: 2>, scalar_prefetch = 0 : i64, scratch_operands = 2 : i64, tpu.core_type = #tpu.core_type<tc>, window_params = [{transform_indices = @transform_0, window_bounds = array<i64: 1, 256, 128>}, {pipeline_mode = #tpu.pipeline_mode<synchronous>, transform_indices = @transform_1, window_bounds = array<i64: 1, 128>}, {pipeline_mode = #tpu.pipeline_mode<synchronous>, transform_indices = @transform_2, window_bounds = array<i64: 1, 128>}, {pipeline_mode = #tpu.pipeline_mode<synchronous>, transform_indices = @transform_3, window_bounds = array<i64: 9, 128, 128>}, {transform_indices = @transform_4, window_bounds = array<i64: 1, 256, 128>}, {transform_indices = @transform_5, window_bounds = array<i64: 1, 2, 128>}]} {
    %c0 = arith.constant 0 : index
    %c0_0 = arith.constant 0 : index
    %c0_1 = arith.constant 0 : index
    %0 = vector.load %arg1[%c0, %c0_0, %c0_1] : memref<1x256x128xf32, #tpu.memory_space<vmem>>, vector<1x256x128xf32>
    %1 = vector.shape_cast %0 : vector<1x256x128xf32> to vector<256x128xf32>
    %c0_2 = arith.constant 0 : index
    %c0_3 = arith.constant 0 : index
    %2 = vector.load %arg2[%c0_2, %c0_3] : memref<1x128xf32, #tpu.memory_space<vmem>>, vector<1x128xf32>
    %3 = vector.broadcast %2 : vector<1x128xf32> to vector<256x128xf32>
    %4 = arith.mulf %1, %3 : vector<256x128xf32>
    %c0_4 = arith.constant 0 : index
    %c0_5 = arith.constant 0 : index
    %5 = vector.load %arg3[%c0_4, %c0_5] : memref<1x128xf32, #tpu.memory_space<vmem>>, vector<1x128xf32>
    %6 = vector.broadcast %5 : vector<1x128xf32> to vector<256x128xf32>
    %7 = arith.addf %4, %6 : vector<256x128xf32>
    %cst = arith.constant 0.000000e+00 : f32
    %8 = vector.broadcast %cst : f32 to vector<256x128xf32>
    %9 = arith.maximumf %7, %8 : vector<256x128xf32>
    %cst_6 = arith.constant 0.000000e+00 : f32
    %10 = vector.broadcast %cst_6 : f32 to vector<18x18x128xf32>
    %c0_7 = arith.constant 0 : index
    %c0_8 = arith.constant 0 : index
    %c0_9 = arith.constant 0 : index
    %11 = vector.load %arg7[%c0_7, %c0_8, %c0_9] : memref<18x18x128xf32, #tpu.memory_space<vmem>>, vector<18x18x128xf32>
    tpu.vector_store %arg7[%c0_7, %c0_8, %c0_9], %10 {strides = array<i32>} : memref<18x18x128xf32, #tpu.memory_space<vmem>>, vector<18x18x128xf32>,
    %12 = vector.shape_cast %9 : vector<256x128xf32> to vector<16x16x128xf32>
    %c1 = arith.constant 1 : index
    %c1_10 = arith.constant 1 : index
    %c0_11 = arith.constant 0 : index
    %13 = vector.load %arg7[%c1, %c1_10, %c0_11] : memref<18x18x128xf32, #tpu.memory_space<vmem>>, vector<16x16x128xf32>
    tpu.vector_store %arg7[%c1, %c1_10, %c0_11], %12 {strides = array<i32>} : memref<18x18x128xf32, #tpu.memory_space<vmem>>, vector<16x16x128xf32>,
    %cst_12 = arith.constant 0.000000e+00 : f32
    %14 = vector.broadcast %cst_12 : f32 to vector<256x128xf32>
    %c0_13 = arith.constant 0 : index
    %c0_14 = arith.constant 0 : index
    %15 = vector.load %arg8[%c0_13, %c0_14] : memref<256x128xf32, #tpu.memory_space<vmem>>, vector<256x128xf32>
    tpu.vector_store %arg8[%c0_13, %c0_14], %14 {strides = array<i32>} : memref<256x128xf32, #tpu.memory_space<vmem>>, vector<256x128xf32>,
    %c0_15 = arith.constant 0 : index
    %c0_16 = arith.constant 0 : index
    %c0_17 = arith.constant 0 : index
    %16 = vector.load %arg7[%c0_15, %c0_16, %c0_17] : memref<18x18x128xf32, #tpu.memory_space<vmem>>, vector<16x16x128xf32>
    %17 = vector.shape_cast %16 : vector<16x16x128xf32> to vector<256x128xf32>
    %c0_18 = arith.constant 0 : index
    %c0_19 = arith.constant 0 : index
    %18 = vector.load %arg8[%c0_18, %c0_19] : memref<256x128xf32, #tpu.memory_space<vmem>>, vector<256x128xf32>
    %c0_20 = arith.constant 0 : index
    %c0_21 = arith.constant 0 : index
    %c0_22 = arith.constant 0 : index
    %19 = vector.load %arg4[%c0_20, %c0_21, %c0_22] : memref<9x128x128xf32, #tpu.memory_space<vmem>>, vector<1x128x128xf32>
    %20 = vector.shape_cast %19 : vector<1x128x128xf32> to vector<128x128xf32>
    %cst_23 = arith.constant dense<0.000000e+00> : vector<256x128xf32>
    %21 = tpu.matmul %17, %20, %cst_23 {dimension_numbers = #tpu.dot_dimension_numbers<[1], [0], [0], [1], [0, 0, 1, 1], [], []>} : vector<256x128xf32>, vector<128x128xf32>, vector<256x128xf32> -> vector<256x128xf32>
    %22 = arith.addf %18, %21 : vector<256x128xf32>
    %c0_24 = arith.constant 0 : index
    %c0_25 = arith.constant 0 : index
    %23 = vector.load %arg8[%c0_24, %c0_25] : memref<256x128xf32, #tpu.memory_space<vmem>>, vector<256x128xf32>
    tpu.vector_store %arg8[%c0_24, %c0_25], %22 {strides = array<i32>} : memref<256x128xf32, #tpu.memory_space<vmem>>, vector<256x128xf32>,
    %c0_26 = arith.constant 0 : index
    %c1_27 = arith.constant 1 : index
    %c0_28 = arith.constant 0 : index
    %24 = vector.load %arg7[%c0_26, %c1_27, %c0_28] : memref<18x18x128xf32, #tpu.memory_space<vmem>>, vector<16x16x128xf32>
    %25 = vector.shape_cast %24 : vector<16x16x128xf32> to vector<256x128xf32>
    %c0_29 = arith.constant 0 : index
    %c0_30 = arith.constant 0 : index
    %26 = vector.load %arg8[%c0_29, %c0_30] : memref<256x128xf32, #tpu.memory_space<vmem>>, vector<256x128xf32>
    %c1_31 = arith.constant 1 : index
    %c0_32 = arith.constant 0 : index
    %c0_33 = arith.constant 0 : index
    %27 = vector.load %arg4[%c1_31, %c0_32, %c0_33] : memref<9x128x128xf32, #tpu.memory_space<vmem>>, vector<1x128x128xf32>
    %28 = vector.shape_cast %27 : vector<1x128x128xf32> to vector<128x128xf32>
    %cst_34 = arith.constant dense<0.000000e+00> : vector<256x128xf32>
    %29 = tpu.matmul %25, %28, %cst_34 {dimension_numbers = #tpu.dot_dimension_numbers<[1], [0], [0], [1], [0, 0, 1, 1], [], []>} : vector<256x128xf32>, vector<128x128xf32>, vector<256x128xf32> -> vector<256x128xf32>
    %30 = arith.addf %26, %29 : vector<256x128xf32>
    %c0_35 = arith.constant 0 : index
    %c0_36 = arith.constant 0 : index
    %31 = vector.load %arg8[%c0_35, %c0_36] : memref<256x128xf32, #tpu.memory_space<vmem>>, vector<256x128xf32>
    tpu.vector_store %arg8[%c0_35, %c0_36], %30 {strides = array<i32>} : memref<256x128xf32, #tpu.memory_space<vmem>>, vector<256x128xf32>,
    %c0_37 = arith.constant 0 : index
    %c2 = arith.constant 2 : index
    %c0_38 = arith.constant 0 : index
    %32 = vector.load %arg7[%c0_37, %c2, %c0_38] : memref<18x18x128xf32, #tpu.memory_space<vmem>>, vector<16x16x128xf32>
    %33 = vector.shape_cast %32 : vector<16x16x128xf32> to vector<256x128xf32>
    %c0_39 = arith.constant 0 : index
    %c0_40 = arith.constant 0 : index
    %34 = vector.load %arg8[%c0_39, %c0_40] : memref<256x128xf32, #tpu.memory_space<vmem>>, vector<256x128xf32>
    %c2_41 = arith.constant 2 : index
    %c0_42 = arith.constant 0 : index
    %c0_43 = arith.constant 0 : index
    %35 = vector.load %arg4[%c2_41, %c0_42, %c0_43] : memref<9x128x128xf32, #tpu.memory_space<vmem>>, vector<1x128x128xf32>
    %36 = vector.shape_cast %35 : vector<1x128x128xf32> to vector<128x128xf32>
    %cst_44 = arith.constant dense<0.000000e+00> : vector<256x128xf32>
    %37 = tpu.matmul %33, %36, %cst_44 {dimension_numbers = #tpu.dot_dimension_numbers<[1], [0], [0], [1], [0, 0, 1, 1], [], []>} : vector<256x128xf32>, vector<128x128xf32>, vector<256x128xf32> -> vector<256x128xf32>
    %38 = arith.addf %34, %37 : vector<256x128xf32>
    %c0_45 = arith.constant 0 : index
    %c0_46 = arith.constant 0 : index
    %39 = vector.load %arg8[%c0_45, %c0_46] : memref<256x128xf32, #tpu.memory_space<vmem>>, vector<256x128xf32>
    tpu.vector_store %arg8[%c0_45, %c0_46], %38 {strides = array<i32>} : memref<256x128xf32, #tpu.memory_space<vmem>>, vector<256x128xf32>,
    %c1_47 = arith.constant 1 : index
    %c0_48 = arith.constant 0 : index
    %c0_49 = arith.constant 0 : index
    %40 = vector.load %arg7[%c1_47, %c0_48, %c0_49] : memref<18x18x128xf32, #tpu.memory_space<vmem>>, vector<16x16x128xf32>
    %41 = vector.shape_cast %40 : vector<16x16x128xf32> to vector<256x128xf32>
    %c0_50 = arith.constant 0 : index
    %c0_51 = arith.constant 0 : index
    %42 = vector.load %arg8[%c0_50, %c0_51] : memref<256x128xf32, #tpu.memory_space<vmem>>, vector<256x128xf32>
    %c3 = arith.constant 3 : index
    %c0_52 = arith.constant 0 : index
    %c0_53 = arith.constant 0 : index
    %43 = vector.load %arg4[%c3, %c0_52, %c0_53] : memref<9x128x128xf32, #tpu.memory_space<vmem>>, vector<1x128x128xf32>
    %44 = vector.shape_cast %43 : vector<1x128x128xf32> to vector<128x128xf32>
    %cst_54 = arith.constant dense<0.000000e+00> : vector<256x128xf32>
    %45 = tpu.matmul %41, %44, %cst_54 {dimension_numbers = #tpu.dot_dimension_numbers<[1], [0], [0], [1], [0, 0, 1, 1], [], []>} : vector<256x128xf32>, vector<128x128xf32>, vector<256x128xf32> -> vector<256x128xf32>
    %46 = arith.addf %42, %45 : vector<256x128xf32>
    %c0_55 = arith.constant 0 : index
    %c0_56 = arith.constant 0 : index
    %47 = vector.load %arg8[%c0_55, %c0_56] : memref<256x128xf32, #tpu.memory_space<vmem>>, vector<256x128xf32>
    tpu.vector_store %arg8[%c0_55, %c0_56], %46 {strides = array<i32>} : memref<256x128xf32, #tpu.memory_space<vmem>>, vector<256x128xf32>,
    %c1_57 = arith.constant 1 : index
    %c1_58 = arith.constant 1 : index
    %c0_59 = arith.constant 0 : index
    %48 = vector.load %arg7[%c1_57, %c1_58, %c0_59] : memref<18x18x128xf32, #tpu.memory_space<vmem>>, vector<16x16x128xf32>
    %49 = vector.shape_cast %48 : vector<16x16x128xf32> to vector<256x128xf32>
    %c0_60 = arith.constant 0 : index
    %c0_61 = arith.constant 0 : index
    %50 = vector.load %arg8[%c0_60, %c0_61] : memref<256x128xf32, #tpu.memory_space<vmem>>, vector<256x128xf32>
    %c4 = arith.constant 4 : index
    %c0_62 = arith.constant 0 : index
    %c0_63 = arith.constant 0 : index
    %51 = vector.load %arg4[%c4, %c0_62, %c0_63] : memref<9x128x128xf32, #tpu.memory_space<vmem>>, vector<1x128x128xf32>
    %52 = vector.shape_cast %51 : vector<1x128x128xf32> to vector<128x128xf32>
    %cst_64 = arith.constant dense<0.000000e+00> : vector<256x128xf32>
    %53 = tpu.matmul %49, %52, %cst_64 {dimension_numbers = #tpu.dot_dimension_numbers<[1], [0], [0], [1], [0, 0, 1, 1], [], []>} : vector<256x128xf32>, vector<128x128xf32>, vector<256x128xf32> -> vector<256x128xf32>
    %54 = arith.addf %50, %53 : vector<256x128xf32>
    %c0_65 = arith.constant 0 : index
    %c0_66 = arith.constant 0 : index
    %55 = vector.load %arg8[%c0_65, %c0_66] : memref<256x128xf32, #tpu.memory_space<vmem>>, vector<256x128xf32>
    tpu.vector_store %arg8[%c0_65, %c0_66], %54 {strides = array<i32>} : memref<256x128xf32, #tpu.memory_space<vmem>>, vector<256x128xf32>,
    %c1_67 = arith.constant 1 : index
    %c2_68 = arith.constant 2 : index
    %c0_69 = arith.constant 0 : index
    %56 = vector.load %arg7[%c1_67, %c2_68, %c0_69] : memref<18x18x128xf32, #tpu.memory_space<vmem>>, vector<16x16x128xf32>
    %57 = vector.shape_cast %56 : vector<16x16x128xf32> to vector<256x128xf32>
    %c0_70 = arith.constant 0 : index
    %c0_71 = arith.constant 0 : index
    %58 = vector.load %arg8[%c0_70, %c0_71] : memref<256x128xf32, #tpu.memory_space<vmem>>, vector<256x128xf32>
    %c5 = arith.constant 5 : index
    %c0_72 = arith.constant 0 : index
    %c0_73 = arith.constant 0 : index
    %59 = vector.load %arg4[%c5, %c0_72, %c0_73] : memref<9x128x128xf32, #tpu.memory_space<vmem>>, vector<1x128x128xf32>
    %60 = vector.shape_cast %59 : vector<1x128x128xf32> to vector<128x128xf32>
    %cst_74 = arith.constant dense<0.000000e+00> : vector<256x128xf32>
    %61 = tpu.matmul %57, %60, %cst_74 {dimension_numbers = #tpu.dot_dimension_numbers<[1], [0], [0], [1], [0, 0, 1, 1], [], []>} : vector<256x128xf32>, vector<128x128xf32>, vector<256x128xf32> -> vector<256x128xf32>
    %62 = arith.addf %58, %61 : vector<256x128xf32>
    %c0_75 = arith.constant 0 : index
    %c0_76 = arith.constant 0 : index
    %63 = vector.load %arg8[%c0_75, %c0_76] : memref<256x128xf32, #tpu.memory_space<vmem>>, vector<256x128xf32>
    tpu.vector_store %arg8[%c0_75, %c0_76], %62 {strides = array<i32>} : memref<256x128xf32, #tpu.memory_space<vmem>>, vector<256x128xf32>,
    %c2_77 = arith.constant 2 : index
    %c0_78 = arith.constant 0 : index
    %c0_79 = arith.constant 0 : index
    %64 = vector.load %arg7[%c2_77, %c0_78, %c0_79] : memref<18x18x128xf32, #tpu.memory_space<vmem>>, vector<16x16x128xf32>
    %65 = vector.shape_cast %64 : vector<16x16x128xf32> to vector<256x128xf32>
    %c0_80 = arith.constant 0 : index
    %c0_81 = arith.constant 0 : index
    %66 = vector.load %arg8[%c0_80, %c0_81] : memref<256x128xf32, #tpu.memory_space<vmem>>, vector<256x128xf32>
    %c6 = arith.constant 6 : index
    %c0_82 = arith.constant 0 : index
    %c0_83 = arith.constant 0 : index
    %67 = vector.load %arg4[%c6, %c0_82, %c0_83] : memref<9x128x128xf32, #tpu.memory_space<vmem>>, vector<1x128x128xf32>
    %68 = vector.shape_cast %67 : vector<1x128x128xf32> to vector<128x128xf32>
    %cst_84 = arith.constant dense<0.000000e+00> : vector<256x128xf32>
    %69 = tpu.matmul %65, %68, %cst_84 {dimension_numbers = #tpu.dot_dimension_numbers<[1], [0], [0], [1], [0, 0, 1, 1], [], []>} : vector<256x128xf32>, vector<128x128xf32>, vector<256x128xf32> -> vector<256x128xf32>
    %70 = arith.addf %66, %69 : vector<256x128xf32>
    %c0_85 = arith.constant 0 : index
    %c0_86 = arith.constant 0 : index
    %71 = vector.load %arg8[%c0_85, %c0_86] : memref<256x128xf32, #tpu.memory_space<vmem>>, vector<256x128xf32>
    tpu.vector_store %arg8[%c0_85, %c0_86], %70 {strides = array<i32>} : memref<256x128xf32, #tpu.memory_space<vmem>>, vector<256x128xf32>,
    %c2_87 = arith.constant 2 : index
    %c1_88 = arith.constant 1 : index
    %c0_89 = arith.constant 0 : index
    %72 = vector.load %arg7[%c2_87, %c1_88, %c0_89] : memref<18x18x128xf32, #tpu.memory_space<vmem>>, vector<16x16x128xf32>
    %73 = vector.shape_cast %72 : vector<16x16x128xf32> to vector<256x128xf32>
    %c0_90 = arith.constant 0 : index
    %c0_91 = arith.constant 0 : index
    %74 = vector.load %arg8[%c0_90, %c0_91] : memref<256x128xf32, #tpu.memory_space<vmem>>, vector<256x128xf32>
    %c7 = arith.constant 7 : index
    %c0_92 = arith.constant 0 : index
    %c0_93 = arith.constant 0 : index
    %75 = vector.load %arg4[%c7, %c0_92, %c0_93] : memref<9x128x128xf32, #tpu.memory_space<vmem>>, vector<1x128x128xf32>
    %76 = vector.shape_cast %75 : vector<1x128x128xf32> to vector<128x128xf32>
    %cst_94 = arith.constant dense<0.000000e+00> : vector<256x128xf32>
    %77 = tpu.matmul %73, %76, %cst_94 {dimension_numbers = #tpu.dot_dimension_numbers<[1], [0], [0], [1], [0, 0, 1, 1], [], []>} : vector<256x128xf32>, vector<128x128xf32>, vector<256x128xf32> -> vector<256x128xf32>
    %78 = arith.addf %74, %77 : vector<256x128xf32>
    %c0_95 = arith.constant 0 : index
    %c0_96 = arith.constant 0 : index
    %79 = vector.load %arg8[%c0_95, %c0_96] : memref<256x128xf32, #tpu.memory_space<vmem>>, vector<256x128xf32>
    tpu.vector_store %arg8[%c0_95, %c0_96], %78 {strides = array<i32>} : memref<256x128xf32, #tpu.memory_space<vmem>>, vector<256x128xf32>,
    %c2_97 = arith.constant 2 : index
    %c2_98 = arith.constant 2 : index
    %c0_99 = arith.constant 0 : index
    %80 = vector.load %arg7[%c2_97, %c2_98, %c0_99] : memref<18x18x128xf32, #tpu.memory_space<vmem>>, vector<16x16x128xf32>
    %81 = vector.shape_cast %80 : vector<16x16x128xf32> to vector<256x128xf32>
    %c0_100 = arith.constant 0 : index
    %c0_101 = arith.constant 0 : index
    %82 = vector.load %arg8[%c0_100, %c0_101] : memref<256x128xf32, #tpu.memory_space<vmem>>, vector<256x128xf32>
    %c8 = arith.constant 8 : index
    %c0_102 = arith.constant 0 : index
    %c0_103 = arith.constant 0 : index
    %83 = vector.load %arg4[%c8, %c0_102, %c0_103] : memref<9x128x128xf32, #tpu.memory_space<vmem>>, vector<1x128x128xf32>
    %84 = vector.shape_cast %83 : vector<1x128x128xf32> to vector<128x128xf32>
    %cst_104 = arith.constant dense<0.000000e+00> : vector<256x128xf32>
    %85 = tpu.matmul %81, %84, %cst_104 {dimension_numbers = #tpu.dot_dimension_numbers<[1], [0], [0], [1], [0, 0, 1, 1], [], []>} : vector<256x128xf32>, vector<128x128xf32>, vector<256x128xf32> -> vector<256x128xf32>
    %86 = arith.addf %82, %85 : vector<256x128xf32>
    %c0_105 = arith.constant 0 : index
    %c0_106 = arith.constant 0 : index
    %87 = vector.load %arg8[%c0_105, %c0_106] : memref<256x128xf32, #tpu.memory_space<vmem>>, vector<256x128xf32>
    tpu.vector_store %arg8[%c0_105, %c0_106], %86 {strides = array<i32>} : memref<256x128xf32, #tpu.memory_space<vmem>>, vector<256x128xf32>,
    %c0_107 = arith.constant 0 : index
    %c0_108 = arith.constant 0 : index
    %88 = vector.load %arg8[%c0_107, %c0_108] : memref<256x128xf32, #tpu.memory_space<vmem>>, vector<256x128xf32>
    %89 = vector.shape_cast %88 : vector<256x128xf32> to vector<1x256x128xf32>
    %c0_109 = arith.constant 0 : index
    %c0_110 = arith.constant 0 : index
    %c0_111 = arith.constant 0 : index
    %90 = vector.load %arg5[%c0_109, %c0_110, %c0_111] : memref<1x256x128xf32, #tpu.memory_space<vmem>>, vector<1x256x128xf32>
    tpu.vector_store %arg5[%c0_109, %c0_110, %c0_111], %89 {strides = array<i32>} : memref<1x256x128xf32, #tpu.memory_space<vmem>>, vector<1x256x128xf32>,
    %cst_112 = arith.constant dense<0.000000e+00> : vector<128xf32>
    %91 = vector.multi_reduction <add>, %88, %cst_112 [0] : vector<256x128xf32> to vector<128xf32>
    %92 = vector.shape_cast %91 : vector<128xf32> to vector<1x128xf32>
    %93 = arith.mulf %88, %88 : vector<256x128xf32>
    %cst_113 = arith.constant dense<0.000000e+00> : vector<128xf32>
    %94 = vector.multi_reduction <add>, %93, %cst_113 [0] : vector<256x128xf32> to vector<128xf32>
    %95 = vector.shape_cast %94 : vector<128xf32> to vector<1x128xf32>
    %96 = tpu.concatenate %92, %95 in 0 : vector<1x128xf32>, vector<1x128xf32> -> vector<2x128xf32>
    %97 = vector.shape_cast %96 : vector<2x128xf32> to vector<1x2x128xf32>
    %c0_114 = arith.constant 0 : index
    %c0_115 = arith.constant 0 : index
    %c0_116 = arith.constant 0 : index
    %98 = vector.load %arg6[%c0_114, %c0_115, %c0_116] : memref<1x2x128xf32, #tpu.memory_space<vmem>>, vector<1x2x128xf32>
    tpu.vector_store %arg6[%c0_114, %c0_115, %c0_116], %97 {strides = array<i32>} : memref<1x2x128xf32, #tpu.memory_space<vmem>>, vector<1x2x128xf32>,
    return
  }
  func.func @transform_0(%arg0: i32) -> (i32, i32, i32) {
    %c0_i32 = arith.constant 0 : i32
    %c0_i32_0 = arith.constant 0 : i32
    %c0_i32_1 = arith.constant 0 : i32
    return %arg0, %c0_i32, %c0_i32_0 : i32, i32, i32
  }
  func.func @transform_1(%arg0: i32) -> (i32, i32) {
    %c0_i32 = arith.constant 0 : i32
    %c0_i32_0 = arith.constant 0 : i32
    %c0_i32_1 = arith.constant 0 : i32
    return %c0_i32, %c0_i32_0 : i32, i32
  }
  func.func @transform_2(%arg0: i32) -> (i32, i32) {
    %c0_i32 = arith.constant 0 : i32
    %c0_i32_0 = arith.constant 0 : i32
    %c0_i32_1 = arith.constant 0 : i32
    return %c0_i32, %c0_i32_0 : i32, i32
  }
  func.func @transform_3(%arg0: i32) -> (i32, i32, i32) {
    %c0_i32 = arith.constant 0 : i32
    %c0_i32_0 = arith.constant 0 : i32
    %c0_i32_1 = arith.constant 0 : i32
    %c0_i32_2 = arith.constant 0 : i32
    return %c0_i32, %c0_i32_0, %c0_i32_1 : i32, i32, i32
  }
  func.func @transform_4(%arg0: i32) -> (i32, i32, i32) {
    %c0_i32 = arith.constant 0 : i32
    %c0_i32_0 = arith.constant 0 : i32
    %c0_i32_1 = arith.constant 0 : i32
    return %arg0, %c0_i32, %c0_i32_0 : i32, i32, i32
  }
  func.func @transform_5(%arg0: i32) -> (i32, i32, i32) {
    %c0_i32 = arith.constant 0 : i32
    %c0_i32_0 = arith.constant 0 : i32
    %c0_i32_1 = arith.constant 0 : i32
    return %arg0, %c0_i32, %c0_i32_0 : i32, i32, i32
  }
}

</mosaic_0001>

<bundles_post_ra>
// kernel: conv_block_forward.5
= control target key start
LH: loop header
LB: loop body
LE: loop exit
PB: predicated region body
PF: predicated region fallthrough
CT: control target
= control target key end

     0   :  { %s451_s12 = smov 0   ;;  %s610_s0 = inlined_call_operand.vmem [shape: f32[2,256,128], index: 0, kind: input, shape index: {}]   ;;  %s611_s1 = inlined_call_operand.vmem [shape: f32[1,128], index: 1, kind: input, shape index: {}]   ;;  %s612_s2 = inlined_call_operand.vmem [shape: f32[1,128], index: 2, kind: input, shape index: {}]   ;;  %s613_s3 = inlined_call_operand.vmem [shape: f32[2,256,128], index: 3, kind: output, shape index: {}]  }
   0x1 LB: > { %s400_s13 = sadd.s32 4294967295, %s429_s12   ;;  %p404_p0 = scmp.ge.s32.totalorder %s429_s12, 1  ;;  %s429_s12 = sphi %s451_s12, %s13_s12  }
   0x2   : > { %p137_p1 = scmp.lt.s32.totalorder %s429_s12, 3 }
   0x4   : > { %p138_p2 = pnand %p404_p0, %p137_p1 }
   0x5   : > { %p161_p3 = scmp.lt.s32.totalorder (!%p138_p2), %s400_s13, 1 }
   0x6   : > { %141 = sbr.rel (%p138_p2) target bundleno = 44 (0x2c), region = 32 }
   0xb   : > { %s615_s13 = smov (!%p161_p3, %s400_s13), 1  ;;  %v462_v0 = vld [vmem:[%s611_s1] ss:$0 sm:$0xff] }
   0xc   : > { %s413_s14 = sshll.u32 %s615_s13, 8  ;;  %v472_v1 = vld [vmem:[%s612_s2] ss:$0 sm:$0xff] }
   0xd   : > { %s467_s19 = scalar_lea.vmem %s610_s0, %s413_s14  ;;  %s495_s24 = scalar_lea.vmem %s613_s3, %s413_s14 }
   0xe   : > { %v171_v2 = vld [vmem:[%s467_s19] sm:$0xff]  ;;  %v172_v3 = vld [vmem:[%s467_s19 + $0x8] sm:$0xff]  ;;  %v173_v4 = vld [vmem:[%s467_s19 + $0x10] sm:$0xff] }
   0xf   : > { %v210_v5 = vmul.f32 %v462_v0, %v171_v2  ;;  %v211_v6 = vmul.f32 %v462_v0, %v172_v3  ;;  %v212_v7 = vmul.f32 %v462_v0, %v173_v4  ;;  %v174_v8 = vld [vmem:[%s467_s19 + $0x18] sm:$0xff]  ;;  %v175_v9 = vld [vmem:[%s467_s19 + $0x20] sm:$0xff]  ;;  %v176_v10 = vld [vmem:[%s467_s19 + $0x28] sm:$0xff] }
  0x10   : > { %v213_v11 = vmul.f32 %v462_v0, %v174_v8  ;;  %v214_v12 = vmul.f32 %v462_v0, %v175_v9  ;;  %v215_v13 = vmul.f32 %v462_v0, %v176_v10  ;;  %v177_v14 = vld [vmem:[%s467_s19 + $0x30] sm:$0xff]  ;;  %v178_v15 = vld [vmem:[%s467_s19 + $0x38] sm:$0xff]  ;;  %v179_v24 = vld [vmem:[%s467_s19 + $0x40] sm:$0xff] }
  0x11   : > { %v249_v16 = vadd.f32 %v472_v1, %v210_v5  ;;  %v250_v17 = vadd.f32 %v472_v1, %v211_v6  ;;  %v251_v18 = vadd.f32 %v472_v1, %v212_v7  ;;  %v216_v19 = vmul.f32 %v462_v0, %v177_v14  ;;  %v180_v25 = vld [vmem:[%s467_s19 + $0x48] sm:$0xff]  ;;  %v181_v26 = vld [vmem:[%s467_s19 + $0x50] sm:$0xff]  ;;  %v182_v31 = vld [vmem:[%s467_s19 + $0x58] sm:$0xff] }
  0x12   : > { %v252_v20 = vadd.f32 %v472_v1, %v213_v11  ;;  %v253_v21 = vadd.f32 %v472_v1, %v214_v12  ;;  %v254_v22 = vadd.f32 %v472_v1, %v215_v13  ;;  %v217_v23 = vmul.f32 %v462_v0, %v178_v15  ;;  %v183_v32 = vld [vmem:[%s467_s19 + $0x60] sm:$0xff]  ;;  %v184_v33 = vld [vmem:[%s467_s19 + $0x68] sm:$0xff]  ;;  %v185_v38 = vld [vmem:[%s467_s19 + $0x70] sm:$0xff] }
  0x13   : > { %v281_v27 = vmax.f32 %v249_v16, 0.0  ;;  %v282_v28 = vmax.f32 %v250_v17, 0.0  ;;  %v283_v29 = vmax.f32 %v251_v18, 0.0  ;;  %v255_v30 = vadd.f32 %v472_v1, %v216_v19  ;;  %v186_v43 = vld [vmem:[%s467_s19 + $0x78] sm:$0xff]  ;;  %v187_v56 = vld [vmem:[%s467_s19 + $0x80] sm:$0xff]  ;;  %v188_v57 = vld [vmem:[%s467_s19 + $0x88] sm:$0xff] }
  0x14   : > { %v284_v34 = vmax.f32 %v252_v20, 0.0  ;;  %v285_v35 = vmax.f32 %v253_v21, 0.0  ;;  %v286_v36 = vmax.f32 %v254_v22, 0.0  ;;  %v256_v37 = vadd.f32 %v472_v1, %v217_v23  ;;  %v189_v58 = vld [vmem:[%s467_s19 + $0x90] sm:$0xff]  ;;  %v190_v63 = vld [vmem:[%s467_s19 + $0x98] sm:$0xff]  ;;  %v191_v2 = vld [vmem:[%s467_s19 + $0xa0] sm:$0xff] }
  0x15   : > { %313 = vst [vmem:[%s495_s24] sm:$0xff] %v281_v27  ;;  %314 = vst [vmem:[%s495_s24 + $0x8] sm:$0xff] %v282_v28  ;;  %v287_v39 = vmax.f32 %v255_v30, 0.0  ;;  %v218_v40 = vmul.f32 %v462_v0, %v179_v24  ;;  %v219_v41 = vmul.f32 %v462_v0, %v180_v25  ;;  %v220_v42 = vmul.f32 %v462_v0, %v181_v26  ;;  %v192_v3 = vld [vmem:[%s467_s19 + $0xa8] sm:$0xff]  ;;  %v193_v8 = vld [vmem:[%s467_s19 + $0xb0] sm:$0xff] }
  0x16   : > { %315 = vst [vmem:[%s495_s24 + $0x10] sm:$0xff] %v283_v29  ;;  %316 = vst [vmem:[%s495_s24 + $0x18] sm:$0xff] %v284_v34  ;;  %v288_v44 = vmax.f32 %v256_v37, 0.0  ;;  %v221_v45 = vmul.f32 %v462_v0, %v182_v31  ;;  %v222_v46 = vmul.f32 %v462_v0, %v183_v32  ;;  %v223_v47 = vmul.f32 %v462_v0, %v184_v33  ;;  %v194_v13 = vld [vmem:[%s467_s19 + $0xb8] sm:$0xff]  ;;  %v195_v26 = vld [vmem:[%s467_s19 + $0xc0] sm:$0xff] }
  0x17   : > { %317 = vst [vmem:[%s495_s24 + $0x20] sm:$0xff] %v285_v35  ;;  %318 = vst [vmem:[%s495_s24 + $0x28] sm:$0xff] %v286_v36  ;;  %v257_v48 = vadd.f32 %v472_v1, %v218_v40  ;;  %v258_v49 = vadd.f32 %v472_v1, %v219_v41  ;;  %v259_v50 = vadd.f32 %v472_v1, %v220_v42  ;;  %v196_v27 = vld [vmem:[%s467_s19 + $0xc8] sm:$0xff]  ;;  %v197_v28 = vld [vmem:[%s467_s19 + $0xd0] sm:$0xff] }
  0x18   : > { %319 = vst [vmem:[%s495_s24 + $0x30] sm:$0xff] %v287_v39  ;;  %v224_v51 = vmul.f32 %v462_v0, %v185_v38  ;;  %320 = vst [vmem:[%s495_s24 + $0x38] sm:$0xff] %v288_v44  ;;  %v260_v52 = vadd.f32 %v472_v1, %v221_v45  ;;  %v261_v53 = vadd.f32 %v472_v1, %v222_v46  ;;  %v198_v33 = vld [vmem:[%s467_s19 + $0xd8] sm:$0xff]  ;;  %v199_v34 = vld [vmem:[%s467_s19 + $0xe0] sm:$0xff] }
  0x19   : > { %v262_v54 = vadd.f32 %v472_v1, %v223_v47  ;;  %v225_v55 = vmul.f32 %v462_v0, %v186_v43  ;;  %v289_v59 = vmax.f32 %v257_v48, 0.0  ;;  %v290_v60 = vmax.f32 %v258_v49, 0.0  ;;  %v200_v35 = vld [vmem:[%s467_s19 + $0xe8] sm:$0xff]  ;;  %v201_v40 = vld [vmem:[%s467_s19 + $0xf0] sm:$0xff]  ;;  %v202_v45 = vld [vmem:[%s467_s19 + $0xf8] sm:$0xff] }
  0x1a   : > { %v291_v61 = vmax.f32 %v259_v50, 0.0  ;;  %v263_v62 = vadd.f32 %v472_v1, %v224_v51  ;;  %v292_v4 = vmax.f32 %v260_v52, 0.0  ;;  %v293_v5 = vmax.f32 %v261_v53, 0.0 }
  0x1b   : > { %v294_v6 = vmax.f32 %v262_v54, 0.0  ;;  %v264_v7 = vadd.f32 %v472_v1, %v225_v55  ;;  %321 = vst [vmem:[%s495_s24 + $0x40] sm:$0xff] %v289_v59  ;;  %322 = vst [vmem:[%s495_s24 + $0x48] sm:$0xff] %v290_v60  ;;  %v226_v10 = vmul.f32 %v462_v0, %v187_v56  ;;  %v227_v11 = vmul.f32 %v462_v0, %v188_v57 }
  0x1c   : > { %323 = vst [vmem:[%s495_s24 + $0x50] sm:$0xff] %v291_v61  ;;  %v295_v9 = vmax.f32 %v263_v62, 0.0  ;;  %v228_v12 = vmul.f32 %v462_v0, %v189_v58  ;;  %324 = vst [vmem:[%s495_s24 + $0x58] sm:$0xff] %v292_v4  ;;  %v229_v15 = vmul.f32 %v462_v0, %v190_v63  ;;  %v230_v16 = vmul.f32 %v462_v0, %v191_v2 }
  0x1d   : > { %325 = vst [vmem:[%s495_s24 + $0x60] sm:$0xff] %v293_v5  ;;  %326 = vst [vmem:[%s495_s24 + $0x68] sm:$0xff] %v294_v6  ;;  %v296_v14 = vmax.f32 %v264_v7, 0.0  ;;  %v231_v17 = vmul.f32 %v462_v0, %v192_v3  ;;  %v265_v18 = vadd.f32 %v472_v1, %v226_v10  ;;  %v266_v19 = vadd.f32 %v472_v1, %v227_v11 }
  0x1e   : > { %327 = vst [vmem:[%s495_s24 + $0x70] sm:$0xff] %v295_v9  ;;  %v267_v20 = vadd.f32 %v472_v1, %v228_v12  ;;  %v232_v21 = vmul.f32 %v462_v0, %v193_v8  ;;  %v268_v22 = vadd.f32 %v472_v1, %v229_v15  ;;  %v269_v23 = vadd.f32 %v472_v1, %v230_v16 }
  0x1f   : > { %328 = vst [vmem:[%s495_s24 + $0x78] sm:$0xff] %v296_v14  ;;  %v270_v24 = vadd.f32 %v472_v1, %v231_v17  ;;  %v233_v25 = vmul.f32 %v462_v0, %v194_v13  ;;  %v297_v29 = vmax.f32 %v265_v18, 0.0  ;;  %v298_v30 = vmax.f32 %v266_v19, 0.0 }
  0x20   : > { %v299_v31 = vmax.f32 %v267_v20, 0.0  ;;  %v271_v32 = vadd.f32 %v472_v1, %v232_v21  ;;  %v300_v36 = vmax.f32 %v268_v22, 0.0  ;;  %v301_v37 = vmax.f32 %v269_v23, 0.0 }
  0x21   : > { %v302_v38 = vmax.f32 %v270_v24, 0.0  ;;  %v272_v39 = vadd.f32 %v472_v1, %v233_v25  ;;  %329 = vst [vmem:[%s495_s24 + $0x80] sm:$0xff] %v297_v29  ;;  %330 = vst [vmem:[%s495_s24 + $0x88] sm:$0xff] %v298_v30  ;;  %v234_v42 = vmul.f32 %v462_v0, %v195_v26  ;;  %v235_v43 = vmul.f32 %v462_v0, %v196_v27 }
  0x22   : > { %331 = vst [vmem:[%s495_s24 + $0x90] sm:$0xff] %v299_v31  ;;  %v303_v41 = vmax.f32 %v271_v32, 0.0  ;;  %v236_v44 = vmul.f32 %v462_v0, %v197_v28  ;;  %332 = vst [vmem:[%s495_s24 + $0x98] sm:$0xff] %v300_v36  ;;  %v237_v47 = vmul.f32 %v462_v0, %v198_v33  ;;  %v238_v48 = vmul.f32 %v462_v0, %v199_v34 }
  0x23   : > { %333 = vst [vmem:[%s495_s24 + $0xa0] sm:$0xff] %v301_v37  ;;  %334 = vst [vmem:[%s495_s24 + $0xa8] sm:$0xff] %v302_v38  ;;  %v304_v46 = vmax.f32 %v272_v39, 0.0  ;;  %v239_v49 = vmul.f32 %v462_v0, %v200_v35  ;;  %v273_v50 = vadd.f32 %v472_v1, %v234_v42  ;;  %v274_v51 = vadd.f32 %v472_v1, %v235_v43 }
  0x24   : > { %335 = vst [vmem:[%s495_s24 + $0xb0] sm:$0xff] %v303_v41  ;;  %v275_v52 = vadd.f32 %v472_v1, %v236_v44  ;;  %v240_v53 = vmul.f32 %v462_v0, %v201_v40  ;;  %v276_v54 = vadd.f32 %v472_v1, %v237_v47  ;;  %v277_v55 = vadd.f32 %v472_v1, %v238_v48 }
  0x25   : > { %336 = vst [vmem:[%s495_s24 + $0xb8] sm:$0xff] %v304_v46  ;;  %v278_v56 = vadd.f32 %v472_v1, %v239_v49  ;;  %v241_v57 = vmul.f32 %v462_v0, %v202_v45  ;;  %v305_v58 = vmax.f32 %v273_v50, 0.0  ;;  %v306_v59 = vmax.f32 %v274_v51, 0.0 }
  0x26   : > { %v307_v60 = vmax.f32 %v275_v52, 0.0  ;;  %v279_v61 = vadd.f32 %v472_v1, %v240_v53  ;;  %v308_v62 = vmax.f32 %v276_v54, 0.0  ;;  %v309_v63 = vmax.f32 %v277_v55, 0.0 }
  0x27   : > { %v310_v2 = vmax.f32 %v278_v56, 0.0  ;;  %v280_v3 = vadd.f32 %v472_v1, %v241_v57  ;;  %337 = vst [vmem:[%s495_s24 + $0xc0] sm:$0xff] %v305_v58  ;;  %338 = vst [vmem:[%s495_s24 + $0xc8] sm:$0xff] %v306_v59 }
  0x28   : > { %339 = vst [vmem:[%s495_s24 + $0xd0] sm:$0xff] %v307_v60  ;;  %v311_v4 = vmax.f32 %v279_v61, 0.0  ;;  %340 = vst [vmem:[%s495_s24 + $0xd8] sm:$0xff] %v308_v62 }
  0x29   : > { %341 = vst [vmem:[%s495_s24 + $0xe0] sm:$0xff] %v309_v63  ;;  %342 = vst [vmem:[%s495_s24 + $0xe8] sm:$0xff] %v310_v2  ;;  %v312_v0 = vmax.f32 %v280_v3, 0.0 }
  0x2a   : > { %343 = vst [vmem:[%s495_s24 + $0xf0] sm:$0xff] %v311_v4 }
  0x2b   : > { %344 = vst [vmem:[%s495_s24 + $0xf8] sm:$0xff] %v312_v0 }
  0x2c PF: > { %s13_s12 = sadd.s32 1, %s429_s12  }
  0x2d   : > { %p10_p4 = scmp.ge.s32.totalorder %s13_s12, 4  }
  0x2f   :  { %12 = sbr.rel (!%p10_p4) target bundleno = 1 (0x1), region = 62 }

// kernel: conv_block_forward.3
= control target key start
LH: loop header
LB: loop body
LE: loop exit
PB: predicated region body
PF: predicated region fallthrough
CT: control target
= control target key end

     0   :  { %s5299_s12 = smov 0   ;;  %s6792_s0 = inlined_call_operand.vmem [shape: f32[2,256,128], index: 0, kind: input, shape index: {}]   ;;  %s6793_s1 = inlined_call_operand.vmem [shape: f32[9,128,128], index: 1, kind: input, shape index: {}]   ;;  %s6794_s2 = inlined_call_operand.vmem [shape: f32[2,256,128], index: 2, kind: output, shape index: {0}]   ;;  %s6795_s3 = inlined_call_operand.vmem [shape: f32[2,2,128], index: 3, kind: output, shape index: {1}]  }
   0x1 LB: > { %s3922_s13 = sadd.s32 4294967295, %s5276_s12   ;;  %p3926_p0 = scmp.ge.s32.totalorder %s5276_s12, 1  ;;  %s5276_s12 = sphi %s5299_s12, %s14_s12  }
   0x2   : > { %p140_p1 = scmp.lt.s32.totalorder %s5276_s12, 3 }
   0x4   : > { %p141_p2 = pnand %p3926_p0, %p140_p1 }
   0x6   : > { %144 = sbr.rel (%p141_p2) target bundleno = 565 (0x235), region = 28 }
   0xb   : > { %v412_v0 = vld [vmem:[%s6793_s1 + $0x78] sm:$0xff]  ;;  %v5313_v1 = vld [vmem:[%s6793_s1 + $0x70] sm:$0xff]  ;;  %p5317_p3 = scmp.lt.s32.totalorder %s3922_s13, 1  ;;  %v5278_v2 = vmov 0.0   ;;  %v410_v3 = vld [vmem:[%s6793_s1 + $0x68] sm:$0xff]  ;;  %vm3833_vm0 = vcmask 1040384  }
   0xc   : > { %5216 = vmatprep.subr.mxu1 %v412_v0  ;;  %4496 = vmatprep.subr.mxu0 %v412_v0  ;;  %238 = vst [vmem:[#allocation2 + $0xc0] sm:$0xff] %v5278_v2  ;;  %239 = vst [vmem:[#allocation2 + $0xc8] sm:$0xff] %v5278_v2  ;;  %v409_v4 = vld [vmem:[%s6793_s1 + $0x60] sm:$0xff]  ;;  %v408_v5 = vld [vmem:[%s6793_s1 + $0x58] sm:$0xff] }
   0xd   : > { %214 = vst [vmem:[#allocation2] sm:$0xff] %v5278_v2  ;;  %215 = vst [vmem:[#allocation2 + $0x8] sm:$0xff] %v5278_v2  ;;  %5232 = vmatpush3.msra.mxu1 %v412_v0  ;;  %4497 = vmatpush3.msra.mxu0 %v412_v0  ;;  %s6917_s13 = smov (!%p5317_p3, %s3922_s13), 1  ;;  %v407_v10 = vld [vmem:[%s6793_s1 + $0x50] sm:$0xff]  ;;  %v406_v14 = vld [vmem:[%s6793_s1 + $0x48] sm:$0xff] }
   0xe   : > { %216 = vst [vmem:[#allocation2 + $0x10] sm:$0x3] %v5278_v2  ;;  %217 = vst [vmem:[#allocation2 + $0x18] sm:$0xff] %v5278_v2  ;;  %5217 = vmatprep.subr.mxu1 %v5313_v1  ;;  %4498 = vmatprep.subr.mxu0 %v5313_v1  ;;  %s4062_s23 = sshll.u32 %s6917_s13, 8  ;;  %v405_v18 = vld [vmem:[%s6793_s1 + $0x40] sm:$0xff]  ;;  %v404_v22 = vld [vmem:[%s6793_s1 + $0x38] sm:$0xff] }
   0xf   : > { %218 = vst [vmem:[#allocation2 + $0x20] sm:$0xff] %v5278_v2  ;;  %219 = vst [vmem:[#allocation2 + $0x28] sm:$0x3] %v5278_v2  ;;  %5233 = vmatpush3.msra.mxu1 %v5313_v1  ;;  %4499 = vmatpush3.msra.mxu0 %v5313_v1  ;;  %s5397_s26 = scalar_lea.vmem %s6792_s0, %s4062_s23  ;;  %v403_v24 = vld [vmem:[%s6793_s1 + $0x30] sm:$0xff]  ;;  %v402_v26 = vld [vmem:[%s6793_s1 + $0x28] sm:$0xff]  ;;  %s6667_s22 = scalar_lea.vmem %s6794_s2, %s4062_s23 }
  0x10   : > { %220 = vst [vmem:[#allocation2 + $0x30] sm:$0xff] %v5278_v2  ;;  %221 = vst [vmem:[#allocation2 + $0x38] sm:$0xff] %v5278_v2  ;;  %5218 = vmatprep.subr.mxu1 %v410_v3  ;;  %4500 = vmatprep.subr.mxu0 %v410_v3  ;;  %v5403_v6 = vld [vmem:[%s5397_s26 + $0x70] sm:$0xff]  ;;  %v5406_v7 = vld [vmem:[%s5397_s26 + $0x78] sm:$0xff]  ;;  %s3931_s23 = sshll.u32 %s6917_s13, 1 }
  0x11   : > { %222 = vst [vmem:[#allocation2 + $0x40] sm:$0x3] %v5278_v2  ;;  %223 = vst [vmem:[#allocation2 + $0x48] sm:$0xff] %v5278_v2  ;;  %5234 = vmatpush3.msra.mxu1 %v410_v3  ;;  %4501 = vmatpush3.msra.mxu0 %v410_v3  ;;  %v5411_v8 = vld [vmem:[%s5397_s26 + $0x80] sm:$0xff]  ;;  %v5422_v11 = vld [vmem:[%s5397_s26 + $0x88] sm:$0xff]  ;;  %s181_s27 = scalar_lea.vmem %s6795_s3, %s3931_s23 }
  0x12   : > { %224 = vst [vmem:[#allocation2 + $0x50] sm:$0xff] %v5278_v2  ;;  %225 = vst [vmem:[#allocation2 + $0x58] sm:$0x3] %v5278_v2  ;;  %5219 = vmatprep.subr.mxu1 %v409_v4  ;;  %4502 = vmatprep.subr.mxu0 %v409_v4  ;;  %v5414_v9 = vld [vmem:[%s5397_s26] sm:$0xff]  ;;  %v5425_v12 = vld [vmem:[%s5397_s26 + $0x8] sm:$0xff] }
  0x13   : > { %226 = vst [vmem:[#allocation2 + $0x60] sm:$0xff] %v5278_v2  ;;  %227 = vst [vmem:[#allocation2 + $0x68] sm:$0xff] %v5278_v2  ;;  %5235 = vmatpush3.msra.mxu1 %v409_v4  ;;  %4503 = vmatpush3.msra.mxu0 %v409_v4  ;;  %v5430_v13 = vld [vmem:[%s5397_s26 + $0x90] sm:$0xff]  ;;  %v5440_v16 = vld [vmem:[%s5397_s26 + $0x98] sm:$0xff] }
  0x14   : > { %228 = vst [vmem:[#allocation2 + $0x70] sm:$0x3] %v5278_v2  ;;  %229 = vst [vmem:[#allocation2 + $0x78] sm:$0xff] %v5278_v2  ;;  %5220 = vmatprep.subr.mxu1 %v408_v5  ;;  %4504 = vmatprep.subr.mxu0 %v408_v5  ;;  %v5437_v15 = vld [vmem:[%s5397_s26 + $0x10] sm:$0xff]  ;;  %v5445_v17 = vld [vmem:[%s5397_s26 + $0x18] sm:$0xff] }
  0x15   : > { %230 = vst [vmem:[#allocation2 + $0x80] sm:$0xff] %v5278_v2  ;;  %231 = vst [vmem:[#allocation2 + $0x88] sm:$0x3] %v5278_v2  ;;  %5236 = vmatpush3.msra.mxu1 %v408_v5  ;;  %4505 = vmatpush3.msra.mxu0 %v408_v5  ;;  %v5452_v19 = vld [vmem:[%s5397_s26 + $0xa0] sm:$0xff]  ;;  %v5459_v21 = vld [vmem:[%s5397_s26 + $0xa8] sm:$0xff] }
  0x16   : > { %232 = vst [vmem:[#allocation2 + $0x90] sm:$0xff] %v5278_v2  ;;  %233 = vst [vmem:[#allocation2 + $0x98] sm:$0xff] %v5278_v2  ;;  %5221 = vmatprep.subr.mxu1 %v407_v10  ;;  %4506 = vmatprep.subr.mxu0 %v407_v10  ;;  %v5456_v20 = vld [vmem:[%s5397_s26 + $0x20] sm:$0xff]  ;;  %v5467_v23 = vld [vmem:[%s5397_s26 + $0x28] sm:$0xff] }
  0x17   : > { %234 = vst [vmem:[#allocation2 + $0xa0] sm:$0x3] %v5278_v2  ;;  %235 = vst [vmem:[#allocation2 + $0xa8] sm:$0xff] %v5278_v2  ;;  %5237 = vmatpush3.msra.mxu1 %v407_v10  ;;  %4507 = vmatpush3.msra.mxu0 %v407_v10  ;;  %v5474_v25 = vld [vmem:[%s5397_s26 + $0xb0] sm:$0xff]  ;;  %v5485_v28 = vld [vmem:[%s5397_s26 + $0xb8] sm:$0xff] }
  0x18   : > { %236 = vst [vmem:[#allocation2 + $0xb0] sm:$0xff] %v5278_v2  ;;  %237 = vst [vmem:[#allocation2 + $0xb8] sm:$0x3] %v5278_v2  ;;  %5222 = vmatprep.subr.mxu1 %v406_v14  ;;  %4508 = vmatprep.subr.mxu0 %v406_v14  ;;  %v5481_v27 = vld [vmem:[%s5397_s26 + $0x30] sm:$0xff]  ;;  %v401_v29 = vld [vmem:[%s6793_s1 + $0x20] sm:$0xff] }
  0x19   : > { %240 = vst [vmem:[#allocation2 + $0xd0] sm:$0x3] %v5278_v2  ;;  %241 = vst [vmem:[#allocation2 + $0xd8] sm:$0xff] %v5278_v2  ;;  %5238 = vmatpush3.msra.mxu1 %v406_v14  ;;  %4509 = vmatpush3.msra.mxu0 %v406_v14  ;;  %v5492_v30 = vld [vmem:[%s5397_s26 + $0x38] sm:$0xff]  ;;  %v5499_v32 = vld [vmem:[%s5397_s26 + $0xc0] sm:$0xff] }
  0x1a   : > { %242 = vst [vmem:[#allocation2 + $0xe0] sm:$0xff] %v5278_v2  ;;  %243 = vst [vmem:[#allocation2 + $0xe8] sm:$0x3] %v5278_v2  ;;  %5223 = vmatprep.subr.mxu1 %v405_v18  ;;  %4510 = vmatprep.subr.mxu0 %v405_v18  ;;  %v400_v31 = vld [vmem:[%s6793_s1 + $0x18] sm:$0xff]  ;;  %v5503_v33 = vld [vmem:[%s5397_s26 + $0x40] sm:$0xff] }
  0x1b   : > { %244 = vst [vmem:[#allocation2 + $0xf0] sm:$0xff] %v5278_v2  ;;  %245 = vst [vmem:[#allocation2 + $0xf8] sm:$0xff] %v5278_v2  ;;  %5239 = vmatpush3.msra.mxu1 %v405_v18  ;;  %4511 = vmatpush3.msra.mxu0 %v405_v18  ;;  %v5506_v34 = vld [vmem:[%s5397_s26 + $0xc8] sm:$0xff]  ;;  %v399_v35 = vld [vmem:[%s6793_s1 + $0x10] sm:$0xff] }
  0x1c   : > { %246 = vst [vmem:[#allocation2 + $0x100] sm:$0x3] %v5278_v2  ;;  %247 = vst [vmem:[#allocation2 + $0x108] sm:$0xff] %v5278_v2  ;;  %5224 = vmatprep.subr.mxu1 %v404_v22  ;;  %4512 = vmatprep.subr.mxu0 %v404_v22  ;;  %v5514_v36 = vld [vmem:[%s5397_s26 + $0x48] sm:$0xff]  ;;  %v5518_v37 = vld [vmem:[%s5397_s26 + $0xd0] sm:$0xff] }
  0x1d   : > { %248 = vst [vmem:[#allocation2 + $0x110] sm:$0xff] %v5278_v2  ;;  %249 = vst [vmem:[#allocation2 + $0x118] sm:$0x3] %v5278_v2  ;;  %5240 = vmatpush3.msra.mxu1 %v404_v22  ;;  %4513 = vmatpush3.msra.mxu0 %v404_v22  ;;  %v398_v38 = vld [vmem:[%s6793_s1 + $0x8] sm:$0xff]  ;;  %v5525_v39 = vld [vmem:[%s5397_s26 + $0x50] sm:$0xff] }
  0x1e   : > { %250 = vst [vmem:[#allocation2 + $0x120] sm:$0xff] %v5278_v2  ;;  %251 = vst [vmem:[#allocation2 + $0x128] sm:$0xff] %v5278_v2  ;;  %5225 = vmatprep.subr.mxu1 %v403_v24  ;;  %4514 = vmatprep.subr.mxu0 %v403_v24  ;;  %v5528_v40 = vld [vmem:[%s5397_s26 + $0xd8] sm:$0xff]  ;;  %v397_v42 = vld [vmem:[%s6793_s1] sm:$0xff] }
  0x1f   : > { %252 = vst [vmem:[#allocation2 + $0x130] sm:$0x3] %v5278_v2  ;;  %253 = vst [vmem:[#allocation2 + $0x138] sm:$0xff] %v5278_v2  ;;  %5241 = vmatpush3.msra.mxu1 %v403_v24  ;;  %4515 = vmatpush3.msra.mxu0 %v403_v24  ;;  %v5533_v41 = vld [vmem:[%s5397_s26 + $0x58] sm:$0xff]  ;;  %v5540_v44 = vld [vmem:[%s5397_s26 + $0xe0] sm:$0xff] }
  0x20   : > { %254 = vst [vmem:[#allocation2 + $0x140] sm:$0xff] %v5278_v2  ;;  %255 = vst [vmem:[#allocation2 + $0x148] sm:$0x3] %v5278_v2  ;;  %5226 = vmatprep.subr.mxu1 %v402_v26  ;;  %4516 = vmatprep.subr.mxu0 %v402_v26  ;;  %v5543_v45 = vld [vmem:[%s5397_s26 + $0x60] sm:$0xff]  ;;  %v5548_v46 = vld [vmem:[%s5397_s26 + $0xe8] sm:$0xff] }
  0x21   : > { %256 = vst [vmem:[#allocation2 + $0x150] sm:$0xff] %v5278_v2  ;;  %257 = vst [vmem:[#allocation2 + $0x158] sm:$0xff] %v5278_v2  ;;  %5242 = vmatpush3.msra.mxu1 %v402_v26  ;;  %4517 = vmatpush3.msra.mxu0 %v402_v26  ;;  %v3947_v48 = vld [vmem:[%s6793_s1 + $0xf8] sm:$0xff]  ;;  %v5555_v49 = vld [vmem:[%s5397_s26 + $0x68] sm:$0xff] }
  0x22   : > { %258 = vst [vmem:[#allocation2 + $0x160] sm:$0x3] %v5278_v2  ;;  %259 = vst [vmem:[#allocation2 + $0x168] sm:$0xff] %v5278_v2  ;;  %5227 = vmatprep.subr.mxu1 %v401_v29  ;;  %4518 = vmatprep.subr.mxu0 %v401_v29  ;;  %v3963_v50 = vld [vmem:[%s6793_s1 + $0x178] sm:$0xff]  ;;  %v3946_v51 = vld [vmem:[%s6793_s1 + $0xf0] sm:$0xff] }
  0x23   : > { %260 = vst [vmem:[#allocation2 + $0x170] sm:$0xff] %v5278_v2  ;;  %261 = vst [vmem:[#allocation2 + $0x178] sm:$0x3] %v5278_v2  ;;  %5243 = vmatpush3.msra.mxu1 %v401_v29  ;;  %4519 = vmatpush3.msra.mxu0 %v401_v29  ;;  %v3962_v53 = vld [vmem:[%s6793_s1 + $0x170] sm:$0xff]  ;;  %v3945_v56 = vld [vmem:[%s6793_s1 + $0xe8] sm:$0xff] }
  0x24   : > { %262 = vst [vmem:[#allocation2 + $0x180] sm:$0xff] %v5278_v2  ;;  %263 = vst [vmem:[#allocation2 + $0x188] sm:$0xff] %v5278_v2  ;;  %5228 = vmatprep.subr.mxu1 %v400_v31  ;;  %4520 = vmatprep.subr.mxu0 %v400_v31  ;;  %v3961_v58 = vld [vmem:[%s6793_s1 + $0x168] sm:$0xff]  ;;  %v3944_v59 = vld [vmem:[%s6793_s1 + $0xe0] sm:$0xff] }
  0x25   : > { %264 = vst [vmem:[#allocation2 + $0x190] sm:$0x3] %v5278_v2  ;;  %265 = vst [vmem:[#allocation2 + $0x198] sm:$0xff] %v5278_v2  ;;  %5244 = vmatpush3.msra.mxu1 %v400_v31  ;;  %4521 = vmatpush3.msra.mxu0 %v400_v31  ;;  %v3960_v61 = vld [vmem:[%s6793_s1 + $0x160] sm:$0xff]  ;;  %v3943_v0 = vld [vmem:[%s6793_s1 + $0xd8] sm:$0xff] }
  0x26   : > { %266 = vst [vmem:[#allocation2 + $0x1a0] sm:$0xff] %v5278_v2  ;;  %267 = vst [vmem:[#allocation2 + $0x1a8] sm:$0x3] %v5278_v2  ;;  %5229 = vmatprep.subr.mxu1 %v399_v35  ;;  %4522 = vmatprep.subr.mxu0 %v399_v35  ;;  %v3942_v3 = vld [vmem:[%s6793_s1 + $0xd0] sm:$0xff]  ;;  %v3941_v18 = vld [vmem:[%s6793_s1 + $0xc8] sm:$0xff] }
  0x27   : > { %283 = vst [vmem:[#allocation2 + $0xc1] sm:$0xff] %v5403_v6  ;;  %284 = vst [vmem:[#allocation2 + $0xc9] sm:$0xff] %v5406_v7  ;;  %5245 = vmatpush3.msra.mxu1 %v399_v35  ;;  %4523 = vmatpush3.msra.mxu0 %v399_v35  ;;  %v3958_v5 = vld [vmem:[%s6793_s1 + $0x150] sm:$0xff]  ;;  %v3957_v24 = vld [vmem:[%s6793_s1 + $0x148] sm:$0xff] }
  0x28   : > { %285 = vst [vmem:[#allocation2 + $0xd9] sm:$0xff] %v5411_v8  ;;  %269 = vst [vmem:[#allocation2 + $0x19] sm:$0xff] %v5414_v9  ;;  %5230 = vmatprep.subr.mxu1 %v398_v38  ;;  %4524 = vmatprep.subr.mxu0 %v398_v38  ;;  %v3940_v26 = vld [vmem:[%s6793_s1 + $0xc0] sm:$0xff] }
  0x29   : > { %286 = vst [vmem:[#allocation2 + $0xe1] sm:$0xff] %v5422_v11  ;;  %270 = vst [vmem:[#allocation2 + $0x21] sm:$0xff] %v5425_v12  ;;  %5246 = vmatpush3.msra.mxu1 %v398_v38  ;;  %4525 = vmatpush3.msra.mxu0 %v398_v38  ;;  %v3956_v31 = vld [vmem:[%s6793_s1 + $0x140] sm:$0xff] }
  0x2a   : > { %287 = vst [vmem:[#allocation2 + $0xf1] sm:$0xff] %v5430_v13  ;;  %271 = vst [vmem:[#allocation2 + $0x31] sm:$0xff] %v5437_v15  ;;  %5231 = vmatprep.subr.mxu1 %v397_v42  ;;  %4526 = vmatprep.subr.mxu0 %v397_v42 }
  0x2b   : > { %288 = vst [vmem:[#allocation2 + $0xf9] sm:$0xff] %v5440_v16  ;;  %272 = vst [vmem:[#allocation2 + $0x39] sm:$0xff] %v5445_v17  ;;  %5247 = vmatpush3.msra.mxu1 %v397_v42  ;;  %4527 = vmatpush3.msra.mxu0 %v397_v42  ;;  %v3939_v42 = vld [vmem:[%s6793_s1 + $0xb8] sm:$0xff] }
  0x2c   : > { %289 = vst [vmem:[#allocation2 + $0x109] sm:$0xff] %v5452_v19  ;;  %273 = vst [vmem:[#allocation2 + $0x49] sm:$0xff] %v5456_v20  ;;  %4528 = vmatprep.mubr.f32.mxu0 %v5278_v2  ;;  %4576 = vmatprep.subr.mxu1 %v3947_v48 }
  0x2d   : > { %290 = vst [vmem:[#allocation2 + $0x111] sm:$0xff] %v5459_v21  ;;  %274 = vst [vmem:[#allocation2 + $0x51] sm:$0xff] %v5467_v23  ;;  %4529 = vmatmul.mubr.f32.vlgmr.msra.gmra.mxu0 %v5278_v2  ;;  %4656 = vmatprep.subr.mxu0 %v3963_v50  ;;  %v3959_v2 = vld [vmem:[%s6793_s1 + $0x158] sm:$0xff] }
  0x2e   : > { %291 = vst [vmem:[#allocation2 + $0x121] sm:$0xff] %v5474_v25  ;;  %275 = vst [vmem:[#allocation2 + $0x61] sm:$0xff] %v5481_v27  ;;  %v349_v43 = vld [vmem:[#allocation2 + $0xc0] sm:$0xff]  ;;  %v350_v47 = vld [vmem:[#allocation2 + $0xc8] sm:$0xff]  ;;  %4657 = vmatpush3.msra.mxu0 %v3963_v50 }
  0x2f   : > { %292 = vst [vmem:[#allocation2 + $0x129] sm:$0xff] %v5485_v28  ;;  %276 = vst [vmem:[#allocation2 + $0x69] sm:$0xff] %v5492_v30  ;;  %4552 = vmatprep.mubr.f32.mxu1 %v349_v43  ;;  %v351_v52 = vld [vmem:[#allocation2 + $0xd8] sm:$0xff]  ;;  %4658 = vmatprep.subr.mxu0 %v3962_v53 }
  0x30   : > { %293 = vst [vmem:[#allocation2 + $0x139] sm:$0xff] %v5499_v32  ;;  %277 = vst [vmem:[#allocation2 + $0x79] sm:$0xff] %v5503_v33  ;;  %4553 = vmatmul.mubr.f32.vlgmr.msra.gmra.mxu1 %v350_v47  ;;  %v5569_v54 = vld [vmem:[#allocation2 + $0x18] sm:$0xff]  ;;  %v352_v55 = vld [vmem:[#allocation2 + $0xe0] sm:$0xff]  ;;  %4659 = vmatpush3.msra.mxu0 %v3962_v53 }
  0x31   : > { %294 = vst [vmem:[#allocation2 + $0x141] sm:$0xff] %v5506_v34  ;;  %278 = vst [vmem:[#allocation2 + $0x81] sm:$0xff] %v5514_v36  ;;  %4577 = vmatpush3.msra.mxu1 %v3947_v48  ;;  %4555 = vmatprep.mubr.f32.mxu1 %v351_v52  ;;  %v5574_v57 = vld [vmem:[#allocation2 + $0x20] sm:$0xff]  ;;  %v353_v60 = vld [vmem:[#allocation2 + $0xf0] sm:$0xff] }
  0x32   : > { %295 = vst [vmem:[#allocation2 + $0x151] sm:$0xff] %v5518_v37  ;;  %279 = vst [vmem:[#allocation2 + $0x91] sm:$0xff] %v5525_v39  ;;  %4578 = vmatprep.subr.mxu1 %v3946_v51  ;;  %4531 = vmatprep.mubr.f32.mxu0 %v5569_v54  ;;  %v5587_v62 = vld [vmem:[#allocation2 + $0x30] sm:$0xff]  ;;  %v5589_v63 = vld [vmem:[#allocation2 + $0xf8] sm:$0xff] }
  0x33   : > { %296 = vst [vmem:[#allocation2 + $0x159] sm:$0xff] %v5528_v40  ;;  %280 = vst [vmem:[#allocation2 + $0x99] sm:$0xff] %v5533_v41  ;;  %4579 = vmatpush3.msra.mxu1 %v3946_v51  ;;  %4532 = vmatmul.mubr.f32.gmra.mxu0 %v5574_v57  ;;  %v5594_v1 = vld [vmem:[#allocation2 + $0x38] sm:$0xff]  ;;  %v5604_v4 = vld [vmem:[#allocation2 + $0x108] sm:$0xff] }
  0x34   : > { %297 = vst [vmem:[#allocation2 + $0x169] sm:$0xff] %v5540_v44  ;;  %281 = vst [vmem:[#allocation2 + $0xa9] sm:$0xff] %v5543_v45  ;;  %4556 = vmatmul.mubr.f32.gmra.mxu1 %v352_v55  ;;  %4580 = vmatprep.subr.mxu1 %v3945_v56  ;;  %v5610_v10 = vld [vmem:[#allocation2 + $0x48] sm:$0xff]  ;;  %v5612_v14 = vld [vmem:[#allocation2 + $0x110] sm:$0xff] }
  0x35   : > { %298 = vst [vmem:[#allocation2 + $0x171] sm:$0xff] %v5548_v46  ;;  %282 = vst [vmem:[#allocation2 + $0xb1] sm:$0xff] %v5555_v49  ;;  %4581 = vmatpush3.msra.mxu1 %v3945_v56  ;;  %4660 = vmatprep.subr.mxu0 %v3961_v58  ;;  %v5618_v22 = vld [vmem:[#allocation2 + $0x50] sm:$0xff]  ;;  %v5628_v29 = vld [vmem:[#allocation2 + $0x120] sm:$0xff] }
  0x36   : > { %4582 = vmatprep.subr.mxu1 %v3944_v59  ;;  %4661 = vmatpush3.msra.mxu0 %v3961_v58  ;;  %v5634_v35 = vld [vmem:[#allocation2 + $0x60] sm:$0xff]  ;;  %v5636_v38 = vld [vmem:[#allocation2 + $0x128] sm:$0xff]  ;;  %v3955_v47 = vld [vmem:[%s6793_s1 + $0x138] sm:$0xff] }
  0x37   : > { %4558 = vmatprep.mubr.f32.mxu1 %v353_v60  ;;  %4583 = vmatpush3.msra.mxu1 %v3944_v59  ;;  %v5642_v43 = vld [vmem:[#allocation2 + $0x68] sm:$0xff]  ;;  %v3938_v48 = vld [vmem:[%s6793_s1 + $0xb0] sm:$0xff]  ;;  %v5652_v50 = vld [vmem:[#allocation2 + $0x138] sm:$0xff] }
  0x38   : > { %4662 = vmatprep.subr.mxu0 %v3960_v61  ;;  %4534 = vmatprep.mubr.f32.mxu0 %v5587_v62  ;;  %v3954_v51 = vld [vmem:[%s6793_s1 + $0x130] sm:$0xff]  ;;  %v5658_v52 = vld [vmem:[#allocation2 + $0x78] sm:$0xff]  ;;  %v5660_v53 = vld [vmem:[#allocation2 + $0x140] sm:$0xff] }
  0x39   : > { %4559 = vmatmul.mubr.f32.gmra.mxu1 %v5589_v63  ;;  %4584 = vmatprep.subr.mxu1 %v3943_v0  ;;  %v3937_v55 = vld [vmem:[%s6793_s1 + $0xa8] sm:$0xff]  ;;  %v5666_v56 = vld [vmem:[#allocation2 + $0x80] sm:$0xff]  ;;  %v5676_v60 = vld [vmem:[#allocation2 + $0x150] sm:$0xff] }
  0x3a   : > { %4663 = vmatpush3.msra.mxu0 %v3960_v61  ;;  %4585 = vmatpush3.msra.mxu1 %v3943_v0  ;;  %v3953_v58 = vld [vmem:[%s6793_s1 + $0x128] sm:$0xff]  ;;  %v3936_v59 = vld [vmem:[%s6793_s1 + $0xa0] sm:$0xff]  ;;  %v5682_v0 = vld [vmem:[#allocation2 + $0x90] sm:$0xff] }
  0x3b   : > { %4535 = vmatmul.mubr.f32.gmra.mxu0 %v5594_v1  ;;  %4664 = vmatprep.subr.mxu0 %v3959_v2  ;;  %v3952_v61 = vld [vmem:[%s6793_s1 + $0x120] sm:$0xff] }
  0x3c   : > { %4586 = vmatprep.subr.mxu1 %v3942_v3  ;;  %4665 = vmatpush3.msra.mxu0 %v3959_v2  ;;  %v5684_v2 = vld [vmem:[#allocation2 + $0x158] sm:$0xff] }
  0x3d   : > { %4561 = vmatprep.mubr.f32.mxu1 %v5604_v4  ;;  %4587 = vmatpush3.msra.mxu1 %v3942_v3  ;;  %v3935_v3 = vld [vmem:[%s6793_s1 + $0x98] sm:$0xff] }
  0x3e   : > { %4666 = vmatprep.subr.mxu0 %v3958_v5  ;;  %4537 = vmatprep.mubr.f32.mxu0 %v5610_v10 }
  0x3f   : > { %4562 = vmatmul.mubr.f32.gmra.mxu1 %v5612_v14  ;;  %4588 = vmatprep.subr.mxu1 %v3941_v18 }
  0x40   : > { %4667 = vmatpush3.msra.mxu0 %v3958_v5  ;;  %4589 = vmatpush3.msra.mxu1 %v3941_v18  ;;  %v5690_v5 = vld [vmem:[#allocation2 + $0x98] sm:$0xff] }
  0x41   : > { %4538 = vmatmul.mubr.f32.gmra.mxu0 %v5618_v22  ;;  %4668 = vmatprep.subr.mxu0 %v3957_v24  ;;  %v3951_v18 = vld [vmem:[%s6793_s1 + $0x118] sm:$0xff] }
  0x42   : > { %4590 = vmatprep.subr.mxu1 %v3940_v26  ;;  %4669 = vmatpush3.msra.mxu0 %v3957_v24  ;;  %v3934_v24 = vld [vmem:[%s6793_s1 + $0x90] sm:$0xff] }
  0x43   : > { %4564 = vmatprep.mubr.f32.mxu1 %v5628_v29  ;;  %4591 = vmatpush3.msra.mxu1 %v3940_v26  ;;  %v5700_v26 = vld [vmem:[#allocation2 + $0x168] sm:$0xff] }
  0x44   : > { %4670 = vmatprep.subr.mxu0 %v3956_v31  ;;  %4540 = vmatprep.mubr.f32.mxu0 %v5634_v35 }
  0x45   : > { %4565 = vmatmul.mubr.f32.gmra.mxu1 %v5636_v38  ;;  %4592 = vmatprep.subr.mxu1 %v3939_v42 }
  0x46   : > { %4671 = vmatpush3.msra.mxu0 %v3956_v31  ;;  %4593 = vmatpush3.msra.mxu1 %v3939_v42  ;;  %v5703_v31 = vld [vmem:[%s5397_s26 + $0xf0] sm:$0xff] }
  0x47   : > { %4541 = vmatmul.mubr.f32.gmra.mxu0 %v5642_v43  ;;  %4672 = vmatprep.subr.mxu0 %v3955_v47  ;;  %6810 = vst [vmem:[#allocation4_spill] sm:$0xff] %v5703_v31  ;;  %v3950_v42 = vld [vmem:[%s6793_s1 + $0x110] sm:$0xff]  ;;  %299 = vst [vmem:[#allocation2 + $0x181] sm:$0xff] %v5703_v31  ;;  %v3979_v31 = vld [vmem:[%s6793_s1 + $0x1f8] sm:$0xff] }
  0x48   : > { %4594 = vmatprep.subr.mxu1 %v3938_v48  ;;  %4673 = vmatpush3.msra.mxu0 %v3955_v47  ;;  %v5711_v47 = vld [vmem:[%s5397_s26 + $0xf8] sm:$0xff] }
  0x49   : > { %4567 = vmatprep.mubr.f32.mxu1 %v5652_v50  ;;  %4595 = vmatpush3.msra.mxu1 %v3938_v48  ;;  %6811 = vst [vmem:[#allocation5_spill] sm:$0xff] %v5711_v47  ;;  %v5713_v48 = vld [vmem:[#allocation2 + $0xa8] sm:$0xff]  ;;  %300 = vst [vmem:[#allocation2 + $0x189] sm:$0xff] %v5711_v47 }
  0x4a   : > { %4674 = vmatprep.subr.mxu0 %v3954_v51  ;;  %4543 = vmatprep.mubr.f32.mxu0 %v5658_v52  ;;  %v1072_v47 = vld [vmem:[#allocation2 + $0x2] sm:$0xff] }
  0x4b   : > { %4568 = vmatmul.mubr.f32.gmra.mxu1 %v5660_v53  ;;  %4596 = vmatprep.subr.mxu1 %v3937_v55 }
  0x4c   : > { %4675 = vmatpush3.msra.mxu0 %v3954_v51  ;;  %4597 = vmatpush3.msra.mxu1 %v3937_v55  ;;  %v5715_v51 = vld [vmem:[#allocation2 + $0x170] sm:$0xff]  ;;  %v3933_v55 = vld [vmem:[%s6793_s1 + $0x88] sm:$0xff] }
  0x4d   : > { %4544 = vmatmul.mubr.f32.gmra.mxu0 %v5666_v56  ;;  %4676 = vmatprep.subr.mxu0 %v3953_v58 }
  0x4e   : > { %4598 = vmatprep.subr.mxu1 %v3936_v59  ;;  %4677 = vmatpush3.msra.mxu0 %v3953_v58  ;;  %v5722_v58 = vld [vmem:[#allocation2 + $0xb0] sm:$0xff] }
  0x4f   : > { %4570 = vmatprep.mubr.f32.mxu1 %v5676_v60  ;;  %4599 = vmatpush3.msra.mxu1 %v3936_v59  ;;  %v3949_v59 = vld [vmem:[%s6793_s1 + $0x108] sm:$0xff] }
  0x50   : > { %4678 = vmatprep.subr.mxu0 %v3952_v61  ;;  %4546 = vmatprep.mubr.f32.mxu0 %v5682_v0 }
  0x51   : > { %4571 = vmatmul.mubr.f32.gmra.mxu1 %v5684_v2  ;;  %4600 = vmatprep.subr.mxu1 %v3935_v3 }
  0x52   : > { %4679 = vmatpush3.msra.mxu0 %v3952_v61  ;;  %4601 = vmatpush3.msra.mxu1 %v3935_v3  ;;  %v3932_v61 = vld [vmem:[%s6793_s1 + $0x80] sm:$0xff] }
  0x53   : > { %4547 = vmatmul.mubr.f32.gmra.mxu0 %v5690_v5  ;;  %4680 = vmatprep.subr.mxu0 %v3951_v18  ;;  %v702_v3 = vld [vmem:[#allocation2 + $0x1] sm:$0xff] }
  0x54   : > { %4602 = vmatprep.subr.mxu1 %v3934_v24  ;;  %4681 = vmatpush3.msra.mxu0 %v3951_v18  ;;  %v3948_v18 = vld [vmem:[%s6793_s1 + $0x100] sm:$0xff] }
  0x55   : > { %4573 = vmatprep.mubr.f32.mxu1 %v5700_v26  ;;  %4603 = vmatpush3.msra.mxu1 %v3934_v24  ;;  %v703_v24 = vld [vmem:[#allocation2 + $0x9] sm:$0xff] }
  0x56   : > { %4682 = vmatprep.subr.mxu0 %v3950_v42  ;;  %4549 = vmatprep.mubr.f32.mxu0 %v5713_v48 }
  0x57   : > { %4574 = vmatmul.mubr.f32.gmra.mxu1 %v5715_v51  ;;  %4604 = vmatprep.subr.mxu1 %v3933_v55 }
  0x58   : > { %4683 = vmatpush3.msra.mxu0 %v3950_v42  ;;  %4605 = vmatpush3.msra.mxu1 %v3933_v55  ;;  %v1073_v42 = vld [vmem:[#allocation2 + $0xa] sm:$0xff]  ;;  %v3995_v55 = vld [vmem:[%s6793_s1 + $0x278] sm:$0xff] }
  0x59   : > { %4550 = vmatmul.mubr.f32.gmra.mxu0 %v5722_v58  ;;  %4684 = vmatprep.subr.mxu0 %v3949_v59 }
  0x5a   : > { %4606 = vmatprep.subr.mxu1 %v3932_v61  ;;  %4685 = vmatpush3.msra.mxu0 %v3949_v59  ;;  %v5742_v59 = vld [vmem:[#allocation2 + $0x1a] sm:$0xff] }
  0x5b   : > { %4607 = vmatpush3.msra.mxu1 %v3932_v61  ;;  %4608 = vmatprep.mubr.f32.mxu1 %v702_v3  ;;  %v3978_v61 = vld [vmem:[%s6793_s1 + $0x1f0] sm:$0xff]  ;;  %v5748_v3 = vld [vmem:[#allocation2 + $0x22] sm:$0xff] }
  0x5c   : > { %4686 = vmatprep.subr.mxu0 %v3948_v18  ;;  %4609 = vmatmul.mubr.f32.vlgmr.msra.gmra.mxu1 %v703_v24  ;;  %v5762_v24 = vld [vmem:[#allocation2 + $0x3a] sm:$0xff] }
  0x5d   : > { %4687 = vmatpush3.msra.mxu0 %v3948_v18  ;;  %4688 = vmatprep.mubr.f32.mxu0 %v1072_v47  ;;  %v3994_v47 = vld [vmem:[%s6793_s1 + $0x270] sm:$0xff]  ;;  %v3977_v18 = vld [vmem:[%s6793_s1 + $0x1e8] sm:$0xff]  ;;  %6813 = vst [vmem:[#allocation7_spill] sm:$0xff] %v5762_v24 }
  0x5e   : > { %4736 = vmatprep.subr.mxu1 %v3979_v31  ;;  %4689 = vmatmul.mubr.f32.vlgmr.msra.gmra.mxu0 %v1073_v42  ;;  %v3993_v42 = vld [vmem:[%s6793_s1 + $0x268] sm:$0xff] }
  0x5f   : > { %4737 = vmatpush3.msra.mxu1 %v3979_v31  ;;  %4816 = vmatprep.subr.mxu0 %v3995_v55  ;;  %v5756_v31 = vld [vmem:[#allocation2 + $0x32] sm:$0xff] }
  0x60   : > { %4611 = vmatprep.mubr.f32.mxu1 %v5414_v9  ;;  %4817 = vmatpush3.msra.mxu0 %v3995_v55  ;;  %6812 = vst [vmem:[#allocation6_spill] sm:$0xff] %v5756_v31  ;;  %v5770_v55 = vld [vmem:[#allocation2 + $0x4a] sm:$0xff] }
  0x61   : > { %4612 = vmatmul.mubr.f32.gmra.mxu1 %v5425_v12  ;;  %4691 = vmatprep.mubr.f32.mxu0 %v5742_v59  ;;  %6814 = vst [vmem:[#allocation8_spill] sm:$0xff] %v5770_v55 }
  0x62   : > { %4738 = vmatprep.subr.mxu1 %v3978_v61  ;;  %4692 = vmatmul.mubr.f32.gmra.mxu0 %v5748_v3 }
  0x63   : > { %4739 = vmatpush3.msra.mxu1 %v3978_v61  ;;  %4818 = vmatprep.subr.mxu0 %v3994_v47  ;;  %v3976_v61 = vld [vmem:[%s6793_s1 + $0x1e0] sm:$0xff] }
  0x64   : > { %4614 = vmatprep.mubr.f32.mxu1 %v5437_v15  ;;  %4819 = vmatpush3.msra.mxu0 %v3994_v47  ;;  %v5776_v47 = vld [vmem:[#allocation2 + $0x52] sm:$0xff] }
  0x65   : > { %4615 = vmatmul.mubr.f32.gmra.mxu1 %v5445_v17  ;;  %4694 = vmatprep.mubr.f32.mxu0 %v5756_v31  ;;  %6815 = vst [vmem:[#allocation9_spill] sm:$0xff] %v5776_v47  ;;  %v3992_v31 = vld [vmem:[%s6793_s1 + $0x260] sm:$0xff] }
  0x66   : > { %4740 = vmatprep.subr.mxu1 %v3977_v18  ;;  %4695 = vmatmul.mubr.f32.gmra.mxu0 %v5762_v24  ;;  %v3975_v24 = vld [vmem:[%s6793_s1 + $0x1d8] sm:$0xff] }
  0x67   : > { %4741 = vmatpush3.msra.mxu1 %v3977_v18  ;;  %4820 = vmatprep.subr.mxu0 %v3993_v42  ;;  %v5784_v18 = vld [vmem:[#allocation2 + $0x62] sm:$0xff] }
  0x68   : > { %4617 = vmatprep.mubr.f32.mxu1 %v5456_v20  ;;  %4821 = vmatpush3.msra.mxu0 %v3993_v42  ;;  %6816 = vst [vmem:[#allocation10_spill] sm:$0xff] %v5784_v18  ;;  %v5790_v42 = vld [vmem:[#allocation2 + $0x6a] sm:$0xff] }
  0x69   : > { %4618 = vmatmul.mubr.f32.gmra.mxu1 %v5467_v23  ;;  %4697 = vmatprep.mubr.f32.mxu0 %v5770_v55  ;;  %6817 = vst [vmem:[#allocation11_spill] sm:$0xff] %v5790_v42  ;;  %v3991_v55 = vld [vmem:[%s6793_s1 + $0x258] sm:$0xff] }
  0x6a   : > { %4742 = vmatprep.subr.mxu1 %v3976_v61  ;;  %4698 = vmatmul.mubr.f32.gmra.mxu0 %v5776_v47  ;;  %v3974_v47 = vld [vmem:[%s6793_s1 + $0x1d0] sm:$0xff] }
  0x6b   : > { %4743 = vmatpush3.msra.mxu1 %v3976_v61  ;;  %4822 = vmatprep.subr.mxu0 %v3992_v31  ;;  %v5798_v61 = vld [vmem:[#allocation2 + $0x7a] sm:$0xff] }
  0x6c   : > { %4620 = vmatprep.mubr.f32.mxu1 %v5481_v27  ;;  %4823 = vmatpush3.msra.mxu0 %v3992_v31  ;;  %6818 = vst [vmem:[#allocation12_spill] sm:$0xff] %v5798_v61  ;;  %v5804_v31 = vld [vmem:[#allocation2 + $0x82] sm:$0xff] }
  0x6d   : > { %4621 = vmatmul.mubr.f32.gmra.mxu1 %v5492_v30  ;;  %4700 = vmatprep.mubr.f32.mxu0 %v5784_v18  ;;  %6819 = vst [vmem:[#allocation13_spill] sm:$0xff] %v5804_v31  ;;  %v3990_v18 = vld [vmem:[%s6793_s1 + $0x250] sm:$0xff] }
  0x6e   : > { %4744 = vmatprep.subr.mxu1 %v3975_v24  ;;  %4701 = vmatmul.mubr.f32.gmra.mxu0 %v5790_v42  ;;  %v3973_v42 = vld [vmem:[%s6793_s1 + $0x1c8] sm:$0xff] }
  0x6f   : > { %4745 = vmatpush3.msra.mxu1 %v3975_v24  ;;  %4824 = vmatprep.subr.mxu0 %v3991_v55  ;;  %v5812_v24 = vld [vmem:[#allocation2 + $0x92] sm:$0xff] }
  0x70   : > { %4623 = vmatprep.mubr.f32.mxu1 %v5503_v33  ;;  %4825 = vmatpush3.msra.mxu0 %v3991_v55  ;;  %6820 = vst [vmem:[#allocation14_spill] sm:$0xff] %v5812_v24  ;;  %v5818_v55 = vld [vmem:[#allocation2 + $0x9a] sm:$0xff] }
  0x71   : > { %4624 = vmatmul.mubr.f32.gmra.mxu1 %v5514_v36  ;;  %4703 = vmatprep.mubr.f32.mxu0 %v5798_v61  ;;  %6821 = vst [vmem:[#allocation15_spill] sm:$0xff] %v5818_v55  ;;  %v3989_v61 = vld [vmem:[%s6793_s1 + $0x248] sm:$0xff] }
  0x72   : > { %4746 = vmatprep.subr.mxu1 %v3974_v47  ;;  %4704 = vmatmul.mubr.f32.gmra.mxu0 %v5804_v31  ;;  %v3972_v31 = vld [vmem:[%s6793_s1 + $0x1c0] sm:$0xff] }
  0x73   : > { %4747 = vmatpush3.msra.mxu1 %v3974_v47  ;;  %4826 = vmatprep.subr.mxu0 %v3990_v18  ;;  %v5826_v47 = vld [vmem:[#allocation2 + $0xaa] sm:$0xff] }
  0x74   : > { %4626 = vmatprep.mubr.f32.mxu1 %v5525_v39  ;;  %4827 = vmatpush3.msra.mxu0 %v3990_v18  ;;  %6822 = vst [vmem:[#allocation16_spill] sm:$0xff] %v5826_v47  ;;  %v5832_v18 = vld [vmem:[#allocation2 + $0xb2] sm:$0xff] }
  0x75   : > { %4627 = vmatmul.mubr.f32.gmra.mxu1 %v5533_v41  ;;  %4706 = vmatprep.mubr.f32.mxu0 %v5812_v24  ;;  %v3988_v24 = vld [vmem:[%s6793_s1 + $0x240] sm:$0xff] }
  0x76   : > { %4748 = vmatprep.subr.mxu1 %v3973_v42  ;;  %4707 = vmatmul.mubr.f32.gmra.mxu0 %v5818_v55  ;;  %v3971_v55 = vld [vmem:[%s6793_s1 + $0x1b8] sm:$0xff] }
  0x77   : > { %4749 = vmatpush3.msra.mxu1 %v3973_v42  ;;  %4828 = vmatprep.subr.mxu0 %v3989_v61  ;;  %v5840_v42 = vld [vmem:[#allocation2 + $0xc2] sm:$0xff] }
  0x78   : > { %4629 = vmatprep.mubr.f32.mxu1 %v5543_v45  ;;  %4829 = vmatpush3.msra.mxu0 %v3989_v61  ;;  %v5846_v61 = vld [vmem:[#allocation2 + $0xca] sm:$0xff] }
  0x79   : > { %4630 = vmatmul.mubr.f32.gmra.mxu1 %v5555_v49  ;;  %4709 = vmatprep.mubr.f32.mxu0 %v5826_v47  ;;  %v3987_v47 = vld [vmem:[%s6793_s1 + $0x238] sm:$0xff] }
  0x7a   : > { %4750 = vmatprep.subr.mxu1 %v3972_v31  ;;  %4710 = vmatmul.mubr.f32.gmra.mxu0 %v5832_v18 }
  0x7b   : > { %4751 = vmatpush3.msra.mxu1 %v3972_v31  ;;  %4830 = vmatprep.subr.mxu0 %v3988_v24  ;;  %v5854_v31 = vld [vmem:[#allocation2 + $0xda] sm:$0xff] }
  0x7c   : > { %4632 = vmatprep.mubr.f32.mxu1 %v5403_v6  ;;  %4831 = vmatpush3.msra.mxu0 %v3988_v24  ;;  %v3970_v6 = vld [vmem:[%s6793_s1 + $0x1b0] sm:$0xff] }
  0x7d   : > { %4633 = vmatmul.mubr.f32.gmra.mxu1 %v5406_v7  ;;  %4712 = vmatprep.mubr.f32.mxu0 %v5840_v42  ;;  %v5860_v7 = vld [vmem:[#allocation2 + $0xe2] sm:$0xff]  ;;  %v3986_v24 = vld [vmem:[%s6793_s1 + $0x230] sm:$0xff] }
  0x7e   : > { %4752 = vmatprep.subr.mxu1 %v3971_v55  ;;  %4713 = vmatmul.mubr.f32.gmra.mxu0 %v5846_v61 }
  0x7f   : > { %4753 = vmatpush3.msra.mxu1 %v3971_v55  ;;  %4832 = vmatprep.subr.mxu0 %v3987_v47  ;;  %v5868_v55 = vld [vmem:[#allocation2 + $0xf2] sm:$0xff] }
  0x80   : > { %4635 = vmatprep.mubr.f32.mxu1 %v5411_v8  ;;  %4833 = vmatpush3.msra.mxu0 %v3987_v47  ;;  %v3969_v8 = vld [vmem:[%s6793_s1 + $0x1a8] sm:$0xff] }
  0x81   : > { %4636 = vmatmul.mubr.f32.gmra.mxu1 %v5422_v11  ;;  %4715 = vmatprep.mubr.f32.mxu0 %v5854_v31  ;;  %v5874_v11 = vld [vmem:[#allocation2 + $0xfa] sm:$0xff]  ;;  %v3985_v47 = vld [vmem:[%s6793_s1 + $0x228] sm:$0xff] }
  0x82   : > { %4754 = vmatprep.subr.mxu1 %v3970_v6  ;;  %4716 = vmatmul.mubr.f32.gmra.mxu0 %v5860_v7 }
  0x83   : > { %4755 = vmatpush3.msra.mxu1 %v3970_v6  ;;  %4834 = vmatprep.subr.mxu0 %v3986_v24  ;;  %v5882_v6 = vld [vmem:[#allocation2 + $0x10a] sm:$0xff] }
  0x84   : > { %4638 = vmatprep.mubr.f32.mxu1 %v5430_v13  ;;  %4835 = vmatpush3.msra.mxu0 %v3986_v24  ;;  %v3968_v13 = vld [vmem:[%s6793_s1 + $0x1a0] sm:$0xff] }
  0x85   : > { %4639 = vmatmul.mubr.f32.gmra.mxu1 %v5440_v16  ;;  %4718 = vmatprep.mubr.f32.mxu0 %v5868_v55  ;;  %v5888_v16 = vld [vmem:[#allocation2 + $0x112] sm:$0xff]  ;;  %v3984_v24 = vld [vmem:[%s6793_s1 + $0x220] sm:$0xff] }
  0x86   : > { %4756 = vmatprep.subr.mxu1 %v3969_v8  ;;  %4719 = vmatmul.mubr.f32.gmra.mxu0 %v5874_v11 }
  0x87   : > { %4757 = vmatpush3.msra.mxu1 %v3969_v8  ;;  %4836 = vmatprep.subr.mxu0 %v3985_v47  ;;  %v5896_v8 = vld [vmem:[#allocation2 + $0x122] sm:$0xff] }
  0x88   : > { %4641 = vmatprep.mubr.f32.mxu1 %v5452_v19  ;;  %4837 = vmatpush3.msra.mxu0 %v3985_v47  ;;  %v3967_v19 = vld [vmem:[%s6793_s1 + $0x198] sm:$0xff] }
  0x89   : > { %4642 = vmatmul.mubr.f32.gmra.mxu1 %v5459_v21  ;;  %4721 = vmatprep.mubr.f32.mxu0 %v5882_v6  ;;  %v5902_v21 = vld [vmem:[#allocation2 + $0x12a] sm:$0xff]  ;;  %v3983_v47 = vld [vmem:[%s6793_s1 + $0x218] sm:$0xff] }
  0x8a   : > { %4758 = vmatprep.subr.mxu1 %v3968_v13  ;;  %4722 = vmatmul.mubr.f32.gmra.mxu0 %v5888_v16 }
  0x8b   : > { %4759 = vmatpush3.msra.mxu1 %v3968_v13  ;;  %4838 = vmatprep.subr.mxu0 %v3984_v24  ;;  %v5910_v13 = vld [vmem:[#allocation2 + $0x13a] sm:$0xff] }
  0x8c   : > { %4644 = vmatprep.mubr.f32.mxu1 %v5474_v25  ;;  %4839 = vmatpush3.msra.mxu0 %v3984_v24  ;;  %v3966_v25 = vld [vmem:[%s6793_s1 + $0x190] sm:$0xff] }
  0x8d   : > { %4645 = vmatmul.mubr.f32.gmra.mxu1 %v5485_v28  ;;  %4724 = vmatprep.mubr.f32.mxu0 %v5896_v8  ;;  %v5916_v28 = vld [vmem:[#allocation2 + $0x142] sm:$0xff]  ;;  %v3982_v24 = vld [vmem:[%s6793_s1 + $0x210] sm:$0xff] }
  0x8e   : > { %4760 = vmatprep.subr.mxu1 %v3967_v19  ;;  %4725 = vmatmul.mubr.f32.gmra.mxu0 %v5902_v21 }
  0x8f   : > { %4761 = vmatpush3.msra.mxu1 %v3967_v19  ;;  %4840 = vmatprep.subr.mxu0 %v3983_v47  ;;  %v5924_v19 = vld [vmem:[#allocation2 + $0x152] sm:$0xff] }
  0x90   : > { %4647 = vmatprep.mubr.f32.mxu1 %v5499_v32  ;;  %4841 = vmatpush3.msra.mxu0 %v3983_v47  ;;  %v3965_v32 = vld [vmem:[%s6793_s1 + $0x188] sm:$0xff] }
  0x91   : > { %4648 = vmatmul.mubr.f32.gmra.mxu1 %v5506_v34  ;;  %4727 = vmatprep.mubr.f32.mxu0 %v5910_v13  ;;  %v5930_v34 = vld [vmem:[#allocation2 + $0x15a] sm:$0xff]  ;;  %v3981_v47 = vld [vmem:[%s6793_s1 + $0x208] sm:$0xff] }
  0x92   : > { %4762 = vmatprep.subr.mxu1 %v3966_v25  ;;  %4728 = vmatmul.mubr.f32.gmra.mxu0 %v5916_v28 }
  0x93   : > { %4763 = vmatpush3.msra.mxu1 %v3966_v25  ;;  %4842 = vmatprep.subr.mxu0 %v3982_v24  ;;  %v5938_v25 = vld [vmem:[#allocation2 + $0x16a] sm:$0xff] }
  0x94   : > { %4650 = vmatprep.mubr.f32.mxu1 %v5518_v37  ;;  %4843 = vmatpush3.msra.mxu0 %v3982_v24  ;;  %v3964_v37 = vld [vmem:[%s6793_s1 + $0x180] sm:$0xff] }
  0x95   : > { %4651 = vmatmul.mubr.f32.gmra.mxu1 %v5528_v40  ;;  %4730 = vmatprep.mubr.f32.mxu0 %v5924_v19  ;;  %v5944_v40 = vld [vmem:[#allocation2 + $0x172] sm:$0xff]  ;;  %v3980_v24 = vld [vmem:[%s6793_s1 + $0x200] sm:$0xff] }
  0x96   : > { %4764 = vmatprep.subr.mxu1 %v3965_v32  ;;  %4731 = vmatmul.mubr.f32.gmra.mxu0 %v5930_v34 }
  0x97   : > { %4765 = vmatpush3.msra.mxu1 %v3965_v32  ;;  %4844 = vmatprep.subr.mxu0 %v3981_v47  ;;  %v4011_v32 = vld [vmem:[%s6793_s1 + $0x2f8] sm:$0xff] }
  0x98   : > { %4653 = vmatprep.mubr.f32.mxu1 %v5540_v44  ;;  %4845 = vmatpush3.msra.mxu0 %v3981_v47  ;;  %v4027_v44 = vld [vmem:[%s6793_s1 + $0x378] sm:$0xff]  ;;  %v4001_v47 = vld [vmem:[%s6793_s1 + $0x2a8] sm:$0xff] }
  0x99   : > { %4654 = vmatmul.mubr.f32.gmra.mxu1 %v5548_v46  ;;  %4733 = vmatprep.mubr.f32.mxu0 %v5938_v25  ;;  %v4010_v46 = vld [vmem:[%s6793_s1 + $0x2f0] sm:$0xff] }
  0x9a   : > { %4766 = vmatprep.subr.mxu1 %v3964_v37  ;;  %4734 = vmatmul.mubr.f32.gmra.mxu0 %v5944_v40 }
  0x9b   : > { %4767 = vmatpush3.msra.mxu1 %v3964_v37  ;;  %4846 = vmatprep.subr.mxu0 %v3980_v24  ;;  %v5257_v37 = vld [vmem:[#allocation2 + $0x109] sm:$0xff] }
  0x9c   : > { %4768 = vmatprep.mubr.f32.mxu1 %v5569_v54  ;;  %4847 = vmatpush3.msra.mxu0 %v3980_v24  ;;  %v4026_v54 = vld [vmem:[%s6793_s1 + $0x370] sm:$0xff] }
  0x9d   : > { %4769 = vmatmul.mubr.f32.vlgmr.msra.gmra.mxu1 %v5574_v57  ;;  %4848 = vmatprep.mubr.f32.mxu0 %v5414_v9  ;;  %v4009_v9 = vld [vmem:[%s6793_s1 + $0x2e8] sm:$0xff]  ;;  %v6020_v57 = vld [vmem:[#allocation2 + $0xc0] sm:$0xff]  ;;  %v5258_v24 = vld [vmem:[#allocation2 + $0x111] sm:$0xff] }
  0x9e   : > { %4896 = vmatprep.subr.mxu1 %v4011_v32  ;;  %4849 = vmatmul.mubr.f32.vlgmr.msra.gmra.mxu0 %v5425_v12  ;;  %v4025_v12 = vld [vmem:[%s6793_s1 + $0x368] sm:$0xff] }
  0x9f   : > { %4897 = vmatpush3.msra.mxu1 %v4011_v32  ;;  %4976 = vmatprep.subr.mxu0 %v4027_v44  ;;  %v4000_v32 = vld [vmem:[%s6793_s1 + $0x2a0] sm:$0xff] }
  0xa0   : > { %4771 = vmatprep.mubr.f32.mxu1 %v5587_v62  ;;  %4977 = vmatpush3.msra.mxu0 %v4027_v44  ;;  %v4004_v62 = vld [vmem:[%s6793_s1 + $0x2c0] sm:$0xff]  ;;  %v5260_v44 = vld [vmem:[#allocation2 + $0x129] sm:$0xff] }
  0xa1   : > { %4772 = vmatmul.mubr.f32.gmra.mxu1 %v5594_v1  ;;  %4851 = vmatprep.mubr.f32.mxu0 %v5437_v15  ;;  %v4008_v15 = vld [vmem:[%s6793_s1 + $0x2e0] sm:$0xff]  ;;  %v6032_v1 = vld [vmem:[#allocation2 + $0xc9] sm:$0xff] }
  0xa2   : > { %4898 = vmatprep.subr.mxu1 %v4010_v46  ;;  %4852 = vmatmul.mubr.f32.gmra.mxu0 %v5445_v17  ;;  %v4024_v17 = vld [vmem:[%s6793_s1 + $0x360] sm:$0xff] }
  0xa3   : > { %4899 = vmatpush3.msra.mxu1 %v4010_v46  ;;  %4978 = vmatprep.subr.mxu0 %v4026_v54  ;;  %v3999_v46 = vld [vmem:[%s6793_s1 + $0x298] sm:$0xff] }
  0xa4   : > { %4774 = vmatprep.mubr.f32.mxu1 %v5610_v10  ;;  %4979 = vmatpush3.msra.mxu0 %v4026_v54  ;;  %v6041_v10 = vld [vmem:[#allocation2 + $0xe0] sm:$0xff] }
  0xa5   : > { %4775 = vmatmul.mubr.f32.gmra.mxu1 %v5618_v22  ;;  %4854 = vmatprep.mubr.f32.mxu0 %v5456_v20  ;;  %v4007_v20 = vld [vmem:[%s6793_s1 + $0x2d8] sm:$0xff]  ;;  %v5262_v54 = vld [vmem:[#allocation2 + $0x141] sm:$0xff] }
  0xa6   : > { %4900 = vmatprep.subr.mxu1 %v4009_v9  ;;  %4855 = vmatmul.mubr.f32.gmra.mxu0 %v5467_v23  ;;  %v4023_v23 = vld [vmem:[%s6793_s1 + $0x358] sm:$0xff] }
  0xa7   : > { %4901 = vmatpush3.msra.mxu1 %v4009_v9  ;;  %4980 = vmatprep.subr.mxu0 %v4025_v12  ;;  %v6044_v22 = vld [vmem:[#allocation2 + $0xd9] sm:$0xff]  ;;  %v3998_v9 = vld [vmem:[%s6793_s1 + $0x290] sm:$0xff] }
  0xa8   : > { %4777 = vmatprep.mubr.f32.mxu1 %v5634_v35  ;;  %4981 = vmatpush3.msra.mxu0 %v4025_v12  ;;  %v4003_v35 = vld [vmem:[%s6793_s1 + $0x2b8] sm:$0xff] }
  0xa9   : > { %4778 = vmatmul.mubr.f32.gmra.mxu1 %v5642_v43  ;;  %4857 = vmatprep.mubr.f32.mxu0 %v5481_v27  ;;  %v4006_v27 = vld [vmem:[%s6793_s1 + $0x2d0] sm:$0xff]  ;;  %v6050_v43 = vld [vmem:[#allocation2 + $0xe1] sm:$0xff]  ;;  %v5264_v12 = vld [vmem:[#allocation2 + $0x159] sm:$0xff] }
  0xaa   : > { %4902 = vmatprep.subr.mxu1 %v4008_v15  ;;  %4858 = vmatmul.mubr.f32.gmra.mxu0 %v5492_v30  ;;  %v4022_v30 = vld [vmem:[%s6793_s1 + $0x350] sm:$0xff] }
  0xab   : > { %4903 = vmatpush3.msra.mxu1 %v4008_v15  ;;  %4982 = vmatprep.subr.mxu0 %v4024_v17  ;;  %v3997_v15 = vld [vmem:[%s6793_s1 + $0x288] sm:$0xff] }
  0xac   : > { %4780 = vmatprep.mubr.f32.mxu1 %v5658_v52  ;;  %4983 = vmatpush3.msra.mxu0 %v4024_v17  ;;  %v4019_v52 = vld [vmem:[%s6793_s1 + $0x338] sm:$0xff]  ;;  %v5265_v17 = vld [vmem:[#allocation2 + $0x169] sm:$0xff] }
  0xad   : > { %4781 = vmatmul.mubr.f32.gmra.mxu1 %v5666_v56  ;;  %4860 = vmatprep.mubr.f32.mxu0 %v5503_v33  ;;  %v4005_v33 = vld [vmem:[%s6793_s1 + $0x2c8] sm:$0xff]  ;;  %v6056_v56 = vld [vmem:[#allocation2 + $0xf0] sm:$0xff] }
  0xae   : > { %4904 = vmatprep.subr.mxu1 %v4007_v20  ;;  %4861 = vmatmul.mubr.f32.gmra.mxu0 %v5514_v36  ;;  %v4021_v36 = vld [vmem:[%s6793_s1 + $0x348] sm:$0xff] }
  0xaf   : > { %4905 = vmatpush3.msra.mxu1 %v4007_v20  ;;  %4984 = vmatprep.subr.mxu0 %v4023_v23  ;;  %v6116_v20 = vld [vmem:[#allocation2 + $0x188] sm:$0xff] }
  0xb0   : > { %4783 = vmatprep.mubr.f32.mxu1 %v5682_v0  ;;  %4985 = vmatpush3.msra.mxu0 %v4023_v23  ;;  %v6060_v0 = vld [vmem:[#allocation2 + $0xf1] sm:$0xff] }
  0xb1   : > { %4784 = vmatmul.mubr.f32.gmra.mxu1 %v5690_v5  ;;  %4863 = vmatprep.mubr.f32.mxu0 %v5525_v39  ;;  %v6023_v39 = vld [vmem:[#allocation2 + $0xc8] sm:$0xff]  ;;  %v4002_v5 = vld [vmem:[%s6793_s1 + $0x2b0] sm:$0xff] }
  0xb2   : > { %4906 = vmatprep.subr.mxu1 %v4006_v27  ;;  %4864 = vmatmul.mubr.f32.gmra.mxu0 %v5533_v41  ;;  %v6026_v41 = vld [vmem:[#allocation2 + $0xc1] sm:$0xff]  ;;  %v5266_v23 = vld [vmem:[#allocation2 + $0x171] sm:$0xff] }
  0xb3   : > { %4907 = vmatpush3.msra.mxu1 %v4006_v27  ;;  %4986 = vmatprep.subr.mxu0 %v4022_v30  ;;  %v6823_v27 = vld [vmem:[#allocation4_spill] sm:$0xff] }
  0xb4   : > { %4786 = vmatprep.mubr.f32.mxu1 %v5713_v48  ;;  %4987 = vmatpush3.msra.mxu0 %v4022_v30  ;;  %v6066_v48 = vld [vmem:[#allocation2 + $0xf9] sm:$0xff] }
  0xb5   : > { %4787 = vmatmul.mubr.f32.gmra.mxu1 %v5722_v58  ;;  %4866 = vmatprep.mubr.f32.mxu0 %v5543_v45  ;;  %v4020_v45 = vld [vmem:[%s6793_s1 + $0x340] sm:$0xff]  ;;  %v4018_v58 = vld [vmem:[%s6793_s1 + $0x330] sm:$0xff]  ;;  %v6824_v30 = vld [vmem:[#allocation5_spill] sm:$0xff] }
  0xb6   : > { %4908 = vmatprep.subr.mxu1 %v4005_v33  ;;  %4867 = vmatmul.mubr.f32.gmra.mxu0 %v5555_v49  ;;  %v6038_v49 = vld [vmem:[#allocation2 + $0xd8] sm:$0xff] }
  0xb7   : > { %4909 = vmatpush3.msra.mxu1 %v4005_v33  ;;  %4988 = vmatprep.subr.mxu0 %v4021_v36  ;;  %v2553_v33 = vld [vmem:[#allocation2 + $0x30] sm:$0xff] }
  0xb8   : > { %4789 = vmatprep.mubr.f32.mxu1 %v6020_v57  ;;  %4989 = vmatpush3.msra.mxu0 %v4021_v36  ;;  %v4043_v36 = vld [vmem:[%s6793_s1 + $0x3f8] sm:$0xff] }
  0xb9   : > { %4790 = vmatmul.mubr.f32.gmra.mxu1 %v6023_v39  ;;  %4869 = vmatprep.mubr.f32.mxu0 %v6026_v41 }
  0xba   : > { %4910 = vmatprep.subr.mxu1 %v4004_v62  ;;  %4870 = vmatmul.mubr.f32.gmra.mxu0 %v6032_v1 }
  0xbb   : > { %4911 = vmatpush3.msra.mxu1 %v4004_v62  ;;  %4990 = vmatprep.subr.mxu0 %v4020_v45  ;;  %v2554_v62 = vld [vmem:[#allocation2 + $0x38] sm:$0xff] }
  0xbc   : > { %4792 = vmatprep.mubr.f32.mxu1 %v6038_v49  ;;  %4991 = vmatpush3.msra.mxu0 %v4020_v45  ;;  %v4059_v45 = vld [vmem:[%s6793_s1 + $0x478] sm:$0xff] }
  0xbd   : > { %4793 = vmatmul.mubr.f32.gmra.mxu1 %v6041_v10  ;;  %4872 = vmatprep.mubr.f32.mxu0 %v6044_v22 }
  0xbe   : > { %4912 = vmatprep.subr.mxu1 %v4003_v35  ;;  %4873 = vmatmul.mubr.f32.gmra.mxu0 %v6050_v43 }
  0xbf   : > { %4913 = vmatpush3.msra.mxu1 %v4003_v35  ;;  %4992 = vmatprep.subr.mxu0 %v4019_v52  ;;  %v2555_v35 = vld [vmem:[#allocation2 + $0x48] sm:$0xff] }
  0xc0   : > { %4795 = vmatprep.mubr.f32.mxu1 %v6056_v56  ;;  %4993 = vmatpush3.msra.mxu0 %v4019_v52  ;;  %v4042_v52 = vld [vmem:[%s6793_s1 + $0x3f0] sm:$0xff] }
  0xc1   : > { %4796 = vmatmul.mubr.f32.gmra.mxu1 %v5589_v63  ;;  %4875 = vmatprep.mubr.f32.mxu0 %v6060_v0  ;;  %v4017_v63 = vld [vmem:[%s6793_s1 + $0x328] sm:$0xff] }
  0xc2   : > { %4914 = vmatprep.subr.mxu1 %v4002_v5  ;;  %4876 = vmatmul.mubr.f32.gmra.mxu0 %v6066_v48 }
  0xc3   : > { %4915 = vmatpush3.msra.mxu1 %v4002_v5  ;;  %4994 = vmatprep.subr.mxu0 %v4018_v58  ;;  %v6825_v5 = vld [vmem:[#allocation6_spill] sm:$0xff] }
  0xc4   : > { %4798 = vmatprep.mubr.f32.mxu1 %v5604_v4  ;;  %4995 = vmatpush3.msra.mxu0 %v4018_v58  ;;  %v4016_v4 = vld [vmem:[%s6793_s1 + $0x320] sm:$0xff]  ;;  %v6826_v58 = vld [vmem:[#allocation7_spill] sm:$0xff] }
  0xc5   : > { %4799 = vmatmul.mubr.f32.gmra.mxu1 %v5612_v14  ;;  %4878 = vmatprep.mubr.f32.mxu0 %v5257_v37  ;;  %v5259_v14 = vld [vmem:[#allocation2 + $0x121] sm:$0xff]  ;;  %v6827_v37 = vld [vmem:[#allocation8_spill] sm:$0xff] }
  0xc6   : > { %4916 = vmatprep.subr.mxu1 %v4001_v47  ;;  %4879 = vmatmul.mubr.f32.gmra.mxu0 %v5258_v24  ;;  %v2558_v24 = vld [vmem:[#allocation2 + $0x68] sm:$0xff] }
  0xc7   : > { %4917 = vmatpush3.msra.mxu1 %v4001_v47  ;;  %4996 = vmatprep.subr.mxu0 %v4017_v63  ;;  %v2557_v47 = vld [vmem:[#allocation2 + $0x60] sm:$0xff] }
  0xc8   : > { %4801 = vmatprep.mubr.f32.mxu1 %v5628_v29  ;;  %4997 = vmatpush3.msra.mxu0 %v4017_v63  ;;  %v4015_v29 = vld [vmem:[%s6793_s1 + $0x318] sm:$0xff]  ;;  %v4041_v63 = vld [vmem:[%s6793_s1 + $0x3e8] sm:$0xff] }
  0xc9   : > { %4802 = vmatmul.mubr.f32.gmra.mxu1 %v5636_v38  ;;  %4881 = vmatprep.mubr.f32.mxu0 %v5259_v14  ;;  %v5261_v38 = vld [vmem:[#allocation2 + $0x139] sm:$0xff] }
  0xca   : > { %4918 = vmatprep.subr.mxu1 %v4000_v32  ;;  %4882 = vmatmul.mubr.f32.gmra.mxu0 %v5260_v44  ;;  %v2559_v14 = vld [vmem:[#allocation2 + $0x78] sm:$0xff]  ;;  %v4040_v44 = vld [vmem:[%s6793_s1 + $0x3e0] sm:$0xff] }
  0xcb   : > { %4919 = vmatpush3.msra.mxu1 %v4000_v32  ;;  %4998 = vmatprep.subr.mxu0 %v4016_v4  ;;  %v6828_v32 = vld [vmem:[#allocation9_spill] sm:$0xff] }
  0xcc   : > { %4804 = vmatprep.mubr.f32.mxu1 %v5652_v50  ;;  %4999 = vmatpush3.msra.mxu0 %v4016_v4  ;;  %v4014_v50 = vld [vmem:[%s6793_s1 + $0x310] sm:$0xff]  ;;  %v4057_v4 = vld [vmem:[%s6793_s1 + $0x468] sm:$0xff] }
  0xcd   : > { %4805 = vmatmul.mubr.f32.gmra.mxu1 %v5660_v53  ;;  %4884 = vmatprep.mubr.f32.mxu0 %v5261_v38  ;;  %v5263_v53 = vld [vmem:[#allocation2 + $0x151] sm:$0xff]  ;;  %v6830_v38 = vld [vmem:[#allocation11_spill] sm:$0xff] }
  0xce   : > { %4920 = vmatprep.subr.mxu1 %v3999_v46  ;;  %4885 = vmatmul.mubr.f32.gmra.mxu0 %v5262_v54  ;;  %v4056_v54 = vld [vmem:[%s6793_s1 + $0x460] sm:$0xff] }
  0xcf   : > { %4921 = vmatpush3.msra.mxu1 %v3999_v46  ;;  %5000 = vmatprep.subr.mxu0 %v4015_v29  ;;  %v6829_v46 = vld [vmem:[#allocation10_spill] sm:$0xff] }
  0xd0   : > { %4807 = vmatprep.mubr.f32.mxu1 %v5676_v60  ;;  %5001 = vmatpush3.msra.mxu0 %v4015_v29  ;;  %v4013_v60 = vld [vmem:[%s6793_s1 + $0x308] sm:$0xff]  ;;  %v2560_v29 = vld [vmem:[#allocation2 + $0x80] sm:$0xff] }
  0xd1   : > { %4808 = vmatmul.mubr.f32.gmra.mxu1 %v5684_v2  ;;  %4887 = vmatprep.mubr.f32.mxu0 %v5263_v53  ;;  %v6114_v2 = vld [vmem:[#allocation2 + $0x180] sm:$0xff]  ;;  %v6831_v53 = vld [vmem:[#allocation12_spill] sm:$0xff] }
  0xd2   : > { %4922 = vmatprep.subr.mxu1 %v3998_v9  ;;  %4888 = vmatmul.mubr.f32.gmra.mxu0 %v5264_v12  ;;  %v2562_v12 = vld [vmem:[#allocation2 + $0x98] sm:$0xff] }
  0xd3   : > { %4923 = vmatpush3.msra.mxu1 %v3998_v9  ;;  %5002 = vmatprep.subr.mxu0 %v4014_v50  ;;  %v2561_v9 = vld [vmem:[#allocation2 + $0x90] sm:$0xff] }
  0xd4   : > { %4810 = vmatprep.mubr.f32.mxu1 %v5700_v26  ;;  %5003 = vmatpush3.msra.mxu0 %v4014_v50  ;;  %v3996_v26 = vld [vmem:[%s6793_s1 + $0x280] sm:$0xff]  ;;  %v4039_v50 = vld [vmem:[%s6793_s1 + $0x3d8] sm:$0xff] }
  0xd5   : > { %4811 = vmatmul.mubr.f32.gmra.mxu1 %v5715_v51  ;;  %4890 = vmatprep.mubr.f32.mxu0 %v5265_v17  ;;  %v4012_v51 = vld [vmem:[%s6793_s1 + $0x300] sm:$0xff] }
  0xd6   : > { %4924 = vmatprep.subr.mxu1 %v3997_v15  ;;  %4891 = vmatmul.mubr.f32.gmra.mxu0 %v5266_v23  ;;  %v2563_v23 = vld [vmem:[#allocation2 + $0xa8] sm:$0xff] }
  0xd7   : > { %4925 = vmatpush3.msra.mxu1 %v3997_v15  ;;  %5004 = vmatprep.subr.mxu0 %v4013_v60  ;;  %v6832_v15 = vld [vmem:[#allocation13_spill] sm:$0xff] }
  0xd8   : > { %4813 = vmatprep.mubr.f32.mxu1 %v6114_v2  ;;  %5005 = vmatpush3.msra.mxu0 %v4013_v60  ;;  %v4055_v60 = vld [vmem:[%s6793_s1 + $0x458] sm:$0xff] }
  0xd9   : > { %4814 = vmatmul.mubr.f32.gmra.mxu1 %v6116_v20  ;;  %4893 = vmatprep.mubr.f32.mxu0 %v6823_v27  ;;  %v6833_v27 = vld [vmem:[#allocation14_spill] sm:$0xff] }
  0xda   : > { %4926 = vmatprep.subr.mxu1 %v3996_v26  ;;  %4894 = vmatmul.mubr.f32.gmra.mxu0 %v6824_v30  ;;  %v2564_v30 = vld [vmem:[#allocation2 + $0xb0] sm:$0xff] }
  0xdb   : > { %4927 = vmatpush3.msra.mxu1 %v3996_v26  ;;  %5006 = vmatprep.subr.mxu0 %v4012_v51  ;;  %v4038_v26 = vld [vmem:[%s6793_s1 + $0x3d0] sm:$0xff] }
  0xdc   : > { %4928 = vmatprep.mubr.f32.mxu1 %v5742_v59  ;;  %5007 = vmatpush3.msra.mxu0 %v4012_v51  ;;  %v2556_v59 = vld [vmem:[#allocation2 + $0x50] sm:$0xff] }
  0xdd   : > { %4929 = vmatmul.mubr.f32.vlgmr.msra.gmra.mxu1 %v5748_v3  ;;  %5008 = vmatprep.mubr.f32.mxu0 %v2553_v33  ;;  %v4058_v3 = vld [vmem:[%s6793_s1 + $0x470] sm:$0xff] }
  0xde   : > { %5056 = vmatprep.subr.mxu1 %v4043_v36  ;;  %5009 = vmatmul.mubr.f32.vlgmr.msra.gmra.mxu0 %v2554_v62  ;;  %v4054_v62 = vld [vmem:[%s6793_s1 + $0x450] sm:$0xff] }
  0xdf   : > { %5057 = vmatpush3.msra.mxu1 %v4043_v36  ;;  %5136 = vmatprep.subr.mxu0 %v4059_v45  ;;  %v6834_v36 = vld [vmem:[#allocation15_spill] sm:$0xff] }
  0xe0   : > { %4931 = vmatprep.mubr.f32.mxu1 %v6825_v5  ;;  %5137 = vmatpush3.msra.mxu0 %v4059_v45  ;;  %v6835_v5 = vld [vmem:[#allocation16_spill] sm:$0xff] }
  0xe1   : > { %4932 = vmatmul.mubr.f32.gmra.mxu1 %v6826_v58  ;;  %5011 = vmatprep.mubr.f32.mxu0 %v2555_v35  ;;  %v4037_v35 = vld [vmem:[%s6793_s1 + $0x3c8] sm:$0xff] }
  0xe2   : > { %5058 = vmatprep.subr.mxu1 %v4042_v52  ;;  %5012 = vmatmul.mubr.f32.gmra.mxu0 %v2556_v59  ;;  %v4053_v59 = vld [vmem:[%s6793_s1 + $0x448] sm:$0xff] }
  0xe3   : > { %5059 = vmatpush3.msra.mxu1 %v4042_v52  ;;  %5138 = vmatprep.subr.mxu0 %v4058_v3 }
  0xe4   : > { %4934 = vmatprep.mubr.f32.mxu1 %v6827_v37  ;;  %5139 = vmatpush3.msra.mxu0 %v4058_v3 }
  0xe5   : > { %4935 = vmatmul.mubr.f32.gmra.mxu1 %v6828_v32  ;;  %5014 = vmatprep.mubr.f32.mxu0 %v2557_v47  ;;  %v4036_v47 = vld [vmem:[%s6793_s1 + $0x3c0] sm:$0xff] }
  0xe6   : > { %5060 = vmatprep.subr.mxu1 %v4041_v63  ;;  %5015 = vmatmul.mubr.f32.gmra.mxu0 %v2558_v24  ;;  %v2571_v24 = vld [vmem:[#allocation2 + $0x108] sm:$0xff] }
  0xe7   : > { %5061 = vmatpush3.msra.mxu1 %v4041_v63  ;;  %5140 = vmatprep.subr.mxu0 %v4057_v4 }
  0xe8   : > { %4937 = vmatprep.mubr.f32.mxu1 %v6829_v46  ;;  %5141 = vmatpush3.msra.mxu0 %v4057_v4 }
  0xe9   : > { %4938 = vmatmul.mubr.f32.gmra.mxu1 %v6830_v38  ;;  %5017 = vmatprep.mubr.f32.mxu0 %v2559_v14 }
  0xea   : > { %5062 = vmatprep.subr.mxu1 %v4040_v44  ;;  %5018 = vmatmul.mubr.f32.gmra.mxu0 %v2560_v29  ;;  %v4049_v29 = vld [vmem:[%s6793_s1 + $0x428] sm:$0xff] }
  0xeb   : > { %5063 = vmatpush3.msra.mxu1 %v4040_v44  ;;  %5142 = vmatprep.subr.mxu0 %v4056_v54  ;;  %v2573_v44 = vld [vmem:[#allocation2 + $0x120] sm:$0xff] }
  0xec   : > { %4940 = vmatprep.mubr.f32.mxu1 %v6831_v53  ;;  %5143 = vmatpush3.msra.mxu0 %v4056_v54  ;;  %v2575_v54 = vld [vmem:[#allocation2 + $0x138] sm:$0xff]  ;;  %v4048_v53 = vld [vmem:[%s6793_s1 + $0x420] sm:$0xff] }
  0xed   : > { %4941 = vmatmul.mubr.f32.gmra.mxu1 %v6832_v15  ;;  %5020 = vmatprep.mubr.f32.mxu0 %v2561_v9  ;;  %v6173_v51 = vpop.f32.mrf.mxu0  ;;  %v4032_v9 = vld [vmem:[%s6793_s1 + $0x3a0] sm:$0xff]  ;;  %v2577_v15 = vld [vmem:[#allocation2 + $0x150] sm:$0xff] }
  0xee   : > { %5064 = vmatprep.subr.mxu1 %v4039_v50  ;;  %5021 = vmatmul.mubr.f32.gmra.mxu0 %v2562_v12 }
  0xef   : > { %5065 = vmatpush3.msra.mxu1 %v4039_v50  ;;  %5144 = vmatprep.subr.mxu0 %v4055_v60  ;;  %v6182_v45 = vpop.f32.mrf.mxu0 }
  0xf0   : > { %v6168_v17 = vpop.f32.mrf.mxu1  ;;  %4943 = vmatprep.mubr.f32.mxu1 %v6833_v27  ;;  %5145 = vmatpush3.msra.mxu0 %v4055_v60  ;;  %v4031_v60 = vld [vmem:[%s6793_s1 + $0x398] sm:$0xff] }
  0xf1   : > { %4944 = vmatmul.mubr.f32.gmra.mxu1 %v6834_v36  ;;  %5023 = vmatprep.mubr.f32.mxu0 %v2563_v23  ;;  %v4047_v23 = vld [vmem:[%s6793_s1 + $0x418] sm:$0xff] }
  0xf2   : > { %v6176_v33 = vpop.f32.mrf.mxu1  ;;  %5066 = vmatprep.subr.mxu1 %v4038_v26  ;;  %5024 = vmatmul.mubr.f32.gmra.mxu0 %v2564_v30  ;;  %v2579_v30 = vld [vmem:[#allocation2 + $0x168] sm:$0xff] }
  0xf3   : > { %5067 = vmatpush3.msra.mxu1 %v4038_v26  ;;  %5146 = vmatprep.subr.mxu0 %v4054_v62  ;;  %v6194_v58 = vpop.f32.mrf.mxu0 }
  0xf4   : > { %v6187_v52 = vpop.f32.mrf.mxu1  ;;  %4946 = vmatprep.mubr.f32.mxu1 %v6835_v5  ;;  %5147 = vmatpush3.msra.mxu0 %v4054_v62  ;;  %v4046_v62 = vld [vmem:[%s6793_s1 + $0x410] sm:$0xff]  ;;  %v4029_v5 = vld [vmem:[%s6793_s1 + $0x388] sm:$0xff] }
  0xf5   : > { %4947 = vmatmul.mubr.f32.gmra.mxu1 %v5832_v18  ;;  %5026 = vmatprep.mubr.f32.mxu0 %v6020_v57  ;;  %v6203_v63 = vpop.f32.mrf.mxu0  ;;  %v4052_v18 = vld [vmem:[%s6793_s1 + $0x440] sm:$0xff] }
  0xf6   : > { %v6196_v3 = vpop.f32.mrf.mxu1  ;;  %5068 = vmatprep.subr.mxu1 %v4037_v35  ;;  %5027 = vmatmul.mubr.f32.gmra.mxu0 %v6023_v39  ;;  %v4035_v39 = vld [vmem:[%s6793_s1 + $0x3b8] sm:$0xff] }
  0xf7   : > { %5069 = vmatpush3.msra.mxu1 %v4037_v35  ;;  %5148 = vmatprep.subr.mxu0 %v4053_v59 }
  0xf8   : > { %4949 = vmatprep.mubr.f32.mxu1 %v5840_v42  ;;  %5149 = vmatpush3.msra.mxu0 %v4053_v59 }
  0xf9   : > { %4950 = vmatmul.mubr.f32.gmra.mxu1 %v5846_v61  ;;  %v6210_v57 = vpop.f32.mrf.mxu1  ;;  %5029 = vmatprep.mubr.f32.mxu0 %v6038_v49  ;;  %v2570_v61 = vld [vmem:[#allocation2 + $0xf8] sm:$0xff] }
  0xfa   : > { %5070 = vmatprep.subr.mxu1 %v4036_v47  ;;  %5030 = vmatmul.mubr.f32.gmra.mxu0 %v6041_v10  ;;  %v4051_v49 = vld [vmem:[%s6793_s1 + $0x438] sm:$0xff] }
  0xfb   : > { %5071 = vmatpush3.msra.mxu1 %v4036_v47  ;;  %v6217_v42 = vpop.f32.mrf.mxu0  ;;  %v6219_v37 = vpop.f32.mrf.mxu1  ;;  %5150 = vmatprep.subr.mxu0 %v4052_v18 }
  0xfc   : > { %4952 = vmatprep.mubr.f32.mxu1 %v5854_v31  ;;  %5151 = vmatpush3.msra.mxu0 %v4052_v18  ;;  %v4034_v31 = vld [vmem:[%s6793_s1 + $0x3b0] sm:$0xff]  ;;  %v6309_v18 = vld [vmem:[#allocation2 + $0x182] sm:$0xff] }
  0xfd   : > { %4953 = vmatmul.mubr.f32.gmra.mxu1 %v5860_v7  ;;  %v6226_v10 = vpop.f32.mrf.mxu0  ;;  %5032 = vmatprep.mubr.f32.mxu0 %v6056_v56  ;;  %v2572_v7 = vld [vmem:[#allocation2 + $0x110] sm:$0xff] }
  0xfe   : > { %5072 = vmatprep.subr.mxu1 %v4035_v39  ;;  %5033 = vmatmul.mubr.f32.gmra.mxu0 %v2570_v61  ;;  %v4050_v56 = vld [vmem:[%s6793_s1 + $0x430] sm:$0xff] }
  0xff   : > { %5073 = vmatpush3.msra.mxu1 %v4035_v39  ;;  %v6232_v32 = vpop.f32.mrf.mxu1  ;;  %5152 = vmatprep.subr.mxu0 %v4051_v49  ;;  %v6312_v39 = vld [vmem:[#allocation2 + $0x18a] sm:$0xff] }
 0x100   : > { %4955 = vmatprep.mubr.f32.mxu1 %v5868_v55  ;;  %5153 = vmatpush3.msra.mxu0 %v4051_v49  ;;  %v4033_v55 = vld [vmem:[%s6793_s1 + $0x3a8] sm:$0xff]  ;;  %v2923_v49 = vld [vmem:[#allocation2 + $0x31] sm:$0xff] }
 0x101   : > { %4956 = vmatmul.mubr.f32.gmra.mxu1 %v5874_v11  ;;  %v6239_v4 = vpop.f32.mrf.mxu0  ;;  %v6241_v14 = vpop.f32.mrf.mxu1  ;;  %5035 = vmatprep.mubr.f32.mxu0 %v2571_v24  ;;  %v2574_v11 = vld [vmem:[#allocation2 + $0x128] sm:$0xff]  ;;  %v5267_v24 = vld [vmem:[#allocation2] sm:$0xff] }
 0x102   : > { %5074 = vmatprep.subr.mxu1 %v4034_v31  ;;  %5036 = vmatmul.mubr.f32.gmra.mxu0 %v2572_v7 }
 0x103   : > { %5075 = vmatpush3.msra.mxu1 %v4034_v31  ;;  %v6246_v46 = vpop.f32.mrf.mxu0  ;;  %5154 = vmatprep.subr.mxu0 %v4050_v56  ;;  %v2924_v31 = vld [vmem:[#allocation2 + $0x39] sm:$0xff] }
 0x104   : > { %4958 = vmatprep.mubr.f32.mxu1 %v5882_v6  ;;  %5155 = vmatpush3.msra.mxu0 %v4050_v56  ;;  %v3293_v56 = vld [vmem:[#allocation2 + $0x32] sm:$0xff] }
 0x105   : > { %4959 = vmatmul.mubr.f32.gmra.mxu1 %v5888_v16  ;;  %v6253_v38 = vpop.f32.mrf.mxu1  ;;  %5038 = vmatprep.mubr.f32.mxu0 %v2573_v44  ;;  %v2576_v16 = vld [vmem:[#allocation2 + $0x140] sm:$0xff]  ;;  %v2925_v44 = vld [vmem:[#allocation2 + $0x49] sm:$0xff] }
 0x106   : > { %5076 = vmatprep.subr.mxu1 %v4033_v55  ;;  %5039 = vmatmul.mubr.f32.gmra.mxu0 %v2574_v11 }
 0x107   : > { %5077 = vmatpush3.msra.mxu1 %v4033_v55  ;;  %v6258_v6 = vpop.f32.mrf.mxu0  ;;  %v6260_v50 = vpop.f32.mrf.mxu1  ;;  %5156 = vmatprep.subr.mxu0 %v4049_v29  ;;  %v3294_v55 = vld [vmem:[#allocation2 + $0x3a] sm:$0xff] }
 0x108   : > { %4961 = vmatprep.mubr.f32.mxu1 %v5896_v8  ;;  %5157 = vmatpush3.msra.mxu0 %v4049_v29  ;;  %v3295_v29 = vld [vmem:[#allocation2 + $0x4a] sm:$0xff] }
 0x109   : > { %4962 = vmatmul.mubr.f32.gmra.mxu1 %v5902_v21  ;;  %v6267_v12 = vpop.f32.mrf.mxu0  ;;  %5041 = vmatprep.mubr.f32.mxu0 %v2575_v54  ;;  %v2578_v21 = vld [vmem:[#allocation2 + $0x158] sm:$0xff] }
 0x10a   : > { %5078 = vmatprep.subr.mxu1 %v4032_v9  ;;  %5042 = vmatmul.mubr.f32.gmra.mxu0 %v2576_v16 }
 0x10b   : > { %5079 = vmatpush3.msra.mxu1 %v4032_v9  ;;  %v6272_v8 = vpop.f32.mrf.mxu1  ;;  %5158 = vmatprep.subr.mxu0 %v4048_v53  ;;  %v2926_v9 = vld [vmem:[#allocation2 + $0x51] sm:$0xff] }
 0x10c   : > { %4964 = vmatprep.mubr.f32.mxu1 %v5910_v13  ;;  %5159 = vmatpush3.msra.mxu0 %v4048_v53  ;;  %v4030_v13 = vld [vmem:[%s6793_s1 + $0x390] sm:$0xff] }
 0x10d   : > { %4965 = vmatmul.mubr.f32.gmra.mxu1 %v5916_v28  ;;  %v6279_v26 = vpop.f32.mrf.mxu0  ;;  %v6281_v27 = vpop.f32.mrf.mxu1  ;;  %5044 = vmatprep.mubr.f32.mxu0 %v2577_v15  ;;  %v2580_v28 = vld [vmem:[#allocation2 + $0x170] sm:$0xff]  ;;  %v2927_v15 = vld [vmem:[#allocation2 + $0x61] sm:$0xff] }
 0x10e   : > { %5080 = vmatprep.subr.mxu1 %v4031_v60  ;;  %5045 = vmatmul.mubr.f32.gmra.mxu0 %v2578_v21 }
 0x10f   : > { %5081 = vmatpush3.msra.mxu1 %v4031_v60  ;;  %v6286_v36 = vpop.f32.mrf.mxu0  ;;  %5160 = vmatprep.subr.mxu0 %v4047_v23 }
 0x110   : > { %4967 = vmatprep.mubr.f32.mxu1 %v5924_v19  ;;  %5161 = vmatpush3.msra.mxu0 %v4047_v23  ;;  %v3296_v23 = vld [vmem:[#allocation2 + $0x52] sm:$0xff] }
 0x111   : > { %4968 = vmatmul.mubr.f32.gmra.mxu1 %v5930_v34  ;;  %v6293_v35 = vpop.f32.mrf.mxu1  ;;  %5047 = vmatprep.mubr.f32.mxu0 %v2579_v30  ;;  %v4045_v34 = vld [vmem:[%s6793_s1 + $0x408] sm:$0xff] }
 0x112   : > { %5082 = vmatprep.subr.mxu1 %v4030_v13  ;;  %5048 = vmatmul.mubr.f32.gmra.mxu0 %v2580_v28  ;;  %v3297_v28 = vld [vmem:[#allocation2 + $0x62] sm:$0xff] }
 0x113   : > { %5083 = vmatpush3.msra.mxu1 %v4030_v13  ;;  %v6298_v59 = vpop.f32.mrf.mxu0  ;;  %v6300_v19 = vpop.f32.mrf.mxu1  ;;  %5162 = vmatprep.subr.mxu0 %v4046_v62 }
 0x114   : > { %4970 = vmatprep.mubr.f32.mxu1 %v5938_v25  ;;  %5163 = vmatpush3.msra.mxu0 %v4046_v62 }
 0x115   : > { %4971 = vmatmul.mubr.f32.gmra.mxu1 %v5944_v40  ;;  %v6307_v47 = vpop.f32.mrf.mxu0  ;;  %5050 = vmatprep.mubr.f32.mxu0 %v6114_v2  ;;  %v4028_v40 = vld [vmem:[%s6793_s1 + $0x380] sm:$0xff] }
 0x116   : > { %5084 = vmatprep.subr.mxu1 %v4029_v5  ;;  %5051 = vmatmul.mubr.f32.gmra.mxu0 %v6116_v20  ;;  %v4044_v20 = vld [vmem:[%s6793_s1 + $0x400] sm:$0xff] }
 0x117   : > { %5085 = vmatpush3.msra.mxu1 %v4029_v5  ;;  %v6315_v25 = vpop.f32.mrf.mxu1  ;;  %5164 = vmatprep.subr.mxu0 %v4045_v34  ;;  %v2928_v5 = vld [vmem:[#allocation2 + $0x69] sm:$0xff] }
 0x118   : > { %4973 = vmatprep.mubr.f32.mxu1 %v6309_v18  ;;  %5165 = vmatpush3.msra.mxu0 %v4045_v34 }
 0x119   : > { %4974 = vmatmul.mubr.f32.gmra.mxu1 %v6312_v39  ;;  %v6322_v61 = vpop.f32.mrf.mxu0  ;;  %v6324_v2 = vpop.f32.mrf.mxu1  ;;  %5053 = vmatprep.mubr.f32.mxu0 %v5267_v24 }
 0x11a   : > { %5086 = vmatprep.subr.mxu1 %v4028_v40  ;;  %5054 = vmatmul.mubr.f32.gmra.mxu0 %v5267_v24  ;;  %v3298_v24 = vld [vmem:[#allocation2 + $0x6a] sm:$0xff] }
 0x11b   : > { %5087 = vmatpush3.msra.mxu1 %v4028_v40  ;;  %v6329_v7 = vpop.f32.mrf.mxu0  ;;  %5166 = vmatprep.subr.mxu0 %v4044_v20 }
 0x11c   : > { %5088 = vmatprep.mubr.f32.mxu1 %v2923_v49  ;;  %5167 = vmatpush3.msra.mxu0 %v4044_v20  ;;  %v4610_v11 = vpop.f32.mrf.mxu1  ;;  %v2929_v20 = vld [vmem:[#allocation2 + $0x79] sm:$0xff] }
 0x11d   : > { %5089 = vmatmul.mubr.f32.vlgmr.msra.gmra.mxu1 %v2924_v31  ;;  %v1009_v54 = vadd.f32 %v4610_v11, %v6173_v51  ;;  %5168 = vmatprep.mubr.f32.mxu0 %v3293_v56  ;;  %v2930_v11 = vld [vmem:[#allocation2 + $0x81] sm:$0xff] }
 0x11e   : > { %5091 = vmatprep.mubr.f32.mxu1 %v2925_v44  ;;  %v4690_v16 = vpop.f32.mrf.mxu0  ;;  %5169 = vmatmul.mubr.f32.vlgmr.msra.gmra.mxu0 %v3294_v55  ;;  %v849_v53 = vpop.f32.mrf.mxu1  ;;  %v3299_v44 = vld [vmem:[#allocation2 + $0x7a] sm:$0xff] }
 0x11f   : > { %v6332_v60 = vadd.f32 %v4690_v16, %v1009_v54  ;;  %v1008_v21 = vadd.f32 %v849_v53, %v6182_v45  ;;  %5171 = vmatprep.mubr.f32.mxu0 %v3295_v29  ;;  %v3300_v53 = vld [vmem:[#allocation2 + $0x82] sm:$0xff] }
 0x120   : > { %v1219_v30 = vpop.f32.mrf.mxu0 }
 0x121   : > { %v4613_v13 = vpop.f32.mrf.mxu1  ;;  %5092 = vmatmul.mubr.f32.gmra.mxu1 %v2926_v9  ;;  %v6335_v62 = vadd.f32 %v1219_v30, %v1008_v21  ;;  %v2931_v9 = vld [vmem:[#allocation2 + $0x91] sm:$0xff] }
 0x122   : > { %v1011_v51 = vadd.f32 %v4613_v13, %v6194_v58  ;;  %5094 = vmatprep.mubr.f32.mxu1 %v2927_v15  ;;  %v4693_v34 = vpop.f32.mrf.mxu0  ;;  %5172 = vmatmul.mubr.f32.gmra.mxu0 %v3296_v23  ;;  %v3301_v23 = vld [vmem:[#allocation2 + $0x92] sm:$0xff] }
 0x123   : > { %v859_v40 = vpop.f32.mrf.mxu1  ;;  %5174 = vmatprep.mubr.f32.mxu0 %v3297_v28  ;;  %v2932_v13 = vld [vmem:[#allocation2 + $0x99] sm:$0xff] }
 0x124   : > { %v6338_v49 = vadd.f32 %v4693_v34, %v1011_v51  ;;  %v1010_v45 = vadd.f32 %v859_v40, %v6203_v63  ;;  %v1229_v31 = vpop.f32.mrf.mxu0  ;;  %v3302_v40 = vld [vmem:[#allocation2 + $0x9a] sm:$0xff] }
 0x125   : > { %v4616_v56 = vpop.f32.mrf.mxu1  ;;  %5095 = vmatmul.mubr.f32.gmra.mxu1 %v2928_v5  ;;  %v2933_v5 = vld [vmem:[#allocation2 + $0xa9] sm:$0xff] }
 0x126   : > { %v6341_v55 = vadd.f32 %v1229_v31, %v1010_v45  ;;  %v1013_v58 = vadd.f32 %v4616_v56, %v6217_v42  ;;  %5097 = vmatprep.mubr.f32.mxu1 %v2929_v20  ;;  %v4696_v29 = vpop.f32.mrf.mxu0  ;;  %5175 = vmatmul.mubr.f32.gmra.mxu0 %v3298_v24  ;;  %v3303_v24 = vld [vmem:[#allocation2 + $0xaa] sm:$0xff] }
 0x127   : > { %v869_v54 = vpop.f32.mrf.mxu1  ;;  %5177 = vmatprep.mubr.f32.mxu0 %v3299_v44  ;;  %v2934_v56 = vld [vmem:[#allocation2 + $0xb1] sm:$0xff] }
 0x128   : > { %v6344_v16 = vadd.f32 %v4696_v29, %v1013_v58  ;;  %v1012_v63 = vadd.f32 %v869_v54, %v6226_v10  ;;  %v1239_v15 = vpop.f32.mrf.mxu0 }
 0x129   : > { %v4619_v21 = vpop.f32.mrf.mxu1  ;;  %5098 = vmatmul.mubr.f32.gmra.mxu1 %v2930_v11 }
 0x12a   : > { %v6347_v30 = vadd.f32 %v1239_v15, %v1012_v63  ;;  %v1015_v42 = vadd.f32 %v4619_v21, %v6239_v4  ;;  %5100 = vmatprep.mubr.f32.mxu1 %v2931_v9  ;;  %v4699_v28 = vpop.f32.mrf.mxu0  ;;  %5178 = vmatmul.mubr.f32.gmra.mxu0 %v3300_v53  ;;  %v3305_v63 = vld [vmem:[#allocation2 + $0xc2] sm:$0xff] }
 0x12b   : > { %v879_v51 = vpop.f32.mrf.mxu1  ;;  %5180 = vmatprep.mubr.f32.mxu0 %v3301_v23 }
 0x12c   : > { %v6350_v34 = vadd.f32 %v4699_v28, %v1015_v42  ;;  %v1014_v10 = vadd.f32 %v879_v51, %v6246_v46  ;;  %v1249_v20 = vpop.f32.mrf.mxu0  ;;  %v3304_v46 = vld [vmem:[#allocation2 + $0xb2] sm:$0xff]  ;;  %v3307_v51 = vld [vmem:[#allocation2 + $0xda] sm:$0xff] }
 0x12d   : > { %v4622_v45 = vpop.f32.mrf.mxu1  ;;  %5101 = vmatmul.mubr.f32.gmra.mxu1 %v2932_v13 }
 0x12e   : > { %v6353_v31 = vadd.f32 %v1249_v20, %v1014_v10  ;;  %v1017_v4 = vadd.f32 %v4622_v45, %v6258_v6  ;;  %5103 = vmatprep.mubr.f32.mxu1 %v2933_v5  ;;  %v4702_v44 = vpop.f32.mrf.mxu0  ;;  %5181 = vmatmul.mubr.f32.gmra.mxu0 %v3302_v40  ;;  %v3308_v20 = vld [vmem:[#allocation2 + $0xe2] sm:$0xff] }
 0x12f   : > { %v889_v58 = vpop.f32.mrf.mxu1  ;;  %5183 = vmatprep.mubr.f32.mxu0 %v3303_v24 }
 0x130   : > { %v6356_v11 = vadd.f32 %v4702_v44, %v1017_v4  ;;  %v1016_v29 = vadd.f32 %v889_v58, %v6267_v12  ;;  %v1259_v54 = vpop.f32.mrf.mxu0  ;;  %v3306_v12 = vld [vmem:[#allocation2 + $0xca] sm:$0xff] }
 0x131   : > { %v4625_v9 = vpop.f32.mrf.mxu1  ;;  %5104 = vmatmul.mubr.f32.gmra.mxu1 %v2934_v56  ;;  %v2941_v44 = vld [vmem:[#allocation2 + $0x109] sm:$0xff] }
 0x132   : > { %v6359_v53 = vadd.f32 %v1259_v54, %v1016_v29  ;;  %v1019_v15 = vadd.f32 %v4625_v9, %v6279_v26  ;;  %5106 = vmatprep.mubr.f32.mxu1 %v6026_v41  ;;  %v4705_v6 = vpop.f32.mrf.mxu0  ;;  %5184 = vmatmul.mubr.f32.gmra.mxu0 %v3304_v46  ;;  %v3310_v29 = vld [vmem:[#allocation2 + $0xfa] sm:$0xff] }
 0x133   : > { %v899_v21 = vpop.f32.mrf.mxu1  ;;  %5186 = vmatprep.mubr.f32.mxu0 %v3305_v63 }
 0x134   : > { %v6363_v23 = vadd.f32 %v4705_v6, %v1019_v15  ;;  %v1018_v42 = vadd.f32 %v899_v21, %v6286_v36  ;;  %v1269_v13 = vpop.f32.mrf.mxu0  ;;  %v2943_v6 = vld [vmem:[#allocation2 + $0x121] sm:$0xff] }
 0x135   : > { %v4628_v28 = vpop.f32.mrf.mxu1  ;;  %5107 = vmatmul.mubr.f32.gmra.mxu1 %v6032_v1  ;;  %v3309_v1 = vld [vmem:[#allocation2 + $0xf2] sm:$0xff] }
 0x136   : > { %v6367_v5 = vadd.f32 %v1269_v13, %v1018_v42  ;;  %v1021_v26 = vadd.f32 %v4628_v28, %v6298_v59  ;;  %5109 = vmatprep.mubr.f32.mxu1 %v6044_v22  ;;  %v4708_v41 = vpop.f32.mrf.mxu0  ;;  %5187 = vmatmul.mubr.f32.gmra.mxu0 %v3306_v12  ;;  %v3312_v42 = vld [vmem:[#allocation2 + $0x112] sm:$0xff] }
 0x137   : > { %v909_v10 = vpop.f32.mrf.mxu1  ;;  %5189 = vmatprep.mubr.f32.mxu0 %v3307_v51  ;;  %v2944_v51 = vld [vmem:[#allocation2 + $0x129] sm:$0xff] }
 0x138   : > { %v6371_v40 = vadd.f32 %v4708_v41, %v1021_v26  ;;  %v1020_v36 = vadd.f32 %v909_v10, %v6307_v47  ;;  %v1279_v45 = vpop.f32.mrf.mxu0  ;;  %v2945_v10 = vld [vmem:[#allocation2 + $0x139] sm:$0xff] }
 0x139   : > { %v4631_v24 = vpop.f32.mrf.mxu1  ;;  %5110 = vmatmul.mubr.f32.gmra.mxu1 %v6050_v43  ;;  %v3311_v43 = vld [vmem:[#allocation2 + $0x10a] sm:$0xff] }
 0x13a   : > { %v6375_v4 = vadd.f32 %v1279_v45, %v1020_v36  ;;  %v1023_v59 = vadd.f32 %v4631_v24, %v6322_v61  ;;  %5112 = vmatprep.mubr.f32.mxu1 %v6060_v0  ;;  %v4711_v22 = vpop.f32.mrf.mxu0  ;;  %5190 = vmatmul.mubr.f32.gmra.mxu0 %v3308_v20  ;;  %v2942_v0 = vld [vmem:[#allocation2 + $0x111] sm:$0xff] }
 0x13b   : > { %v919_v56 = vpop.f32.mrf.mxu1  ;;  %5192 = vmatprep.mubr.f32.mxu0 %v3309_v1  ;;  %v3314_v20 = vld [vmem:[#allocation2 + $0x12a] sm:$0xff]  ;;  %v3315_v1 = vld [vmem:[#allocation2 + $0x13a] sm:$0xff] }
 0x13c   : > { %v6379_v58 = vadd.f32 %v4711_v22, %v1023_v59  ;;  %v1022_v47 = vadd.f32 %v919_v56, %v6329_v7  ;;  %v1289_v46 = vpop.f32.mrf.mxu0  ;;  %v2946_v22 = vld [vmem:[#allocation2 + $0x141] sm:$0xff] }
 0x13d   : > { %v4634_v54 = vpop.f32.mrf.mxu1  ;;  %5113 = vmatmul.mubr.f32.gmra.mxu1 %v6066_v48  ;;  %v3313_v48 = vld [vmem:[#allocation2 + $0x122] sm:$0xff] }
 0x13e   : > { %v6383_v9 = vadd.f32 %v1289_v46, %v1022_v47  ;;  %v1025_v61 = vadd.f32 %v4634_v54, %v6168_v17  ;;  %5115 = vmatprep.mubr.f32.mxu1 %v2941_v44  ;;  %v4714_v63 = vpop.f32.mrf.mxu0  ;;  %5193 = vmatmul.mubr.f32.gmra.mxu0 %v3310_v29  ;;  %v2947_v47 = vld [vmem:[#allocation2 + $0x151] sm:$0xff]  ;;  %v3316_v46 = vld [vmem:[#allocation2 + $0x142] sm:$0xff] }
 0x13f   : > { %v929_v15 = vpop.f32.mrf.mxu1  ;;  %5195 = vmatprep.mubr.f32.mxu0 %v3311_v43 }
 0x140   : > { %v6386_v21 = vadd.f32 %v4714_v63, %v1025_v61  ;;  %v1024_v7 = vadd.f32 %v929_v15, %v6176_v33  ;;  %v1299_v12 = vpop.f32.mrf.mxu0  ;;  %v3317_v61 = vld [vmem:[#allocation2 + $0x152] sm:$0xff] }
 0x141   : > { %v4637_v13 = vpop.f32.mrf.mxu1  ;;  %5116 = vmatmul.mubr.f32.gmra.mxu1 %v2942_v0  ;;  %v2948_v63 = vld [vmem:[#allocation2 + $0x159] sm:$0xff] }
 0x142   : > { %v6389_v28 = vadd.f32 %v1299_v12, %v1024_v7  ;;  %v1027_v17 = vadd.f32 %v4637_v13, %v6187_v52  ;;  %5118 = vmatprep.mubr.f32.mxu1 %v2943_v6  ;;  %v4717_v26 = vpop.f32.mrf.mxu0  ;;  %5196 = vmatmul.mubr.f32.gmra.mxu0 %v3312_v42  ;;  %v2949_v7 = vld [vmem:[#allocation2 + $0x169] sm:$0xff]  ;;  %v3318_v12 = vld [vmem:[#allocation2 + $0x15a] sm:$0xff] }
 0x143   : > { %v939_v41 = vpop.f32.mrf.mxu1  ;;  %5198 = vmatprep.mubr.f32.mxu0 %v3313_v48 }
 0x144   : > { %v6392_v36 = vadd.f32 %v4717_v26, %v1027_v17  ;;  %v1026_v33 = vadd.f32 %v939_v41, %v6196_v3  ;;  %v1309_v45 = vpop.f32.mrf.mxu0  ;;  %v3319_v17 = vld [vmem:[#allocation2 + $0x16a] sm:$0xff] }
 0x145   : > { %v4640_v24 = vpop.f32.mrf.mxu1  ;;  %5119 = vmatmul.mubr.f32.gmra.mxu1 %v2944_v51  ;;  %v2950_v26 = vld [vmem:[#allocation2 + $0x171] sm:$0xff] }
 0x146   : > { %v6395_v59 = vadd.f32 %v1309_v45, %v1026_v33  ;;  %v1029_v52 = vadd.f32 %v4640_v24, %v6210_v57  ;;  %5121 = vmatprep.mubr.f32.mxu1 %v2945_v10  ;;  %v4720_v56 = vpop.f32.mrf.mxu0  ;;  %5199 = vmatmul.mubr.f32.gmra.mxu0 %v3314_v20 }
 0x147   : > { %v949_v44 = vpop.f32.mrf.mxu1  ;;  %5201 = vmatprep.mubr.f32.mxu0 %v3315_v1 }
 0x148   : > { %v6398_v29 = vadd.f32 %v4720_v56, %v1029_v52  ;;  %v1028_v3 = vadd.f32 %v949_v44, %v6219_v37  ;;  %v1319_v54 = vpop.f32.mrf.mxu0  ;;  %v2953_v44 = vld [vmem:[#allocation2 + $0x199] sm:$0xff] }
 0x149   : > { %v4643_v43 = vpop.f32.mrf.mxu1  ;;  %5122 = vmatmul.mubr.f32.gmra.mxu1 %v2946_v22  ;;  %v5268_v22 = vld [vmem:[#allocation2 + $0x181] sm:$0xff] }
 0x14a   : > { %v6401_v0 = vadd.f32 %v1319_v54, %v1028_v3  ;;  %v1031_v57 = vadd.f32 %v4643_v43, %v6232_v32  ;;  %5124 = vmatprep.mubr.f32.mxu1 %v2947_v47  ;;  %v4723_v15 = vpop.f32.mrf.mxu0  ;;  %5202 = vmatmul.mubr.f32.gmra.mxu0 %v3316_v46  ;;  %v5269_v54 = vld [vmem:[#allocation2 + $0x189] sm:$0xff]  ;;  %v3323_v43 = vld [vmem:[#allocation2 + $0x19a] sm:$0xff] }
 0x14b   : > { %v959_v6 = vpop.f32.mrf.mxu1  ;;  %5204 = vmatprep.mubr.f32.mxu0 %v3317_v61 }
 0x14c   : > { %v6404_v42 = vadd.f32 %v4723_v15, %v1031_v57  ;;  %v1030_v37 = vadd.f32 %v959_v6, %v6241_v14  ;;  %v1329_v13 = vpop.f32.mrf.mxu0  ;;  %v3320_v14 = vld [vmem:[#allocation2 + $0x172] sm:$0xff]  ;;  %v2954_v57 = vld [vmem:[#allocation2 + $0x1a1] sm:$0xff] }
 0x14d   : > { %v4646_v48 = vpop.f32.mrf.mxu1  ;;  %5125 = vmatmul.mubr.f32.gmra.mxu1 %v2948_v63 }
 0x14e   : > { %v6407_v51 = vadd.f32 %v1329_v13, %v1030_v37  ;;  %v1033_v32 = vadd.f32 %v4646_v48, %v6253_v38  ;;  %5127 = vmatprep.mubr.f32.mxu1 %v2949_v7  ;;  %v4726_v41 = vpop.f32.mrf.mxu0  ;;  %5205 = vmatmul.mubr.f32.gmra.mxu0 %v3318_v12 }
 0x14f   : > { %v969_v10 = vpop.f32.mrf.mxu1  ;;  %5207 = vmatprep.mubr.f32.mxu0 %v3319_v17 }
 0x150   : > { %v6410_v33 = vadd.f32 %v4726_v41, %v1033_v32  ;;  %v1032_v20 = vadd.f32 %v969_v10, %v6260_v50  ;;  %v1339_v45 = vpop.f32.mrf.mxu0 }
 0x151   : > { %v4649_v24 = vpop.f32.mrf.mxu1  ;;  %5128 = vmatmul.mubr.f32.gmra.mxu1 %v2950_v26 }
 0x152   : > { %v6413_v1 = vadd.f32 %v1339_v45, %v1032_v20  ;;  %v1035_v52 = vadd.f32 %v4649_v24, %v6272_v8  ;;  %5130 = vmatprep.mubr.f32.mxu1 %v5268_v22  ;;  %v4729_v38 = vpop.f32.mrf.mxu0  ;;  %5208 = vmatmul.mubr.f32.gmra.mxu0 %v3320_v14 }
 0x153   : > { %v979_v56 = vpop.f32.mrf.mxu1  ;;  %5210 = vmatprep.mubr.f32.mxu0 %v6309_v18  ;;  %v3324_v18 = vld [vmem:[#allocation2 + $0x1a2] sm:$0xff] }
 0x154   : > { %v6416_v47 = vadd.f32 %v4729_v38, %v1035_v52  ;;  %v1034_v3 = vadd.f32 %v979_v56, %v6281_v27  ;;  %v1349_v50 = vpop.f32.mrf.mxu0 }
 0x155   : > { %v4652_v46 = vpop.f32.mrf.mxu1  ;;  %5131 = vmatmul.mubr.f32.gmra.mxu1 %v5269_v54 }
 0x156   : > { %v6420_v61 = vadd.f32 %v1349_v50, %v1034_v3  ;;  %v1037_v8 = vadd.f32 %v4652_v46, %v6293_v35  ;;  %5133 = vmatprep.mubr.f32.mxu1 %v2953_v44  ;;  %v4732_v63 = vpop.f32.mrf.mxu0  ;;  %5211 = vmatmul.mubr.f32.gmra.mxu0 %v6312_v39 }
 0x157   : > { %v989_v15 = vpop.f32.mrf.mxu1  ;;  %5213 = vmatprep.mubr.f32.mxu0 %v3323_v43 }
 0x158   : > { %v6424_v6 = vadd.f32 %v4732_v63, %v1037_v8  ;;  %v1036_v27 = vadd.f32 %v989_v15, %v6300_v19  ;;  %v1359_v7 = vpop.f32.mrf.mxu0 }
 0x159   : > { %v4655_v37 = vpop.f32.mrf.mxu1  ;;  %5134 = vmatmul.mubr.f32.gmra.mxu1 %v2954_v57 }
 0x15a   : > { %v6427_v12 = vadd.f32 %v1359_v7, %v1036_v27  ;;  %v1039_v13 = vadd.f32 %v4655_v37, %v6315_v25  ;;  %v4735_v35 = vpop.f32.mrf.mxu0  ;;  %5214 = vmatmul.mubr.f32.gmra.mxu0 %v3324_v18 }
 0x15b   : > { %v999_v48 = vpop.f32.mrf.mxu1 }
 0x15c   : > { %v6430_v17 = vadd.f32 %v4735_v35, %v1039_v13  ;;  %v1038_v39 = vadd.f32 %v999_v48, %v6324_v2  ;;  %v1369_v32 = vpop.f32.mrf.mxu0 }
 0x15d   : > { %v4770_v26 = vpop.f32.mrf.mxu1 }
 0x15e   : > { %v6433_v41 = vadd.f32 %v1369_v32, %v1038_v39  ;;  %v1749_v19 = vadd.f32 %v4770_v26, %v6332_v60  ;;  %v4850_v10 = vpop.f32.mrf.mxu0 }
 0x15f   : > { %v1589_v20 = vpop.f32.mrf.mxu1 }
 0x160   : > { %v6436_v14 = vadd.f32 %v4850_v10, %v1749_v19  ;;  %v1748_v45 = vadd.f32 %v1589_v20, %v6335_v62  ;;  %v1959_v25 = vpop.f32.mrf.mxu0 }
 0x161   : > { %v4773_v24 = vpop.f32.mrf.mxu1 }
 0x162   : > { %v6439_v52 = vadd.f32 %v1959_v25, %v1748_v45  ;;  %v1751_v22 = vadd.f32 %v4773_v24, %v6338_v49  ;;  %v4853_v38 = vpop.f32.mrf.mxu0 }
 0x163   : > { %v1599_v2 = vpop.f32.mrf.mxu1 }
 0x164   : > { %v6442_v56 = vadd.f32 %v4853_v38, %v1751_v22  ;;  %v1750_v44 = vadd.f32 %v1599_v2, %v6341_v55  ;;  %v1969_v3 = vpop.f32.mrf.mxu0 }
 0x165   : > { %v4776_v60 = vpop.f32.mrf.mxu1 }
 0x166   : > { %v6445_v50 = vadd.f32 %v1969_v3, %v1750_v44  ;;  %v1753_v46 = vadd.f32 %v4776_v60, %v6344_v16  ;;  %v4856_v54 = vpop.f32.mrf.mxu0 }
 0x167   : > { %v1609_v62 = vpop.f32.mrf.mxu1 }
 0x168   : > { %v6448_v43 = vadd.f32 %v4856_v54, %v1753_v46  ;;  %v1752_v8 = vadd.f32 %v1609_v62, %v6347_v30  ;;  %v1979_v57 = vpop.f32.mrf.mxu0 }
 0x169   : > { %v4779_v49 = vpop.f32.mrf.mxu1 }
 0x16a   : > { %v6451_v63 = vadd.f32 %v1979_v57, %v1752_v8  ;;  %v1755_v15 = vadd.f32 %v4779_v49, %v6350_v34  ;;  %v4859_v27 = vpop.f32.mrf.mxu0 }
 0x16b   : > { %v1619_v55 = vpop.f32.mrf.mxu1 }
 0x16c   : > { %v6454_v18 = vadd.f32 %v4859_v27, %v1755_v15  ;;  %v1754_v7 = vadd.f32 %v1619_v55, %v6353_v31  ;;  %v1989_v37 = vpop.f32.mrf.mxu0 }
 0x16d   : > { %v4782_v16 = vpop.f32.mrf.mxu1 }
 0x16e   : > { %v6457_v13 = vadd.f32 %v1989_v37, %v1754_v7  ;;  %v1757_v35 = vadd.f32 %v4782_v16, %v6356_v11  ;;  %v4862_v48 = vpop.f32.mrf.mxu0 }
 0x16f   : > { %v1629_v30 = vpop.f32.mrf.mxu1 }
 0x170   : > { %v6460_v39 = vadd.f32 %v4862_v48, %v1757_v35  ;;  %v1756_v32 = vadd.f32 %v1629_v30, %v6359_v53  ;;  %v1999_v26 = vpop.f32.mrf.mxu0 }
 0x171   : > { %v4785_v34 = vpop.f32.mrf.mxu1 }
 0x172   : > { %v6463_v19 = vadd.f32 %v1999_v26, %v1756_v32  ;;  %v1759_v10 = vadd.f32 %v4785_v34, %v6363_v23  ;;  %v4865_v20 = vpop.f32.mrf.mxu0 }
 0x173   : > { %v1639_v31 = vpop.f32.mrf.mxu1 }
 0x174   : > { %v6466_v45 = vadd.f32 %v4865_v20, %v1759_v10  ;;  %v1758_v25 = vadd.f32 %v1639_v31, %v6367_v5  ;;  %v2009_v24 = vpop.f32.mrf.mxu0 }
 0x175   : > { %v4788_v11 = vpop.f32.mrf.mxu1 }
 0x176   : > { %v6469_v22 = vadd.f32 %v2009_v24, %v1758_v25  ;;  %v1761_v38 = vadd.f32 %v4788_v11, %v6371_v40  ;;  %v4868_v2 = vpop.f32.mrf.mxu0 }
 0x177   : > { %v1649_v53 = vpop.f32.mrf.mxu1 }
 0x178   : > { %v6472_v44 = vadd.f32 %v4868_v2, %v1761_v38  ;;  %v1760_v3 = vadd.f32 %v1649_v53, %v6375_v4  ;;  %v2019_v60 = vpop.f32.mrf.mxu0 }
 0x179   : > { %v4791_v23 = vpop.f32.mrf.mxu1 }
 0x17a   : > { %v6475_v46 = vadd.f32 %v2019_v60, %v1760_v3  ;;  %v1763_v54 = vadd.f32 %v4791_v23, %v6379_v58  ;;  %v4871_v62 = vpop.f32.mrf.mxu0 }
 0x17b   : > { %v1659_v5 = vpop.f32.mrf.mxu1 }
 0x17c   : > { %v6478_v8 = vadd.f32 %v4871_v62, %v1763_v54  ;;  %v1762_v57 = vadd.f32 %v1659_v5, %v6383_v9  ;;  %v2029_v49 = vpop.f32.mrf.mxu0 }
 0x17d   : > { %v4794_v40 = vpop.f32.mrf.mxu1 }
 0x17e   : > { %v6481_v15 = vadd.f32 %v2029_v49, %v1762_v57  ;;  %v1765_v27 = vadd.f32 %v4794_v40, %v6386_v21  ;;  %v4874_v55 = vpop.f32.mrf.mxu0 }
 0x17f   : > { %v1669_v4 = vpop.f32.mrf.mxu1 }
 0x180   : > { %v6484_v7 = vadd.f32 %v4874_v55, %v1765_v27  ;;  %v1764_v37 = vadd.f32 %v1669_v4, %v6389_v28  ;;  %v2039_v16 = vpop.f32.mrf.mxu0 }
 0x181   : > { %v4797_v58 = vpop.f32.mrf.mxu1 }
 0x182   : > { %v6487_v35 = vadd.f32 %v2039_v16, %v1764_v37  ;;  %v1767_v48 = vadd.f32 %v4797_v58, %v6392_v36  ;;  %v4877_v30 = vpop.f32.mrf.mxu0 }
 0x183   : > { %v1679_v9 = vpop.f32.mrf.mxu1 }
 0x184   : > { %v6490_v32 = vadd.f32 %v4877_v30, %v1767_v48  ;;  %v1766_v26 = vadd.f32 %v1679_v9, %v6395_v59  ;;  %v2049_v34 = vpop.f32.mrf.mxu0 }
 0x185   : > { %v4800_v21 = vpop.f32.mrf.mxu1 }
 0x186   : > { %6836 = vst [vmem:[#allocation4_spill] sm:$0xff] %v6490_v32  ;;  %v6493_v10 = vadd.f32 %v2049_v34, %v1766_v26  ;;  %v1769_v20 = vadd.f32 %v4800_v21, %v6398_v29  ;;  %v4880_v31 = vpop.f32.mrf.mxu0 }
 0x187   : > { %v1689_v28 = vpop.f32.mrf.mxu1 }
 0x188   : > { %6837 = vst [vmem:[#allocation5_spill] sm:$0xff] %v6493_v10  ;;  %v6496_v25 = vadd.f32 %v4880_v31, %v1769_v20  ;;  %v1768_v24 = vadd.f32 %v1689_v28, %v6401_v0  ;;  %v2059_v11 = vpop.f32.mrf.mxu0 }
 0x189   : > { %v4803_v36 = vpop.f32.mrf.mxu1 }
 0x18a   : > { %6838 = vst [vmem:[#allocation6_spill] sm:$0xff] %v6496_v25  ;;  %v6499_v38 = vadd.f32 %v2059_v11, %v1768_v24  ;;  %v1771_v2 = vadd.f32 %v4803_v36, %v6404_v42  ;;  %v4883_v53 = vpop.f32.mrf.mxu0 }
 0x18b   : > { %v1699_v59 = vpop.f32.mrf.mxu1 }
 0x18c   : > { %6839 = vst [vmem:[#allocation7_spill] sm:$0xff] %v6499_v38  ;;  %v6502_v3 = vadd.f32 %v4883_v53, %v1771_v2  ;;  %v1770_v60 = vadd.f32 %v1699_v59, %v6407_v51  ;;  %v2069_v23 = vpop.f32.mrf.mxu0 }
 0x18d   : > { %v4806_v29 = vpop.f32.mrf.mxu1 }
 0x18e   : > { %6840 = vst [vmem:[#allocation8_spill] sm:$0xff] %v6502_v3  ;;  %v6505_v54 = vadd.f32 %v2069_v23, %v1770_v60  ;;  %v1773_v62 = vadd.f32 %v4806_v29, %v6410_v33  ;;  %v4886_v5 = vpop.f32.mrf.mxu0 }
 0x18f   : > { %v1709_v0 = vpop.f32.mrf.mxu1 }
 0x190   : > { %6841 = vst [vmem:[#allocation9_spill] sm:$0xff] %v6505_v54  ;;  %v6508_v57 = vadd.f32 %v4886_v5, %v1773_v62  ;;  %v1772_v49 = vadd.f32 %v1709_v0, %v6413_v1  ;;  %v2079_v40 = vpop.f32.mrf.mxu0 }
 0x191   : > { %v4809_v42 = vpop.f32.mrf.mxu1 }
 0x192   : > { %6842 = vst [vmem:[#allocation10_spill] sm:$0xff] %v6508_v57  ;;  %v6511_v27 = vadd.f32 %v2079_v40, %v1772_v49  ;;  %v1775_v55 = vadd.f32 %v4809_v42, %v6416_v47  ;;  %v4889_v4 = vpop.f32.mrf.mxu0 }
 0x193   : > { %v1719_v51 = vpop.f32.mrf.mxu1 }
 0x194   : > { %6843 = vst [vmem:[#allocation11_spill] sm:$0xff] %v6511_v27  ;;  %v6514_v37 = vadd.f32 %v4889_v4, %v1775_v55  ;;  %v1774_v16 = vadd.f32 %v1719_v51, %v6420_v61  ;;  %v2089_v58 = vpop.f32.mrf.mxu0 }
 0x195   : > { %v4812_v33 = vpop.f32.mrf.mxu1 }
 0x196   : > { %6844 = vst [vmem:[#allocation12_spill] sm:$0xff] %v6514_v37  ;;  %v6517_v48 = vadd.f32 %v2089_v58, %v1774_v16  ;;  %v1777_v30 = vadd.f32 %v4812_v33, %v6424_v6  ;;  %v4892_v9 = vpop.f32.mrf.mxu0 }
 0x197   : > { %v1729_v1 = vpop.f32.mrf.mxu1 }
 0x198   : > { %6845 = vst [vmem:[#allocation13_spill] sm:$0xff] %v6517_v48  ;;  %v6520_v26 = vadd.f32 %v4892_v9, %v1777_v30  ;;  %v1776_v34 = vadd.f32 %v1729_v1, %v6427_v12  ;;  %v2099_v21 = vpop.f32.mrf.mxu0 }
 0x199   : > { %v4815_v47 = vpop.f32.mrf.mxu1 }
 0x19a   : > { %6846 = vst [vmem:[#allocation14_spill] sm:$0xff] %v6520_v26  ;;  %v6523_v20 = vadd.f32 %v2099_v21, %v1776_v34  ;;  %v1779_v31 = vadd.f32 %v4815_v47, %v6430_v17  ;;  %v4895_v28 = vpop.f32.mrf.mxu0 }
 0x19b   : > { %v1739_v61 = vpop.f32.mrf.mxu1 }
 0x19c   : > { %6847 = vst [vmem:[#allocation15_spill] sm:$0xff] %v6523_v20  ;;  %v6526_v24 = vadd.f32 %v4895_v28, %v1779_v31  ;;  %v1778_v11 = vadd.f32 %v1739_v61, %v6433_v41  ;;  %v2109_v36 = vpop.f32.mrf.mxu0 }
 0x19d   : > { %v4930_v6 = vpop.f32.mrf.mxu1 }
 0x19e   : > { %6848 = vst [vmem:[#allocation16_spill] sm:$0xff] %v6526_v24  ;;  %v6529_v2 = vadd.f32 %v2109_v36, %v1778_v11  ;;  %v6531_v53 = vpop.f32.mrf.mxu0 }
 0x19f   : > { %v2329_v59 = vpop.f32.mrf.mxu1 }
 0x1a0   : > { %6849 = vst [vmem:[#allocation17_spill] sm:$0xff] %v6529_v2  ;;  %v6533_v12 = vpop.f32.mrf.mxu0 }
 0x1a1   : > { %v4933_v60 = vpop.f32.mrf.mxu1 }
 0x1a2   : > { %v6535_v23 = vpop.f32.mrf.mxu0 }
 0x1a3   : > { %v6537_v29 = vpop.f32.mrf.mxu1 }
 0x1a4   : > { %v6539_v17 = vpop.f32.mrf.mxu0 }
 0x1a5   : > { %v6541_v62 = vpop.f32.mrf.mxu1 }
 0x1a6   : > { %v6543_v5 = vpop.f32.mrf.mxu0 }
 0x1a7   : > { %v6545_v41 = vpop.f32.mrf.mxu1 }
 0x1a8   : > { %v6547_v0 = vpop.f32.mrf.mxu0 }
 0x1a9   : > { %v6549_v49 = vpop.f32.mrf.mxu1 }
 0x1aa   : > { %v6551_v40 = vpop.f32.mrf.mxu0 }
 0x1ab   : > { %v6553_v42 = vpop.f32.mrf.mxu1 }
 0x1ac   : > { %v6555_v55 = vpop.f32.mrf.mxu0 }
 0x1ad   : > { %v6557_v4 = vpop.f32.mrf.mxu1 }
 0x1ae   : > { %v6559_v51 = vpop.f32.mrf.mxu0 }
 0x1af   : > { %v6561_v16 = vpop.f32.mrf.mxu1 }
 0x1b0   : > { %v6563_v58 = vpop.f32.mrf.mxu0 }
 0x1b1   : > { %v6565_v33 = vpop.f32.mrf.mxu1 }
 0x1b2   : > { %v6567_v30 = vpop.f32.mrf.mxu0 }
 0x1b3   : > { %v6569_v9 = vpop.f32.mrf.mxu1 }
 0x1b4   : > { %v6571_v1 = vpop.f32.mrf.mxu0 }
 0x1b5   : > { %v6573_v34 = vpop.f32.mrf.mxu1 }
 0x1b6   : > { %v6575_v21 = vpop.f32.mrf.mxu0 }
 0x1b7   : > { %v6577_v47 = vpop.f32.mrf.mxu1 }
 0x1b8   : > { %v6579_v31 = vpop.f32.mrf.mxu0 }
 0x1b9   : > { %v6581_v28 = vpop.f32.mrf.mxu1 }
 0x1ba   : > { %v6583_v61 = vpop.f32.mrf.mxu0 }
 0x1bb   : > { %v6585_v11 = vpop.f32.mrf.mxu1 }
 0x1bc   : > { %v6587_v36 = vpop.f32.mrf.mxu0 }
 0x1bd   : > { %v6589_v2 = vpop.f32.mrf.mxu1 }
 0x1be   : > { %v6591_v24 = vpop.f32.mrf.mxu0 }
 0x1bf   : > { %v6593_v20 = vpop.f32.mrf.mxu1 }
 0x1c0   : > { %v6595_v26 = vpop.f32.mrf.mxu0 }
 0x1c1   : > { %6850 = vst [vmem:[#allocation18_spill] sm:$0xff] %v6595_v26  ;;  %v6597_v48 = vpop.f32.mrf.mxu1 }
 0x1c2   : > { %6851 = vst [vmem:[#allocation19_spill] sm:$0xff] %v6597_v48  ;;  %v6599_v37 = vpop.f32.mrf.mxu0 }
 0x1c3   : > { %6852 = vst [vmem:[#allocation20_spill] sm:$0xff] %v6599_v37  ;;  %v6601_v27 = vpop.f32.mrf.mxu1 }
 0x1c4   : > { %6853 = vst [vmem:[#allocation21_spill] sm:$0xff] %v6601_v27  ;;  %v6603_v57 = vpop.f32.mrf.mxu0 }
 0x1c5   : > { %6854 = vst [vmem:[#allocation22_spill] sm:$0xff] %v6603_v57  ;;  %v6605_v54 = vpop.f32.mrf.mxu1 }
 0x1c6   : > { %6855 = vst [vmem:[#allocation23_spill] sm:$0xff] %v6605_v54  ;;  %v6607_v3 = vpop.f32.mrf.mxu0 }
 0x1c7   : > { %6856 = vst [vmem:[#allocation24_spill] sm:$0xff] %v6607_v3  ;;  %v6609_v38 = vpop.f32.mrf.mxu1 }
 0x1c8   : > { %6857 = vst [vmem:[#allocation25_spill] sm:$0xff] %v6609_v38  ;;  %v6611_v25 = vpop.f32.mrf.mxu0 }
 0x1c9   : > { %6858 = vst [vmem:[#allocation26_spill] sm:$0xff] %v6611_v25  ;;  %v6613_v10 = vpop.f32.mrf.mxu1 }
 0x1ca   : > { %6859 = vst [vmem:[#allocation27_spill] sm:$0xff] %v6613_v10  ;;  %v6615_v32 = vpop.f32.mrf.mxu0 }
 0x1cb   : > { %6860 = vst [vmem:[#allocation28_spill] sm:$0xff] %v6615_v32  ;;  %v6617_v26 = vpop.f32.mrf.mxu1 }
 0x1cc   : > { %6861 = vst [vmem:[#allocation29_spill] sm:$0xff] %v6617_v26  ;;  %v6619_v48 = vpop.f32.mrf.mxu0 }
 0x1cd   : > { %6862 = vst [vmem:[#allocation30_spill] sm:$0xff] %v6619_v48  ;;  %v6621_v37 = vpop.f32.mrf.mxu1 }
 0x1ce   : > { %6863 = vst [vmem:[#allocation31_spill] sm:$0xff] %v6621_v37  ;;  %v6623_v27 = vpop.f32.mrf.mxu0 }
 0x1cf   : > { %6864 = vst [vmem:[#allocation32_spill] sm:$0xff] %v6623_v27  ;;  %v6625_v57 = vpop.f32.mrf.mxu1  ;;  %v2489_v27 = vadd.f32 %v4930_v6, %v6436_v14  ;;  %v2490_v14 = vadd.f32 %v6537_v29, %v6445_v50 }
 0x1d0   : > { %6865 = vst [vmem:[#allocation33_spill] sm:$0xff] %v6625_v57  ;;  %v6627_v54 = vpop.f32.mrf.mxu0 }
 0x1d1   : > { %6866 = vst [vmem:[#allocation34_spill] sm:$0xff] %v6627_v54  ;;  %v6629_v3 = vpop.f32.mrf.mxu1 }
 0x1d2   : > { %6867 = vst [vmem:[#allocation35_spill] sm:$0xff] %v6629_v3  ;;  %v6631_v38 = vpop.f32.mrf.mxu0  ;;  %v2488_v3 = vadd.f32 %v2329_v59, %v6439_v52  ;;  %v2493_v52 = vadd.f32 %v6541_v62, %v6448_v43  ;;  %v2492_v43 = vadd.f32 %v6545_v41, %v6451_v63  ;;  %v2494_v63 = vadd.f32 %v6553_v42, %v6457_v13 }
 0x1d3   : > { %6868 = vst [vmem:[#allocation36_spill] sm:$0xff] %v6631_v38  ;;  %v6633_v25 = vpop.f32.mrf.mxu1 }
 0x1d4   : > { %6869 = vst [vmem:[#allocation37_spill] sm:$0xff] %v6633_v25  ;;  %v6635_v10 = vpop.f32.mrf.mxu0  ;;  %v2864_v29 = vadd.f32 %v6543_v5, %v2493_v52 }
 0x1d5   : > { %6870 = vst [vmem:[#allocation38_spill] sm:$0xff] %v6635_v10  ;;  %v6637_v32 = vpop.f32.mrf.mxu1  ;;  %v2860_v10 = vadd.f32 %v6531_v53, %v2489_v27 }
 0x1d6   : > { %6871 = vst [vmem:[#allocation39_spill] sm:$0xff] %v6637_v32  ;;  %v6639_v26 = vpop.f32.mrf.mxu0  ;;  %v2491_v32 = vadd.f32 %v4933_v60, %v6442_v56 }
 0x1d7   : > { %6872 = vst [vmem:[#allocation40_spill] sm:$0xff] %v6639_v26  ;;  %v6641_v48 = vpop.f32.mrf.mxu1 }
 0x1d8   : > { %6873 = vst [vmem:[#allocation41_spill] sm:$0xff] %v6641_v48  ;;  %v6644_v57 = vpop.f32.mrf.mxu0  ;;  %v2859_v48 = vadd.f32 %v6533_v12, %v2488_v3  ;;  %v2862_v53 = vadd.f32 %v6535_v23, %v2491_v32 }
 0x1d9   : > { %v6646_v54 = vpop.f32.mrf.mxu1 }
 0x1da   : > { %v6649_v38 = vpop.f32.mrf.mxu0 }
 0x1db   : > { %6874 = vst [vmem:[#allocation42_spill] sm:$0xff] %v6649_v38  ;;  %v6651_v25 = vpop.f32.mrf.mxu1 }
 0x1dc   : > { %v6655_v26 = vpop.f32.mrf.mxu0 }
 0x1dd   : > { %6875 = vst [vmem:[#allocation43_spill] sm:$0xff] %v6655_v26  ;;  %v5090_v37 = vpop.f32.mrf.mxu1 }
 0x1de   : > { %v3230_v6 = vadd.f32 %v5090_v37, %v2860_v10  ;;  %v5170_v56 = vpop.f32.mrf.mxu0  ;;  %v2861_v10 = vadd.f32 %v6539_v17, %v2490_v14  ;;  %v2495_v17 = vadd.f32 %v6549_v49, %v6454_v18 }
 0x1df   : > { %v3070_v27 = vpop.f32.mrf.mxu1 }
 0x1e0   : > { %v3600_v3 = vadd.f32 %v5170_v56, %v3230_v6  ;;  %v3229_v59 = vadd.f32 %v3070_v27, %v2859_v48  ;;  %v3440_v12 = vpop.f32.mrf.mxu0  ;;  %v2863_v56 = vadd.f32 %v6547_v0, %v2492_v43  ;;  %v2866_v13 = vadd.f32 %v6551_v40, %v2495_v17 }
 0x1e1   : > { %v5093_v50 = vpop.f32.mrf.mxu1  ;;  %v2865_v0 = vadd.f32 %v6555_v55, %v2494_v63 }
 0x1e2   : > { %3696 = vst [vmem:[%s6667_s22 + $0x8] sm:$0xff] %v3600_v3  ;;  %v3599_v37 = vadd.f32 %v3440_v12, %v3229_v59  ;;  %v3232_v60 = vadd.f32 %v5093_v50, %v2862_v53  ;;  %v3765_v62 = vmul.f32 %v3600_v3, %v3600_v3  ;;  %v5173_v26 = vpop.f32.mrf.mxu0  ;;  %v2497_v53 = vadd.f32 %v6557_v4, %v6460_v39 }
 0x1e3   : > { %v3080_v38 = vpop.f32.mrf.mxu1  ;;  %v2496_v4 = vadd.f32 %v6561_v16, %v6463_v19 }
 0x1e4   : > { %3695 = vst [vmem:[%s6667_s22] sm:$0xff] %v3599_v37  ;;  %v3727_v32 = vadd.f32 %v3600_v3, %v3599_v37  ;;  %v3764_v48 = vmul.f32 %v3599_v37, %v3599_v37  ;;  %v3602_v23 = vadd.f32 %v5173_v26, %v3232_v60  ;;  %v3231_v6 = vadd.f32 %v3080_v38, %v2861_v10  ;;  %v3450_v41 = vpop.f32.mrf.mxu0 }
 0x1e5   : > { %v5096_v14 = vpop.f32.mrf.mxu1  ;;  %v2868_v39 = vadd.f32 %v6559_v51, %v2497_v53  ;;  %v2499_v60 = vadd.f32 %v6565_v33, %v6466_v45 }
 0x1e6   : > { %v3796_v5 = vadd.f32 %v3765_v62, %v3764_v48  ;;  %3698 = vst [vmem:[%s6667_s22 + $0x18] sm:$0xff] %v3602_v23  ;;  %v3601_v52 = vadd.f32 %v3450_v41, %v3231_v6  ;;  %v3234_v27 = vadd.f32 %v5096_v14, %v2864_v29  ;;  %v5176_v26 = vpop.f32.mrf.mxu0  ;;  %v3767_v50 = vmul.f32 %v3602_v23, %v3602_v23 }
 0x1e7   : > { %v3090_v38 = vpop.f32.mrf.mxu1  ;;  %v2867_v14 = vadd.f32 %v6563_v58, %v2496_v4 }
 0x1e8   : > { %3697 = vst [vmem:[%s6667_s22 + $0x10] sm:$0xff] %v3601_v52  ;;  %v3728_v3 = vadd.f32 %v3727_v32, %v3601_v52  ;;  %v3766_v18 = vmul.f32 %v3601_v52, %v3601_v52  ;;  %v3604_v49 = vadd.f32 %v5176_v26, %v3234_v27  ;;  %v3233_v59 = vadd.f32 %v3090_v38, %v2863_v56  ;;  %v3460_v42 = vpop.f32.mrf.mxu0 }
 0x1e9   : > { %v5099_v12 = vpop.f32.mrf.mxu1  ;;  %v2870_v56 = vadd.f32 %v6567_v30, %v2499_v60 }
 0x1ea   : > { %v3797_v10 = vadd.f32 %v3796_v5, %v3766_v18  ;;  %3700 = vst [vmem:[%s6667_s22 + $0x28] sm:$0xff] %v3604_v49  ;;  %v3603_v43 = vadd.f32 %v3460_v42, %v3233_v59  ;;  %v3729_v37 = vadd.f32 %v3728_v3, %v3602_v23  ;;  %v3236_v29 = vadd.f32 %v5099_v12, %v2866_v13  ;;  %v5179_v62 = vpop.f32.mrf.mxu0 }
 0x1eb   : > { %v3100_v40 = vpop.f32.mrf.mxu1  ;;  %v2498_v23 = vadd.f32 %v6569_v9, %v6469_v22  ;;  %v3769_v51 = vmul.f32 %v3604_v49, %v3604_v49  ;;  %v2501_v5 = vadd.f32 %v6573_v34, %v6472_v44  ;;  %v2500_v3 = vadd.f32 %v6577_v47, %v6475_v46 }
 0x1ec   : > { %3699 = vst [vmem:[%s6667_s22 + $0x20] sm:$0xff] %v3603_v43  ;;  %v3730_v55 = vadd.f32 %v3729_v37, %v3603_v43  ;;  %v3768_v32 = vmul.f32 %v3603_v43, %v3603_v43  ;;  %v3798_v48 = vadd.f32 %v3797_v10, %v3767_v50  ;;  %v3235_v6 = vadd.f32 %v3100_v40, %v2865_v0  ;;  %v3470_v63 = vpop.f32.mrf.mxu0 }
 0x1ed   : > { %v3606_v17 = vadd.f32 %v5179_v62, %v3236_v29  ;;  %v5102_v19 = vpop.f32.mrf.mxu1  ;;  %v2869_v38 = vadd.f32 %v6571_v1, %v2498_v23  ;;  %v2872_v13 = vadd.f32 %v6575_v21, %v2501_v5  ;;  %v2503_v1 = vadd.f32 %v6581_v28, %v6478_v8  ;;  %v6877_v5 = vld [vmem:[#allocation19_spill] sm:$0xff] }
 0x1ee   : > { %v3799_v16 = vadd.f32 %v3798_v48, %v3768_v32  ;;  %v3605_v41 = vadd.f32 %v3470_v63, %v3235_v6  ;;  %v3731_v45 = vadd.f32 %v3730_v55, %v3604_v49  ;;  %v3238_v33 = vadd.f32 %v5102_v19, %v2868_v39  ;;  %v5182_v52 = vpop.f32.mrf.mxu0 }
 0x1ef   : > { %3702 = vst [vmem:[%s6667_s22 + $0x38] sm:$0xff] %v3606_v17  ;;  %v3110_v27 = vpop.f32.mrf.mxu1  ;;  %v3771_v49 = vmul.f32 %v3606_v17, %v3606_v17  ;;  %v2871_v4 = vadd.f32 %v6579_v31, %v2500_v3  ;;  %v2502_v21 = vadd.f32 %v6585_v11, %v6481_v15  ;;  %v2505_v8 = vadd.f32 %v6589_v2, %v6484_v7  ;;  %v6880_v3 = vld [vmem:[#allocation21_spill] sm:$0xff] }
 0x1f0   : > { %3701 = vst [vmem:[%s6667_s22 + $0x30] sm:$0xff] %v3605_v41  ;;  %v3732_v22 = vadd.f32 %v3731_v45, %v3605_v41  ;;  %v3770_v9 = vmul.f32 %v3605_v41, %v3605_v41  ;;  %v3800_v53 = vadd.f32 %v3799_v16, %v3769_v51  ;;  %v3608_v26 = vadd.f32 %v5182_v52, %v3238_v33  ;;  %v3480_v30 = vpop.f32.mrf.mxu0 }
 0x1f1   : > { %v3237_v58 = vadd.f32 %v3110_v27, %v2867_v14  ;;  %v5105_v18 = vpop.f32.mrf.mxu1  ;;  %v2874_v48 = vadd.f32 %v6583_v61, %v2503_v1  ;;  %v2873_v63 = vadd.f32 %v6587_v36, %v2502_v21  ;;  %v2504_v7 = vadd.f32 %v6593_v20, %v6487_v35  ;;  %v6883_v1 = vld [vmem:[#allocation20_spill] sm:$0xff]  ;;  %v6884_v21 = vld [vmem:[#allocation22_spill] sm:$0xff] }
 0x1f2   : > { %v3801_v44 = vadd.f32 %v3800_v53, %v3770_v9  ;;  %3704 = vst [vmem:[%s6667_s22 + $0x48] sm:$0xff] %v3608_v26  ;;  %v3733_v34 = vadd.f32 %v3732_v22, %v3606_v17  ;;  %v3240_v59 = vadd.f32 %v5105_v18, %v2870_v56  ;;  %v5185_v42 = vpop.f32.mrf.mxu0  ;;  %v3773_v28 = vmul.f32 %v3608_v26, %v3608_v26  ;;  %v6876_v56 = vld [vmem:[#allocation4_spill] sm:$0xff] }
 0x1f3   : > { %v3607_v0 = vadd.f32 %v3480_v30, %v3237_v58  ;;  %v3120_v12 = vpop.f32.mrf.mxu1  ;;  %v2876_v16 = vadd.f32 %v6591_v24, %v2505_v8  ;;  %v2507_v52 = vadd.f32 %v6877_v5, %v6876_v56  ;;  %v6886_v8 = vld [vmem:[#allocation25_spill] sm:$0xff] }
 0x1f4   : > { %v3802_v50 = vadd.f32 %v3801_v44, %v3771_v49  ;;  %v3610_v46 = vadd.f32 %v5185_v42, %v3240_v59  ;;  %v3239_v47 = vadd.f32 %v3120_v12, %v2869_v38  ;;  %v3490_v37 = vpop.f32.mrf.mxu0  ;;  %v6879_v38 = vld [vmem:[#allocation5_spill] sm:$0xff]  ;;  %v6881_v49 = vld [vmem:[#allocation6_spill] sm:$0xff]  ;;  %v6882_v44 = vld [vmem:[#allocation23_spill] sm:$0xff] }
 0x1f5   : > { %3703 = vst [vmem:[%s6667_s22 + $0x40] sm:$0xff] %v3607_v0  ;;  %v3734_v10 = vadd.f32 %v3733_v34, %v3607_v0  ;;  %v3772_v43 = vmul.f32 %v3607_v0, %v3607_v0  ;;  %v5108_v39 = vpop.f32.mrf.mxu1  ;;  %v2506_v58 = vadd.f32 %v6880_v3, %v6879_v38  ;;  %v2509_v34 = vadd.f32 %v6882_v44, %v6881_v49  ;;  %v6892_v56 = vld [vmem:[#allocation29_spill] sm:$0xff]  ;;  %v6895_v38 = vld [vmem:[#allocation28_spill] sm:$0xff] }
 0x1f6   : > { %3706 = vst [vmem:[%s6667_s22 + $0x58] sm:$0xff] %v3610_v46  ;;  %v3609_v60 = vadd.f32 %v3490_v37, %v3239_v47  ;;  %v3242_v29 = vadd.f32 %v5108_v39, %v2872_v13  ;;  %v5188_v55 = vpop.f32.mrf.mxu0  ;;  %v3775_v61 = vmul.f32 %v3610_v46, %v3610_v46 }
 0x1f7   : > { %v3803_v62 = vadd.f32 %v3802_v50, %v3772_v43  ;;  %v3735_v40 = vadd.f32 %v3734_v10, %v3608_v26  ;;  %v3130_v32 = vpop.f32.mrf.mxu1  ;;  %v6878_v26 = vld [vmem:[#allocation18_spill] sm:$0xff]  ;;  %v2878_v50 = vadd.f32 %v6883_v1, %v2507_v52 }
 0x1f8   : > { %3705 = vst [vmem:[%s6667_s22 + $0x50] sm:$0xff] %v3609_v60  ;;  %v3774_v6 = vmul.f32 %v3609_v60, %v3609_v60  ;;  %v3612_v31 = vadd.f32 %v5188_v55, %v3242_v29  ;;  %v3241_v23 = vadd.f32 %v3130_v32, %v2871_v4  ;;  %v3500_v11 = vpop.f32.mrf.mxu0  ;;  %v2875_v24 = vadd.f32 %v6878_v26, %v2504_v7  ;;  %v6885_v29 = vld [vmem:[#allocation7_spill] sm:$0xff]  ;;  %v6887_v55 = vld [vmem:[#allocation24_spill] sm:$0xff] }
 0x1f9   : > { %v3736_v51 = vadd.f32 %v3735_v40, %v3609_v60  ;;  %v3804_v15 = vadd.f32 %v3803_v62, %v3773_v28  ;;  %v5111_v17 = vpop.f32.mrf.mxu1  ;;  %v2877_v60 = vadd.f32 %v6884_v21, %v2506_v58  ;;  %v2508_v28 = vadd.f32 %v6886_v8, %v6885_v29  ;;  %v6901_v29 = vld [vmem:[#allocation35_spill] sm:$0xff] }
 0x1fa   : > { %3708 = vst [vmem:[%s6667_s22 + $0x68] sm:$0xff] %v3612_v31  ;;  %v3611_v2 = vadd.f32 %v3500_v11, %v3241_v23  ;;  %v3244_v19 = vadd.f32 %v5111_v17, %v2874_v48  ;;  %v5191_v33 = vpop.f32.mrf.mxu0  ;;  %v3777_v59 = vmul.f32 %v3612_v31, %v3612_v31  ;;  %v2880_v32 = vadd.f32 %v6887_v55, %v2509_v34  ;;  %v6889_v11 = vld [vmem:[#allocation27_spill] sm:$0xff] }
 0x1fb   : > { %v3805_v41 = vadd.f32 %v3804_v15, %v3774_v6  ;;  %v3737_v45 = vadd.f32 %v3736_v51, %v3610_v46  ;;  %v3140_v14 = vpop.f32.mrf.mxu1  ;;  %v6888_v15 = vld [vmem:[#allocation8_spill] sm:$0xff] }
 0x1fc   : > { %3707 = vst [vmem:[%s6667_s22 + $0x60] sm:$0xff] %v3611_v2  ;;  %v3776_v27 = vmul.f32 %v3611_v2, %v3611_v2  ;;  %v3614_v36 = vadd.f32 %v5191_v33, %v3244_v19  ;;  %v3243_v22 = vadd.f32 %v3140_v14, %v2873_v63  ;;  %v3510_v20 = vpop.f32.mrf.mxu0  ;;  %v2511_v17 = vadd.f32 %v6889_v11, %v6888_v15  ;;  %v6891_v14 = vld [vmem:[#allocation9_spill] sm:$0xff] }
 0x1fd   : > { %v3738_v9 = vadd.f32 %v3737_v45, %v3611_v2  ;;  %v3806_v35 = vadd.f32 %v3805_v41, %v3775_v61  ;;  %v5114_v53 = vpop.f32.mrf.mxu1  ;;  %v6890_v45 = vld [vmem:[#allocation26_spill] sm:$0xff]  ;;  %v2510_v5 = vadd.f32 %v6892_v56, %v6891_v14  ;;  %v6904_v15 = vld [vmem:[#allocation37_spill] sm:$0xff]  ;;  %v6907_v14 = vld [vmem:[#allocation36_spill] sm:$0xff] }
 0x1fe   : > { %3710 = vst [vmem:[%s6667_s22 + $0x78] sm:$0xff] %v3614_v36  ;;  %v3613_v30 = vadd.f32 %v3510_v20, %v3243_v22  ;;  %v3246_v18 = vadd.f32 %v5114_v53, %v2876_v16  ;;  %v5194_v42 = vpop.f32.mrf.mxu0  ;;  %v3779_v48 = vmul.f32 %v3614_v36, %v3614_v36  ;;  %v2879_v33 = vadd.f32 %v6890_v45, %v2508_v28  ;;  %v6894_v22 = vld [vmem:[#allocation31_spill] sm:$0xff] }
 0x1ff   : > { %v3807_v13 = vadd.f32 %v3806_v35, %v3776_v27  ;;  %v3739_v0 = vadd.f32 %v3738_v9, %v3612_v31  ;;  %v3150_v12 = vpop.f32.mrf.mxu1  ;;  %v2882_v3 = vadd.f32 %v6895_v38, %v2511_v17 }
 0x200   : > { %3709 = vst [vmem:[%s6667_s22 + $0x70] sm:$0xff] %v3613_v30  ;;  %v3778_v46 = vmul.f32 %v3613_v30, %v3613_v30  ;;  %v3616_v47 = vadd.f32 %v5194_v42, %v3246_v18  ;;  %v3245_v10 = vadd.f32 %v3150_v12, %v2875_v24  ;;  %v3520_v39 = vpop.f32.mrf.mxu0  ;;  %v6897_v42 = vld [vmem:[#allocation11_spill] sm:$0xff]  ;;  %v6898_v12 = vld [vmem:[#allocation33_spill] sm:$0xff] }
 0x201   : > { %v3740_v43 = vadd.f32 %v3739_v0, %v3613_v30  ;;  %v3808_v37 = vadd.f32 %v3807_v13, %v3777_v59  ;;  %v5117_v4 = vpop.f32.mrf.mxu1  ;;  %v6896_v13 = vld [vmem:[#allocation30_spill] sm:$0xff]  ;;  %v2512_v1 = vadd.f32 %v6898_v12, %v6897_v42 }
 0x202   : > { %3712 = vst [vmem:[%s6667_s22 + $0x88] sm:$0xff] %v3616_v47  ;;  %v3615_v62 = vadd.f32 %v3520_v39, %v3245_v10  ;;  %v3248_v40 = vadd.f32 %v5117_v4, %v2878_v50  ;;  %v5197_v23 = vpop.f32.mrf.mxu0  ;;  %v3781_v35 = vmul.f32 %v3616_v47, %v3616_v47  ;;  %v2881_v0 = vadd.f32 %v6896_v13, %v2510_v5 }
 0x203   : > { %v3809_v6 = vadd.f32 %v3808_v37, %v3778_v46  ;;  %v3741_v31 = vadd.f32 %v3740_v43, %v3614_v36  ;;  %v3160_v51 = vpop.f32.mrf.mxu1  ;;  %v6893_v36 = vld [vmem:[#allocation10_spill] sm:$0xff] }
 0x204   : > { %3711 = vst [vmem:[%s6667_s22 + $0x80] sm:$0xff] %v3615_v62  ;;  %v3780_v63 = vmul.f32 %v3615_v62, %v3615_v62  ;;  %v3618_v7 = vadd.f32 %v5197_v23, %v3248_v40  ;;  %v3247_v2 = vadd.f32 %v3160_v51, %v2877_v60  ;;  %v3530_v61 = vpop.f32.mrf.mxu0  ;;  %v2513_v9 = vadd.f32 %v6894_v22, %v6893_v36  ;;  %v6900_v60 = vld [vmem:[#allocation12_spill] sm:$0xff]  ;;  %v6903_v51 = vld [vmem:[#allocation13_spill] sm:$0xff] }
 0x205   : > { %v3742_v19 = vadd.f32 %v3741_v31, %v3615_v62  ;;  %v3810_v16 = vadd.f32 %v3809_v6, %v3779_v48  ;;  %v5120_v41 = vpop.f32.mrf.mxu1  ;;  %v2515_v8 = vadd.f32 %v6901_v29, %v6900_v60  ;;  %v6902_v31 = vld [vmem:[#allocation34_spill] sm:$0xff]  ;;  %v2514_v11 = vadd.f32 %v6904_v15, %v6903_v51  ;;  %v6915_v51 = vld [vmem:[#allocation43_spill] sm:$0xff] }
 0x206   : > { %3714 = vst [vmem:[%s6667_s22 + $0x98] sm:$0xff] %v3618_v7  ;;  %v3617_v52 = vadd.f32 %v3530_v61, %v3247_v2  ;;  %v3250_v27 = vadd.f32 %v5120_v41, %v2880_v32  ;;  %v5200_v26 = vpop.f32.mrf.mxu0  ;;  %v3783_v43 = vmul.f32 %v3618_v7, %v3618_v7  ;;  %v2883_v23 = vadd.f32 %v6902_v31, %v2512_v1  ;;  %v6906_v2 = vld [vmem:[#allocation39_spill] sm:$0xff] }
 0x207   : > { %v3811_v20 = vadd.f32 %v3810_v16, %v3780_v63  ;;  %v3743_v53 = vadd.f32 %v3742_v19, %v3616_v47  ;;  %v3170_v24 = vpop.f32.mrf.mxu1  ;;  %v6899_v47 = vld [vmem:[#allocation32_spill] sm:$0xff]  ;;  %v2886_v56 = vadd.f32 %v6907_v14, %v2515_v8 }
 0x208   : > { %3713 = vst [vmem:[%s6667_s22 + $0x90] sm:$0xff] %v3617_v52  ;;  %v3782_v58 = vmul.f32 %v3617_v52, %v3617_v52  ;;  %v3620_v30 = vadd.f32 %v5200_v26, %v3250_v27  ;;  %v3249_v18 = vadd.f32 %v3170_v24, %v2879_v33  ;;  %v3540_v34 = vpop.f32.mrf.mxu0  ;;  %v2884_v10 = vadd.f32 %v6899_v47, %v2513_v9  ;;  %v6909_v26 = vld [vmem:[#allocation15_spill] sm:$0xff]  ;;  %v6910_v24 = vld [vmem:[#allocation41_spill] sm:$0xff] }
 0x209   : > { %v3744_v49 = vadd.f32 %v3743_v53, %v3617_v52  ;;  %v3812_v44 = vadd.f32 %v3811_v20, %v3781_v35  ;;  %v5123_v59 = vpop.f32.mrf.mxu1  ;;  %v6908_v20 = vld [vmem:[#allocation38_spill] sm:$0xff]  ;;  %v2516_v38 = vadd.f32 %v6910_v24, %v6909_v26 }
 0x20a   : > { %3716 = vst [vmem:[%s6667_s22 + $0xa8] sm:$0xff] %v3620_v30  ;;  %v3619_v50 = vadd.f32 %v3540_v34, %v3249_v18  ;;  %v3252_v46 = vadd.f32 %v5123_v59, %v2882_v3  ;;  %v5203_v4 = vpop.f32.mrf.mxu0  ;;  %v3785_v16 = vmul.f32 %v3620_v30, %v3620_v30  ;;  %v2885_v53 = vadd.f32 %v6908_v20, %v2514_v11 }
 0x20b   : > { %v3813_v37 = vadd.f32 %v3812_v44, %v3782_v58  ;;  %v3745_v39 = vadd.f32 %v3744_v49, %v3618_v7  ;;  %v3180_v21 = vpop.f32.mrf.mxu1  ;;  %v6905_v7 = vld [vmem:[#allocation14_spill] sm:$0xff] }
 0x20c   : > { %3715 = vst [vmem:[%s6667_s22 + $0xa0] sm:$0xff] %v3619_v50  ;;  %v3784_v28 = vmul.f32 %v3619_v50, %v3619_v50  ;;  %v3622_v62 = vadd.f32 %v5203_v4, %v3252_v46  ;;  %v3251_v40 = vadd.f32 %v3180_v21, %v2881_v0  ;;  %v3550_v48 = vpop.f32.mrf.mxu0  ;;  %v2517_v19 = vadd.f32 %v6906_v2, %v6905_v7  ;;  %v6912_v0 = vld [vmem:[#allocation16_spill] sm:$0xff] }
 0x20d   : > { %v3746_v55 = vadd.f32 %v3745_v39, %v3619_v50  ;;  %v3814_v32 = vadd.f32 %v3813_v37, %v3783_v43  ;;  %v5126_v6 = vpop.f32.mrf.mxu1  ;;  %v2519_v42 = vadd.f32 %v6646_v54, %v6912_v0  ;;  %v2887_v37 = vadd.f32 %v6644_v57, %v2516_v38  ;;  %v6913_v39 = vld [vmem:[#allocation17_spill] sm:$0xff] }
 0x20e   : > { %3718 = vst [vmem:[%s6667_s22 + $0xb8] sm:$0xff] %v3622_v62  ;;  %v3621_v17 = vadd.f32 %v3550_v48, %v3251_v40  ;;  %v3254_v63 = vadd.f32 %v5126_v6, %v2884_v10  ;;  %v5206_v45 = vpop.f32.mrf.mxu0  ;;  %v3787_v49 = vmul.f32 %v3622_v62, %v3622_v62  ;;  %v2518_v4 = vadd.f32 %v6651_v25, %v6913_v39  ;;  %v6914_v40 = vld [vmem:[#allocation42_spill] sm:$0xff] }
 0x20f   : > { %v3815_v61 = vadd.f32 %v3814_v32, %v3784_v28  ;;  %v3747_v41 = vadd.f32 %v3746_v55, %v3620_v30  ;;  %v3190_v33 = vpop.f32.mrf.mxu1  ;;  %v6911_v30 = vld [vmem:[#allocation40_spill] sm:$0xff]  ;;  %v2890_v55 = vadd.f32 %v6914_v40, %v2519_v42 }
 0x210   : > { %3717 = vst [vmem:[%s6667_s22 + $0xb0] sm:$0xff] %v3621_v17  ;;  %v3786_v5 = vmul.f32 %v3621_v17, %v3621_v17  ;;  %v3624_v52 = vadd.f32 %v5206_v45, %v3254_v63  ;;  %v3253_v27 = vadd.f32 %v3190_v33, %v2883_v23  ;;  %v3560_v9 = vpop.f32.mrf.mxu0  ;;  %v2888_v18 = vadd.f32 %v6911_v30, %v2517_v19 }
 0x211   : > { %v3748_v36 = vadd.f32 %v3747_v41, %v3621_v17  ;;  %v3816_v22 = vadd.f32 %v3815_v61, %v3785_v16  ;;  %v5129_v35 = vpop.f32.mrf.mxu1  ;;  %v2889_v15 = vadd.f32 %v6915_v51, %v2518_v4 }
 0x212   : > { %3720 = vst [vmem:[%s6667_s22 + $0xc8] sm:$0xff] %v3624_v52  ;;  %v3623_v3 = vadd.f32 %v3560_v9, %v3253_v27  ;;  %v3256_v58 = vadd.f32 %v5129_v35, %v2886_v56  ;;  %v5209_v59 = vpop.f32.mrf.mxu0  ;;  %v3789_v29 = vmul.f32 %v3624_v52, %v3624_v52 }
 0x213   : > { %v3817_v44 = vadd.f32 %v3816_v22, %v3786_v5  ;;  %v3749_v34 = vadd.f32 %v3748_v36, %v3622_v62  ;;  %v3200_v13 = vpop.f32.mrf.mxu1 }
 0x214   : > { %3719 = vst [vmem:[%s6667_s22 + $0xc0] sm:$0xff] %v3623_v3  ;;  %v3788_v12 = vmul.f32 %v3623_v3, %v3623_v3  ;;  %v3626_v1 = vadd.f32 %v5209_v59, %v3256_v58  ;;  %v3255_v50 = vadd.f32 %v3200_v13, %v2885_v53  ;;  %v3570_v10 = vpop.f32.mrf.mxu0 }
 0x215   : > { %v3750_v46 = vadd.f32 %v3749_v34, %v3623_v3  ;;  %v3818_v47 = vadd.f32 %v3817_v44, %v3787_v49  ;;  %v5132_v43 = vpop.f32.mrf.mxu1 }
 0x216   : > { %3722 = vst [vmem:[%s6667_s22 + $0xd8] sm:$0xff] %v3626_v1  ;;  %v3625_v21 = vadd.f32 %v3570_v10, %v3255_v50  ;;  %v3258_v60 = vadd.f32 %v5132_v43, %v2888_v18  ;;  %v5212_v28 = vpop.f32.mrf.mxu0  ;;  %v3791_v63 = vmul.f32 %v3626_v1, %v3626_v1 }
 0x217   : > { %v3819_v54 = vadd.f32 %v3818_v47, %v3788_v12  ;;  %v3751_v8 = vadd.f32 %v3750_v46, %v3624_v52  ;;  %v3210_v62 = vpop.f32.mrf.mxu1 }
 0x218   : > { %3721 = vst [vmem:[%s6667_s22 + $0xd0] sm:$0xff] %v3625_v21  ;;  %v3790_v32 = vmul.f32 %v3625_v21, %v3625_v21  ;;  %v3628_v48 = vadd.f32 %v5212_v28, %v3258_v60  ;;  %v3257_v6 = vadd.f32 %v3210_v62, %v2887_v37  ;;  %v3580_v23 = vpop.f32.mrf.mxu0 }
 0x219   : > { %v3752_v57 = vadd.f32 %v3751_v8, %v3625_v21  ;;  %v3820_v31 = vadd.f32 %v3819_v54, %v3789_v29  ;;  %v5135_v25 = vpop.f32.mrf.mxu1 }
 0x21a   : > { %3724 = vst [vmem:[%s6667_s22 + $0xe8] sm:$0xff] %v3628_v48  ;;  %v3627_v11 = vadd.f32 %v3580_v23, %v3257_v6  ;;  %v3260_v17 = vadd.f32 %v5135_v25, %v2890_v55  ;;  %v5215_v19 = vpop.f32.mrf.mxu0  ;;  %v3793_v52 = vmul.f32 %v3628_v48, %v3628_v48 }
 0x21b   : > { %v3821_v7 = vadd.f32 %v3820_v31, %v3790_v32  ;;  %v3753_v2 = vadd.f32 %v3752_v57, %v3626_v1  ;;  %v3220_v16 = vpop.f32.mrf.mxu1 }
 0x21c   : > { %3723 = vst [vmem:[%s6667_s22 + $0xe0] sm:$0xff] %v3627_v11  ;;  %v3792_v61 = vmul.f32 %v3627_v11, %v3627_v11  ;;  %v3630_v41 = vadd.f32 %v5215_v19, %v3260_v17  ;;  %v3259_v45 = vadd.f32 %v3220_v16, %v2889_v15  ;;  %v3590_v56 = vpop.f32.mrf.mxu0 }
 0x21d   : > { %v3754_v33 = vadd.f32 %v3753_v2, %v3627_v11  ;;  %v3822_v14 = vadd.f32 %v3821_v7, %v3791_v63 }
 0x21e   : > { %3726 = vst [vmem:[%s6667_s22 + $0xf8] sm:$0xff] %v3630_v41  ;;  %v3629_v5 = vadd.f32 %v3590_v56, %v3259_v45  ;;  %v3795_v20 = vmul.f32 %v3630_v41, %v3630_v41 }
 0x21f   : > { %v3823_v27 = vadd.f32 %v3822_v14, %v3792_v61  ;;  %v3755_v36 = vadd.f32 %v3754_v33, %v3628_v48 }
 0x220   : > { %3725 = vst [vmem:[%s6667_s22 + $0xf0] sm:$0xff] %v3629_v5  ;;  %v3794_v22 = vmul.f32 %v3629_v5, %v3629_v5 }
 0x221   : > { %v3756_v9 = vadd.f32 %v3755_v36, %v3629_v5  ;;  %v3824_v35 = vadd.f32 %v3823_v27, %v3793_v52 }
 0x223   : > { %v3757_v53 = vadd.f32 %v3756_v9, %v3630_v41  ;;  %v3825_v26 = vadd.f32 %v3824_v35, %v3794_v22 }
 0x225   : > { %v3758_v24 = vrot.slane %v3757_v53, 4  ;;  %v3826_v38 = vadd.f32 %v3825_v26, %v3795_v20 }
 0x227   : > { %v3759_v3 = vadd.f32 %v3758_v24, %v3757_v53  ;;  %v3827_v58 = vrot.slane %v3826_v38, 4 }
 0x229   : > { %v3760_v30 = vrot.slane %v3759_v3, 2  ;;  %v3828_v18 = vadd.f32 %v3827_v58, %v3826_v38 }
 0x22b   : > { %v3761_v49 = vadd.f32 %v3760_v30, %v3759_v3  ;;  %v3829_v44 = vrot.slane %v3828_v18, 2 }
 0x22d   : > { %v3762_v34 = vrot.slane %v3761_v49, 1  ;;  %v3830_v59 = vadd.f32 %v3829_v44, %v3828_v18 }
 0x22f   : > { %v3831_v13 = vrot.slane %v3830_v59, 1  ;;  %v3763_v0 = vadd.f32 %v3762_v34, %v3761_v49 }
 0x231   : > { %v3832_v42 = vadd.f32 %v3831_v13, %v3830_v59 }
 0x233   : > { %v3834_v12 = vsel %vm3833_vm0, %v3763_v0, %v3832_v42 }
 0x234   : > { %3835 = vst [vmem:[%s181_s27] sm:$0x3] %v3834_v12 }
 0x235 PF: > { %s14_s12 = sadd.s32 1, %s5276_s12  }
 0x236   : > { %p11_p4 = scmp.ge.s32.totalorder %s14_s12, 4  }
 0x238   :  { %13 = sbr.rel (!%p11_p4) target bundleno = 1 (0x1), region = 80 }

// kernel: conv_block_forward.4
= control target key start
LH: loop header
LB: loop body
LE: loop exit
PB: predicated region body
PF: predicated region fallthrough
CT: control target
= control target key end

     0   :  { %s5471_s18 = smov 0   ;;  %s7114_s0 = inlined_call_operand.vmem [shape: f32[2,256,128], index: 0, kind: input, shape index: {}]   ;;  %s7115_s1 = inlined_call_operand.vmem [shape: f32[1,128], index: 1, kind: input, shape index: {}]   ;;  %s7116_s2 = inlined_call_operand.vmem [shape: f32[1,128], index: 2, kind: input, shape index: {}]   ;;  %s7117_s3 = inlined_call_operand.vmem [shape: f32[9,128,128], index: 3, kind: input, shape index: {}]   ;;  %s7118_s4 = inlined_call_operand.vmem [shape: f32[2,256,128], index: 4, kind: output, shape index: {0}]   ;;  %s7119_s5 = inlined_call_operand.vmem [shape: f32[2,2,128], index: 5, kind: output, shape index: {1}]  }
   0x1 LB: > { %s4086_s19 = sadd.s32 4294967295, %s5438_s18   ;;  %p4090_p0 = scmp.ge.s32.totalorder %s5438_s18, 1  ;;  %s5438_s18 = sphi %s5471_s18, %s16_s18  }
   0x2   : > { %p190_p1 = scmp.lt.s32.totalorder %s5438_s18, 3 }
   0x4   : > { %p191_p2 = pnand %p4090_p0, %p190_p1 }
   0x6   : > { %194 = sbr.rel (%p191_p2) target bundleno = 567 (0x237), region = 36 }
   0xb   : > { %v576_v0 = vld [vmem:[%s7117_s3 + $0x78] sm:$0xff]  ;;  %v5485_v1 = vld [vmem:[%s7117_s3 + $0x70] sm:$0xff]  ;;  %p5489_p3 = scmp.lt.s32.totalorder %s4086_s19, 1  ;;  %v5440_v2 = vmov 0.0   ;;  %v574_v3 = vld [vmem:[%s7117_s3 + $0x68] sm:$0xff]  ;;  %vm3997_vm0 = vcmask 1040384  }
   0xc   : > { %5382 = vmatprep.subr.mxu1 %v576_v0  ;;  %4662 = vmatprep.subr.mxu0 %v576_v0  ;;  %402 = vst [vmem:[#allocation2 + $0xc0] sm:$0xff] %v5440_v2  ;;  %403 = vst [vmem:[#allocation2 + $0xc8] sm:$0xff] %v5440_v2  ;;  %v573_v4 = vld [vmem:[%s7117_s3 + $0x60] sm:$0xff]  ;;  %v572_v5 = vld [vmem:[%s7117_s3 + $0x58] sm:$0xff] }
   0xd   : > { %378 = vst [vmem:[#allocation2] sm:$0xff] %v5440_v2  ;;  %379 = vst [vmem:[#allocation2 + $0x8] sm:$0xff] %v5440_v2  ;;  %5398 = vmatpush3.msra.mxu1 %v576_v0  ;;  %4663 = vmatpush3.msra.mxu0 %v576_v0  ;;  %s7267_s19 = smov (!%p5489_p3, %s4086_s19), 1  ;;  %v5577_v6 = vld [vmem:[%s7115_s1] ss:$0 sm:$0xff]  ;;  %v571_v13 = vld [vmem:[%s7117_s3 + $0x50] sm:$0xff] }
   0xe   : > { %380 = vst [vmem:[#allocation2 + $0x10] sm:$0x3] %v5440_v2  ;;  %381 = vst [vmem:[#allocation2 + $0x18] sm:$0xff] %v5440_v2  ;;  %5383 = vmatprep.subr.mxu1 %v5485_v1  ;;  %4664 = vmatprep.subr.mxu0 %v5485_v1  ;;  %s4228_s29 = sshll.u32 %s7267_s19, 8  ;;  %v5583_v8 = vld [vmem:[%s7116_s2] ss:$0 sm:$0xff] }
   0xf   : > { %382 = vst [vmem:[#allocation2 + $0x20] sm:$0xff] %v5440_v2  ;;  %383 = vst [vmem:[#allocation2 + $0x28] sm:$0x3] %v5440_v2  ;;  %5399 = vmatpush3.msra.mxu1 %v5485_v1  ;;  %4665 = vmatpush3.msra.mxu0 %v5485_v1  ;;  %s5572_s9 = scalar_lea.vmem %s7114_s0, %s4228_s29  ;;  %v570_v21 = vld [vmem:[%s7117_s3 + $0x48] sm:$0xff]  ;;  %v569_v32 = vld [vmem:[%s7117_s3 + $0x40] sm:$0xff]  ;;  %s6989_s12 = scalar_lea.vmem %s7118_s4, %s4228_s29 }
  0x10   : > { %384 = vst [vmem:[#allocation2 + $0x30] sm:$0xff] %v5440_v2  ;;  %385 = vst [vmem:[#allocation2 + $0x38] sm:$0xff] %v5440_v2  ;;  %5384 = vmatprep.subr.mxu1 %v574_v3  ;;  %4666 = vmatprep.subr.mxu0 %v574_v3  ;;  %v250_v7 = vld [vmem:[%s5572_s9 + $0x70] sm:$0xff]  ;;  %v251_v9 = vld [vmem:[%s5572_s9 + $0x78] sm:$0xff]  ;;  %s4095_s29 = sshll.u32 %s7267_s19, 1 }
  0x11   : > { %386 = vst [vmem:[#allocation2 + $0x40] sm:$0x3] %v5440_v2  ;;  %387 = vst [vmem:[#allocation2 + $0x48] sm:$0xff] %v5440_v2  ;;  %5400 = vmatpush3.msra.mxu1 %v574_v3  ;;  %4667 = vmatpush3.msra.mxu0 %v574_v3  ;;  %v289_v10 = vmul.f32 %v5577_v6, %v250_v7  ;;  %v290_v11 = vmul.f32 %v5577_v6, %v251_v9  ;;  %v252_v12 = vld [vmem:[%s5572_s9 + $0x80] sm:$0xff]  ;;  %v253_v16 = vld [vmem:[%s5572_s9 + $0x88] sm:$0xff]  ;;  %s235_s15 = scalar_lea.vmem %s7119_s5, %s4095_s29 }
  0x12   : > { %388 = vst [vmem:[#allocation2 + $0x50] sm:$0xff] %v5440_v2  ;;  %389 = vst [vmem:[#allocation2 + $0x58] sm:$0x3] %v5440_v2  ;;  %5385 = vmatprep.subr.mxu1 %v573_v4  ;;  %4668 = vmatprep.subr.mxu0 %v573_v4  ;;  %v291_v14 = vmul.f32 %v5577_v6, %v252_v12  ;;  %v236_v15 = vld [vmem:[%s5572_s9] sm:$0xff]  ;;  %v237_v20 = vld [vmem:[%s5572_s9 + $0x8] sm:$0xff]  ;;  %v292_v23 = vmul.f32 %v5577_v6, %v253_v16 }
  0x13   : > { %390 = vst [vmem:[#allocation2 + $0x60] sm:$0xff] %v5440_v2  ;;  %391 = vst [vmem:[#allocation2 + $0x68] sm:$0xff] %v5440_v2  ;;  %5401 = vmatpush3.msra.mxu1 %v573_v4  ;;  %4669 = vmatpush3.msra.mxu0 %v573_v4  ;;  %v5596_v17 = vadd.f32 %v5583_v8, %v289_v10  ;;  %v5599_v18 = vadd.f32 %v5583_v8, %v290_v11  ;;  %v254_v25 = vld [vmem:[%s5572_s9 + $0x90] sm:$0xff]  ;;  %v255_v31 = vld [vmem:[%s5572_s9 + $0x98] sm:$0xff] }
  0x14   : > { %392 = vst [vmem:[#allocation2 + $0x70] sm:$0x3] %v5440_v2  ;;  %393 = vst [vmem:[#allocation2 + $0x78] sm:$0xff] %v5440_v2  ;;  %5386 = vmatprep.subr.mxu1 %v572_v5  ;;  %4670 = vmatprep.subr.mxu0 %v572_v5  ;;  %v275_v19 = vmul.f32 %v5577_v6, %v236_v15  ;;  %v5607_v22 = vadd.f32 %v5583_v8, %v291_v14  ;;  %v238_v30 = vld [vmem:[%s5572_s9 + $0x10] sm:$0xff]  ;;  %v239_v37 = vld [vmem:[%s5572_s9 + $0x18] sm:$0xff] }
  0x15   : > { %394 = vst [vmem:[#allocation2 + $0x80] sm:$0xff] %v5440_v2  ;;  %395 = vst [vmem:[#allocation2 + $0x88] sm:$0x3] %v5440_v2  ;;  %5402 = vmatpush3.msra.mxu1 %v572_v5  ;;  %4671 = vmatpush3.msra.mxu0 %v572_v5  ;;  %v276_v24 = vmul.f32 %v5577_v6, %v237_v20  ;;  %v7135_v26 = vmax.f32 %v5596_v17, 0.0  ;;  %v7134_v27 = vmax.f32 %v5599_v18, 0.0  ;;  %v256_v42 = vld [vmem:[%s5572_s9 + $0xa0] sm:$0xff] }
  0x16   : > { %396 = vst [vmem:[#allocation2 + $0x90] sm:$0xff] %v5440_v2  ;;  %397 = vst [vmem:[#allocation2 + $0x98] sm:$0xff] %v5440_v2  ;;  %5387 = vmatprep.subr.mxu1 %v571_v13  ;;  %4672 = vmatprep.subr.mxu0 %v571_v13  ;;  %v5615_v28 = vadd.f32 %v5583_v8, %v275_v19  ;;  %v293_v29 = vmul.f32 %v5577_v6, %v254_v25  ;;  %v7133_v33 = vmax.f32 %v5607_v22, 0.0  ;;  %v240_v43 = vld [vmem:[%s5572_s9 + $0x20] sm:$0xff]  ;;  %v568_v44 = vld [vmem:[%s7117_s3 + $0x38] sm:$0xff] }
  0x17   : > { %398 = vst [vmem:[#allocation2 + $0xa0] sm:$0x3] %v5440_v2  ;;  %399 = vst [vmem:[#allocation2 + $0xa8] sm:$0xff] %v5440_v2  ;;  %5403 = vmatpush3.msra.mxu1 %v571_v13  ;;  %4673 = vmatpush3.msra.mxu0 %v571_v13  ;;  %v5625_v34 = vadd.f32 %v5583_v8, %v292_v23  ;;  %v315_v35 = vadd.f32 %v5583_v8, %v276_v24  ;;  %v257_v49 = vld [vmem:[%s5572_s9 + $0xa8] sm:$0xff]  ;;  %v258_v55 = vld [vmem:[%s5572_s9 + $0xb0] sm:$0xff] }
  0x18   : > { %400 = vst [vmem:[#allocation2 + $0xb0] sm:$0xff] %v5440_v2  ;;  %401 = vst [vmem:[#allocation2 + $0xb8] sm:$0x3] %v5440_v2  ;;  %v277_v36 = vmul.f32 %v5577_v6, %v238_v30  ;;  %5388 = vmatprep.subr.mxu1 %v570_v21  ;;  %4674 = vmatprep.subr.mxu0 %v570_v21  ;;  %v7136_v38 = vmax.f32 %v5615_v28, 0.0  ;;  %v5636_v39 = vadd.f32 %v5583_v8, %v293_v29  ;;  %v241_v50 = vld [vmem:[%s5572_s9 + $0x28] sm:$0xff]  ;;  %v567_v56 = vld [vmem:[%s7117_s3 + $0x30] sm:$0xff] }
  0x19   : > { %404 = vst [vmem:[#allocation2 + $0xd0] sm:$0x3] %v5440_v2  ;;  %405 = vst [vmem:[#allocation2 + $0xd8] sm:$0xff] %v5440_v2  ;;  %v294_v40 = vmul.f32 %v5577_v6, %v255_v31  ;;  %v278_v41 = vmul.f32 %v5577_v6, %v239_v37  ;;  %5404 = vmatpush3.msra.mxu1 %v570_v21  ;;  %4675 = vmatpush3.msra.mxu0 %v570_v21  ;;  %v7132_v45 = vmax.f32 %v5625_v34, 0.0  ;;  %v242_v61 = vld [vmem:[%s5572_s9 + $0x30] sm:$0xff]  ;;  %v259_v62 = vld [vmem:[%s5572_s9 + $0xb8] sm:$0xff] }
  0x1a   : > { %406 = vst [vmem:[#allocation2 + $0xe0] sm:$0xff] %v5440_v2  ;;  %407 = vst [vmem:[#allocation2 + $0xe8] sm:$0x3] %v5440_v2  ;;  %v5648_v46 = vmax.f32 %v315_v35, 0.0  ;;  %v316_v47 = vadd.f32 %v5583_v8, %v277_v36  ;;  %v295_v48 = vmul.f32 %v5577_v6, %v256_v42  ;;  %5389 = vmatprep.subr.mxu1 %v569_v32  ;;  %4676 = vmatprep.subr.mxu0 %v569_v32  ;;  %v243_v4 = vld [vmem:[%s5572_s9 + $0x38] sm:$0xff]  ;;  %v566_v5 = vld [vmem:[%s7117_s3 + $0x28] sm:$0xff] }
  0x1b   : > { %408 = vst [vmem:[#allocation2 + $0xf0] sm:$0xff] %v5440_v2  ;;  %409 = vst [vmem:[#allocation2 + $0xf8] sm:$0xff] %v5440_v2  ;;  %v7131_v51 = vmax.f32 %v5636_v39, 0.0  ;;  %v5658_v52 = vadd.f32 %v5583_v8, %v294_v40  ;;  %v317_v53 = vadd.f32 %v5583_v8, %v278_v41  ;;  %v279_v54 = vmul.f32 %v5577_v6, %v240_v43  ;;  %v260_v12 = vld [vmem:[%s5572_s9 + $0xc0] sm:$0xff]  ;;  %v261_v20 = vld [vmem:[%s5572_s9 + $0xc8] sm:$0xff] }
  0x1c   : > { %410 = vst [vmem:[#allocation2 + $0x100] sm:$0x3] %v5440_v2  ;;  %411 = vst [vmem:[#allocation2 + $0x108] sm:$0xff] %v5440_v2  ;;  %5405 = vmatpush3.msra.mxu1 %v569_v32  ;;  %4677 = vmatpush3.msra.mxu0 %v569_v32  ;;  %v5669_v57 = vmax.f32 %v316_v47, 0.0  ;;  %v5672_v58 = vadd.f32 %v5583_v8, %v295_v48  ;;  %v296_v59 = vmul.f32 %v5577_v6, %v257_v49  ;;  %v244_v19 = vld [vmem:[%s5572_s9 + $0x40] sm:$0xff]  ;;  %v245_v30 = vld [vmem:[%s5572_s9 + $0x48] sm:$0xff] }
  0x1d   : > { %412 = vst [vmem:[#allocation2 + $0x110] sm:$0xff] %v5440_v2  ;;  %413 = vst [vmem:[#allocation2 + $0x118] sm:$0x3] %v5440_v2  ;;  %v280_v60 = vmul.f32 %v5577_v6, %v241_v50  ;;  %5390 = vmatprep.subr.mxu1 %v568_v44  ;;  %4678 = vmatprep.subr.mxu0 %v568_v44  ;;  %v7130_v63 = vmax.f32 %v5658_v52, 0.0  ;;  %v5681_v0 = vmax.f32 %v317_v53, 0.0  ;;  %v565_v21 = vld [vmem:[%s7117_s3 + $0x20] sm:$0xff] }
  0x1e   : > { %414 = vst [vmem:[#allocation2 + $0x120] sm:$0xff] %v5440_v2  ;;  %415 = vst [vmem:[#allocation2 + $0x128] sm:$0xff] %v5440_v2  ;;  %v318_v1 = vadd.f32 %v5583_v8, %v279_v54  ;;  %v297_v3 = vmul.f32 %v5577_v6, %v258_v55  ;;  %5406 = vmatpush3.msra.mxu1 %v568_v44  ;;  %4679 = vmatpush3.msra.mxu0 %v568_v44  ;;  %v7129_v7 = vmax.f32 %v5672_v58, 0.0  ;;  %v564_v37 = vld [vmem:[%s7117_s3 + $0x18] sm:$0xff]  ;;  %v262_v44 = vld [vmem:[%s5572_s9 + $0xd0] sm:$0xff] }
  0x1f   : > { %416 = vst [vmem:[#allocation2 + $0x130] sm:$0x3] %v5440_v2  ;;  %417 = vst [vmem:[#allocation2 + $0x138] sm:$0xff] %v5440_v2  ;;  %v5692_v9 = vadd.f32 %v5583_v8, %v296_v59  ;;  %v319_v10 = vadd.f32 %v5583_v8, %v280_v60  ;;  %v281_v11 = vmul.f32 %v5577_v6, %v242_v61  ;;  %5391 = vmatprep.subr.mxu1 %v567_v56  ;;  %v246_v53 = vld [vmem:[%s5572_s9 + $0x50] sm:$0xff]  ;;  %v263_v61 = vld [vmem:[%s5572_s9 + $0xd8] sm:$0xff] }
  0x20   : > { %418 = vst [vmem:[#allocation2 + $0x140] sm:$0xff] %v5440_v2  ;;  %419 = vst [vmem:[#allocation2 + $0x148] sm:$0x3] %v5440_v2  ;;  %4680 = vmatprep.subr.mxu0 %v567_v56  ;;  %v5700_v13 = vmax.f32 %v318_v1, 0.0  ;;  %v5703_v14 = vadd.f32 %v5583_v8, %v297_v3  ;;  %v298_v15 = vmul.f32 %v5577_v6, %v259_v62  ;;  %5407 = vmatpush3.msra.mxu1 %v567_v56  ;;  %v563_v54 = vld [vmem:[%s7117_s3 + $0x10] sm:$0xff] }
  0x21   : > { %420 = vst [vmem:[#allocation2 + $0x150] sm:$0xff] %v5440_v2  ;;  %421 = vst [vmem:[#allocation2 + $0x158] sm:$0xff] %v5440_v2  ;;  %v282_v16 = vmul.f32 %v5577_v6, %v243_v4  ;;  %4681 = vmatpush3.msra.mxu0 %v567_v56  ;;  %v7128_v23 = vmax.f32 %v5692_v9, 0.0  ;;  %v5715_v24 = vmax.f32 %v319_v10, 0.0  ;;  %v320_v25 = vadd.f32 %v5583_v8, %v281_v11  ;;  %v247_v4 = vld [vmem:[%s5572_s9 + $0x58] sm:$0xff] }
  0x22   : > { %422 = vst [vmem:[#allocation2 + $0x160] sm:$0x3] %v5440_v2  ;;  %423 = vst [vmem:[#allocation2 + $0x168] sm:$0xff] %v5440_v2  ;;  %v299_v29 = vmul.f32 %v5577_v6, %v260_v12  ;;  %5392 = vmatprep.subr.mxu1 %v566_v5  ;;  %4682 = vmatprep.subr.mxu0 %v566_v5  ;;  %v7127_v31 = vmax.f32 %v5703_v14, 0.0  ;;  %v5723_v32 = vadd.f32 %v5583_v8, %v298_v15 }
  0x23   : > { %424 = vst [vmem:[#allocation2 + $0x170] sm:$0xff] %v5440_v2  ;;  %425 = vst [vmem:[#allocation2 + $0x178] sm:$0x3] %v5440_v2  ;;  %v321_v35 = vadd.f32 %v5583_v8, %v282_v16  ;;  %v283_v36 = vmul.f32 %v5577_v6, %v244_v19  ;;  %5408 = vmatpush3.msra.mxu1 %v566_v5  ;;  %4683 = vmatpush3.msra.mxu0 %v566_v5  ;;  %v5733_v40 = vmax.f32 %v320_v25, 0.0  ;;  %v562_v5 = vld [vmem:[%s7117_s3 + $0x8] sm:$0xff] }
  0x24   : > { %426 = vst [vmem:[#allocation2 + $0x180] sm:$0xff] %v5440_v2  ;;  %427 = vst [vmem:[#allocation2 + $0x188] sm:$0xff] %v5440_v2  ;;  %v5736_v41 = vadd.f32 %v5583_v8, %v299_v29  ;;  %v300_v42 = vmul.f32 %v5577_v6, %v261_v20  ;;  %v284_v43 = vmul.f32 %v5577_v6, %v245_v30  ;;  %5393 = vmatprep.subr.mxu1 %v565_v21  ;;  %v264_v20 = vld [vmem:[%s5572_s9 + $0xe0] sm:$0xff] }
  0x25   : > { %428 = vst [vmem:[#allocation2 + $0x190] sm:$0x3] %v5440_v2  ;;  %429 = vst [vmem:[#allocation2 + $0x198] sm:$0xff] %v5440_v2  ;;  %4684 = vmatprep.subr.mxu0 %v565_v21  ;;  %v7126_v47 = vmax.f32 %v5723_v32, 0.0  ;;  %v5744_v48 = vmax.f32 %v321_v35, 0.0  ;;  %v322_v49 = vadd.f32 %v5583_v8, %v283_v36  ;;  %v301_v50 = vmul.f32 %v5577_v6, %v262_v44  ;;  %v248_v35 = vld [vmem:[%s5572_s9 + $0x60] sm:$0xff] }
  0x26   : > { %430 = vst [vmem:[#allocation2 + $0x1a0] sm:$0xff] %v5440_v2  ;;  %431 = vst [vmem:[#allocation2 + $0x1a8] sm:$0x3] %v5440_v2  ;;  %5409 = vmatpush3.msra.mxu1 %v565_v21  ;;  %4685 = vmatpush3.msra.mxu0 %v565_v21  ;;  %v7125_v55 = vmax.f32 %v5736_v41, 0.0  ;;  %v5755_v56 = vadd.f32 %v5583_v8, %v300_v42  ;;  %v323_v59 = vadd.f32 %v5583_v8, %v284_v43  ;;  %v561_v21 = vld [vmem:[%s7117_s3] sm:$0xff]  ;;  %v265_v36 = vld [vmem:[%s5572_s9 + $0xe8] sm:$0xff] }
  0x27   : > { %447 = vst [vmem:[#allocation2 + $0xc1] sm:$0xff] %v7135_v26  ;;  %448 = vst [vmem:[#allocation2 + $0xc9] sm:$0xff] %v7134_v27  ;;  %v285_v60 = vmul.f32 %v5577_v6, %v246_v53  ;;  %5394 = vmatprep.subr.mxu1 %v564_v37  ;;  %4686 = vmatprep.subr.mxu0 %v564_v37  ;;  %v5763_v62 = vmax.f32 %v322_v49, 0.0  ;;  %v5766_v1 = vadd.f32 %v5583_v8, %v301_v50  ;;  %v249_v53 = vld [vmem:[%s5572_s9 + $0x68] sm:$0xff] }
  0x28   : > { %449 = vst [vmem:[#allocation2 + $0xd9] sm:$0xff] %v7133_v33  ;;  %433 = vst [vmem:[#allocation2 + $0x19] sm:$0xff] %v7136_v38  ;;  %v302_v3 = vmul.f32 %v5577_v6, %v263_v61  ;;  %5410 = vmatpush3.msra.mxu1 %v564_v37  ;;  %4687 = vmatpush3.msra.mxu0 %v564_v37  ;;  %v7124_v10 = vmax.f32 %v5755_v56, 0.0  ;;  %v5776_v11 = vmax.f32 %v323_v59, 0.0  ;;  %v4113_v59 = vld [vmem:[%s7117_s3 + $0xf8] sm:$0xff]  ;;  %v4114_v33 = vld [vmem:[%s7117_s3 + $0x100] sm:$0xff] }
  0x29   : > { %450 = vst [vmem:[#allocation2 + $0xe1] sm:$0xff] %v7132_v45  ;;  %434 = vst [vmem:[#allocation2 + $0x21] sm:$0xff] %v5648_v46  ;;  %v324_v12 = vadd.f32 %v5583_v8, %v285_v60  ;;  %v286_v15 = vmul.f32 %v5577_v6, %v247_v4  ;;  %5395 = vmatprep.subr.mxu1 %v563_v54  ;;  %4688 = vmatprep.subr.mxu0 %v563_v54  ;;  %v7123_v16 = vmax.f32 %v5766_v1, 0.0  ;;  %v866_v45 = vld [vmem:[#allocation2 + $0x1] sm:$0xff]  ;;  %v867_v26 = vld [vmem:[#allocation2 + $0x9] sm:$0xff] }
  0x2a   : > { %451 = vst [vmem:[#allocation2 + $0xf1] sm:$0xff] %v7131_v51  ;;  %435 = vst [vmem:[#allocation2 + $0x31] sm:$0xff] %v5669_v57  ;;  %v5783_v19 = vadd.f32 %v5583_v8, %v302_v3  ;;  %5411 = vmatpush3.msra.mxu1 %v563_v54  ;;  %4689 = vmatpush3.msra.mxu0 %v563_v54  ;;  %v303_v30 = vmul.f32 %v5577_v6, %v264_v20  ;;  %v267_v51 = vld [vmem:[%s5572_s9 + $0xf8] sm:$0xff] }
  0x2b   : > { %452 = vst [vmem:[#allocation2 + $0xf9] sm:$0xff] %v7130_v63  ;;  %436 = vst [vmem:[#allocation2 + $0x39] sm:$0xff] %v5681_v0  ;;  %v5792_v25 = vmax.f32 %v324_v12, 0.0  ;;  %v325_v29 = vadd.f32 %v5583_v8, %v286_v15  ;;  %5396 = vmatprep.subr.mxu1 %v562_v5  ;;  %4690 = vmatprep.subr.mxu0 %v562_v5  ;;  %v287_v43 = vmul.f32 %v5577_v6, %v248_v35  ;;  %v4112_v12 = vld [vmem:[%s7117_s3 + $0xf0] sm:$0xff] }
  0x2c   : > { %453 = vst [vmem:[#allocation2 + $0x109] sm:$0xff] %v7129_v7  ;;  %437 = vst [vmem:[#allocation2 + $0x49] sm:$0xff] %v5700_v13  ;;  %v7122_v42 = vmax.f32 %v5783_v19, 0.0  ;;  %v304_v44 = vmul.f32 %v5577_v6, %v265_v36  ;;  %5412 = vmatpush3.msra.mxu1 %v562_v5  ;;  %4691 = vmatpush3.msra.mxu0 %v562_v5  ;;  %v5807_v50 = vadd.f32 %v5583_v8, %v303_v30  ;;  %v4129_v5 = vld [vmem:[%s7117_s3 + $0x178] sm:$0xff]  ;;  %v4115_v7 = vld [vmem:[%s7117_s3 + $0x108] sm:$0xff] }
  0x2d   : > { %454 = vst [vmem:[#allocation2 + $0x111] sm:$0xff] %v7128_v23  ;;  %438 = vst [vmem:[#allocation2 + $0x51] sm:$0xff] %v5715_v24  ;;  %v5804_v49 = vmax.f32 %v325_v29, 0.0  ;;  %5397 = vmatprep.subr.mxu1 %v561_v21  ;;  %4692 = vmatprep.subr.mxu0 %v561_v21  ;;  %v326_v60 = vadd.f32 %v5583_v8, %v287_v43  ;;  %v288_v3 = vmul.f32 %v5577_v6, %v249_v53  ;;  %v4110_v53 = vld [vmem:[%s7117_s3 + $0xe0] sm:$0xff]  ;;  %v266_v63 = vld [vmem:[%s5572_s9 + $0xf0] sm:$0xff] }
  0x2e   : > { %455 = vst [vmem:[#allocation2 + $0x121] sm:$0xff] %v7127_v31  ;;  %439 = vst [vmem:[#allocation2 + $0x61] sm:$0xff] %v5733_v40  ;;  %v513_v37 = vld [vmem:[#allocation2 + $0xc0] sm:$0xff]  ;;  %v514_v54 = vld [vmem:[#allocation2 + $0xc8] sm:$0xff]  ;;  %v5817_v61 = vadd.f32 %v5583_v8, %v304_v44  ;;  %5413 = vmatpush3.msra.mxu1 %v561_v21  ;;  %v7121_v4 = vmax.f32 %v5807_v50, 0.0  ;;  %4693 = vmatpush3.msra.mxu0 %v561_v21  ;;  %v306_v27 = vmul.f32 %v5577_v6, %v267_v51 }
  0x2f   : > { %456 = vst [vmem:[#allocation2 + $0x129] sm:$0xff] %v7126_v47  ;;  %440 = vst [vmem:[#allocation2 + $0x69] sm:$0xff] %v5744_v48  ;;  %4718 = vmatprep.mubr.f32.mxu1 %v513_v37  ;;  %4694 = vmatprep.mubr.f32.mxu0 %v5440_v2  ;;  %v5829_v15 = vmax.f32 %v326_v60, 0.0  ;;  %v327_v29 = vadd.f32 %v5583_v8, %v288_v3  ;;  %v515_v30 = vld [vmem:[#allocation2 + $0xd8] sm:$0xff]  ;;  %v4128_v21 = vld [vmem:[%s7117_s3 + $0x170] sm:$0xff] }
  0x30   : > { %457 = vst [vmem:[#allocation2 + $0x139] sm:$0xff] %v7125_v55  ;;  %441 = vst [vmem:[#allocation2 + $0x79] sm:$0xff] %v5763_v62  ;;  %v7120_v20 = vmax.f32 %v5817_v61, 0.0  ;;  %4719 = vmatmul.mubr.f32.vlgmr.msra.gmra.mxu1 %v514_v54  ;;  %4742 = vmatprep.subr.mxu1 %v4113_v59  ;;  %v5844_v36 = vld [vmem:[#allocation2 + $0x18] sm:$0xff]  ;;  %v516_v37 = vld [vmem:[#allocation2 + $0xe0] sm:$0xff] }
  0x31   : > { %458 = vst [vmem:[#allocation2 + $0x141] sm:$0xff] %v7124_v10  ;;  %442 = vst [vmem:[#allocation2 + $0x81] sm:$0xff] %v5776_v11  ;;  %4695 = vmatmul.mubr.f32.vlgmr.msra.gmra.mxu0 %v5440_v2  ;;  %4743 = vmatpush3.msra.mxu1 %v4113_v59  ;;  %v5842_v35 = vmax.f32 %v327_v29, 0.0  ;;  %v4111_v2 = vld [vmem:[%s7117_s3 + $0xe8] sm:$0xff]  ;;  %v5850_v43 = vld [vmem:[#allocation2 + $0x20] sm:$0xff] }
  0x32   : > { %459 = vst [vmem:[#allocation2 + $0x151] sm:$0xff] %v7123_v16  ;;  %443 = vst [vmem:[#allocation2 + $0x91] sm:$0xff] %v5792_v25  ;;  %4822 = vmatprep.subr.mxu0 %v4129_v5  ;;  %4744 = vmatprep.subr.mxu1 %v4112_v12  ;;  %v4127_v44 = vld [vmem:[%s7117_s3 + $0x168] sm:$0xff]  ;;  %v517_v54 = vld [vmem:[#allocation2 + $0xf0] sm:$0xff] }
  0x33   : > { %460 = vst [vmem:[#allocation2 + $0x159] sm:$0xff] %v7122_v42  ;;  %444 = vst [vmem:[#allocation2 + $0x99] sm:$0xff] %v5804_v49  ;;  %4823 = vmatpush3.msra.mxu0 %v4129_v5  ;;  %4721 = vmatprep.mubr.f32.mxu1 %v515_v30  ;;  %v4126_v59 = vld [vmem:[%s7117_s3 + $0x160] sm:$0xff]  ;;  %v5863_v60 = vld [vmem:[#allocation2 + $0x30] sm:$0xff] }
  0x34   : > { %461 = vst [vmem:[#allocation2 + $0x169] sm:$0xff] %v7121_v4  ;;  %445 = vst [vmem:[#allocation2 + $0xa9] sm:$0xff] %v5829_v15  ;;  %4745 = vmatpush3.msra.mxu1 %v4112_v12  ;;  %4824 = vmatprep.subr.mxu0 %v4128_v21  ;;  %v518_v3 = vld [vmem:[#allocation2 + $0xf8] sm:$0xff]  ;;  %v4108_v30 = vld [vmem:[%s7117_s3 + $0xd0] sm:$0xff] }
  0x35   : > { %462 = vst [vmem:[#allocation2 + $0x171] sm:$0xff] %v7120_v20  ;;  %446 = vst [vmem:[#allocation2 + $0xb1] sm:$0xff] %v5842_v35  ;;  %4697 = vmatprep.mubr.f32.mxu0 %v5844_v36  ;;  %4722 = vmatmul.mubr.f32.gmra.mxu1 %v516_v37  ;;  %v4109_v5 = vld [vmem:[%s7117_s3 + $0xd8] sm:$0xff]  ;;  %v4124_v37 = vld [vmem:[%s7117_s3 + $0x150] sm:$0xff] }
  0x36   : > { %4746 = vmatprep.subr.mxu1 %v4111_v2  ;;  %4825 = vmatpush3.msra.mxu0 %v4128_v21  ;;  %v5868_v12 = vld [vmem:[#allocation2 + $0x38] sm:$0xff]  ;;  %v519_v21 = vld [vmem:[#allocation2 + $0x108] sm:$0xff] }
  0x37   : > { %4698 = vmatmul.mubr.f32.gmra.mxu0 %v5850_v43  ;;  %4747 = vmatpush3.msra.mxu1 %v4111_v2  ;;  %v4125_v29 = vld [vmem:[%s7117_s3 + $0x158] sm:$0xff]  ;;  %v5881_v2 = vld [vmem:[#allocation2 + $0x48] sm:$0xff] }
  0x38   : > { %4826 = vmatprep.subr.mxu0 %v4127_v44  ;;  %4748 = vmatprep.subr.mxu1 %v4110_v53  ;;  %v5921_v20 = vld [vmem:[#allocation2 + $0x140] sm:$0xff]  ;;  %v4119_v4 = vld [vmem:[%s7117_s3 + $0x128] sm:$0xff]  ;;  %v4117_v55 = vld [vmem:[%s7117_s3 + $0x118] sm:$0xff] }
  0x39   : > { %4827 = vmatpush3.msra.mxu0 %v4127_v44  ;;  %4724 = vmatprep.mubr.f32.mxu1 %v517_v54  ;;  %v520_v44 = vld [vmem:[#allocation2 + $0x110] sm:$0xff]  ;;  %v4161_v51 = vld [vmem:[%s7117_s3 + $0x278] sm:$0xff] }
  0x3a   : > { %4749 = vmatpush3.msra.mxu1 %v4110_v53  ;;  %4828 = vmatprep.subr.mxu0 %v4126_v59  ;;  %v4107_v53 = vld [vmem:[%s7117_s3 + $0xc8] sm:$0xff]  ;;  %v5886_v54 = vld [vmem:[#allocation2 + $0x50] sm:$0xff]  ;;  %v5945_v10 = vld [vmem:[#allocation2 + $0x158] sm:$0xff] }
  0x3b   : > { %4700 = vmatprep.mubr.f32.mxu0 %v5863_v60  ;;  %4725 = vmatmul.mubr.f32.gmra.mxu1 %v518_v3  ;;  %v4106_v3 = vld [vmem:[%s7117_s3 + $0xc0] sm:$0xff]  ;;  %v5937_v42 = vld [vmem:[#allocation2 + $0x150] sm:$0xff]  ;;  %v5961_v47 = vld [vmem:[#allocation2 + $0x168] sm:$0xff] }
  0x3c   : > { %4750 = vmatprep.subr.mxu1 %v4109_v5  ;;  %4829 = vmatpush3.msra.mxu0 %v4126_v59  ;;  %v4123_v59 = vld [vmem:[%s7117_s3 + $0x148] sm:$0xff]  ;;  %v5943_v16 = vld [vmem:[#allocation2 + $0x90] sm:$0xff] }
  0x3d   : > { %4701 = vmatmul.mubr.f32.gmra.mxu0 %v5868_v12  ;;  %4751 = vmatpush3.msra.mxu1 %v4109_v5  ;;  %v521_v5 = vld [vmem:[#allocation2 + $0x120] sm:$0xff]  ;;  %v5967_v31 = vld [vmem:[#allocation2 + $0xa8] sm:$0xff]  ;;  %v5969_v23 = vld [vmem:[#allocation2 + $0x170] sm:$0xff] }
  0x3e   : > { %4830 = vmatprep.subr.mxu0 %v4125_v29  ;;  %4752 = vmatprep.subr.mxu1 %v4108_v30  ;;  %7149 = vst [vmem:[#allocation4_spill] sm:$0xff] %v5969_v23 }
  0x3f   : > { %4831 = vmatpush3.msra.mxu0 %v4125_v29  ;;  %4727 = vmatprep.mubr.f32.mxu1 %v519_v21  ;;  %v4122_v29 = vld [vmem:[%s7117_s3 + $0x140] sm:$0xff]  ;;  %v522_v21 = vld [vmem:[#allocation2 + $0x128] sm:$0xff] }
  0x40   : > { %4753 = vmatpush3.msra.mxu1 %v4108_v30  ;;  %4832 = vmatprep.subr.mxu0 %v4124_v37  ;;  %v5899_v30 = vld [vmem:[#allocation2 + $0x60] sm:$0xff] }
  0x41   : > { %4703 = vmatprep.mubr.f32.mxu0 %v5881_v2  ;;  %4728 = vmatmul.mubr.f32.gmra.mxu1 %v520_v44  ;;  %v4105_v44 = vld [vmem:[%s7117_s3 + $0xb8] sm:$0xff] }
  0x42   : > { %4754 = vmatprep.subr.mxu1 %v4107_v53  ;;  %4833 = vmatpush3.msra.mxu0 %v4124_v37  ;;  %v5904_v37 = vld [vmem:[#allocation2 + $0x68] sm:$0xff] }
  0x43   : > { %4704 = vmatmul.mubr.f32.gmra.mxu0 %v5886_v54  ;;  %4755 = vmatpush3.msra.mxu1 %v4107_v53  ;;  %v4121_v53 = vld [vmem:[%s7117_s3 + $0x138] sm:$0xff] }
  0x44   : > { %4834 = vmatprep.subr.mxu0 %v4123_v59  ;;  %4756 = vmatprep.subr.mxu1 %v4106_v3 }
  0x45   : > { %4835 = vmatpush3.msra.mxu0 %v4123_v59  ;;  %4730 = vmatprep.mubr.f32.mxu1 %v521_v5  ;;  %v4104_v59 = vld [vmem:[%s7117_s3 + $0xb0] sm:$0xff]  ;;  %v5913_v5 = vld [vmem:[#allocation2 + $0x138] sm:$0xff] }
  0x46   : > { %4757 = vmatpush3.msra.mxu1 %v4106_v3  ;;  %4836 = vmatprep.subr.mxu0 %v4122_v29  ;;  %v4120_v3 = vld [vmem:[%s7117_s3 + $0x130] sm:$0xff] }
  0x47   : > { %4706 = vmatprep.mubr.f32.mxu0 %v5899_v30  ;;  %4731 = vmatmul.mubr.f32.gmra.mxu1 %v522_v21  ;;  %v5919_v21 = vld [vmem:[#allocation2 + $0x78] sm:$0xff] }
  0x48   : > { %4758 = vmatprep.subr.mxu1 %v4105_v44  ;;  %4837 = vmatpush3.msra.mxu0 %v4122_v29  ;;  %v4103_v29 = vld [vmem:[%s7117_s3 + $0xa8] sm:$0xff] }
  0x49   : > { %4707 = vmatmul.mubr.f32.gmra.mxu0 %v5904_v37  ;;  %4759 = vmatpush3.msra.mxu1 %v4105_v44  ;;  %v5927_v44 = vld [vmem:[#allocation2 + $0x80] sm:$0xff] }
  0x4a   : > { %4838 = vmatprep.subr.mxu0 %v4121_v53  ;;  %4760 = vmatprep.subr.mxu1 %v4104_v59 }
  0x4b   : > { %4839 = vmatpush3.msra.mxu0 %v4121_v53  ;;  %4733 = vmatprep.mubr.f32.mxu1 %v5913_v5  ;;  %v4102_v53 = vld [vmem:[%s7117_s3 + $0xa0] sm:$0xff] }
  0x4c   : > { %4761 = vmatpush3.msra.mxu1 %v4104_v59  ;;  %4840 = vmatprep.subr.mxu0 %v4120_v3  ;;  %v4118_v59 = vld [vmem:[%s7117_s3 + $0x120] sm:$0xff] }
  0x4d   : > { %4709 = vmatprep.mubr.f32.mxu0 %v5919_v21  ;;  %4734 = vmatmul.mubr.f32.gmra.mxu1 %v5921_v20 }
  0x4e   : > { %4762 = vmatprep.subr.mxu1 %v4103_v29  ;;  %4841 = vmatpush3.msra.mxu0 %v4120_v3  ;;  %v4101_v3 = vld [vmem:[%s7117_s3 + $0x98] sm:$0xff] }
  0x4f   : > { %4710 = vmatmul.mubr.f32.gmra.mxu0 %v5927_v44  ;;  %4763 = vmatpush3.msra.mxu1 %v4103_v29  ;;  %v5951_v29 = vld [vmem:[#allocation2 + $0x98] sm:$0xff] }
  0x50   : > { %4842 = vmatprep.subr.mxu0 %v4119_v4  ;;  %4764 = vmatprep.subr.mxu1 %v4102_v53 }
  0x51   : > { %4843 = vmatpush3.msra.mxu0 %v4119_v4  ;;  %4736 = vmatprep.mubr.f32.mxu1 %v5937_v42  ;;  %v4100_v4 = vld [vmem:[%s7117_s3 + $0x90] sm:$0xff] }
  0x52   : > { %4765 = vmatpush3.msra.mxu1 %v4102_v53  ;;  %4844 = vmatprep.subr.mxu0 %v4118_v59  ;;  %v4116_v53 = vld [vmem:[%s7117_s3 + $0x110] sm:$0xff] }
  0x53   : > { %4712 = vmatprep.mubr.f32.mxu0 %v5943_v16  ;;  %4737 = vmatmul.mubr.f32.gmra.mxu1 %v5945_v10 }
  0x54   : > { %4766 = vmatprep.subr.mxu1 %v4101_v3  ;;  %4845 = vmatpush3.msra.mxu0 %v4118_v59  ;;  %v4099_v59 = vld [vmem:[%s7117_s3 + $0x88] sm:$0xff] }
  0x55   : > { %4713 = vmatmul.mubr.f32.gmra.mxu0 %v5951_v29  ;;  %4767 = vmatpush3.msra.mxu1 %v4101_v3  ;;  %v5975_v3 = vld [vmem:[#allocation2 + $0xb0] sm:$0xff] }
  0x56   : > { %4846 = vmatprep.subr.mxu0 %v4117_v55  ;;  %4768 = vmatprep.subr.mxu1 %v4100_v4 }
  0x57   : > { %4847 = vmatpush3.msra.mxu0 %v4117_v55  ;;  %4739 = vmatprep.mubr.f32.mxu1 %v5961_v47  ;;  %v4098_v55 = vld [vmem:[%s7117_s3 + $0x80] sm:$0xff] }
  0x58   : > { %4769 = vmatpush3.msra.mxu1 %v4100_v4  ;;  %4848 = vmatprep.subr.mxu0 %v4116_v53  ;;  %v305_v4 = vmul.f32 %v5577_v6, %v266_v63  ;;  %v1236_v63 = vld [vmem:[#allocation2 + $0x2] sm:$0xff] }
  0x59   : > { %4715 = vmatprep.mubr.f32.mxu0 %v5967_v31  ;;  %4740 = vmatmul.mubr.f32.gmra.mxu1 %v5969_v23  ;;  %v1237_v23 = vld [vmem:[#allocation2 + $0xa] sm:$0xff] }
  0x5a   : > { %4770 = vmatprep.subr.mxu1 %v4099_v59  ;;  %4849 = vmatpush3.msra.mxu0 %v4116_v53  ;;  %v5994_v38 = vadd.f32 %v5583_v8, %v305_v4  ;;  %v4145_v53 = vld [vmem:[%s7117_s3 + $0x1f8] sm:$0xff]  ;;  %v4159_v4 = vld [vmem:[%s7117_s3 + $0x268] sm:$0xff] }
  0x5b   : > { %4716 = vmatmul.mubr.f32.gmra.mxu0 %v5975_v3  ;;  %4771 = vmatpush3.msra.mxu1 %v4099_v59  ;;  %v6000_v59 = vadd.f32 %v5583_v8, %v306_v27  ;;  %v6009_v8 = vld [vmem:[#allocation2 + $0x1a] sm:$0xff]  ;;  %v7150_v27 = vmax.f32 %v5615_v28, 0.0  ;;  %v4143_v28 = vld [vmem:[%s7117_s3 + $0x1e8] sm:$0xff] }
  0x5c   : > { %4850 = vmatprep.subr.mxu0 %v4115_v7  ;;  %4772 = vmatprep.subr.mxu1 %v4098_v55  ;;  %v7139_v6 = vmax.f32 %v5994_v38, 0.0 }
  0x5d   : > { %4851 = vmatpush3.msra.mxu0 %v4115_v7  ;;  %4773 = vmatpush3.msra.mxu1 %v4098_v55  ;;  %v7138_v7 = vmax.f32 %v6000_v59, 0.0  ;;  %v6032_v55 = vld [vmem:[#allocation2 + $0x3a] sm:$0xff] }
  0x5e   : > { %4774 = vmatprep.mubr.f32.mxu1 %v866_v45  ;;  %4852 = vmatprep.subr.mxu0 %v4114_v33  ;;  %463 = vst [vmem:[#allocation2 + $0x181] sm:$0xff] %v7139_v6  ;;  %v4160_v45 = vld [vmem:[%s7117_s3 + $0x270] sm:$0xff] }
  0x5f   : > { %4775 = vmatmul.mubr.f32.vlgmr.msra.gmra.mxu1 %v867_v26  ;;  %4853 = vmatpush3.msra.mxu0 %v4114_v33  ;;  %v4144_v26 = vld [vmem:[%s7117_s3 + $0x1f0] sm:$0xff]  ;;  %464 = vst [vmem:[#allocation2 + $0x189] sm:$0xff] %v7138_v7  ;;  %v6018_v33 = vld [vmem:[#allocation2 + $0x22] sm:$0xff] }
  0x60   : > { %4854 = vmatprep.mubr.f32.mxu0 %v1236_v63  ;;  %4902 = vmatprep.subr.mxu1 %v4145_v53  ;;  %v6040_v63 = vld [vmem:[#allocation2 + $0x4a] sm:$0xff] }
  0x61   : > { %4855 = vmatmul.mubr.f32.vlgmr.msra.gmra.mxu0 %v1237_v23  ;;  %4903 = vmatpush3.msra.mxu1 %v4145_v53  ;;  %v6026_v23 = vld [vmem:[#allocation2 + $0x32] sm:$0xff]  ;;  %v4142_v53 = vld [vmem:[%s7117_s3 + $0x1e0] sm:$0xff] }
  0x62   : > { %4982 = vmatprep.subr.mxu0 %v4161_v51  ;;  %4777 = vmatprep.mubr.f32.mxu1 %v7150_v27  ;;  %v6054_v27 = vld [vmem:[#allocation2 + $0x62] sm:$0xff]  ;;  %v4140_v7 = vld [vmem:[%s7117_s3 + $0x1d0] sm:$0xff] }
  0x63   : > { %4983 = vmatpush3.msra.mxu0 %v4161_v51  ;;  %4778 = vmatmul.mubr.f32.gmra.mxu1 %v5648_v46  ;;  %v6046_v51 = vld [vmem:[#allocation2 + $0x52] sm:$0xff]  ;;  %7152 = vst [vmem:[#allocation6_spill] sm:$0xff] %v6054_v27 }
  0x64   : > { %4857 = vmatprep.mubr.f32.mxu0 %v6009_v8  ;;  %4904 = vmatprep.subr.mxu1 %v4144_v26  ;;  %7151 = vst [vmem:[#allocation5_spill] sm:$0xff] %v6046_v51  ;;  %v4156_v6 = vld [vmem:[%s7117_s3 + $0x250] sm:$0xff] }
  0x65   : > { %4858 = vmatmul.mubr.f32.gmra.mxu0 %v6018_v33  ;;  %4905 = vmatpush3.msra.mxu1 %v4144_v26  ;;  %v4158_v26 = vld [vmem:[%s7117_s3 + $0x260] sm:$0xff] }
  0x66   : > { %4984 = vmatprep.subr.mxu0 %v4160_v45  ;;  %4780 = vmatprep.mubr.f32.mxu1 %v5669_v57 }
  0x67   : > { %4985 = vmatpush3.msra.mxu0 %v4160_v45  ;;  %4781 = vmatmul.mubr.f32.gmra.mxu1 %v5681_v0  ;;  %v4141_v45 = vld [vmem:[%s7117_s3 + $0x1d8] sm:$0xff] }
  0x68   : > { %4860 = vmatprep.mubr.f32.mxu0 %v6026_v23  ;;  %4906 = vmatprep.subr.mxu1 %v4143_v28 }
  0x69   : > { %4861 = vmatmul.mubr.f32.gmra.mxu0 %v6032_v55  ;;  %4907 = vmatpush3.msra.mxu1 %v4143_v28  ;;  %v6060_v28 = vld [vmem:[#allocation2 + $0x6a] sm:$0xff] }
  0x6a   : > { %4986 = vmatprep.subr.mxu0 %v4159_v4  ;;  %4783 = vmatprep.mubr.f32.mxu1 %v5700_v13  ;;  %7153 = vst [vmem:[#allocation7_spill] sm:$0xff] %v6060_v28 }
  0x6b   : > { %4987 = vmatpush3.msra.mxu0 %v4159_v4  ;;  %4784 = vmatmul.mubr.f32.gmra.mxu1 %v5715_v24  ;;  %v4157_v4 = vld [vmem:[%s7117_s3 + $0x258] sm:$0xff] }
  0x6c   : > { %4863 = vmatprep.mubr.f32.mxu0 %v6040_v63  ;;  %4908 = vmatprep.subr.mxu1 %v4142_v53 }
  0x6d   : > { %4864 = vmatmul.mubr.f32.gmra.mxu0 %v6046_v51  ;;  %4909 = vmatpush3.msra.mxu1 %v4142_v53  ;;  %v6068_v53 = vld [vmem:[#allocation2 + $0x7a] sm:$0xff]  ;;  %v7160_v51 = vmax.f32 %v5599_v18, 0.0  ;;  %v7161_v18 = vmax.f32 %v5607_v22, 0.0  ;;  %v4135_v22 = vld [vmem:[%s7117_s3 + $0x1a8] sm:$0xff] }
  0x6e   : > { %4988 = vmatprep.subr.mxu0 %v4158_v26  ;;  %4786 = vmatprep.mubr.f32.mxu1 %v5733_v40  ;;  %7154 = vst [vmem:[#allocation8_spill] sm:$0xff] %v6068_v53 }
  0x6f   : > { %4989 = vmatpush3.msra.mxu0 %v4158_v26  ;;  %4787 = vmatmul.mubr.f32.gmra.mxu1 %v5744_v48  ;;  %v6074_v26 = vld [vmem:[#allocation2 + $0x82] sm:$0xff] }
  0x70   : > { %4866 = vmatprep.mubr.f32.mxu0 %v6054_v27  ;;  %4910 = vmatprep.subr.mxu1 %v4141_v45  ;;  %7155 = vst [vmem:[#allocation9_spill] sm:$0xff] %v6074_v26  ;;  %v6117_v27 = vld [vmem:[#allocation2 + $0xca] sm:$0xff] }
  0x71   : > { %4867 = vmatmul.mubr.f32.gmra.mxu0 %v6060_v28  ;;  %4911 = vmatpush3.msra.mxu1 %v4141_v45  ;;  %v6082_v45 = vld [vmem:[#allocation2 + $0x92] sm:$0xff]  ;;  %v4139_v28 = vld [vmem:[%s7117_s3 + $0x1c8] sm:$0xff] }
  0x72   : > { %4990 = vmatprep.subr.mxu0 %v4157_v4  ;;  %4789 = vmatprep.mubr.f32.mxu1 %v5763_v62  ;;  %7156 = vst [vmem:[#allocation10_spill] sm:$0xff] %v6082_v45 }
  0x73   : > { %4991 = vmatpush3.msra.mxu0 %v4157_v4  ;;  %4790 = vmatmul.mubr.f32.gmra.mxu1 %v5776_v11  ;;  %v6088_v4 = vld [vmem:[#allocation2 + $0x9a] sm:$0xff] }
  0x74   : > { %4869 = vmatprep.mubr.f32.mxu0 %v6068_v53  ;;  %4912 = vmatprep.subr.mxu1 %v4140_v7  ;;  %7157 = vst [vmem:[#allocation11_spill] sm:$0xff] %v6088_v4  ;;  %v4155_v53 = vld [vmem:[%s7117_s3 + $0x248] sm:$0xff] }
  0x75   : > { %4870 = vmatmul.mubr.f32.gmra.mxu0 %v6074_v26  ;;  %4913 = vmatpush3.msra.mxu1 %v4140_v7  ;;  %v6096_v7 = vld [vmem:[#allocation2 + $0xaa] sm:$0xff]  ;;  %v4138_v26 = vld [vmem:[%s7117_s3 + $0x1c0] sm:$0xff] }
  0x76   : > { %4992 = vmatprep.subr.mxu0 %v4156_v6  ;;  %4792 = vmatprep.mubr.f32.mxu1 %v5792_v25 }
  0x77   : > { %4993 = vmatpush3.msra.mxu0 %v4156_v6  ;;  %4793 = vmatmul.mubr.f32.gmra.mxu1 %v5804_v49  ;;  %v6102_v6 = vld [vmem:[#allocation2 + $0xb2] sm:$0xff] }
  0x78   : > { %4872 = vmatprep.mubr.f32.mxu0 %v6082_v45  ;;  %4914 = vmatprep.subr.mxu1 %v4139_v28  ;;  %7158 = vst [vmem:[#allocation12_spill] sm:$0xff] %v6102_v6  ;;  %v4154_v45 = vld [vmem:[%s7117_s3 + $0x240] sm:$0xff] }
  0x79   : > { %4873 = vmatmul.mubr.f32.gmra.mxu0 %v6088_v4  ;;  %4915 = vmatpush3.msra.mxu1 %v4139_v28  ;;  %v6110_v28 = vld [vmem:[#allocation2 + $0xc2] sm:$0xff]  ;;  %v4137_v4 = vld [vmem:[%s7117_s3 + $0x1b8] sm:$0xff] }
  0x7a   : > { %4994 = vmatprep.subr.mxu0 %v4155_v53  ;;  %4795 = vmatprep.mubr.f32.mxu1 %v5829_v15 }
  0x7b   : > { %4995 = vmatpush3.msra.mxu0 %v4155_v53  ;;  %4796 = vmatmul.mubr.f32.gmra.mxu1 %v5842_v35  ;;  %v7159_v53 = vmax.f32 %v5596_v17, 0.0  ;;  %v4136_v17 = vld [vmem:[%s7117_s3 + $0x1b0] sm:$0xff] }
  0x7c   : > { %4875 = vmatprep.mubr.f32.mxu0 %v6096_v7  ;;  %4916 = vmatprep.subr.mxu1 %v4138_v26 }
  0x7d   : > { %4876 = vmatmul.mubr.f32.gmra.mxu0 %v6102_v6  ;;  %4917 = vmatpush3.msra.mxu1 %v4138_v26  ;;  %v4153_v26 = vld [vmem:[%s7117_s3 + $0x238] sm:$0xff] }
  0x7e   : > { %4996 = vmatprep.subr.mxu0 %v4154_v45  ;;  %4798 = vmatprep.mubr.f32.mxu1 %v7159_v53  ;;  %v6126_v6 = vld [vmem:[#allocation2 + $0xda] sm:$0xff]  ;;  %v6142_v53 = vld [vmem:[#allocation2 + $0xf2] sm:$0xff] }
  0x7f   : > { %4997 = vmatpush3.msra.mxu0 %v4154_v45  ;;  %4799 = vmatmul.mubr.f32.gmra.mxu1 %v7160_v51  ;;  %v6133_v51 = vld [vmem:[#allocation2 + $0xe2] sm:$0xff]  ;;  %v7162_v45 = vmax.f32 %v5625_v34, 0.0  ;;  %v7163_v34 = vmax.f32 %v5636_v39, 0.0 }
  0x80   : > { %4878 = vmatprep.mubr.f32.mxu0 %v6110_v28  ;;  %4918 = vmatprep.subr.mxu1 %v4137_v4  ;;  %v4134_v39 = vld [vmem:[%s7117_s3 + $0x1a0] sm:$0xff] }
  0x81   : > { %4879 = vmatmul.mubr.f32.gmra.mxu0 %v6117_v27  ;;  %4919 = vmatpush3.msra.mxu1 %v4137_v4  ;;  %v4152_v4 = vld [vmem:[%s7117_s3 + $0x230] sm:$0xff] }
  0x82   : > { %4998 = vmatprep.subr.mxu0 %v4153_v26  ;;  %4801 = vmatprep.mubr.f32.mxu1 %v7161_v18  ;;  %v7164_v18 = vmax.f32 %v5658_v52, 0.0  ;;  %v7165_v52 = vmax.f32 %v5672_v58, 0.0  ;;  %v4133_v58 = vld [vmem:[%s7117_s3 + $0x198] sm:$0xff] }
  0x83   : > { %4999 = vmatpush3.msra.mxu0 %v4153_v26  ;;  %4802 = vmatmul.mubr.f32.gmra.mxu1 %v7162_v45  ;;  %v6149_v26 = vld [vmem:[#allocation2 + $0xfa] sm:$0xff]  ;;  %v6158_v45 = vld [vmem:[#allocation2 + $0x10a] sm:$0xff] }
  0x84   : > { %4881 = vmatprep.mubr.f32.mxu0 %v6126_v6  ;;  %4920 = vmatprep.subr.mxu1 %v4136_v17 }
  0x85   : > { %4882 = vmatmul.mubr.f32.gmra.mxu0 %v6133_v51  ;;  %4921 = vmatpush3.msra.mxu1 %v4136_v17  ;;  %v4151_v17 = vld [vmem:[%s7117_s3 + $0x228] sm:$0xff] }
  0x86   : > { %5000 = vmatprep.subr.mxu0 %v4152_v4  ;;  %4804 = vmatprep.mubr.f32.mxu1 %v7163_v34  ;;  %v7166_v34 = vmax.f32 %v5692_v9, 0.0  ;;  %v7167_v9 = vmax.f32 %v5703_v14, 0.0  ;;  %v4132_v14 = vld [vmem:[%s7117_s3 + $0x190] sm:$0xff] }
  0x87   : > { %5001 = vmatpush3.msra.mxu0 %v4152_v4  ;;  %4805 = vmatmul.mubr.f32.gmra.mxu1 %v7164_v18  ;;  %v6165_v4 = vld [vmem:[#allocation2 + $0x112] sm:$0xff]  ;;  %v6174_v18 = vld [vmem:[#allocation2 + $0x122] sm:$0xff] }
  0x88   : > { %4884 = vmatprep.mubr.f32.mxu0 %v6142_v53  ;;  %4922 = vmatprep.subr.mxu1 %v4135_v22 }
  0x89   : > { %4885 = vmatmul.mubr.f32.gmra.mxu0 %v6149_v26  ;;  %4923 = vmatpush3.msra.mxu1 %v4135_v22  ;;  %v4150_v22 = vld [vmem:[%s7117_s3 + $0x220] sm:$0xff] }
  0x8a   : > { %5002 = vmatprep.subr.mxu0 %v4151_v17  ;;  %4807 = vmatprep.mubr.f32.mxu1 %v7165_v52  ;;  %v7168_v52 = vmax.f32 %v5723_v32, 0.0  ;;  %v7169_v32 = vmax.f32 %v5736_v41, 0.0  ;;  %v4131_v41 = vld [vmem:[%s7117_s3 + $0x188] sm:$0xff] }
  0x8b   : > { %5003 = vmatpush3.msra.mxu0 %v4151_v17  ;;  %4808 = vmatmul.mubr.f32.gmra.mxu1 %v7166_v34  ;;  %v6181_v17 = vld [vmem:[#allocation2 + $0x12a] sm:$0xff]  ;;  %v6190_v34 = vld [vmem:[#allocation2 + $0x13a] sm:$0xff] }
  0x8c   : > { %4887 = vmatprep.mubr.f32.mxu0 %v6158_v45  ;;  %4924 = vmatprep.subr.mxu1 %v4134_v39 }
  0x8d   : > { %4888 = vmatmul.mubr.f32.gmra.mxu0 %v6165_v4  ;;  %4925 = vmatpush3.msra.mxu1 %v4134_v39  ;;  %v4149_v39 = vld [vmem:[%s7117_s3 + $0x218] sm:$0xff] }
  0x8e   : > { %5004 = vmatprep.subr.mxu0 %v4150_v22  ;;  %4810 = vmatprep.mubr.f32.mxu1 %v7167_v9  ;;  %v7170_v9 = vmax.f32 %v5755_v56, 0.0  ;;  %v7171_v56 = vmax.f32 %v5766_v1, 0.0  ;;  %v4130_v1 = vld [vmem:[%s7117_s3 + $0x180] sm:$0xff] }
  0x8f   : > { %5005 = vmatpush3.msra.mxu0 %v4150_v22  ;;  %4811 = vmatmul.mubr.f32.gmra.mxu1 %v7168_v52  ;;  %v6197_v22 = vld [vmem:[#allocation2 + $0x142] sm:$0xff]  ;;  %v6206_v52 = vld [vmem:[#allocation2 + $0x152] sm:$0xff] }
  0x90   : > { %4890 = vmatprep.mubr.f32.mxu0 %v6174_v18  ;;  %4926 = vmatprep.subr.mxu1 %v4133_v58 }
  0x91   : > { %4891 = vmatmul.mubr.f32.gmra.mxu0 %v6181_v17  ;;  %4927 = vmatpush3.msra.mxu1 %v4133_v58  ;;  %v4148_v58 = vld [vmem:[%s7117_s3 + $0x210] sm:$0xff] }
  0x92   : > { %5006 = vmatprep.subr.mxu0 %v4149_v39  ;;  %4813 = vmatprep.mubr.f32.mxu1 %v7169_v32  ;;  %v7172_v32 = vmax.f32 %v5783_v19, 0.0  ;;  %v7173_v19 = vmax.f32 %v5807_v50, 0.0  ;;  %v4177_v50 = vld [vmem:[%s7117_s3 + $0x2f8] sm:$0xff] }
  0x93   : > { %5007 = vmatpush3.msra.mxu0 %v4149_v39  ;;  %4814 = vmatmul.mubr.f32.gmra.mxu1 %v7170_v9  ;;  %v6213_v39 = vld [vmem:[#allocation2 + $0x15a] sm:$0xff]  ;;  %v6222_v9 = vld [vmem:[#allocation2 + $0x16a] sm:$0xff] }
  0x94   : > { %4893 = vmatprep.mubr.f32.mxu0 %v6190_v34  ;;  %4928 = vmatprep.subr.mxu1 %v4132_v14 }
  0x95   : > { %4894 = vmatmul.mubr.f32.gmra.mxu0 %v6197_v22  ;;  %4929 = vmatpush3.msra.mxu1 %v4132_v14  ;;  %v4147_v14 = vld [vmem:[%s7117_s3 + $0x208] sm:$0xff] }
  0x96   : > { %5008 = vmatprep.subr.mxu0 %v4148_v58  ;;  %4816 = vmatprep.mubr.f32.mxu1 %v7171_v56  ;;  %v7174_v56 = vmax.f32 %v5817_v61, 0.0  ;;  %v4193_v61 = vld [vmem:[%s7117_s3 + $0x378] sm:$0xff] }
  0x97   : > { %5009 = vmatpush3.msra.mxu0 %v4148_v58  ;;  %4817 = vmatmul.mubr.f32.gmra.mxu1 %v7172_v32  ;;  %v6229_v58 = vld [vmem:[#allocation2 + $0x172] sm:$0xff] }
  0x98   : > { %4896 = vmatprep.mubr.f32.mxu0 %v6206_v52  ;;  %4930 = vmatprep.subr.mxu1 %v4131_v41  ;;  %v5423_v32 = vld [vmem:[#allocation2 + $0x19] sm:$0xff] }
  0x99   : > { %4897 = vmatmul.mubr.f32.gmra.mxu0 %v6213_v39  ;;  %4931 = vmatpush3.msra.mxu1 %v4131_v41  ;;  %v4146_v41 = vld [vmem:[%s7117_s3 + $0x200] sm:$0xff] }
  0x9a   : > { %5010 = vmatprep.subr.mxu0 %v4147_v14  ;;  %4819 = vmatprep.mubr.f32.mxu1 %v7173_v19  ;;  %v4184_v19 = vld [vmem:[%s7117_s3 + $0x330] sm:$0xff] }
  0x9b   : > { %5011 = vmatpush3.msra.mxu0 %v4147_v14  ;;  %4820 = vmatmul.mubr.f32.gmra.mxu1 %v7174_v56  ;;  %v4176_v14 = vld [vmem:[%s7117_s3 + $0x2f0] sm:$0xff]  ;;  %v6359_v56 = vld [vmem:[#allocation2 + $0x108] sm:$0xff] }
  0x9c   : > { %4899 = vmatprep.mubr.f32.mxu0 %v6222_v9  ;;  %4932 = vmatprep.subr.mxu1 %v4130_v1 }
  0x9d   : > { %4900 = vmatmul.mubr.f32.gmra.mxu0 %v6229_v58  ;;  %4933 = vmatpush3.msra.mxu1 %v4130_v1  ;;  %v6353_v1 = vld [vmem:[#allocation2 + $0xf9] sm:$0xff] }
  0x9e   : > { %5012 = vmatprep.subr.mxu0 %v4146_v41  ;;  %4934 = vmatprep.mubr.f32.mxu1 %v5844_v36  ;;  %v4192_v36 = vld [vmem:[%s7117_s3 + $0x370] sm:$0xff] }
  0x9f   : > { %5013 = vmatpush3.msra.mxu0 %v4146_v41  ;;  %4935 = vmatmul.mubr.f32.vlgmr.msra.gmra.mxu1 %v5850_v43  ;;  %v4191_v43 = vld [vmem:[%s7117_s3 + $0x368] sm:$0xff]  ;;  %v6362_v41 = vld [vmem:[#allocation2 + $0x110] sm:$0xff] }
  0xa0   : > { %5014 = vmatprep.mubr.f32.mxu0 %v5423_v32  ;;  %5062 = vmatprep.subr.mxu1 %v4177_v50  ;;  %v6371_v32 = vld [vmem:[#allocation2 + $0x111] sm:$0xff] }
  0xa1   : > { %5015 = vmatmul.mubr.f32.vlgmr.msra.gmra.mxu0 %v5648_v46  ;;  %5063 = vmatpush3.msra.mxu1 %v4177_v50  ;;  %v4175_v46 = vld [vmem:[%s7117_s3 + $0x2e8] sm:$0xff] }
  0xa2   : > { %5142 = vmatprep.subr.mxu0 %v4193_v61  ;;  %4937 = vmatprep.mubr.f32.mxu1 %v5863_v60  ;;  %v6317_v60 = vld [vmem:[#allocation2 + $0xc9] sm:$0xff] }
  0xa3   : > { %5143 = vmatpush3.msra.mxu0 %v4193_v61  ;;  %4938 = vmatmul.mubr.f32.gmra.mxu1 %v5868_v12  ;;  %v6326_v12 = vld [vmem:[#allocation2 + $0xe0] sm:$0xff]  ;;  %v6365_v50 = vld [vmem:[#allocation2 + $0x109] sm:$0xff] }
  0xa4   : > { %5017 = vmatprep.mubr.f32.mxu0 %v5669_v57  ;;  %5064 = vmatprep.subr.mxu1 %v4176_v14  ;;  %v4174_v57 = vld [vmem:[%s7117_s3 + $0x2e0] sm:$0xff]  ;;  %v4167_v61 = vld [vmem:[%s7117_s3 + $0x2a8] sm:$0xff] }
  0xa5   : > { %5018 = vmatmul.mubr.f32.gmra.mxu0 %v5681_v0  ;;  %5065 = vmatpush3.msra.mxu1 %v4176_v14  ;;  %v4190_v0 = vld [vmem:[%s7117_s3 + $0x360] sm:$0xff]  ;;  %v4183_v14 = vld [vmem:[%s7117_s3 + $0x328] sm:$0xff] }
  0xa6   : > { %5144 = vmatprep.subr.mxu0 %v4192_v36  ;;  %4940 = vmatprep.mubr.f32.mxu1 %v5881_v2  ;;  %v6329_v2 = vld [vmem:[#allocation2 + $0xd9] sm:$0xff] }
  0xa7   : > { %5145 = vmatpush3.msra.mxu0 %v4192_v36  ;;  %4941 = vmatmul.mubr.f32.gmra.mxu1 %v5886_v54  ;;  %v4169_v54 = vld [vmem:[%s7117_s3 + $0x2b8] sm:$0xff]  ;;  %v6377_v36 = vld [vmem:[#allocation2 + $0x120] sm:$0xff] }
  0xa8   : > { %5020 = vmatprep.mubr.f32.mxu0 %v5700_v13  ;;  %5066 = vmatprep.subr.mxu1 %v4175_v46  ;;  %v4173_v13 = vld [vmem:[%s7117_s3 + $0x2d8] sm:$0xff] }
  0xa9   : > { %5021 = vmatmul.mubr.f32.gmra.mxu0 %v5715_v24  ;;  %5067 = vmatpush3.msra.mxu1 %v4175_v46  ;;  %v4189_v24 = vld [vmem:[%s7117_s3 + $0x358] sm:$0xff]  ;;  %v6380_v46 = vld [vmem:[#allocation2 + $0x128] sm:$0xff] }
  0xaa   : > { %5146 = vmatprep.subr.mxu0 %v4191_v43  ;;  %4943 = vmatprep.mubr.f32.mxu1 %v5899_v30  ;;  %v6335_v30 = vld [vmem:[#allocation2 + $0xe1] sm:$0xff] }
  0xab   : > { %5147 = vmatpush3.msra.mxu0 %v4191_v43  ;;  %4944 = vmatmul.mubr.f32.gmra.mxu1 %v5904_v37  ;;  %v4185_v37 = vld [vmem:[%s7117_s3 + $0x338] sm:$0xff]  ;;  %v6383_v43 = vld [vmem:[#allocation2 + $0x121] sm:$0xff] }
  0xac   : > { %5023 = vmatprep.mubr.f32.mxu0 %v5733_v40  ;;  %5068 = vmatprep.subr.mxu1 %v4174_v57  ;;  %v4172_v40 = vld [vmem:[%s7117_s3 + $0x2d0] sm:$0xff] }
  0xad   : > { %5024 = vmatmul.mubr.f32.gmra.mxu0 %v5744_v48  ;;  %5069 = vmatpush3.msra.mxu1 %v4174_v57  ;;  %v4188_v48 = vld [vmem:[%s7117_s3 + $0x350] sm:$0xff]  ;;  %v4166_v57 = vld [vmem:[%s7117_s3 + $0x2a0] sm:$0xff] }
  0xae   : > { %5148 = vmatprep.subr.mxu0 %v4190_v0  ;;  %4946 = vmatprep.mubr.f32.mxu1 %v5919_v21  ;;  %v6341_v21 = vld [vmem:[#allocation2 + $0xf0] sm:$0xff] }
  0xaf   : > { %5149 = vmatpush3.msra.mxu0 %v4190_v0  ;;  %4947 = vmatmul.mubr.f32.gmra.mxu1 %v5927_v44  ;;  %v6344_v44 = vld [vmem:[#allocation2 + $0xf8] sm:$0xff]  ;;  %v6389_v0 = vld [vmem:[#allocation2 + $0x129] sm:$0xff] }
  0xb0   : > { %5026 = vmatprep.mubr.f32.mxu0 %v5763_v62  ;;  %5070 = vmatprep.subr.mxu1 %v4173_v13  ;;  %v4171_v62 = vld [vmem:[%s7117_s3 + $0x2c8] sm:$0xff] }
  0xb1   : > { %5027 = vmatmul.mubr.f32.gmra.mxu0 %v5776_v11  ;;  %5071 = vmatpush3.msra.mxu1 %v4173_v13  ;;  %v4187_v11 = vld [vmem:[%s7117_s3 + $0x348] sm:$0xff]  ;;  %v4182_v13 = vld [vmem:[%s7117_s3 + $0x320] sm:$0xff] }
  0xb2   : > { %5150 = vmatprep.subr.mxu0 %v4189_v24  ;;  %4949 = vmatprep.mubr.f32.mxu1 %v5943_v16  ;;  %v6305_v16 = vld [vmem:[#allocation2 + $0xc0] sm:$0xff] }
  0xb3   : > { %5151 = vmatpush3.msra.mxu0 %v4189_v24  ;;  %4950 = vmatmul.mubr.f32.gmra.mxu1 %v5951_v29  ;;  %v6347_v29 = vld [vmem:[#allocation2 + $0xf1] sm:$0xff]  ;;  %v6397_v24 = vld [vmem:[#allocation2 + $0x139] sm:$0xff] }
  0xb4   : > { %5029 = vmatprep.mubr.f32.mxu0 %v5792_v25  ;;  %5072 = vmatprep.subr.mxu1 %v4172_v40  ;;  %v6308_v25 = vld [vmem:[#allocation2 + $0xc8] sm:$0xff] }
  0xb5   : > { %5030 = vmatmul.mubr.f32.gmra.mxu0 %v5804_v49  ;;  %5073 = vmatpush3.msra.mxu1 %v4172_v40  ;;  %v6311_v49 = vld [vmem:[#allocation2 + $0xc1] sm:$0xff]  ;;  %v4165_v40 = vld [vmem:[%s7117_s3 + $0x298] sm:$0xff] }
  0xb6   : > { %5152 = vmatprep.subr.mxu0 %v4188_v48  ;;  %4952 = vmatprep.mubr.f32.mxu1 %v5967_v31  ;;  %v4170_v31 = vld [vmem:[%s7117_s3 + $0x2c0] sm:$0xff] }
  0xb7   : > { %5153 = vmatpush3.msra.mxu0 %v4188_v48  ;;  %4953 = vmatmul.mubr.f32.gmra.mxu1 %v5975_v3  ;;  %v4168_v3 = vld [vmem:[%s7117_s3 + $0x2b0] sm:$0xff]  ;;  %v4181_v48 = vld [vmem:[%s7117_s3 + $0x318] sm:$0xff] }
  0xb8   : > { %5032 = vmatprep.mubr.f32.mxu0 %v5829_v15  ;;  %5074 = vmatprep.subr.mxu1 %v4171_v62  ;;  %v4186_v15 = vld [vmem:[%s7117_s3 + $0x340] sm:$0xff] }
  0xb9   : > { %5033 = vmatmul.mubr.f32.gmra.mxu0 %v5842_v35  ;;  %5075 = vmatpush3.msra.mxu1 %v4171_v62  ;;  %v6323_v35 = vld [vmem:[#allocation2 + $0xd8] sm:$0xff]  ;;  %v5424_v62 = vld [vmem:[#allocation2 + $0x141] sm:$0xff] }
  0xba   : > { %5154 = vmatprep.subr.mxu0 %v4187_v11  ;;  %4955 = vmatprep.mubr.f32.mxu1 %v6305_v16 }
  0xbb   : > { %5155 = vmatpush3.msra.mxu0 %v4187_v11  ;;  %4956 = vmatmul.mubr.f32.gmra.mxu1 %v6308_v25  ;;  %v4164_v11 = vld [vmem:[%s7117_s3 + $0x290] sm:$0xff] }
  0xbc   : > { %5035 = vmatprep.mubr.f32.mxu0 %v6311_v49  ;;  %5076 = vmatprep.subr.mxu1 %v4170_v31 }
  0xbd   : > { %5036 = vmatmul.mubr.f32.gmra.mxu0 %v6317_v60  ;;  %5077 = vmatpush3.msra.mxu1 %v4170_v31  ;;  %v5426_v31 = vld [vmem:[#allocation2 + $0x159] sm:$0xff] }
  0xbe   : > { %5156 = vmatprep.subr.mxu0 %v4186_v15  ;;  %4958 = vmatprep.mubr.f32.mxu1 %v6323_v35 }
  0xbf   : > { %5157 = vmatpush3.msra.mxu0 %v4186_v15  ;;  %4959 = vmatmul.mubr.f32.gmra.mxu1 %v6326_v12  ;;  %v4163_v15 = vld [vmem:[%s7117_s3 + $0x288] sm:$0xff] }
  0xc0   : > { %5038 = vmatprep.mubr.f32.mxu0 %v6329_v2  ;;  %5078 = vmatprep.subr.mxu1 %v4169_v54 }
  0xc1   : > { %5039 = vmatmul.mubr.f32.gmra.mxu0 %v6335_v30  ;;  %5079 = vmatpush3.msra.mxu1 %v4169_v54  ;;  %v6424_v54 = vld [vmem:[#allocation2 + $0x180] sm:$0xff] }
  0xc2   : > { %5158 = vmatprep.subr.mxu0 %v4185_v37  ;;  %4961 = vmatprep.mubr.f32.mxu1 %v6341_v21 }
  0xc3   : > { %5159 = vmatpush3.msra.mxu0 %v4185_v37  ;;  %4962 = vmatmul.mubr.f32.gmra.mxu1 %v6344_v44  ;;  %v5427_v37 = vld [vmem:[#allocation2 + $0x169] sm:$0xff] }
  0xc4   : > { %5041 = vmatprep.mubr.f32.mxu0 %v6347_v29  ;;  %5080 = vmatprep.subr.mxu1 %v4168_v3 }
  0xc5   : > { %5042 = vmatmul.mubr.f32.gmra.mxu0 %v6353_v1  ;;  %5081 = vmatpush3.msra.mxu1 %v4168_v3  ;;  %v6426_v3 = vld [vmem:[#allocation2 + $0x188] sm:$0xff] }
  0xc6   : > { %5160 = vmatprep.subr.mxu0 %v4184_v19  ;;  %4964 = vmatprep.mubr.f32.mxu1 %v6359_v56 }
  0xc7   : > { %5161 = vmatpush3.msra.mxu0 %v4184_v19  ;;  %4965 = vmatmul.mubr.f32.gmra.mxu1 %v6362_v41  ;;  %v5428_v19 = vld [vmem:[#allocation2 + $0x171] sm:$0xff] }
  0xc8   : > { %5044 = vmatprep.mubr.f32.mxu0 %v6365_v50  ;;  %5082 = vmatprep.subr.mxu1 %v4167_v61 }
  0xc9   : > { %5045 = vmatmul.mubr.f32.gmra.mxu0 %v6371_v32  ;;  %5083 = vmatpush3.msra.mxu1 %v4167_v61  ;;  %v4178_v61 = vld [vmem:[%s7117_s3 + $0x300] sm:$0xff] }
  0xca   : > { %5162 = vmatprep.subr.mxu0 %v4183_v14  ;;  %4967 = vmatprep.mubr.f32.mxu1 %v6377_v36 }
  0xcb   : > { %5163 = vmatpush3.msra.mxu0 %v4183_v14  ;;  %4968 = vmatmul.mubr.f32.gmra.mxu1 %v6380_v46  ;;  %v7176_v14 = vmax.f32 %v5994_v38, 0.0  ;;  %v4225_v38 = vld [vmem:[%s7117_s3 + $0x478] sm:$0xff] }
  0xcc   : > { %5047 = vmatprep.mubr.f32.mxu0 %v6383_v43  ;;  %5084 = vmatprep.subr.mxu1 %v4166_v57 }
  0xcd   : > { %5048 = vmatmul.mubr.f32.gmra.mxu0 %v6389_v0  ;;  %5085 = vmatpush3.msra.mxu1 %v4166_v57  ;;  %v7177_v57 = vmax.f32 %v6000_v59, 0.0  ;;  %v2719_v59 = vld [vmem:[#allocation2 + $0x48] sm:$0xff] }
  0xce   : > { %5164 = vmatprep.subr.mxu0 %v4182_v13  ;;  %4970 = vmatprep.mubr.f32.mxu1 %v5913_v5  ;;  %v5425_v5 = vld [vmem:[#allocation2 + $0x151] sm:$0xff] }
  0xcf   : > { %5165 = vmatpush3.msra.mxu0 %v4182_v13  ;;  %4971 = vmatmul.mubr.f32.gmra.mxu1 %v5921_v20  ;;  %v4180_v20 = vld [vmem:[%s7117_s3 + $0x310] sm:$0xff] }
  0xd0   : > { %5050 = vmatprep.mubr.f32.mxu0 %v6397_v24  ;;  %5086 = vmatprep.subr.mxu1 %v4165_v40  ;;  %v2717_v13 = vld [vmem:[#allocation2 + $0x30] sm:$0xff] }
  0xd1   : > { %5051 = vmatmul.mubr.f32.gmra.mxu0 %v5424_v62  ;;  %5087 = vmatpush3.msra.mxu1 %v4165_v40  ;;  %v4209_v40 = vld [vmem:[%s7117_s3 + $0x3f8] sm:$0xff]  ;;  %v4208_v62 = vld [vmem:[%s7117_s3 + $0x3f0] sm:$0xff] }
  0xd2   : > { %5166 = vmatprep.subr.mxu0 %v4181_v48  ;;  %4973 = vmatprep.mubr.f32.mxu1 %v5937_v42  ;;  %v7175_v42 = vld [vmem:[#allocation4_spill] sm:$0xff] }
  0xd3   : > { %5167 = vmatpush3.msra.mxu0 %v4181_v48  ;;  %4974 = vmatmul.mubr.f32.gmra.mxu1 %v5945_v10  ;;  %v4179_v10 = vld [vmem:[%s7117_s3 + $0x308] sm:$0xff]  ;;  %v2718_v48 = vld [vmem:[#allocation2 + $0x38] sm:$0xff] }
  0xd4   : > { %5053 = vmatprep.mubr.f32.mxu0 %v5425_v5  ;;  %5088 = vmatprep.subr.mxu1 %v4164_v11  ;;  %v7178_v5 = vld [vmem:[#allocation5_spill] sm:$0xff] }
  0xd5   : > { %5054 = vmatmul.mubr.f32.gmra.mxu0 %v5426_v31  ;;  %5089 = vmatpush3.msra.mxu1 %v4164_v11  ;;  %v2721_v11 = vld [vmem:[#allocation2 + $0x60] sm:$0xff]  ;;  %v2723_v31 = vld [vmem:[#allocation2 + $0x78] sm:$0xff] }
  0xd6   : > { %5168 = vmatprep.subr.mxu0 %v4180_v20  ;;  %4976 = vmatprep.mubr.f32.mxu1 %v5961_v47  ;;  %v4162_v47 = vld [vmem:[%s7117_s3 + $0x280] sm:$0xff] }
  0xd7   : > { %5169 = vmatpush3.msra.mxu0 %v4180_v20  ;;  %4977 = vmatmul.mubr.f32.gmra.mxu1 %v7175_v42  ;;  %v4207_v20 = vld [vmem:[%s7117_s3 + $0x3e8] sm:$0xff]  ;;  %v7179_v42 = vld [vmem:[#allocation6_spill] sm:$0xff] }
  0xd8   : > { %5056 = vmatprep.mubr.f32.mxu0 %v5427_v37  ;;  %5090 = vmatprep.subr.mxu1 %v4163_v15  ;;  %v4222_v37 = vld [vmem:[%s7117_s3 + $0x460] sm:$0xff] }
  0xd9   : > { %5057 = vmatmul.mubr.f32.gmra.mxu0 %v5428_v19  ;;  %5091 = vmatpush3.msra.mxu1 %v4163_v15  ;;  %v4206_v15 = vld [vmem:[%s7117_s3 + $0x3e0] sm:$0xff]  ;;  %v2725_v19 = vld [vmem:[#allocation2 + $0x90] sm:$0xff] }
  0xda   : > { %5170 = vmatprep.subr.mxu0 %v4179_v10  ;;  %4979 = vmatprep.mubr.f32.mxu1 %v6424_v54 }
  0xdb   : > { %5171 = vmatpush3.msra.mxu0 %v4179_v10  ;;  %4980 = vmatmul.mubr.f32.gmra.mxu1 %v6426_v3  ;;  %v7180_v10 = vld [vmem:[#allocation7_spill] sm:$0xff] }
  0xdc   : > { %5059 = vmatprep.mubr.f32.mxu0 %v7176_v14  ;;  %5092 = vmatprep.subr.mxu1 %v4162_v47  ;;  %v2726_v14 = vld [vmem:[#allocation2 + $0x98] sm:$0xff] }
  0xdd   : > { %5060 = vmatmul.mubr.f32.gmra.mxu0 %v7177_v57  ;;  %5093 = vmatpush3.msra.mxu1 %v4162_v47  ;;  %v4205_v47 = vld [vmem:[%s7117_s3 + $0x3d8] sm:$0xff] }
  0xde   : > { %5172 = vmatprep.subr.mxu0 %v4178_v61  ;;  %5094 = vmatprep.mubr.f32.mxu1 %v6009_v8  ;;  %v2720_v8 = vld [vmem:[#allocation2 + $0x50] sm:$0xff]  ;;  %v7182_v57 = vld [vmem:[#allocation9_spill] sm:$0xff] }
  0xdf   : > { %5173 = vmatpush3.msra.mxu0 %v4178_v61  ;;  %5095 = vmatmul.mubr.f32.vlgmr.msra.gmra.mxu1 %v6018_v33  ;;  %v4224_v33 = vld [vmem:[%s7117_s3 + $0x470] sm:$0xff] }
  0xe0   : > { %5174 = vmatprep.mubr.f32.mxu0 %v2717_v13  ;;  %5222 = vmatprep.subr.mxu1 %v4209_v40  ;;  %v7181_v61 = vld [vmem:[#allocation8_spill] sm:$0xff]  ;;  %v4221_v13 = vld [vmem:[%s7117_s3 + $0x458] sm:$0xff] }
  0xe1   : > { %5175 = vmatmul.mubr.f32.vlgmr.msra.gmra.mxu0 %v2718_v48  ;;  %5223 = vmatpush3.msra.mxu1 %v4209_v40  ;;  %v2727_v48 = vld [vmem:[#allocation2 + $0xa8] sm:$0xff] }
  0xe2   : > { %5302 = vmatprep.subr.mxu0 %v4225_v38  ;;  %5097 = vmatprep.mubr.f32.mxu1 %v6026_v23  ;;  %v2722_v23 = vld [vmem:[#allocation2 + $0x68] sm:$0xff] }
  0xe3   : > { %5303 = vmatpush3.msra.mxu0 %v4225_v38  ;;  %5098 = vmatmul.mubr.f32.gmra.mxu1 %v6032_v55  ;;  %v4223_v55 = vld [vmem:[%s7117_s3 + $0x468] sm:$0xff]  ;;  %v4204_v38 = vld [vmem:[%s7117_s3 + $0x3d0] sm:$0xff] }
  0xe4   : > { %5177 = vmatprep.mubr.f32.mxu0 %v2719_v59  ;;  %5224 = vmatprep.subr.mxu1 %v4208_v62 }
  0xe5   : > { %5178 = vmatmul.mubr.f32.gmra.mxu0 %v2720_v8  ;;  %5225 = vmatpush3.msra.mxu1 %v4208_v62  ;;  %v7183_v62 = vld [vmem:[#allocation10_spill] sm:$0xff]  ;;  %v2728_v8 = vld [vmem:[#allocation2 + $0xb0] sm:$0xff] }
  0xe6   : > { %5304 = vmatprep.subr.mxu0 %v4224_v33  ;;  %5100 = vmatprep.mubr.f32.mxu1 %v6040_v63  ;;  %v2724_v63 = vld [vmem:[#allocation2 + $0x80] sm:$0xff] }
  0xe7   : > { %5305 = vmatpush3.msra.mxu0 %v4224_v33  ;;  %5101 = vmatmul.mubr.f32.gmra.mxu1 %v7178_v5  ;;  %v4203_v5 = vld [vmem:[%s7117_s3 + $0x3c8] sm:$0xff] }
  0xe8   : > { %5180 = vmatprep.mubr.f32.mxu0 %v2721_v11  ;;  %5226 = vmatprep.subr.mxu1 %v4207_v20  ;;  %v7184_v11 = vld [vmem:[#allocation11_spill] sm:$0xff] }
  0xe9   : > { %5181 = vmatmul.mubr.f32.gmra.mxu0 %v2722_v23  ;;  %5227 = vmatpush3.msra.mxu1 %v4207_v20  ;;  %v4220_v20 = vld [vmem:[%s7117_s3 + $0x450] sm:$0xff] }
  0xea   : > { %5306 = vmatprep.subr.mxu0 %v4223_v55  ;;  %5103 = vmatprep.mubr.f32.mxu1 %v7179_v42 }
  0xeb   : > { %5307 = vmatpush3.msra.mxu0 %v4223_v55  ;;  %5104 = vmatmul.mubr.f32.gmra.mxu1 %v7180_v10 }
  0xec   : > { %5183 = vmatprep.mubr.f32.mxu0 %v2723_v31  ;;  %5228 = vmatprep.subr.mxu1 %v4206_v15  ;;  %v7185_v31 = vld [vmem:[#allocation12_spill] sm:$0xff] }
  0xed   : > { %5184 = vmatmul.mubr.f32.gmra.mxu0 %v2724_v63  ;;  %5229 = vmatpush3.msra.mxu1 %v4206_v15  ;;  %v4219_v15 = vld [vmem:[%s7117_s3 + $0x448] sm:$0xff] }
  0xee   : > { %5308 = vmatprep.subr.mxu0 %v4222_v37  ;;  %5106 = vmatprep.mubr.f32.mxu1 %v7181_v61 }
  0xef   : > { %5309 = vmatpush3.msra.mxu0 %v4222_v37  ;;  %5107 = vmatmul.mubr.f32.gmra.mxu1 %v7182_v57  ;;  %v2741_v57 = vld [vmem:[#allocation2 + $0x150] sm:$0xff] }
  0xf0   : > { %5186 = vmatprep.mubr.f32.mxu0 %v2725_v19  ;;  %5230 = vmatprep.subr.mxu1 %v4205_v47  ;;  %v6480_v40 = vpop.f32.mrf.mxu1 }
  0xf1   : > { %5187 = vmatmul.mubr.f32.gmra.mxu0 %v2726_v14  ;;  %5231 = vmatpush3.msra.mxu1 %v4205_v47  ;;  %v6485_v59 = vpop.f32.mrf.mxu0  ;;  %v2740_v14 = vld [vmem:[#allocation2 + $0x140] sm:$0xff] }
  0xf2   : > { %5310 = vmatprep.subr.mxu0 %v4221_v13  ;;  %5109 = vmatprep.mubr.f32.mxu1 %v7183_v62  ;;  %v6488_v33 = vpop.f32.mrf.mxu1 }
  0xf3   : > { %5311 = vmatpush3.msra.mxu0 %v4221_v13  ;;  %5110 = vmatmul.mubr.f32.gmra.mxu1 %v7184_v11  ;;  %v6494_v23 = vpop.f32.mrf.mxu0  ;;  %v4197_v13 = vld [vmem:[%s7117_s3 + $0x398] sm:$0xff] }
  0xf4   : > { %5189 = vmatprep.mubr.f32.mxu0 %v2727_v48  ;;  %5232 = vmatprep.subr.mxu1 %v4204_v38  ;;  %v4213_v48 = vld [vmem:[%s7117_s3 + $0x418] sm:$0xff] }
  0xf5   : > { %5190 = vmatmul.mubr.f32.gmra.mxu0 %v2728_v8  ;;  %5233 = vmatpush3.msra.mxu1 %v4204_v38  ;;  %v6499_v55 = vpop.f32.mrf.mxu1  ;;  %v2743_v8 = vld [vmem:[#allocation2 + $0x168] sm:$0xff] }
  0xf6   : > { %5312 = vmatprep.subr.mxu0 %v4220_v20  ;;  %5112 = vmatprep.mubr.f32.mxu1 %v6096_v7  ;;  %v4202_v7 = vld [vmem:[%s7117_s3 + $0x3c0] sm:$0xff] }
  0xf7   : > { %5313 = vmatpush3.msra.mxu0 %v4220_v20  ;;  %5113 = vmatmul.mubr.f32.gmra.mxu1 %v7185_v31  ;;  %v6506_v42 = vpop.f32.mrf.mxu0  ;;  %v6508_v63 = vpop.f32.mrf.mxu1  ;;  %v4212_v20 = vld [vmem:[%s7117_s3 + $0x410] sm:$0xff]  ;;  %v4195_v31 = vld [vmem:[%s7117_s3 + $0x388] sm:$0xff] }
  0xf8   : > { %5192 = vmatprep.mubr.f32.mxu0 %v6305_v16  ;;  %5234 = vmatprep.subr.mxu1 %v4203_v5  ;;  %v4218_v16 = vld [vmem:[%s7117_s3 + $0x440] sm:$0xff] }
  0xf9   : > { %5193 = vmatmul.mubr.f32.gmra.mxu0 %v6308_v25  ;;  %5235 = vmatpush3.msra.mxu1 %v4203_v5  ;;  %v6515_v10 = vpop.f32.mrf.mxu0  ;;  %v4201_v25 = vld [vmem:[%s7117_s3 + $0x3b8] sm:$0xff] }
  0xfa   : > { %5314 = vmatprep.subr.mxu0 %v4219_v15  ;;  %5115 = vmatprep.mubr.f32.mxu1 %v6110_v28 }
  0xfb   : > { %5315 = vmatpush3.msra.mxu0 %v4219_v15  ;;  %5116 = vmatmul.mubr.f32.gmra.mxu1 %v6117_v27  ;;  %v6522_v37 = vpop.f32.mrf.mxu1  ;;  %v4217_v27 = vld [vmem:[%s7117_s3 + $0x438] sm:$0xff] }
  0xfc   : > { %5195 = vmatprep.mubr.f32.mxu0 %v6323_v35  ;;  %5236 = vmatprep.subr.mxu1 %v4202_v7 }
  0xfd   : > { %5196 = vmatmul.mubr.f32.gmra.mxu0 %v6326_v12  ;;  %5237 = vmatpush3.msra.mxu1 %v4202_v7  ;;  %v6529_v28 = vpop.f32.mrf.mxu0  ;;  %v6531_v19 = vpop.f32.mrf.mxu1  ;;  %v4200_v12 = vld [vmem:[%s7117_s3 + $0x3b0] sm:$0xff] }
  0xfe   : > { %5316 = vmatprep.subr.mxu0 %v4218_v16  ;;  %5118 = vmatprep.mubr.f32.mxu1 %v6126_v6 }
  0xff   : > { %5317 = vmatpush3.msra.mxu0 %v4218_v16  ;;  %5119 = vmatmul.mubr.f32.gmra.mxu1 %v6133_v51  ;;  %v6538_v35 = vpop.f32.mrf.mxu0  ;;  %v4216_v51 = vld [vmem:[%s7117_s3 + $0x430] sm:$0xff]  ;;  %v6626_v16 = vld [vmem:[#allocation2 + $0x182] sm:$0xff] }
 0x100   : > { %5198 = vmatprep.mubr.f32.mxu0 %v6341_v21  ;;  %5238 = vmatprep.subr.mxu1 %v4201_v25 }
 0x101   : > { %5199 = vmatmul.mubr.f32.gmra.mxu0 %v6344_v44  ;;  %5239 = vmatpush3.msra.mxu1 %v4201_v25  ;;  %v6545_v6 = vpop.f32.mrf.mxu1  ;;  %v6629_v25 = vld [vmem:[#allocation2 + $0x18a] sm:$0xff] }
 0x102   : > { %5318 = vmatprep.subr.mxu0 %v4217_v27  ;;  %5121 = vmatprep.mubr.f32.mxu1 %v6142_v53  ;;  %v4199_v53 = vld [vmem:[%s7117_s3 + $0x3a8] sm:$0xff] }
 0x103   : > { %5319 = vmatpush3.msra.mxu0 %v4217_v27  ;;  %5122 = vmatmul.mubr.f32.gmra.mxu1 %v6149_v26  ;;  %v6552_v21 = vpop.f32.mrf.mxu0  ;;  %v6554_v44 = vpop.f32.mrf.mxu1  ;;  %v4215_v26 = vld [vmem:[%s7117_s3 + $0x428] sm:$0xff] }
 0x104   : > { %5201 = vmatprep.mubr.f32.mxu0 %v6359_v56  ;;  %5240 = vmatprep.subr.mxu1 %v4200_v12 }
 0x105   : > { %5202 = vmatmul.mubr.f32.gmra.mxu0 %v6362_v41  ;;  %5241 = vmatpush3.msra.mxu1 %v4200_v12  ;;  %v6561_v47 = vpop.f32.mrf.mxu0  ;;  %v2739_v41 = vld [vmem:[#allocation2 + $0x138] sm:$0xff] }
 0x106   : > { %5320 = vmatprep.subr.mxu0 %v4216_v51  ;;  %5124 = vmatprep.mubr.f32.mxu1 %v6158_v45  ;;  %v4198_v45 = vld [vmem:[%s7117_s3 + $0x3a0] sm:$0xff]  ;;  %v3087_v12 = vld [vmem:[#allocation2 + $0x31] sm:$0xff] }
 0x107   : > { %5321 = vmatpush3.msra.mxu0 %v4216_v51  ;;  %5125 = vmatmul.mubr.f32.gmra.mxu1 %v6165_v4  ;;  %v6568_v56 = vpop.f32.mrf.mxu1  ;;  %v5429_v51 = vld [vmem:[#allocation2] sm:$0xff] }
 0x108   : > { %5204 = vmatprep.mubr.f32.mxu0 %v6377_v36  ;;  %5242 = vmatprep.subr.mxu1 %v4199_v53  ;;  %v4214_v36 = vld [vmem:[%s7117_s3 + $0x420] sm:$0xff] }
 0x109   : > { %5205 = vmatmul.mubr.f32.gmra.mxu0 %v6380_v46  ;;  %5243 = vmatpush3.msra.mxu1 %v4199_v53  ;;  %v6575_v61 = vpop.f32.mrf.mxu0  ;;  %v6577_v4 = vpop.f32.mrf.mxu1  ;;  %v3088_v53 = vld [vmem:[#allocation2 + $0x39] sm:$0xff] }
 0x10a   : > { %5322 = vmatprep.subr.mxu0 %v4215_v26  ;;  %5127 = vmatprep.mubr.f32.mxu1 %v6174_v18 }
 0x10b   : > { %5323 = vmatpush3.msra.mxu0 %v4215_v26  ;;  %5128 = vmatmul.mubr.f32.gmra.mxu1 %v6181_v17  ;;  %v6584_v46 = vpop.f32.mrf.mxu0  ;;  %v2742_v17 = vld [vmem:[#allocation2 + $0x158] sm:$0xff] }
 0x10c   : > { %5207 = vmatprep.mubr.f32.mxu0 %v2739_v41  ;;  %5244 = vmatprep.subr.mxu1 %v4198_v45  ;;  %v3457_v41 = vld [vmem:[#allocation2 + $0x32] sm:$0xff] }
 0x10d   : > { %5208 = vmatmul.mubr.f32.gmra.mxu0 %v2740_v14  ;;  %5245 = vmatpush3.msra.mxu1 %v4198_v45  ;;  %v6589_v18 = vpop.f32.mrf.mxu1  ;;  %v3089_v45 = vld [vmem:[#allocation2 + $0x49] sm:$0xff]  ;;  %v3458_v14 = vld [vmem:[#allocation2 + $0x3a] sm:$0xff] }
 0x10e   : > { %5324 = vmatprep.subr.mxu0 %v4214_v36  ;;  %5130 = vmatprep.mubr.f32.mxu1 %v6190_v34  ;;  %v4196_v34 = vld [vmem:[%s7117_s3 + $0x390] sm:$0xff] }
 0x10f   : > { %5325 = vmatpush3.msra.mxu0 %v4214_v36  ;;  %5131 = vmatmul.mubr.f32.gmra.mxu1 %v6197_v22  ;;  %v6596_v38 = vpop.f32.mrf.mxu0  ;;  %v6598_v62 = vpop.f32.mrf.mxu1  ;;  %v2744_v22 = vld [vmem:[#allocation2 + $0x170] sm:$0xff] }
 0x110   : > { %5210 = vmatprep.mubr.f32.mxu0 %v2741_v57  ;;  %5246 = vmatprep.subr.mxu1 %v4197_v13  ;;  %v3459_v57 = vld [vmem:[#allocation2 + $0x4a] sm:$0xff] }
 0x111   : > { %5211 = vmatmul.mubr.f32.gmra.mxu0 %v2742_v17  ;;  %5247 = vmatpush3.msra.mxu1 %v4197_v13  ;;  %v6603_v11 = vpop.f32.mrf.mxu0  ;;  %v3090_v17 = vld [vmem:[#allocation2 + $0x51] sm:$0xff] }
 0x112   : > { %5326 = vmatprep.subr.mxu0 %v4213_v48  ;;  %5133 = vmatprep.mubr.f32.mxu1 %v6206_v52 }
 0x113   : > { %5327 = vmatpush3.msra.mxu0 %v4213_v48  ;;  %5134 = vmatmul.mubr.f32.gmra.mxu1 %v6213_v39  ;;  %v6610_v5 = vpop.f32.mrf.mxu1  ;;  %v4211_v39 = vld [vmem:[%s7117_s3 + $0x408] sm:$0xff] }
 0x114   : > { %5213 = vmatprep.mubr.f32.mxu0 %v2743_v8  ;;  %5248 = vmatprep.subr.mxu1 %v4196_v34 }
 0x115   : > { %5214 = vmatmul.mubr.f32.gmra.mxu0 %v2744_v22  ;;  %5249 = vmatpush3.msra.mxu1 %v4196_v34  ;;  %v6615_v15 = vpop.f32.mrf.mxu0  ;;  %v6617_v52 = vpop.f32.mrf.mxu1  ;;  %v3091_v34 = vld [vmem:[#allocation2 + $0x61] sm:$0xff] }
 0x116   : > { %5328 = vmatprep.subr.mxu0 %v4212_v20  ;;  %5136 = vmatprep.mubr.f32.mxu1 %v6222_v9 }
 0x117   : > { %5329 = vmatpush3.msra.mxu0 %v4212_v20  ;;  %5137 = vmatmul.mubr.f32.gmra.mxu1 %v6229_v58  ;;  %v6624_v7 = vpop.f32.mrf.mxu0  ;;  %v4194_v58 = vld [vmem:[%s7117_s3 + $0x380] sm:$0xff] }
 0x118   : > { %5216 = vmatprep.mubr.f32.mxu0 %v6424_v54  ;;  %5250 = vmatprep.subr.mxu1 %v4195_v31 }
 0x119   : > { %5217 = vmatmul.mubr.f32.gmra.mxu0 %v6426_v3  ;;  %5251 = vmatpush3.msra.mxu1 %v4195_v31  ;;  %v6632_v9 = vpop.f32.mrf.mxu1  ;;  %v4210_v3 = vld [vmem:[%s7117_s3 + $0x400] sm:$0xff]  ;;  %v3460_v31 = vld [vmem:[#allocation2 + $0x52] sm:$0xff] }
 0x11a   : > { %5330 = vmatprep.subr.mxu0 %v4211_v39  ;;  %5139 = vmatprep.mubr.f32.mxu1 %v6626_v16 }
 0x11b   : > { %5331 = vmatpush3.msra.mxu0 %v4211_v39  ;;  %5140 = vmatmul.mubr.f32.gmra.mxu1 %v6629_v25  ;;  %v6639_v27 = vpop.f32.mrf.mxu0  ;;  %v6641_v54 = vpop.f32.mrf.mxu1 }
 0x11c   : > { %5219 = vmatprep.mubr.f32.mxu0 %v5429_v51  ;;  %5252 = vmatprep.subr.mxu1 %v4194_v58 }
 0x11d   : > { %5220 = vmatmul.mubr.f32.gmra.mxu0 %v5429_v51  ;;  %5253 = vmatpush3.msra.mxu1 %v4194_v58  ;;  %v6646_v26 = vpop.f32.mrf.mxu0  ;;  %v3092_v51 = vld [vmem:[#allocation2 + $0x69] sm:$0xff] }
 0x11e   : > { %5332 = vmatprep.subr.mxu0 %v4210_v3  ;;  %5254 = vmatprep.mubr.f32.mxu1 %v3087_v12 }
 0x11f   : > { %5333 = vmatpush3.msra.mxu0 %v4210_v3  ;;  %v4776_v36 = vpop.f32.mrf.mxu1  ;;  %5255 = vmatmul.mubr.f32.vlgmr.msra.gmra.mxu1 %v3088_v53  ;;  %v3461_v3 = vld [vmem:[#allocation2 + $0x62] sm:$0xff] }
 0x120   : > { %v1173_v13 = vadd.f32 %v4776_v36, %v6485_v59  ;;  %5334 = vmatprep.mubr.f32.mxu0 %v3457_v41  ;;  %5257 = vmatprep.mubr.f32.mxu1 %v3089_v45  ;;  %v3093_v45 = vld [vmem:[#allocation2 + $0x79] sm:$0xff]  ;;  %v3462_v36 = vld [vmem:[#allocation2 + $0x6a] sm:$0xff] }
 0x121   : > { %v4856_v48 = vpop.f32.mrf.mxu0  ;;  %5335 = vmatmul.mubr.f32.vlgmr.msra.gmra.mxu0 %v3458_v14  ;;  %v1013_v8 = vpop.f32.mrf.mxu1 }
 0x122   : > { %v6649_v22 = vadd.f32 %v4856_v48, %v1173_v13  ;;  %v1172_v20 = vadd.f32 %v1013_v8, %v6494_v23  ;;  %5337 = vmatprep.mubr.f32.mxu0 %v3459_v57  ;;  %v3094_v8 = vld [vmem:[#allocation2 + $0x81] sm:$0xff] }
 0x123   : > { %v1383_v39 = vpop.f32.mrf.mxu0  ;;  %v4779_v58 = vpop.f32.mrf.mxu1  ;;  %5258 = vmatmul.mubr.f32.gmra.mxu1 %v3090_v17  ;;  %v3463_v17 = vld [vmem:[#allocation2 + $0x7a] sm:$0xff] }
 0x124   : > { %v6652_v12 = vadd.f32 %v1383_v39, %v1172_v20  ;;  %v1175_v59 = vadd.f32 %v4779_v58, %v6506_v42  ;;  %5260 = vmatprep.mubr.f32.mxu1 %v3091_v34  ;;  %v3464_v58 = vld [vmem:[#allocation2 + $0x82] sm:$0xff] }
 0x125   : > { %v4859_v53 = vpop.f32.mrf.mxu0  ;;  %5338 = vmatmul.mubr.f32.gmra.mxu0 %v3460_v31  ;;  %v1023_v41 = vpop.f32.mrf.mxu1  ;;  %v3095_v31 = vld [vmem:[#allocation2 + $0x91] sm:$0xff] }
 0x126   : > { %v6655_v14 = vadd.f32 %v4859_v53, %v1175_v59  ;;  %v1174_v23 = vadd.f32 %v1023_v41, %v6515_v10  ;;  %5340 = vmatprep.mubr.f32.mxu0 %v3461_v3  ;;  %v3096_v41 = vld [vmem:[#allocation2 + $0x99] sm:$0xff] }
 0x127   : > { %v1393_v57 = vpop.f32.mrf.mxu0  ;;  %v4782_v13 = vpop.f32.mrf.mxu1  ;;  %5261 = vmatmul.mubr.f32.gmra.mxu1 %v3092_v51  ;;  %v3465_v51 = vld [vmem:[#allocation2 + $0x92] sm:$0xff] }
 0x128   : > { %v6658_v48 = vadd.f32 %v1393_v57, %v1174_v23  ;;  %v1177_v42 = vadd.f32 %v4782_v13, %v6529_v28  ;;  %5263 = vmatprep.mubr.f32.mxu1 %v3093_v45  ;;  %v3466_v13 = vld [vmem:[#allocation2 + $0x9a] sm:$0xff] }
 0x129   : > { %v4862_v34 = vpop.f32.mrf.mxu0  ;;  %5341 = vmatmul.mubr.f32.gmra.mxu0 %v3462_v36  ;;  %v1033_v20 = vpop.f32.mrf.mxu1  ;;  %v3097_v36 = vld [vmem:[#allocation2 + $0xa9] sm:$0xff] }
 0x12a   : > { %v6661_v39 = vadd.f32 %v4862_v34, %v1177_v42  ;;  %v1176_v10 = vadd.f32 %v1033_v20, %v6538_v35  ;;  %5343 = vmatprep.mubr.f32.mxu0 %v3463_v17  ;;  %v3098_v20 = vld [vmem:[#allocation2 + $0xb1] sm:$0xff] }
 0x12b   : > { %v1403_v3 = vpop.f32.mrf.mxu0  ;;  %v4785_v59 = vpop.f32.mrf.mxu1  ;;  %5264 = vmatmul.mubr.f32.gmra.mxu1 %v3094_v8  ;;  %v3467_v8 = vld [vmem:[#allocation2 + $0xaa] sm:$0xff] }
 0x12c   : > { %v6664_v53 = vadd.f32 %v1403_v3, %v1176_v10  ;;  %v1179_v28 = vadd.f32 %v4785_v59, %v6552_v21  ;;  %5266 = vmatprep.mubr.f32.mxu1 %v3095_v31 }
 0x12d   : > { %v4865_v45 = vpop.f32.mrf.mxu0  ;;  %5344 = vmatmul.mubr.f32.gmra.mxu0 %v3464_v58  ;;  %v1043_v23 = vpop.f32.mrf.mxu1 }
 0x12e   : > { %v6667_v57 = vadd.f32 %v4865_v45, %v1179_v28  ;;  %v1178_v35 = vadd.f32 %v1043_v23, %v6561_v47  ;;  %5346 = vmatprep.mubr.f32.mxu0 %v3465_v51  ;;  %v3468_v47 = vld [vmem:[#allocation2 + $0xb2] sm:$0xff]  ;;  %v3469_v28 = vld [vmem:[#allocation2 + $0xc2] sm:$0xff] }
 0x12f   : > { %v1413_v17 = vpop.f32.mrf.mxu0  ;;  %v4788_v42 = vpop.f32.mrf.mxu1  ;;  %5267 = vmatmul.mubr.f32.gmra.mxu1 %v3096_v41 }
 0x130   : > { %v6670_v34 = vadd.f32 %v1413_v17, %v1178_v35  ;;  %v1181_v21 = vadd.f32 %v4788_v42, %v6575_v61  ;;  %5269 = vmatprep.mubr.f32.mxu1 %v3097_v36  ;;  %v3471_v42 = vld [vmem:[#allocation2 + $0xda] sm:$0xff] }
 0x131   : > { %v4868_v31 = vpop.f32.mrf.mxu0  ;;  %5347 = vmatmul.mubr.f32.gmra.mxu0 %v3466_v13  ;;  %v1053_v10 = vpop.f32.mrf.mxu1 }
 0x132   : > { %v6673_v58 = vadd.f32 %v4868_v31, %v1181_v21  ;;  %v1180_v3 = vadd.f32 %v1053_v10, %v6584_v46  ;;  %5349 = vmatprep.mubr.f32.mxu0 %v3467_v8  ;;  %v3470_v46 = vld [vmem:[#allocation2 + $0xca] sm:$0xff]  ;;  %v3472_v31 = vld [vmem:[#allocation2 + $0xe2] sm:$0xff] }
 0x133   : > { %v1423_v59 = vpop.f32.mrf.mxu0  ;;  %v4791_v51 = vpop.f32.mrf.mxu1  ;;  %5270 = vmatmul.mubr.f32.gmra.mxu1 %v3098_v20 }
 0x134   : > { %v6676_v41 = vadd.f32 %v1423_v59, %v1180_v3  ;;  %v1183_v45 = vadd.f32 %v4791_v51, %v6596_v38  ;;  %5272 = vmatprep.mubr.f32.mxu1 %v6311_v49 }
 0x135   : > { %v4871_v61 = vpop.f32.mrf.mxu0  ;;  %5350 = vmatmul.mubr.f32.gmra.mxu0 %v3468_v47  ;;  %v1063_v23 = vpop.f32.mrf.mxu1 }
 0x136   : > { %v6680_v36 = vadd.f32 %v4871_v61, %v1183_v45  ;;  %v1182_v35 = vadd.f32 %v1063_v23, %v6603_v11  ;;  %5352 = vmatprep.mubr.f32.mxu0 %v3469_v28  ;;  %v3474_v28 = vld [vmem:[#allocation2 + $0xfa] sm:$0xff] }
 0x137   : > { %v1433_v13 = vpop.f32.mrf.mxu0  ;;  %v4794_v17 = vpop.f32.mrf.mxu1  ;;  %5273 = vmatmul.mubr.f32.gmra.mxu1 %v6317_v60  ;;  %v3473_v60 = vld [vmem:[#allocation2 + $0xf2] sm:$0xff] }
 0x138   : > { %v6684_v8 = vadd.f32 %v1433_v13, %v1182_v35  ;;  %v1185_v38 = vadd.f32 %v4794_v17, %v6615_v15  ;;  %5275 = vmatprep.mubr.f32.mxu1 %v6329_v2  ;;  %v3476_v13 = vld [vmem:[#allocation2 + $0x112] sm:$0xff] }
 0x139   : > { %v4874_v49 = vpop.f32.mrf.mxu0  ;;  %5353 = vmatmul.mubr.f32.gmra.mxu0 %v3470_v46  ;;  %v1073_v21 = vpop.f32.mrf.mxu1 }
 0x13a   : > { %v6688_v20 = vadd.f32 %v4874_v49, %v1185_v38  ;;  %v1184_v11 = vadd.f32 %v1073_v21, %v6624_v7  ;;  %5355 = vmatprep.mubr.f32.mxu0 %v3471_v42 }
 0x13b   : > { %v1443_v10 = vpop.f32.mrf.mxu0  ;;  %v4797_v3 = vpop.f32.mrf.mxu1  ;;  %5276 = vmatmul.mubr.f32.gmra.mxu1 %v6335_v30  ;;  %v3475_v30 = vld [vmem:[#allocation2 + $0x10a] sm:$0xff] }
 0x13c   : > { %v6692_v47 = vadd.f32 %v1443_v10, %v1184_v11  ;;  %v1187_v15 = vadd.f32 %v4797_v3, %v6639_v27  ;;  %5278 = vmatprep.mubr.f32.mxu1 %v6347_v29  ;;  %v3478_v11 = vld [vmem:[#allocation2 + $0x12a] sm:$0xff] }
 0x13d   : > { %v4877_v2 = vpop.f32.mrf.mxu0  ;;  %5356 = vmatmul.mubr.f32.gmra.mxu0 %v3472_v31  ;;  %v1083_v59 = vpop.f32.mrf.mxu1 }
 0x13e   : > { %v6696_v51 = vadd.f32 %v4877_v2, %v1187_v15  ;;  %v1186_v7 = vadd.f32 %v1083_v59, %v6646_v26  ;;  %5358 = vmatprep.mubr.f32.mxu0 %v3473_v60  ;;  %v3111_v2 = vld [vmem:[#allocation2 + $0x151] sm:$0xff] }
 0x13f   : > { %v1453_v45 = vpop.f32.mrf.mxu0  ;;  %v4800_v61 = vpop.f32.mrf.mxu1  ;;  %5279 = vmatmul.mubr.f32.gmra.mxu1 %v6353_v1  ;;  %v3477_v1 = vld [vmem:[#allocation2 + $0x122] sm:$0xff] }
 0x140   : > { %v6700_v23 = vadd.f32 %v1453_v45, %v1186_v7  ;;  %v1189_v27 = vadd.f32 %v4800_v61, %v6480_v40  ;;  %5281 = vmatprep.mubr.f32.mxu1 %v6365_v50  ;;  %v3480_v7 = vld [vmem:[#allocation2 + $0x142] sm:$0xff]  ;;  %v3481_v45 = vld [vmem:[#allocation2 + $0x152] sm:$0xff] }
 0x141   : > { %v4880_v29 = vpop.f32.mrf.mxu0  ;;  %5359 = vmatmul.mubr.f32.gmra.mxu0 %v3474_v28  ;;  %v1093_v35 = vpop.f32.mrf.mxu1 }
 0x142   : > { %v6704_v46 = vadd.f32 %v4880_v29, %v1189_v27  ;;  %v1188_v26 = vadd.f32 %v1093_v35, %v6488_v33  ;;  %5361 = vmatprep.mubr.f32.mxu0 %v3475_v30  ;;  %v3113_v29 = vld [vmem:[#allocation2 + $0x169] sm:$0xff] }
 0x143   : > { %v1463_v17 = vpop.f32.mrf.mxu0  ;;  %v4803_v42 = vpop.f32.mrf.mxu1  ;;  %5282 = vmatmul.mubr.f32.gmra.mxu1 %v6371_v32  ;;  %v3479_v32 = vld [vmem:[#allocation2 + $0x13a] sm:$0xff] }
 0x144   : > { %v6708_v38 = vadd.f32 %v1463_v17, %v1188_v26  ;;  %v1191_v40 = vadd.f32 %v4803_v42, %v6499_v55  ;;  %5284 = vmatprep.mubr.f32.mxu1 %v6383_v43  ;;  %v3110_v43 = vld [vmem:[#allocation2 + $0x141] sm:$0xff]  ;;  %v3483_v42 = vld [vmem:[#allocation2 + $0x16a] sm:$0xff] }
 0x145   : > { %v4883_v50 = vpop.f32.mrf.mxu0  ;;  %5362 = vmatmul.mubr.f32.gmra.mxu0 %v3476_v13  ;;  %v1103_v49 = vpop.f32.mrf.mxu1  ;;  %v3482_v26 = vld [vmem:[#allocation2 + $0x15a] sm:$0xff] }
 0x146   : > { %v6712_v21 = vadd.f32 %v4883_v50, %v1191_v40  ;;  %v1190_v33 = vadd.f32 %v1103_v49, %v6508_v63  ;;  %5364 = vmatprep.mubr.f32.mxu0 %v3477_v1  ;;  %v3114_v40 = vld [vmem:[#allocation2 + $0x171] sm:$0xff] }
 0x147   : > { %v1473_v31 = vpop.f32.mrf.mxu0  ;;  %v4806_v10 = vpop.f32.mrf.mxu1  ;;  %5285 = vmatmul.mubr.f32.gmra.mxu1 %v6389_v0 }
 0x148   : > { %v6716_v3 = vadd.f32 %v1473_v31, %v1190_v33  ;;  %v1193_v55 = vadd.f32 %v4806_v10, %v6522_v37  ;;  %5287 = vmatprep.mubr.f32.mxu1 %v6397_v24  ;;  %v3112_v24 = vld [vmem:[#allocation2 + $0x159] sm:$0xff] }
 0x149   : > { %v4886_v60 = vpop.f32.mrf.mxu0  ;;  %5365 = vmatmul.mubr.f32.gmra.mxu0 %v3478_v11  ;;  %v1113_v15 = vpop.f32.mrf.mxu1 }
 0x14a   : > { %v6720_v59 = vadd.f32 %v4886_v60, %v1193_v55  ;;  %v1192_v63 = vadd.f32 %v1113_v15, %v6531_v19  ;;  %5367 = vmatprep.mubr.f32.mxu0 %v3479_v32  ;;  %v3117_v15 = vld [vmem:[#allocation2 + $0x199] sm:$0xff] }
 0x14b   : > { %v1483_v28 = vpop.f32.mrf.mxu0  ;;  %v4809_v0 = vpop.f32.mrf.mxu1  ;;  %5288 = vmatmul.mubr.f32.gmra.mxu1 %v3110_v43  ;;  %v5430_v43 = vld [vmem:[#allocation2 + $0x181] sm:$0xff] }
 0x14c   : > { %v6723_v61 = vadd.f32 %v1483_v28, %v1192_v63  ;;  %v1195_v37 = vadd.f32 %v4809_v0, %v6545_v6  ;;  %5290 = vmatprep.mubr.f32.mxu1 %v3111_v2  ;;  %v5431_v28 = vld [vmem:[#allocation2 + $0x189] sm:$0xff]  ;;  %v3487_v0 = vld [vmem:[#allocation2 + $0x19a] sm:$0xff] }
 0x14d   : > { %v4889_v30 = vpop.f32.mrf.mxu0  ;;  %5368 = vmatmul.mubr.f32.gmra.mxu0 %v3480_v7  ;;  %v1123_v27 = vpop.f32.mrf.mxu1 }
 0x14e   : > { %v6726_v35 = vadd.f32 %v4889_v30, %v1195_v37  ;;  %v1194_v19 = vadd.f32 %v1123_v27, %v6554_v44  ;;  %5370 = vmatprep.mubr.f32.mxu0 %v3481_v45  ;;  %v3484_v44 = vld [vmem:[#allocation2 + $0x172] sm:$0xff]  ;;  %v3118_v37 = vld [vmem:[#allocation2 + $0x1a1] sm:$0xff] }
 0x14f   : > { %v1493_v13 = vpop.f32.mrf.mxu0  ;;  %v4812_v17 = vpop.f32.mrf.mxu1  ;;  %5291 = vmatmul.mubr.f32.gmra.mxu1 %v3112_v24 }
 0x150   : > { %v6729_v1 = vadd.f32 %v1493_v13, %v1194_v19  ;;  %v1197_v6 = vadd.f32 %v4812_v17, %v6568_v56  ;;  %5293 = vmatprep.mubr.f32.mxu1 %v3113_v29 }
 0x151   : > { %v4892_v50 = vpop.f32.mrf.mxu0  ;;  %5371 = vmatmul.mubr.f32.gmra.mxu0 %v3482_v26  ;;  %v1133_v49 = vpop.f32.mrf.mxu1 }
 0x152   : > { %v6732_v33 = vadd.f32 %v4892_v50, %v1197_v6  ;;  %v1196_v11 = vadd.f32 %v1133_v49, %v6577_v4  ;;  %5373 = vmatprep.mubr.f32.mxu0 %v3483_v42 }
 0x153   : > { %v1503_v31 = vpop.f32.mrf.mxu0  ;;  %v4815_v10 = vpop.f32.mrf.mxu1  ;;  %5294 = vmatmul.mubr.f32.gmra.mxu1 %v3114_v40 }
 0x154   : > { %v6735_v32 = vadd.f32 %v1503_v31, %v1196_v11  ;;  %v1199_v55 = vadd.f32 %v4815_v10, %v6589_v18  ;;  %5296 = vmatprep.mubr.f32.mxu1 %v5430_v43 }
 0x155   : > { %v4895_v56 = vpop.f32.mrf.mxu0  ;;  %5374 = vmatmul.mubr.f32.gmra.mxu0 %v3484_v44  ;;  %v1143_v60 = vpop.f32.mrf.mxu1 }
 0x156   : > { %v6738_v2 = vadd.f32 %v4895_v56, %v1199_v55  ;;  %v1198_v63 = vadd.f32 %v1143_v60, %v6598_v62  ;;  %5376 = vmatprep.mubr.f32.mxu0 %v6626_v16  ;;  %v3488_v16 = vld [vmem:[#allocation2 + $0x1a2] sm:$0xff] }
 0x157   : > { %v1513_v4 = vpop.f32.mrf.mxu0  ;;  %v4818_v7 = vpop.f32.mrf.mxu1  ;;  %5297 = vmatmul.mubr.f32.gmra.mxu1 %v5431_v28 }
 0x158   : > { %v6742_v45 = vadd.f32 %v1513_v4, %v1198_v63  ;;  %v1201_v18 = vadd.f32 %v4818_v7, %v6610_v5  ;;  %5299 = vmatprep.mubr.f32.mxu1 %v3117_v15 }
 0x159   : > { %v4898_v24 = vpop.f32.mrf.mxu0  ;;  %5377 = vmatmul.mubr.f32.gmra.mxu0 %v6629_v25  ;;  %v1153_v30 = vpop.f32.mrf.mxu1 }
 0x15a   : > { %v6746_v27 = vadd.f32 %v4898_v24, %v1201_v18  ;;  %v1200_v62 = vadd.f32 %v1153_v30, %v6617_v52  ;;  %5379 = vmatprep.mubr.f32.mxu0 %v3487_v0 }
 0x15b   : > { %v1523_v29 = vpop.f32.mrf.mxu0  ;;  %v4821_v19 = vpop.f32.mrf.mxu1  ;;  %5300 = vmatmul.mubr.f32.gmra.mxu1 %v3118_v37 }
 0x15c   : > { %v6749_v26 = vadd.f32 %v1523_v29, %v1200_v62  ;;  %v1203_v13 = vadd.f32 %v4821_v19, %v6632_v9 }
 0x15d   : > { %v4901_v5 = vpop.f32.mrf.mxu0  ;;  %5380 = vmatmul.mubr.f32.gmra.mxu0 %v3488_v16  ;;  %v1163_v17 = vpop.f32.mrf.mxu1 }
 0x15e   : > { %v6752_v42 = vadd.f32 %v4901_v5, %v1203_v13  ;;  %v1202_v25 = vadd.f32 %v1163_v17, %v6641_v54 }
 0x15f   : > { %v1533_v6 = vpop.f32.mrf.mxu0  ;;  %v4936_v40 = vpop.f32.mrf.mxu1 }
 0x160   : > { %v6755_v50 = vadd.f32 %v1533_v6, %v1202_v25  ;;  %v1913_v52 = vadd.f32 %v4936_v40, %v6649_v22 }
 0x161   : > { %v5016_v49 = vpop.f32.mrf.mxu0  ;;  %v1753_v11 = vpop.f32.mrf.mxu1 }
 0x162   : > { %v6758_v44 = vadd.f32 %v5016_v49, %v1913_v52  ;;  %v1912_v31 = vadd.f32 %v1753_v11, %v6652_v12 }
 0x163   : > { %v2123_v9 = vpop.f32.mrf.mxu0  ;;  %v4939_v10 = vpop.f32.mrf.mxu1 }
 0x164   : > { %v6761_v55 = vadd.f32 %v2123_v9, %v1912_v31  ;;  %v1915_v43 = vadd.f32 %v4939_v10, %v6655_v14 }
 0x165   : > { %v5019_v56 = vpop.f32.mrf.mxu0  ;;  %v1763_v54 = vpop.f32.mrf.mxu1 }
 0x166   : > { %v6764_v60 = vadd.f32 %v5019_v56, %v1915_v43  ;;  %v1914_v15 = vadd.f32 %v1763_v54, %v6658_v48 }
 0x167   : > { %v2133_v63 = vpop.f32.mrf.mxu0  ;;  %v4942_v22 = vpop.f32.mrf.mxu1 }
 0x168   : > { %v6767_v4 = vadd.f32 %v2133_v63, %v1914_v15  ;;  %v1917_v7 = vadd.f32 %v4942_v22, %v6661_v39 }
 0x169   : > { %v5022_v28 = vpop.f32.mrf.mxu0  ;;  %v1773_v12 = vpop.f32.mrf.mxu1 }
 0x16a   : > { %v6770_v0 = vadd.f32 %v5022_v28, %v1917_v7  ;;  %v1916_v18 = vadd.f32 %v1773_v12, %v6664_v53 }
 0x16b   : > { %v2143_v37 = vpop.f32.mrf.mxu0  ;;  %v4945_v14 = vpop.f32.mrf.mxu1 }
 0x16c   : > { %v6773_v24 = vadd.f32 %v2143_v37, %v1916_v18  ;;  %v1919_v30 = vadd.f32 %v4945_v14, %v6667_v57 }
 0x16d   : > { %v5025_v62 = vpop.f32.mrf.mxu0  ;;  %v1783_v48 = vpop.f32.mrf.mxu1 }
 0x16e   : > { %v6776_v16 = vadd.f32 %v5025_v62, %v1919_v30  ;;  %v1918_v29 = vadd.f32 %v1783_v48, %v6670_v34 }
 0x16f   : > { %v2153_v19 = vpop.f32.mrf.mxu0  ;;  %v4948_v39 = vpop.f32.mrf.mxu1 }
 0x170   : > { %v6779_v13 = vadd.f32 %v2153_v19, %v1918_v29  ;;  %v1921_v5 = vadd.f32 %v4948_v39, %v6673_v58 }
 0x171   : > { %v5028_v17 = vpop.f32.mrf.mxu0  ;;  %v1793_v53 = vpop.f32.mrf.mxu1 }
 0x172   : > { %v6782_v25 = vadd.f32 %v5028_v17, %v1921_v5  ;;  %v1920_v6 = vadd.f32 %v1793_v53, %v6676_v41 }
 0x173   : > { %v2163_v40 = vpop.f32.mrf.mxu0  ;;  %v4951_v57 = vpop.f32.mrf.mxu1 }
 0x174   : > { %v6785_v52 = vadd.f32 %v2163_v40, %v1920_v6  ;;  %v1923_v49 = vadd.f32 %v4951_v57, %v6680_v36 }
 0x175   : > { %v5031_v11 = vpop.f32.mrf.mxu0  ;;  %v1803_v34 = vpop.f32.mrf.mxu1 }
 0x176   : > { %v6788_v31 = vadd.f32 %v5031_v11, %v1923_v49  ;;  %v1922_v9 = vadd.f32 %v1803_v34, %v6684_v8 }
 0x177   : > { %v2173_v10 = vpop.f32.mrf.mxu0  ;;  %v4954_v58 = vpop.f32.mrf.mxu1 }
 0x178   : > { %v6791_v43 = vadd.f32 %v2173_v10, %v1922_v9  ;;  %v1925_v56 = vadd.f32 %v4954_v58, %v6688_v20 }
 0x179   : > { %v5034_v54 = vpop.f32.mrf.mxu0  ;;  %v1813_v41 = vpop.f32.mrf.mxu1 }
 0x17a   : > { %v6794_v15 = vadd.f32 %v5034_v54, %v1925_v56  ;;  %v1924_v63 = vadd.f32 %v1813_v41, %v6692_v47 }
 0x17b   : > { %v2183_v22 = vpop.f32.mrf.mxu0  ;;  %v4957_v36 = vpop.f32.mrf.mxu1 }
 0x17c   : > { %v6797_v7 = vadd.f32 %v2183_v22, %v1924_v63  ;;  %v1927_v28 = vadd.f32 %v4957_v36, %v6696_v51 }
 0x17d   : > { %v5037_v12 = vpop.f32.mrf.mxu0  ;;  %v1823_v8 = vpop.f32.mrf.mxu1 }
 0x17e   : > { %v6800_v18 = vadd.f32 %v5037_v12, %v1927_v28  ;;  %v1926_v37 = vadd.f32 %v1823_v8, %v6700_v23 }
 0x17f   : > { %v2193_v14 = vpop.f32.mrf.mxu0  ;;  %v4960_v20 = vpop.f32.mrf.mxu1 }
 0x180   : > { %v6803_v30 = vadd.f32 %v2193_v14, %v1926_v37  ;;  %v1929_v62 = vadd.f32 %v4960_v20, %v6704_v46 }
 0x181   : > { %v5040_v48 = vpop.f32.mrf.mxu0  ;;  %v1833_v47 = vpop.f32.mrf.mxu1 }
 0x182   : > { %v6806_v29 = vadd.f32 %v5040_v48, %v1929_v62  ;;  %v1928_v19 = vadd.f32 %v1833_v47, %v6708_v38 }
 0x183   : > { %v2203_v39 = vpop.f32.mrf.mxu0  ;;  %v4963_v51 = vpop.f32.mrf.mxu1 }
 0x184   : > { %v6809_v5 = vadd.f32 %v2203_v39, %v1928_v19  ;;  %v1931_v17 = vadd.f32 %v4963_v51, %v6712_v21 }
 0x185   : > { %v5043_v53 = vpop.f32.mrf.mxu0  ;;  %v1843_v23 = vpop.f32.mrf.mxu1 }
 0x186   : > { %v6812_v6 = vadd.f32 %v5043_v53, %v1931_v17  ;;  %v1930_v40 = vadd.f32 %v1843_v23, %v6716_v3 }
 0x187   : > { %v2213_v57 = vpop.f32.mrf.mxu0  ;;  %v4966_v46 = vpop.f32.mrf.mxu1 }
 0x188   : > { %7186 = vst [vmem:[#allocation4_spill] sm:$0xff] %v6812_v6  ;;  %v6815_v49 = vadd.f32 %v2213_v57, %v1930_v40  ;;  %v1933_v11 = vadd.f32 %v4966_v46, %v6720_v59 }
 0x189   : > { %v5046_v34 = vpop.f32.mrf.mxu0  ;;  %v1853_v38 = vpop.f32.mrf.mxu1 }
 0x18a   : > { %7187 = vst [vmem:[#allocation5_spill] sm:$0xff] %v6815_v49  ;;  %v6818_v9 = vadd.f32 %v5046_v34, %v1933_v11  ;;  %v1932_v10 = vadd.f32 %v1853_v38, %v6723_v61 }
 0x18b   : > { %v2223_v58 = vpop.f32.mrf.mxu0  ;;  %v4969_v21 = vpop.f32.mrf.mxu1 }
 0x18c   : > { %7188 = vst [vmem:[#allocation6_spill] sm:$0xff] %v6818_v9  ;;  %v6821_v56 = vadd.f32 %v2223_v58, %v1932_v10  ;;  %v1935_v54 = vadd.f32 %v4969_v21, %v6726_v35 }
 0x18d   : > { %v5049_v41 = vpop.f32.mrf.mxu0  ;;  %v1863_v3 = vpop.f32.mrf.mxu1 }
 0x18e   : > { %7189 = vst [vmem:[#allocation7_spill] sm:$0xff] %v6821_v56  ;;  %v6824_v63 = vadd.f32 %v5049_v41, %v1935_v54  ;;  %v1934_v22 = vadd.f32 %v1863_v3, %v6729_v1 }
 0x18f   : > { %v2233_v36 = vpop.f32.mrf.mxu0  ;;  %v4972_v59 = vpop.f32.mrf.mxu1 }
 0x190   : > { %7190 = vst [vmem:[#allocation8_spill] sm:$0xff] %v6824_v63  ;;  %v6827_v28 = vadd.f32 %v2233_v36, %v1934_v22  ;;  %v1937_v12 = vadd.f32 %v4972_v59, %v6732_v33 }
 0x191   : > { %v5052_v8 = vpop.f32.mrf.mxu0  ;;  %v1873_v61 = vpop.f32.mrf.mxu1 }
 0x192   : > { %7191 = vst [vmem:[#allocation9_spill] sm:$0xff] %v6827_v28  ;;  %v6830_v37 = vadd.f32 %v5052_v8, %v1937_v12  ;;  %v1936_v14 = vadd.f32 %v1873_v61, %v6735_v32 }
 0x193   : > { %v2243_v20 = vpop.f32.mrf.mxu0  ;;  %v4975_v35 = vpop.f32.mrf.mxu1 }
 0x194   : > { %7192 = vst [vmem:[#allocation10_spill] sm:$0xff] %v6830_v37  ;;  %v6833_v62 = vadd.f32 %v2243_v20, %v1936_v14  ;;  %v1939_v48 = vadd.f32 %v4975_v35, %v6738_v2 }
 0x195   : > { %v5055_v47 = vpop.f32.mrf.mxu0  ;;  %v1883_v1 = vpop.f32.mrf.mxu1 }
 0x196   : > { %7193 = vst [vmem:[#allocation11_spill] sm:$0xff] %v6833_v62  ;;  %v6836_v19 = vadd.f32 %v5055_v47, %v1939_v48  ;;  %v1938_v39 = vadd.f32 %v1883_v1, %v6742_v45 }
 0x197   : > { %v2253_v51 = vpop.f32.mrf.mxu0  ;;  %v4978_v33 = vpop.f32.mrf.mxu1 }
 0x198   : > { %7194 = vst [vmem:[#allocation12_spill] sm:$0xff] %v6836_v19  ;;  %v6839_v17 = vadd.f32 %v2253_v51, %v1938_v39  ;;  %v1941_v53 = vadd.f32 %v4978_v33, %v6746_v27 }
 0x199   : > { %v5058_v23 = vpop.f32.mrf.mxu0  ;;  %v1893_v32 = vpop.f32.mrf.mxu1 }
 0x19a   : > { %7195 = vst [vmem:[#allocation13_spill] sm:$0xff] %v6839_v17  ;;  %v6842_v40 = vadd.f32 %v5058_v23, %v1941_v53  ;;  %v1940_v57 = vadd.f32 %v1893_v32, %v6749_v26 }
 0x19b   : > { %v2263_v46 = vpop.f32.mrf.mxu0  ;;  %v4981_v2 = vpop.f32.mrf.mxu1 }
 0x19c   : > { %7196 = vst [vmem:[#allocation14_spill] sm:$0xff] %v6842_v40  ;;  %v6845_v11 = vadd.f32 %v2263_v46, %v1940_v57  ;;  %v1943_v34 = vadd.f32 %v4981_v2, %v6752_v42 }
 0x19d   : > { %v5061_v38 = vpop.f32.mrf.mxu0  ;;  %v1903_v45 = vpop.f32.mrf.mxu1 }
 0x19e   : > { %7197 = vst [vmem:[#allocation15_spill] sm:$0xff] %v6845_v11  ;;  %v6848_v10 = vadd.f32 %v5061_v38, %v1943_v34  ;;  %v1942_v58 = vadd.f32 %v1903_v45, %v6755_v50 }
 0x19f   : > { %v2273_v21 = vpop.f32.mrf.mxu0  ;;  %v5096_v27 = vpop.f32.mrf.mxu1 }
 0x1a0   : > { %7198 = vst [vmem:[#allocation16_spill] sm:$0xff] %v6848_v10  ;;  %v6851_v54 = vadd.f32 %v2273_v21, %v1942_v58 }
 0x1a1   : > { %v6853_v41 = vpop.f32.mrf.mxu0  ;;  %v2493_v3 = vpop.f32.mrf.mxu1 }
 0x1a2   : > { %7199 = vst [vmem:[#allocation17_spill] sm:$0xff] %v6851_v54 }
 0x1a3   : > { %v6855_v26 = vpop.f32.mrf.mxu0  ;;  %v5099_v22 = vpop.f32.mrf.mxu1 }
 0x1a5   : > { %v6857_v36 = vpop.f32.mrf.mxu0  ;;  %v6859_v59 = vpop.f32.mrf.mxu1 }
 0x1a7   : > { %v6861_v42 = vpop.f32.mrf.mxu0  ;;  %v6863_v12 = vpop.f32.mrf.mxu1 }
 0x1a9   : > { %v6865_v8 = vpop.f32.mrf.mxu0  ;;  %v6867_v50 = vpop.f32.mrf.mxu1 }
 0x1ab   : > { %v6869_v61 = vpop.f32.mrf.mxu0  ;;  %v6871_v14 = vpop.f32.mrf.mxu1 }
 0x1ad   : > { %v6873_v20 = vpop.f32.mrf.mxu0  ;;  %v6875_v35 = vpop.f32.mrf.mxu1 }
 0x1af   : > { %v6877_v48 = vpop.f32.mrf.mxu0  ;;  %v6879_v47 = vpop.f32.mrf.mxu1 }
 0x1b1   : > { %v6881_v1 = vpop.f32.mrf.mxu0  ;;  %v6883_v39 = vpop.f32.mrf.mxu1 }
 0x1b3   : > { %v6885_v51 = vpop.f32.mrf.mxu0  ;;  %v6887_v33 = vpop.f32.mrf.mxu1 }
 0x1b5   : > { %v6889_v53 = vpop.f32.mrf.mxu0  ;;  %v6891_v23 = vpop.f32.mrf.mxu1 }
 0x1b7   : > { %v6893_v32 = vpop.f32.mrf.mxu0  ;;  %v6895_v57 = vpop.f32.mrf.mxu1 }
 0x1b9   : > { %v6897_v46 = vpop.f32.mrf.mxu0  ;;  %v6899_v2 = vpop.f32.mrf.mxu1 }
 0x1bb   : > { %v6901_v34 = vpop.f32.mrf.mxu0  ;;  %v6903_v38 = vpop.f32.mrf.mxu1 }
 0x1bd   : > { %v6905_v45 = vpop.f32.mrf.mxu0  ;;  %v6907_v58 = vpop.f32.mrf.mxu1 }
 0x1bf   : > { %v6909_v21 = vpop.f32.mrf.mxu0  ;;  %v6911_v54 = vpop.f32.mrf.mxu1 }
 0x1c1   : > { %v6913_v10 = vpop.f32.mrf.mxu0  ;;  %v6915_v11 = vpop.f32.mrf.mxu1 }
 0x1c3   : > { %v6917_v40 = vpop.f32.mrf.mxu0  ;;  %v6919_v17 = vpop.f32.mrf.mxu1 }
 0x1c4   : > { %7200 = vst [vmem:[#allocation18_spill] sm:$0xff] %v6917_v40  ;;  %7201 = vst [vmem:[#allocation19_spill] sm:$0xff] %v6919_v17 }
 0x1c5   : > { %v6921_v19 = vpop.f32.mrf.mxu0  ;;  %v6923_v62 = vpop.f32.mrf.mxu1 }
 0x1c6   : > { %7202 = vst [vmem:[#allocation20_spill] sm:$0xff] %v6921_v19  ;;  %7203 = vst [vmem:[#allocation21_spill] sm:$0xff] %v6923_v62 }
 0x1c7   : > { %v6925_v37 = vpop.f32.mrf.mxu0  ;;  %v6927_v28 = vpop.f32.mrf.mxu1 }
 0x1c8   : > { %7204 = vst [vmem:[#allocation22_spill] sm:$0xff] %v6925_v37  ;;  %7205 = vst [vmem:[#allocation23_spill] sm:$0xff] %v6927_v28 }
 0x1c9   : > { %v6929_v63 = vpop.f32.mrf.mxu0  ;;  %v6931_v56 = vpop.f32.mrf.mxu1 }
 0x1ca   : > { %7206 = vst [vmem:[#allocation24_spill] sm:$0xff] %v6929_v63  ;;  %7207 = vst [vmem:[#allocation25_spill] sm:$0xff] %v6931_v56 }
 0x1cb   : > { %v6933_v9 = vpop.f32.mrf.mxu0  ;;  %v6935_v49 = vpop.f32.mrf.mxu1 }
 0x1cc   : > { %7208 = vst [vmem:[#allocation26_spill] sm:$0xff] %v6933_v9  ;;  %7209 = vst [vmem:[#allocation27_spill] sm:$0xff] %v6935_v49 }
 0x1cd   : > { %v6937_v6 = vpop.f32.mrf.mxu0  ;;  %v6939_v40 = vpop.f32.mrf.mxu1 }
 0x1ce   : > { %7210 = vst [vmem:[#allocation28_spill] sm:$0xff] %v6937_v6  ;;  %7211 = vst [vmem:[#allocation29_spill] sm:$0xff] %v6939_v40 }
 0x1cf   : > { %v6941_v17 = vpop.f32.mrf.mxu0  ;;  %v6943_v19 = vpop.f32.mrf.mxu1 }
 0x1d0   : > { %7212 = vst [vmem:[#allocation30_spill] sm:$0xff] %v6941_v17  ;;  %7213 = vst [vmem:[#allocation31_spill] sm:$0xff] %v6943_v19 }
 0x1d1   : > { %v6945_v62 = vpop.f32.mrf.mxu0  ;;  %v6947_v37 = vpop.f32.mrf.mxu1 }
 0x1d2   : > { %7214 = vst [vmem:[#allocation32_spill] sm:$0xff] %v6945_v62  ;;  %7215 = vst [vmem:[#allocation33_spill] sm:$0xff] %v6947_v37  ;;  %v2653_v62 = vadd.f32 %v5096_v27, %v6758_v44  ;;  %v2654_v44 = vadd.f32 %v6859_v59, %v6767_v4 }
 0x1d3   : > { %v6949_v28 = vpop.f32.mrf.mxu0  ;;  %v6951_v63 = vpop.f32.mrf.mxu1 }
 0x1d4   : > { %7216 = vst [vmem:[#allocation34_spill] sm:$0xff] %v6949_v28  ;;  %7217 = vst [vmem:[#allocation35_spill] sm:$0xff] %v6951_v63  ;;  %v2652_v63 = vadd.f32 %v2493_v3, %v6761_v55  ;;  %v2657_v55 = vadd.f32 %v6863_v12, %v6770_v0  ;;  %v2656_v0 = vadd.f32 %v6867_v50, %v6773_v24 }
 0x1d5   : > { %v6953_v56 = vpop.f32.mrf.mxu0  ;;  %v6955_v9 = vpop.f32.mrf.mxu1  ;;  %v2658_v24 = vadd.f32 %v6875_v35, %v6779_v13 }
 0x1d6   : > { %7218 = vst [vmem:[#allocation36_spill] sm:$0xff] %v6953_v56  ;;  %7219 = vst [vmem:[#allocation37_spill] sm:$0xff] %v6955_v9  ;;  %v3028_v59 = vadd.f32 %v6865_v8, %v2657_v55 }
 0x1d7   : > { %v6957_v49 = vpop.f32.mrf.mxu0  ;;  %v6959_v6 = vpop.f32.mrf.mxu1 }
 0x1d8   : > { %7220 = vst [vmem:[#allocation38_spill] sm:$0xff] %v6957_v49  ;;  %7221 = vst [vmem:[#allocation39_spill] sm:$0xff] %v6959_v6  ;;  %v3024_v49 = vadd.f32 %v6853_v41, %v2653_v62  ;;  %v2655_v6 = vadd.f32 %v5099_v22, %v6764_v60 }
 0x1d9   : > { %v6961_v40 = vpop.f32.mrf.mxu0  ;;  %v6963_v17 = vpop.f32.mrf.mxu1 }
 0x1da   : > { %7222 = vst [vmem:[#allocation40_spill] sm:$0xff] %v6961_v40  ;;  %7223 = vst [vmem:[#allocation41_spill] sm:$0xff] %v6963_v17  ;;  %v3023_v17 = vadd.f32 %v6855_v26, %v2652_v63  ;;  %v3026_v41 = vadd.f32 %v6857_v36, %v2655_v6 }
 0x1db   : > { %v6966_v37 = vpop.f32.mrf.mxu0  ;;  %v6968_v28 = vpop.f32.mrf.mxu1 }
 0x1dd   : > { %v6971_v56 = vpop.f32.mrf.mxu0  ;;  %v6973_v9 = vpop.f32.mrf.mxu1 }
 0x1de   : > { %7224 = vst [vmem:[#allocation42_spill] sm:$0xff] %v6971_v56 }
 0x1df   : > { %v6977_v40 = vpop.f32.mrf.mxu0  ;;  %v5256_v19 = vpop.f32.mrf.mxu1 }
 0x1e0   : > { %7225 = vst [vmem:[#allocation43_spill] sm:$0xff] %v6977_v40  ;;  %v3394_v27 = vadd.f32 %v5256_v19, %v3024_v49  ;;  %v3025_v49 = vadd.f32 %v6861_v42, %v2654_v44  ;;  %v2659_v42 = vadd.f32 %v6871_v14, %v6776_v16 }
 0x1e1   : > { %v5336_v60 = vpop.f32.mrf.mxu0  ;;  %v3234_v62 = vpop.f32.mrf.mxu1 }
 0x1e2   : > { %v3764_v63 = vadd.f32 %v5336_v60, %v3394_v27  ;;  %v3393_v3 = vadd.f32 %v3234_v62, %v3023_v17  ;;  %v3027_v60 = vadd.f32 %v6869_v61, %v2656_v0  ;;  %v3030_v13 = vadd.f32 %v6873_v20, %v2659_v42 }
 0x1e3   : > { %v3604_v26 = vpop.f32.mrf.mxu0  ;;  %v5259_v4 = vpop.f32.mrf.mxu1  ;;  %v3029_v61 = vadd.f32 %v6877_v48, %v2658_v24 }
 0x1e4   : > { %3860 = vst [vmem:[%s6989_s12 + $0x8] sm:$0xff] %v3764_v63  ;;  %v3763_v19 = vadd.f32 %v3604_v26, %v3393_v3  ;;  %v3396_v22 = vadd.f32 %v5259_v4, %v3026_v41  ;;  %v3929_v12 = vmul.f32 %v3764_v63, %v3764_v63  ;;  %v2661_v41 = vadd.f32 %v6879_v47, %v6782_v25 }
 0x1e5   : > { %v5339_v40 = vpop.f32.mrf.mxu0  ;;  %v3244_v56 = vpop.f32.mrf.mxu1  ;;  %v2660_v47 = vadd.f32 %v6883_v39, %v6785_v52 }
 0x1e6   : > { %3859 = vst [vmem:[%s6989_s12] sm:$0xff] %v3763_v19  ;;  %v3891_v6 = vadd.f32 %v3764_v63, %v3763_v19  ;;  %v3928_v17 = vmul.f32 %v3763_v19, %v3763_v19  ;;  %v3766_v36 = vadd.f32 %v5339_v40, %v3396_v22  ;;  %v3395_v27 = vadd.f32 %v3244_v56, %v3025_v49 }
 0x1e7   : > { %v3614_v50 = vpop.f32.mrf.mxu0  ;;  %v5262_v44 = vpop.f32.mrf.mxu1  ;;  %v3032_v25 = vadd.f32 %v6881_v1, %v2661_v41  ;;  %v2663_v22 = vadd.f32 %v6887_v33, %v6788_v31 }
 0x1e8   : > { %v3960_v8 = vadd.f32 %v3929_v12, %v3928_v17  ;;  %3862 = vst [vmem:[%s6989_s12 + $0x18] sm:$0xff] %v3766_v36  ;;  %v3765_v55 = vadd.f32 %v3614_v50, %v3395_v27  ;;  %v3398_v62 = vadd.f32 %v5262_v44, %v3028_v59  ;;  %v3931_v4 = vmul.f32 %v3766_v36, %v3766_v36 }
 0x1e9   : > { %v5342_v40 = vpop.f32.mrf.mxu0  ;;  %v3254_v56 = vpop.f32.mrf.mxu1  ;;  %v3031_v44 = vadd.f32 %v6885_v51, %v2660_v47 }
 0x1ea   : > { %3861 = vst [vmem:[%s6989_s12 + $0x10] sm:$0xff] %v3765_v55  ;;  %v3892_v63 = vadd.f32 %v3891_v6, %v3765_v55  ;;  %v3930_v16 = vmul.f32 %v3765_v55, %v3765_v55  ;;  %v3768_v14 = vadd.f32 %v5342_v40, %v3398_v62  ;;  %v3397_v3 = vadd.f32 %v3254_v56, %v3027_v60 }
 0x1eb   : > { %v3624_v35 = vpop.f32.mrf.mxu0  ;;  %v5265_v26 = vpop.f32.mrf.mxu1  ;;  %v3034_v60 = vadd.f32 %v6889_v53, %v2663_v22 }
 0x1ec   : > { %v3961_v49 = vadd.f32 %v3960_v8, %v3930_v16  ;;  %3864 = vst [vmem:[%s6989_s12 + $0x28] sm:$0xff] %v3768_v14  ;;  %v3767_v0 = vadd.f32 %v3624_v35, %v3397_v3  ;;  %v3893_v19 = vadd.f32 %v3892_v63, %v3766_v36  ;;  %v3400_v59 = vadd.f32 %v5265_v26, %v3030_v13 }
 0x1ed   : > { %v5345_v12 = vpop.f32.mrf.mxu0  ;;  %v3264_v20 = vpop.f32.mrf.mxu1  ;;  %v2662_v36 = vadd.f32 %v6891_v23, %v6791_v43  ;;  %v3933_v1 = vmul.f32 %v3768_v14, %v3768_v14  ;;  %v2665_v8 = vadd.f32 %v6895_v57, %v6794_v15  ;;  %v2664_v63 = vadd.f32 %v6899_v2, %v6797_v7 }
 0x1ee   : > { %3863 = vst [vmem:[%s6989_s12 + $0x20] sm:$0xff] %v3767_v0  ;;  %v3894_v48 = vadd.f32 %v3893_v19, %v3767_v0  ;;  %v3932_v6 = vmul.f32 %v3767_v0, %v3767_v0  ;;  %v3962_v17 = vadd.f32 %v3961_v49, %v3931_v4  ;;  %v3399_v27 = vadd.f32 %v3264_v20, %v3029_v61 }
 0x1ef   : > { %v3770_v42 = vadd.f32 %v5345_v12, %v3400_v59  ;;  %v3634_v24 = vpop.f32.mrf.mxu0  ;;  %v5268_v52 = vpop.f32.mrf.mxu1  ;;  %v3033_v56 = vadd.f32 %v6893_v32, %v2662_v36  ;;  %v3036_v13 = vadd.f32 %v6897_v46, %v2665_v8  ;;  %v2667_v32 = vadd.f32 %v6903_v38, %v6800_v18  ;;  %v7227_v8 = vld [vmem:[#allocation19_spill] sm:$0xff] }
 0x1f0   : > { %v3963_v39 = vadd.f32 %v3962_v17, %v3932_v6  ;;  %v3769_v50 = vadd.f32 %v3634_v24, %v3399_v27  ;;  %v3895_v31 = vadd.f32 %v3894_v48, %v3768_v14  ;;  %v3402_v33 = vadd.f32 %v5268_v52, %v3032_v25 }
 0x1f1   : > { %3866 = vst [vmem:[%s6989_s12 + $0x38] sm:$0xff] %v3770_v42  ;;  %v5348_v55 = vpop.f32.mrf.mxu0  ;;  %v3274_v62 = vpop.f32.mrf.mxu1  ;;  %v3935_v14 = vmul.f32 %v3770_v42, %v3770_v42  ;;  %v3035_v47 = vadd.f32 %v6901_v34, %v2664_v63  ;;  %v2666_v46 = vadd.f32 %v6907_v58, %v6803_v30  ;;  %v2669_v18 = vadd.f32 %v6911_v54, %v6806_v29  ;;  %v7230_v63 = vld [vmem:[#allocation21_spill] sm:$0xff] }
 0x1f2   : > { %3865 = vst [vmem:[%s6989_s12 + $0x30] sm:$0xff] %v3769_v50  ;;  %v3896_v43 = vadd.f32 %v3895_v31, %v3769_v50  ;;  %v3934_v23 = vmul.f32 %v3769_v50, %v3769_v50  ;;  %v3964_v41 = vadd.f32 %v3963_v39, %v3933_v1  ;;  %v3772_v40 = vadd.f32 %v5348_v55, %v3402_v33 }
 0x1f3   : > { %v3401_v51 = vadd.f32 %v3274_v62, %v3031_v44  ;;  %v3644_v53 = vpop.f32.mrf.mxu0  ;;  %v5271_v16 = vpop.f32.mrf.mxu1  ;;  %v3038_v17 = vadd.f32 %v6905_v45, %v2667_v32  ;;  %v3037_v24 = vadd.f32 %v6909_v21, %v2666_v46  ;;  %v2668_v29 = vadd.f32 %v6915_v11, %v6809_v5  ;;  %v7233_v32 = vld [vmem:[#allocation20_spill] sm:$0xff]  ;;  %v7234_v46 = vld [vmem:[#allocation22_spill] sm:$0xff] }
 0x1f4   : > { %v3965_v15 = vadd.f32 %v3964_v41, %v3934_v23  ;;  %3868 = vst [vmem:[%s6989_s12 + $0x48] sm:$0xff] %v3772_v40  ;;  %v3897_v57 = vadd.f32 %v3896_v43, %v3770_v42  ;;  %v3404_v3 = vadd.f32 %v5271_v16, %v3034_v60  ;;  %v3937_v38 = vmul.f32 %v3772_v40, %v3772_v40  ;;  %v7226_v60 = vld [vmem:[#allocation4_spill] sm:$0xff] }
 0x1f5   : > { %v3771_v61 = vadd.f32 %v3644_v53, %v3401_v51  ;;  %v5351_v35 = vpop.f32.mrf.mxu0  ;;  %v3284_v26 = vpop.f32.mrf.mxu1  ;;  %v3040_v39 = vadd.f32 %v6913_v10, %v2669_v18  ;;  %v2671_v55 = vadd.f32 %v7227_v8, %v7226_v60  ;;  %v7236_v18 = vld [vmem:[#allocation25_spill] sm:$0xff] }
 0x1f6   : > { %v3966_v4 = vadd.f32 %v3965_v15, %v3935_v14  ;;  %v3774_v7 = vadd.f32 %v5351_v35, %v3404_v3  ;;  %v3403_v2 = vadd.f32 %v3284_v26, %v3033_v56  ;;  %v7229_v56 = vld [vmem:[#allocation5_spill] sm:$0xff]  ;;  %v7231_v14 = vld [vmem:[#allocation6_spill] sm:$0xff]  ;;  %v7232_v15 = vld [vmem:[#allocation23_spill] sm:$0xff] }
 0x1f7   : > { %3867 = vst [vmem:[%s6989_s12 + $0x40] sm:$0xff] %v3771_v61  ;;  %v3898_v49 = vadd.f32 %v3897_v57, %v3771_v61  ;;  %v3936_v0 = vmul.f32 %v3771_v61, %v3771_v61  ;;  %v3654_v19 = vpop.f32.mrf.mxu0  ;;  %v5274_v25 = vpop.f32.mrf.mxu1  ;;  %v2670_v51 = vadd.f32 %v7230_v63, %v7229_v56  ;;  %v2673_v57 = vadd.f32 %v7232_v15, %v7231_v14  ;;  %v7242_v60 = vld [vmem:[#allocation29_spill] sm:$0xff]  ;;  %v7245_v56 = vld [vmem:[#allocation28_spill] sm:$0xff] }
 0x1f8   : > { %3870 = vst [vmem:[%s6989_s12 + $0x58] sm:$0xff] %v3774_v7  ;;  %v3773_v22 = vadd.f32 %v3654_v19, %v3403_v2  ;;  %v3406_v59 = vadd.f32 %v5274_v25, %v3036_v13  ;;  %v3939_v45 = vmul.f32 %v3774_v7, %v3774_v7 }
 0x1f9   : > { %v3967_v12 = vadd.f32 %v3966_v4, %v3936_v0  ;;  %v3899_v20 = vadd.f32 %v3898_v49, %v3772_v40  ;;  %v5354_v48 = vpop.f32.mrf.mxu0  ;;  %v3294_v6 = vpop.f32.mrf.mxu1  ;;  %v7228_v40 = vld [vmem:[#allocation18_spill] sm:$0xff]  ;;  %v3042_v4 = vadd.f32 %v7233_v32, %v2671_v55 }
 0x1fa   : > { %3869 = vst [vmem:[%s6989_s12 + $0x50] sm:$0xff] %v3773_v22  ;;  %v3938_v27 = vmul.f32 %v3773_v22, %v3773_v22  ;;  %v3776_v34 = vadd.f32 %v5354_v48, %v3406_v59  ;;  %v3405_v36 = vadd.f32 %v3294_v6, %v3035_v47  ;;  %v3039_v10 = vadd.f32 %v7228_v40, %v2668_v29  ;;  %v7235_v59 = vld [vmem:[#allocation7_spill] sm:$0xff]  ;;  %v7237_v48 = vld [vmem:[#allocation24_spill] sm:$0xff] }
 0x1fb   : > { %v3900_v1 = vadd.f32 %v3899_v20, %v3773_v22  ;;  %v3968_v30 = vadd.f32 %v3967_v12, %v3937_v38  ;;  %v3664_v58 = vpop.f32.mrf.mxu0  ;;  %v5277_v42 = vpop.f32.mrf.mxu1  ;;  %v3041_v22 = vadd.f32 %v7234_v46, %v2670_v51  ;;  %v2672_v38 = vadd.f32 %v7236_v18, %v7235_v59  ;;  %v7251_v59 = vld [vmem:[#allocation35_spill] sm:$0xff] }
 0x1fc   : > { %3872 = vst [vmem:[%s6989_s12 + $0x68] sm:$0xff] %v3776_v34  ;;  %v3775_v54 = vadd.f32 %v3664_v58, %v3405_v36  ;;  %v3408_v52 = vadd.f32 %v5277_v42, %v3038_v17  ;;  %v3941_v3 = vmul.f32 %v3776_v34, %v3776_v34  ;;  %v3044_v6 = vadd.f32 %v7237_v48, %v2673_v57  ;;  %v7239_v58 = vld [vmem:[#allocation27_spill] sm:$0xff] }
 0x1fd   : > { %v3969_v50 = vadd.f32 %v3968_v30, %v3938_v27  ;;  %v3901_v31 = vadd.f32 %v3900_v1, %v3774_v7  ;;  %v5357_v33 = vpop.f32.mrf.mxu0  ;;  %v3304_v44 = vpop.f32.mrf.mxu1  ;;  %v7238_v30 = vld [vmem:[#allocation8_spill] sm:$0xff] }
 0x1fe   : > { %3871 = vst [vmem:[%s6989_s12 + $0x60] sm:$0xff] %v3775_v54  ;;  %v3940_v62 = vmul.f32 %v3775_v54, %v3775_v54  ;;  %v3778_v21 = vadd.f32 %v5357_v33, %v3408_v52  ;;  %v3407_v43 = vadd.f32 %v3304_v44, %v3037_v24  ;;  %v2675_v42 = vadd.f32 %v7239_v58, %v7238_v30  ;;  %v7241_v44 = vld [vmem:[#allocation9_spill] sm:$0xff] }
 0x1ff   : > { %v3902_v23 = vadd.f32 %v3901_v31, %v3775_v54  ;;  %v3970_v5 = vadd.f32 %v3969_v50, %v3939_v45  ;;  %v3674_v11 = vpop.f32.mrf.mxu0  ;;  %v5280_v41 = vpop.f32.mrf.mxu1  ;;  %v7240_v31 = vld [vmem:[#allocation26_spill] sm:$0xff]  ;;  %v2674_v8 = vadd.f32 %v7242_v60, %v7241_v44  ;;  %v7254_v30 = vld [vmem:[#allocation37_spill] sm:$0xff]  ;;  %v7257_v44 = vld [vmem:[#allocation36_spill] sm:$0xff] }
 0x200   : > { %3874 = vst [vmem:[%s6989_s12 + $0x78] sm:$0xff] %v3778_v21  ;;  %v3777_v53 = vadd.f32 %v3674_v11, %v3407_v43  ;;  %v3410_v16 = vadd.f32 %v5280_v41, %v3040_v39  ;;  %v3943_v17 = vmul.f32 %v3778_v21, %v3778_v21  ;;  %v3043_v33 = vadd.f32 %v7240_v31, %v2672_v38  ;;  %v7244_v43 = vld [vmem:[#allocation31_spill] sm:$0xff] }
 0x201   : > { %v3971_v13 = vadd.f32 %v3970_v5, %v3940_v62  ;;  %v3903_v61 = vadd.f32 %v3902_v23, %v3776_v34  ;;  %v5360_v35 = vpop.f32.mrf.mxu0  ;;  %v3314_v26 = vpop.f32.mrf.mxu1  ;;  %v3046_v63 = vadd.f32 %v7245_v56, %v2675_v42 }
 0x202   : > { %3873 = vst [vmem:[%s6989_s12 + $0x70] sm:$0xff] %v3777_v53  ;;  %v3942_v7 = vmul.f32 %v3777_v53, %v3777_v53  ;;  %v3780_v2 = vadd.f32 %v5360_v35, %v3410_v16  ;;  %v3409_v49 = vadd.f32 %v3314_v26, %v3039_v10  ;;  %v7247_v35 = vld [vmem:[#allocation11_spill] sm:$0xff]  ;;  %v7248_v26 = vld [vmem:[#allocation33_spill] sm:$0xff] }
 0x203   : > { %v3904_v0 = vadd.f32 %v3903_v61, %v3777_v53  ;;  %v3972_v19 = vadd.f32 %v3971_v13, %v3941_v3  ;;  %v3684_v25 = vpop.f32.mrf.mxu0  ;;  %v5283_v47 = vpop.f32.mrf.mxu1  ;;  %v7246_v13 = vld [vmem:[#allocation30_spill] sm:$0xff]  ;;  %v2676_v32 = vadd.f32 %v7248_v26, %v7247_v35 }
 0x204   : > { %3876 = vst [vmem:[%s6989_s12 + $0x88] sm:$0xff] %v3780_v2  ;;  %v3779_v12 = vadd.f32 %v3684_v25, %v3409_v49  ;;  %v3412_v20 = vadd.f32 %v5283_v47, %v3042_v4  ;;  %v3945_v5 = vmul.f32 %v3780_v2, %v3780_v2  ;;  %v3045_v61 = vadd.f32 %v7246_v13, %v2674_v8 }
 0x205   : > { %v3973_v27 = vadd.f32 %v3972_v19, %v3942_v7  ;;  %v3905_v34 = vadd.f32 %v3904_v0, %v3778_v21  ;;  %v5363_v36 = vpop.f32.mrf.mxu0  ;;  %v3324_v1 = vpop.f32.mrf.mxu1  ;;  %v7243_v21 = vld [vmem:[#allocation10_spill] sm:$0xff] }
 0x206   : > { %3875 = vst [vmem:[%s6989_s12 + $0x80] sm:$0xff] %v3779_v12  ;;  %v3944_v24 = vmul.f32 %v3779_v12, %v3779_v12  ;;  %v3782_v29 = vadd.f32 %v5363_v36, %v3412_v20  ;;  %v3411_v54 = vadd.f32 %v3324_v1, %v3041_v22  ;;  %v2677_v23 = vadd.f32 %v7244_v43, %v7243_v21  ;;  %v7250_v22 = vld [vmem:[#allocation12_spill] sm:$0xff]  ;;  %v7253_v1 = vld [vmem:[#allocation13_spill] sm:$0xff] }
 0x207   : > { %v3906_v52 = vadd.f32 %v3905_v34, %v3779_v12  ;;  %v3974_v39 = vadd.f32 %v3973_v27, %v3943_v17  ;;  %v3694_v45 = vpop.f32.mrf.mxu0  ;;  %v5286_v50 = vpop.f32.mrf.mxu1  ;;  %v2679_v18 = vadd.f32 %v7251_v59, %v7250_v22  ;;  %v7252_v34 = vld [vmem:[#allocation34_spill] sm:$0xff]  ;;  %v2678_v58 = vadd.f32 %v7254_v30, %v7253_v1  ;;  %v7265_v1 = vld [vmem:[#allocation43_spill] sm:$0xff] }
 0x208   : > { %3878 = vst [vmem:[%s6989_s12 + $0x98] sm:$0xff] %v3782_v29  ;;  %v3781_v55 = vadd.f32 %v3694_v45, %v3411_v54  ;;  %v3414_v62 = vadd.f32 %v5286_v50, %v3044_v6  ;;  %v3947_v0 = vmul.f32 %v3782_v29, %v3782_v29  ;;  %v3047_v36 = vadd.f32 %v7252_v34, %v2676_v32  ;;  %v7256_v54 = vld [vmem:[#allocation39_spill] sm:$0xff] }
 0x209   : > { %v3975_v11 = vadd.f32 %v3974_v39, %v3944_v24  ;;  %v3907_v41 = vadd.f32 %v3906_v52, %v3780_v2  ;;  %v5366_v40 = vpop.f32.mrf.mxu0  ;;  %v3334_v10 = vpop.f32.mrf.mxu1  ;;  %v7249_v2 = vld [vmem:[#allocation32_spill] sm:$0xff]  ;;  %v3050_v60 = vadd.f32 %v7257_v44, %v2679_v18 }
 0x20a   : > { %3877 = vst [vmem:[%s6989_s12 + $0x90] sm:$0xff] %v3781_v55  ;;  %v3946_v51 = vmul.f32 %v3781_v55, %v3781_v55  ;;  %v3784_v53 = vadd.f32 %v5366_v40, %v3414_v62  ;;  %v3413_v16 = vadd.f32 %v3334_v10, %v3043_v33  ;;  %v3048_v49 = vadd.f32 %v7249_v2, %v2677_v23  ;;  %v7259_v40 = vld [vmem:[#allocation15_spill] sm:$0xff]  ;;  %v7260_v10 = vld [vmem:[#allocation41_spill] sm:$0xff] }
 0x20b   : > { %v3908_v14 = vadd.f32 %v3907_v41, %v3781_v55  ;;  %v3976_v15 = vadd.f32 %v3975_v11, %v3945_v5  ;;  %v3704_v57 = vpop.f32.mrf.mxu0  ;;  %v5289_v3 = vpop.f32.mrf.mxu1  ;;  %v7258_v11 = vld [vmem:[#allocation38_spill] sm:$0xff]  ;;  %v2680_v56 = vadd.f32 %v7260_v10, %v7259_v40 }
 0x20c   : > { %3880 = vst [vmem:[%s6989_s12 + $0xa8] sm:$0xff] %v3784_v53  ;;  %v3783_v4 = vadd.f32 %v3704_v57, %v3413_v16  ;;  %v3416_v7 = vadd.f32 %v5289_v3, %v3046_v63  ;;  %v3949_v39 = vmul.f32 %v3784_v53, %v3784_v53  ;;  %v3049_v41 = vadd.f32 %v7258_v11, %v2678_v58 }
 0x20d   : > { %v3977_v19 = vadd.f32 %v3976_v15, %v3946_v51  ;;  %v3909_v25 = vadd.f32 %v3908_v14, %v3782_v29  ;;  %v5369_v47 = vpop.f32.mrf.mxu0  ;;  %v3344_v46 = vpop.f32.mrf.mxu1  ;;  %v7255_v29 = vld [vmem:[#allocation14_spill] sm:$0xff] }
 0x20e   : > { %3879 = vst [vmem:[%s6989_s12 + $0xa0] sm:$0xff] %v3783_v4  ;;  %v3948_v38 = vmul.f32 %v3783_v4, %v3783_v4  ;;  %v3786_v12 = vadd.f32 %v5369_v47, %v3416_v7  ;;  %v3415_v20 = vadd.f32 %v3344_v46, %v3045_v61  ;;  %v2681_v52 = vadd.f32 %v7256_v54, %v7255_v29  ;;  %v7262_v61 = vld [vmem:[#allocation16_spill] sm:$0xff] }
 0x20f   : > { %v3910_v48 = vadd.f32 %v3909_v25, %v3783_v4  ;;  %v3978_v6 = vadd.f32 %v3977_v19, %v3947_v0  ;;  %v3714_v17 = vpop.f32.mrf.mxu0  ;;  %v5292_v27 = vpop.f32.mrf.mxu1  ;;  %v2683_v35 = vadd.f32 %v6968_v28, %v7262_v61  ;;  %v3051_v19 = vadd.f32 %v6966_v37, %v2680_v56  ;;  %v7263_v25 = vld [vmem:[#allocation17_spill] sm:$0xff] }
 0x210   : > { %3882 = vst [vmem:[%s6989_s12 + $0xb8] sm:$0xff] %v3786_v12  ;;  %v3785_v42 = vadd.f32 %v3714_v17, %v3415_v20  ;;  %v3418_v24 = vadd.f32 %v5292_v27, %v3048_v49  ;;  %v3951_v14 = vmul.f32 %v3786_v12, %v3786_v12  ;;  %v2682_v47 = vadd.f32 %v6973_v9, %v7263_v25  ;;  %v7264_v20 = vld [vmem:[#allocation42_spill] sm:$0xff] }
 0x211   : > { %v3979_v45 = vadd.f32 %v3978_v6, %v3948_v38  ;;  %v3911_v50 = vadd.f32 %v3910_v48, %v3784_v53  ;;  %v5372_v31 = vpop.f32.mrf.mxu0  ;;  %v3354_v33 = vpop.f32.mrf.mxu1  ;;  %v7261_v53 = vld [vmem:[#allocation40_spill] sm:$0xff]  ;;  %v3054_v48 = vadd.f32 %v7264_v20, %v2683_v35 }
 0x212   : > { %3881 = vst [vmem:[%s6989_s12 + $0xb0] sm:$0xff] %v3785_v42  ;;  %v3950_v8 = vmul.f32 %v3785_v42, %v3785_v42  ;;  %v3788_v55 = vadd.f32 %v5372_v31, %v3418_v24  ;;  %v3417_v62 = vadd.f32 %v3354_v33, %v3047_v36  ;;  %v3052_v16 = vadd.f32 %v7261_v53, %v2681_v52 }
 0x213   : > { %v3912_v21 = vadd.f32 %v3911_v50, %v3785_v42  ;;  %v3980_v43 = vadd.f32 %v3979_v45, %v3949_v39  ;;  %v3724_v23 = vpop.f32.mrf.mxu0  ;;  %v5295_v5 = vpop.f32.mrf.mxu1  ;;  %v3053_v30 = vadd.f32 %v7265_v1, %v2682_v47 }
 0x214   : > { %3884 = vst [vmem:[%s6989_s12 + $0xc8] sm:$0xff] %v3788_v55  ;;  %v3787_v63 = vadd.f32 %v3724_v23, %v3417_v62  ;;  %v3420_v51 = vadd.f32 %v5295_v5, %v3050_v60  ;;  %v3953_v59 = vmul.f32 %v3788_v55, %v3788_v55 }
 0x215   : > { %v3981_v15 = vadd.f32 %v3980_v43, %v3950_v8  ;;  %v3913_v57 = vadd.f32 %v3912_v21, %v3786_v12  ;;  %v5375_v3 = vpop.f32.mrf.mxu0  ;;  %v3364_v13 = vpop.f32.mrf.mxu1 }
 0x216   : > { %3883 = vst [vmem:[%s6989_s12 + $0xc0] sm:$0xff] %v3787_v63  ;;  %v3952_v26 = vmul.f32 %v3787_v63, %v3787_v63  ;;  %v3790_v32 = vadd.f32 %v5375_v3, %v3420_v51  ;;  %v3419_v4 = vadd.f32 %v3364_v13, %v3049_v41 }
 0x217   : > { %v3914_v7 = vadd.f32 %v3913_v57, %v3787_v63  ;;  %v3982_v2 = vadd.f32 %v3981_v15, %v3951_v14  ;;  %v3734_v49 = vpop.f32.mrf.mxu0  ;;  %v5298_v0 = vpop.f32.mrf.mxu1 }
 0x218   : > { %3886 = vst [vmem:[%s6989_s12 + $0xd8] sm:$0xff] %v3790_v32  ;;  %v3789_v46 = vadd.f32 %v3734_v49, %v3419_v4  ;;  %v3422_v22 = vadd.f32 %v5298_v0, %v3052_v16  ;;  %v3955_v24 = vmul.f32 %v3790_v32, %v3790_v32 }
 0x219   : > { %v3983_v28 = vadd.f32 %v3982_v2, %v3952_v26  ;;  %v3915_v18 = vadd.f32 %v3914_v7, %v3788_v55  ;;  %v5378_v38 = vpop.f32.mrf.mxu0  ;;  %v3374_v12 = vpop.f32.mrf.mxu1 }
 0x21a   : > { %3885 = vst [vmem:[%s6989_s12 + $0xd0] sm:$0xff] %v3789_v46  ;;  %v3954_v6 = vmul.f32 %v3789_v46, %v3789_v46  ;;  %v3792_v17 = vadd.f32 %v5378_v38, %v3422_v22  ;;  %v3421_v27 = vadd.f32 %v3374_v12, %v3051_v19 }
 0x21b   : > { %v3916_v37 = vadd.f32 %v3915_v18, %v3789_v46  ;;  %v3984_v34 = vadd.f32 %v3983_v28, %v3953_v59  ;;  %v3744_v36 = vpop.f32.mrf.mxu0  ;;  %v5301_v9 = vpop.f32.mrf.mxu1 }
 0x21c   : > { %3888 = vst [vmem:[%s6989_s12 + $0xe8] sm:$0xff] %v3792_v17  ;;  %v3791_v58 = vadd.f32 %v3744_v36, %v3421_v27  ;;  %v3424_v42 = vadd.f32 %v5301_v9, %v3054_v48  ;;  %v3957_v55 = vmul.f32 %v3792_v17, %v3792_v17 }
 0x21d   : > { %v3985_v29 = vadd.f32 %v3984_v34, %v3954_v6  ;;  %v3917_v54 = vadd.f32 %v3916_v37, %v3790_v32  ;;  %v5381_v52 = vpop.f32.mrf.mxu0  ;;  %v3384_v39 = vpop.f32.mrf.mxu1 }
 0x21e   : > { %3887 = vst [vmem:[%s6989_s12 + $0xe0] sm:$0xff] %v3791_v58  ;;  %v3956_v45 = vmul.f32 %v3791_v58, %v3791_v58  ;;  %v3794_v50 = vadd.f32 %v5381_v52, %v3424_v42  ;;  %v3423_v31 = vadd.f32 %v3384_v39, %v3053_v30 }
 0x21f   : > { %v3918_v33 = vadd.f32 %v3917_v54, %v3791_v58  ;;  %v3986_v44 = vadd.f32 %v3985_v29, %v3955_v24  ;;  %v3754_v60 = vpop.f32.mrf.mxu0 }
 0x220   : > { %3890 = vst [vmem:[%s6989_s12 + $0xf8] sm:$0xff] %v3794_v50  ;;  %v3793_v8 = vadd.f32 %v3754_v60, %v3423_v31  ;;  %v3959_v11 = vmul.f32 %v3794_v50, %v3794_v50 }
 0x221   : > { %v3987_v62 = vadd.f32 %v3986_v44, %v3956_v45  ;;  %v3919_v21 = vadd.f32 %v3918_v33, %v3792_v17 }
 0x222   : > { %3889 = vst [vmem:[%s6989_s12 + $0xf0] sm:$0xff] %v3793_v8  ;;  %v3958_v43 = vmul.f32 %v3793_v8, %v3793_v8 }
 0x223   : > { %v3920_v23 = vadd.f32 %v3919_v21, %v3793_v8  ;;  %v3988_v5 = vadd.f32 %v3987_v62, %v3957_v55 }
 0x225   : > { %v3921_v41 = vadd.f32 %v3920_v23, %v3794_v50  ;;  %v3989_v40 = vadd.f32 %v3988_v5, %v3958_v43 }
 0x227   : > { %v3922_v10 = vrot.slane %v3921_v41, 4  ;;  %v3990_v56 = vadd.f32 %v3989_v40, %v3959_v11 }
 0x229   : > { %v3923_v63 = vadd.f32 %v3922_v10, %v3921_v41  ;;  %v3991_v51 = vrot.slane %v3990_v56, 4 }
 0x22b   : > { %v3924_v53 = vrot.slane %v3923_v63, 2  ;;  %v3992_v16 = vadd.f32 %v3991_v51, %v3990_v56 }
 0x22d   : > { %v3925_v14 = vadd.f32 %v3924_v53, %v3923_v63  ;;  %v3993_v15 = vrot.slane %v3992_v16, 2 }
 0x22f   : > { %v3926_v57 = vrot.slane %v3925_v14, 1  ;;  %v3994_v3 = vadd.f32 %v3993_v15, %v3992_v16 }
 0x231   : > { %v3995_v13 = vrot.slane %v3994_v3, 1  ;;  %v3927_v61 = vadd.f32 %v3926_v57, %v3925_v14 }
 0x233   : > { %v3996_v35 = vadd.f32 %v3995_v13, %v3994_v3 }
 0x235   : > { %v3998_v26 = vsel %vm3997_vm0, %v3927_v61, %v3996_v35 }
 0x236   : > { %3999 = vst [vmem:[%s235_s15] sm:$0x3] %v3998_v26 }
 0x237 PF: > { %s16_s18 = sadd.s32 1, %s5438_s18  }
 0x238   : > { %p13_p4 = scmp.ge.s32.totalorder %s16_s18, 4  }
 0x23a   :  { %15 = sbr.rel (!%p13_p4) target bundleno = 1 (0x1), region = 88 }

</bundles_post_ra>
